<compile_context>
chip_gen: v7x
topology: tpu7x:2x2x1
jax: 0.10.0
libtpu: 0.0.40
codegen_flags: <defaults>
</compile_context>

<pallas_src>
import functools

import jax
import jax.numpy as jnp
from jax.experimental import pallas as pl
from jax.experimental.pallas import tpu as pltpu


_DEFAULT_TM = 4096  # row tile (multiple of 16 for bf16); activations <=160 ch

_CPARAMS = pltpu.CompilerParams(
    # single row axis: shard across TensorCores where available (v7x megacore)
    dimension_semantics=("parallel",),
    # explicit budget: safe on v5e/v6e (128 MiB) and v7x (64 MiB per TC)
    vmem_limit_bytes=32 * 1024 * 1024,
)


def _row_grid(n, tm=_DEFAULT_TM):
    # Block rows == full array rows when n < tm (always legal); otherwise a
    # multiple-of-16 tile with a cdiv grid (boundary block masked by Pallas).
    tm = min(tm, n)
    return tm, pl.cdiv(n, tm)


# ----------------------------------------------------------------------------
# Pallas kernels (bf16 operands, f32 accumulation)
# ----------------------------------------------------------------------------
def _linear_kernel(x_ref, w_ref, b_ref, o_ref, *, relu):
    y = jnp.dot(x_ref[...], w_ref[...],
                preferred_element_type=jnp.float32) + b_ref[...]
    if relu:
        y = jnp.maximum(y, 0.0)
    o_ref[...] = y.astype(o_ref.dtype)


def _linear2_kernel(x_ref, w1_ref, b1_ref, w2_ref, b2_ref, o_ref):
    """Two back-to-back Linear+ReLU layers; intermediate stays in VMEM."""
    h = jnp.dot(x_ref[...], w1_ref[...],
                preferred_element_type=jnp.float32) + b1_ref[...]
    h = jnp.maximum(h, 0.0)
    y = jnp.dot(h.astype(jnp.bfloat16), w2_ref[...],
                preferred_element_type=jnp.float32) + b2_ref[...]
    o_ref[...] = jnp.maximum(y, 0.0).astype(o_ref.dtype)


def _linear_cat2_kernel(x1_ref, x2_ref, wa_ref, wb_ref, b_ref, o_ref):
    """y = relu(x1 @ Wa + x2 @ Wb + b)  == relu(concat(x1,x2) @ W + b)."""
    y = (jnp.dot(x1_ref[...], wa_ref[...], preferred_element_type=jnp.float32)
         + jnp.dot(x2_ref[...], wb_ref[...], preferred_element_type=jnp.float32)
         + b_ref[...])
    o_ref[...] = jnp.maximum(y, 0.0).astype(o_ref.dtype)


def _vdown_chain_kernel(x_ref, w1_ref, b1_ref, w2_ref, b2_ref, w3_ref, b3_ref,
                        o2_ref, o4_ref, o8_ref):
    """Voxel down chain v1 -> v2 -> v4 -> v8; intermediates never hit HBM twice."""
    h2 = jnp.maximum(jnp.dot(x_ref[...], w1_ref[...],
                             preferred_element_type=jnp.float32) + b1_ref[...], 0.0)
    o2_ref[...] = h2.astype(o2_ref.dtype)
    h4 = jnp.maximum(jnp.dot(h2.astype(jnp.bfloat16), w2_ref[...],
                             preferred_element_type=jnp.float32) + b2_ref[...], 0.0)
    o4_ref[...] = h4.astype(o4_ref.dtype)
    h8 = jnp.maximum(jnp.dot(h4.astype(jnp.bfloat16), w3_ref[...],
                             preferred_element_type=jnp.float32) + b3_ref[...], 0.0)
    o8_ref[...] = h8.astype(o8_ref.dtype)


def _gfm_kernel(pfin_ref, r2p_ref, v2p_ref, ws_ref, bs_ref,
                wr_ref, wp_ref, wv_ref, b3_ref, fuse_ref):
    """point_stem (Linear+BN+ReLU) fused with the GFM gated fusion."""
    # point stem on-chip: pf' = relu(pf_in @ Ws + bs)
    pf = jnp.maximum(jnp.dot(pfin_ref[...], ws_ref[...],
                             preferred_element_type=jnp.float32) + bs_ref[...], 0.0)
    r2p = r2p_ref[...].astype(jnp.float32)
    v2p = v2p_ref[...].astype(jnp.float32)
    # three (C -> 3) projections as MXU dots
    logits = (
        jnp.dot(r2p_ref[...], wr_ref[...], preferred_element_type=jnp.float32)
        + jnp.dot(pf.astype(jnp.bfloat16), wp_ref[...],
                  preferred_element_type=jnp.float32)
        + jnp.dot(v2p_ref[...], wv_ref[...], preferred_element_type=jnp.float32)
        + b3_ref[...]
    )                                                   # (TM, 3), f32
    m = jnp.max(logits, axis=-1, keepdims=True)
    e = jnp.exp(logits - m)
    inv = pl.reciprocal(jnp.sum(e, axis=-1, keepdims=True), approx=True)
    wgt = e * inv                                       # softmax over 3 branches
    fuse = r2p * wgt[:, 0:1] + pf * wgt[:, 1:2] + v2p * wgt[:, 2:3]
    fuse_ref[...] = fuse.astype(fuse_ref.dtype)


def _final_kernel(x_ref, w_ref, b_ref, o_ref):
    y = jnp.dot(x_ref[...], w_ref[...],
                preferred_element_type=jnp.float32) + b_ref[...]
    ssq = jnp.sum(y * y, axis=-1, keepdims=True)
    # rsqrt goes to the EUP slot; eps avoids NaN on all-zero rows.
    o_ref[...] = y * jax.lax.rsqrt(ssq + 1e-12)


# ----------------------------------------------------------------------------
# Pallas wrappers (row-tiled cdiv grids, weights resident across the grid)
# ----------------------------------------------------------------------------
def pallas_linear(x, w, b, relu=True, tm=_DEFAULT_TM):
    n, cin = x.shape
    cout = w.shape[1]
    tm, gm = _row_grid(n, tm)
    return pl.pallas_call(
        functools.partial(_linear_kernel, relu=relu),
        grid=(gm,),
        out_shape=jax.ShapeDtypeStruct((n, cout), jnp.bfloat16),
        in_specs=[
            pl.BlockSpec((tm, cin), lambda i: (i, 0)),
            pl.BlockSpec((cin, cout), lambda i: (0, 0)),
            pl.BlockSpec((1, cout), lambda i: (0, 0)),
        ],
        out_specs=pl.BlockSpec((tm, cout), lambda i: (i, 0)),
        compiler_params=_CPARAMS,
    )(x, w, b)


def pallas_linear2(x, w1, b1, w2, b2, tm=_DEFAULT_TM):
    n, cin = x.shape
    cmid, cout = w1.shape[1], w2.shape[1]
    tm, gm = _row_grid(n, tm)
    return pl.pallas_call(
        _linear2_kernel,
        grid=(gm,),
        out_shape=jax.ShapeDtypeStruct((n, cout), jnp.bfloat16),
        in_specs=[
            pl.BlockSpec((tm, cin), lambda i: (i, 0)),
            pl.BlockSpec((cin, cmid), lambda i: (0, 0)),
            pl.BlockSpec((1, cmid), lambda i: (0, 0)),
            pl.BlockSpec((cmid, cout), lambda i: (0, 0)),
            pl.BlockSpec((1, cout), lambda i: (0, 0)),
        ],
        out_specs=pl.BlockSpec((tm, cout), lambda i: (i, 0)),
        compiler_params=_CPARAMS,
    )(x, w1, b1, w2, b2)


def pallas_linear_cat2(x1, x2, wa, wb, b, tm=_DEFAULT_TM):
    n, c1 = x1.shape
    c2 = x2.shape[1]
    cout = wa.shape[1]
    tm, gm = _row_grid(n, tm)
    return pl.pallas_call(
        _linear_cat2_kernel,
        grid=(gm,),
        out_shape=jax.ShapeDtypeStruct((n, cout), jnp.bfloat16),
        in_specs=[
            pl.BlockSpec((tm, c1), lambda i: (i, 0)),
            pl.BlockSpec((tm, c2), lambda i: (i, 0)),
            pl.BlockSpec((c1, cout), lambda i: (0, 0)),
            pl.BlockSpec((c2, cout), lambda i: (0, 0)),
            pl.BlockSpec((1, cout), lambda i: (0, 0)),
        ],
        out_specs=pl.BlockSpec((tm, cout), lambda i: (i, 0)),
        compiler_params=_CPARAMS,
    )(x1, x2, wa, wb, b)


def pallas_vdown_chain(v1, p1, p2, p3, tm=_DEFAULT_TM):
    n, c0 = v1.shape
    (w1, b1), (w2, b2), (w3, b3) = p1, p2, p3
    c1, c2, c3 = w1.shape[1], w2.shape[1], w3.shape[1]
    tm, gm = _row_grid(n, tm)
    return pl.pallas_call(
        _vdown_chain_kernel,
        grid=(gm,),
        out_shape=(jax.ShapeDtypeStruct((n, c1), jnp.bfloat16),
                   jax.ShapeDtypeStruct((n, c2), jnp.bfloat16),
                   jax.ShapeDtypeStruct((n, c3), jnp.bfloat16)),
        in_specs=[
            pl.BlockSpec((tm, c0), lambda i: (i, 0)),
            pl.BlockSpec((c0, c1), lambda i: (0, 0)),
            pl.BlockSpec((1, c1), lambda i: (0, 0)),
            pl.BlockSpec((c1, c2), lambda i: (0, 0)),
            pl.BlockSpec((1, c2), lambda i: (0, 0)),
            pl.BlockSpec((c2, c3), lambda i: (0, 0)),
            pl.BlockSpec((1, c3), lambda i: (0, 0)),
        ],
        out_specs=(pl.BlockSpec((tm, c1), lambda i: (i, 0)),
                   pl.BlockSpec((tm, c2), lambda i: (i, 0)),
                   pl.BlockSpec((tm, c3), lambda i: (i, 0))),
        compiler_params=_CPARAMS,
    )(v1, w1, b1, w2, b2, w3, b3)


def pallas_gfm(pf_in, r2p, v2p, stem_p, gp, tm=_DEFAULT_TM):
    n, cin = pf_in.shape
    c = r2p.shape[1]
    ws, bs = stem_p
    tm, gm = _row_grid(n, tm)
    row = lambda cd: pl.BlockSpec((tm, cd), lambda i: (i, 0))
    full = lambda sh: pl.BlockSpec(sh, lambda i: (0, 0))
    return pl.pallas_call(
        _gfm_kernel,
        grid=(gm,),
        out_shape=jax.ShapeDtypeStruct((n, c), jnp.bfloat16),
        in_specs=[row(cin), row(c), row(c),
                  full((cin, c)), full((1, c)),
                  full((c, 3)), full((c, 3)), full((c, 3)), full((1, 3))],
        out_specs=row(c),
        compiler_params=_CPARAMS,
    )(pf_in, r2p, v2p, ws, bs, gp["wr"], gp["wp"], gp["wv"], gp["b3"])


def pallas_final(x, w, b, tm=_DEFAULT_TM):
    n, cin = x.shape
    cout = w.shape[1]
    tm, gm = _row_grid(n, tm)
    return pl.pallas_call(
        _final_kernel,
        grid=(gm,),
        out_shape=jax.ShapeDtypeStruct((n, cout), jnp.float32),
        in_specs=[
            pl.BlockSpec((tm, cin), lambda i: (i, 0)),
            pl.BlockSpec((cin, cout), lambda i: (0, 0)),
            pl.BlockSpec((1, cout), lambda i: (0, 0)),
        ],
        out_specs=pl.BlockSpec((tm, cout), lambda i: (i, 0)),
        compiler_params=_CPARAMS,
    )(x, w, b)


# ----------------------------------------------------------------------------
# Plain-JAX glue (gather / scatter / pooling; range branch is channels-last)
# ----------------------------------------------------------------------------
def segment_mean(feats, idx, num_segments):
    # f32 accumulation for the scatter-sum (counts must be exact), bf16 result
    f32 = feats.astype(jnp.float32)
    ones = jnp.ones((feats.shape[0], 1), jnp.float32)
    summed = jax.ops.segment_sum(jnp.concatenate([f32, ones], axis=1), idx,
                                 num_segments)
    mean = summed[:, :-1] / jnp.maximum(summed[:, -1:], 1.0)
    return mean.astype(feats.dtype)


def range_to_point(r_hwc, px, py):
    h, w, c = r_hwc.shape
    return r_hwc.reshape(h * w, c)[py * w + px]


def point_to_range(shape_hw, pf, px, py):
    h, w = shape_hw
    img = segment_mean(pf, py * w + px, h * w)
    return img.reshape(h, w, -1)


def avg_pool2x2(img_hwc):
    h, w, c = img_hwc.shape
    return img_hwc.reshape(h // 2, 2, w // 2, 2, c).mean(axis=(1, 3))


def upsample2x(img_hwc):
    return jnp.repeat(jnp.repeat(img_hwc, 2, axis=0), 2, axis=1)


def range_proj(img_hwc, w, b):
    h, wd, c = img_hwc.shape
    return pallas_linear(img_hwc.reshape(h * wd, c), w, b).reshape(h, wd, -1)


def range_proj2(img_hwc, w1, b1, w2, b2):
    h, wd, c = img_hwc.shape
    y = pallas_linear2(img_hwc.reshape(h * wd, c), w1, b1, w2, b2)
    return y.reshape(h, wd, -1)


def range_up(img_low, img_skip, wa, wb, b):
    up = upsample2x(img_low)
    h, wd, c1 = up.shape
    c2 = img_skip.shape[-1]
    y = pallas_linear_cat2(up.reshape(h * wd, c1),
                           img_skip.reshape(h * wd, c2), wa, wb, b)
    return y.reshape(h, wd, -1)


def gfm(stem_p, gp, r_hwc, pf_in, vf, inv, px, py):
    v2p = vf[inv]                                   # voxel_to_point (nearest)
    r2p = range_to_point(r_hwc, px, py)             # range_to_point
    fuse = pallas_gfm(pf_in, r2p, v2p, stem_p, gp)  # point_stem + gating fused
    new_v = segment_mean(fuse, inv, vf.shape[0])    # point_to_voxel
    new_r = point_to_range(r_hwc.shape[:2], fuse, px, py)
    return new_r, fuse, new_v


# ----------------------------------------------------------------------------
# Parameter init (deterministic, in-script; weights pre-cast to bf16 once)
# ----------------------------------------------------------------------------
def init_linear(key, cin, cout):
    kw, kb = jax.random.split(key)
    s = 1.0 / jnp.sqrt(jnp.float32(cin))
    w = jax.random.uniform(kw, (cin, cout), jnp.float32, -s, s)
    b = jax.random.uniform(kb, (cout,), jnp.float32, -s, s)
    return w.astype(jnp.bfloat16), b.reshape(1, cout)


def init_linear_cat2(key, c1, c2, cout):
    kw, kb = jax.random.split(key)
    s = 1.0 / jnp.sqrt(jnp.float32(c1 + c2))
    w = jax.random.uniform(kw, (c1 + c2, cout), jnp.float32, -s, s)
    b = jax.random.uniform(kb, (cout,), jnp.float32, -s, s)
    return (w[:c1].astype(jnp.bfloat16), w[c1:].astype(jnp.bfloat16),
            b.reshape(1, cout))


def init_gfm(key, c):
    ks = jax.random.split(key, 6)
    s = 1.0 / jnp.sqrt(jnp.float32(c))
    wfn = lambda k: jax.random.uniform(k, (c, 3), jnp.float32, -s, s)
    bfn = lambda k: jax.random.uniform(k, (3,), jnp.float32, -s, s)
    wr, br = wfn(ks[0]), bfn(ks[1])
    wp, bp = wfn(ks[2]), bfn(ks[3])
    wv, bv = wfn(ks[4]), bfn(ks[5])
    return dict(wr=wr.astype(jnp.bfloat16), wp=wp.astype(jnp.bfloat16),
                wv=wv.astype(jnp.bfloat16), b3=(br + bp + bv).reshape(1, 3))


def init_params(key, num_feats, cs):
    ks = iter(jax.random.split(key, 40))
    p = {}
    # voxel branch
    p["vstem0"] = init_linear(next(ks), num_feats, cs[0])
    p["vstem1"] = init_linear(next(ks), cs[0], cs[0])
    p["vdown1"] = init_linear(next(ks), cs[0], cs[1])
    p["vdown2"] = init_linear(next(ks), cs[1], cs[2])
    p["vdown3"] = init_linear(next(ks), cs[2], cs[3])
    p["vup1"] = init_linear_cat2(next(ks), cs[3], cs[2], cs[4])
    p["vup2"] = init_linear_cat2(next(ks), cs[4], cs[1], cs[5])
    p["vup3"] = init_linear_cat2(next(ks), cs[5], cs[0], cs[6])
    # range branch
    p["rstem0"] = init_linear(next(ks), 2, cs[0])
    p["rstem1"] = init_linear(next(ks), cs[0], cs[0])
    p["rdown1"] = init_linear(next(ks), cs[0], cs[1])
    p["rdown2"] = init_linear(next(ks), cs[1], cs[2])
    p["rdown3"] = init_linear(next(ks), cs[2], cs[3])
    p["rup1"] = init_linear_cat2(next(ks), cs[3], cs[2], cs[4])
    p["rup2"] = init_linear_cat2(next(ks), cs[4], cs[1], cs[5])
    p["rup3"] = init_linear_cat2(next(ks), cs[5], cs[0], cs[6])
    # point branch (fused into the GFM kernels)
    p["pstem0"] = init_linear(next(ks), num_feats, cs[0])
    p["pstem1"] = init_linear(next(ks), cs[0], cs[3])
    p["pstem2"] = init_linear(next(ks), cs[3], cs[5])
    p["pstem3"] = init_linear(next(ks), cs[5], cs[6])
    # GFM stages
    p["gfm0"] = init_gfm(next(ks), cs[0])
    p["gfm1"] = init_gfm(next(ks), cs[3])
    p["gfm2"] = init_gfm(next(ks), cs[5])
    p["gfm3"] = init_gfm(next(ks), cs[6])
    # final
    p["final"] = init_linear(next(ks), cs[6], cs[6])
    return p


# ----------------------------------------------------------------------------
# RPVNet forward
# ----------------------------------------------------------------------------
def rpvnet_forward(p, lidar_f, lidar_c, image, py, px, vsize):
    n = lidar_f.shape[0]
    lidar_bf = lidar_f.astype(jnp.bfloat16)

    # NCHW -> HWC once; whole range branch stays channels-last / bf16 after this
    img = jnp.transpose(image[0], (1, 2, 0)).astype(jnp.bfloat16)   # (H, W, 2)

    # initial_voxelize: alias-free hash (shift by min, dynamic extents) + mean
    vc = jnp.floor(lidar_c[:, :3] / vsize).astype(jnp.int32)
    vc = vc - jnp.min(vc, axis=0, keepdims=True)
    ext = jnp.max(vc, axis=0) + 1
    h = (vc[:, 0] * ext[1] + vc[:, 1]) * ext[2] + vc[:, 2]
    _, inv = jnp.unique(h, size=n, fill_value=jnp.int32(2 ** 30),
                        return_inverse=True)
    inv = inv.reshape(-1)
    v0 = segment_mean(lidar_bf, inv, n)

    # ---- Fuse 1 ----
    v1 = pallas_linear2(v0, *p["vstem0"], *p["vstem1"])      # fused voxel stem
    r1 = range_proj2(img, *p["rstem0"], *p["rstem1"])        # fused range stem
    r1, pf, v1 = gfm(p["pstem0"], p["gfm0"], r1, lidar_bf, v1, inv, px, py)

    # ---- Fuse 2 ----
    v2, v4, v8 = pallas_vdown_chain(v1, p["vdown1"], p["vdown2"], p["vdown3"])
    r2 = avg_pool2x2(range_proj(r1, *p["rdown1"]))
    r4 = avg_pool2x2(range_proj(r2, *p["rdown2"]))
    r8 = avg_pool2x2(range_proj(r4, *p["rdown3"]))
    r8, pf, v8 = gfm(p["pstem1"], p["gfm1"], r8, pf, v8, inv, px // 8, py // 8)

    # ---- Fuse 3 ----
    v4t = pallas_linear_cat2(v8, v4, *p["vup1"])
    v2t = pallas_linear_cat2(v4t, v2, *p["vup2"])
    r4t = range_up(r8, r4, *p["rup1"])
    r2t = range_up(r4t, r2, *p["rup2"])
    r2t, pf, v2t = gfm(p["pstem2"], p["gfm2"], r2t, pf, v2t, inv, px // 2, py // 2)

    # ---- Fuse 4 ----
    v1t = pallas_linear_cat2(v2t, v1, *p["vup3"])
    r1t = range_up(r2t, r1, *p["rup3"])
    r1t, pf, v1t = gfm(p["pstem3"], p["gfm3"], r1t, pf, v1t, inv, px, py)

    # final Linear + L2 row normalization (fused, f32 output)
    return pallas_final(pf, *p["final"])


# ----------------------------------------------------------------------------
if __name__ == "__main__":
    cs = [8, 16, 32, 64, 48, 48, 32]      # cs * cr (cr = 1), small for the demo
    num_feats = 4
    n_points, h_img, w_img = 64, 16, 32
    vsize = 0.05

    params = init_params(jax.random.PRNGKey(0), num_feats, cs)

    dk = jax.random.split(jax.random.PRNGKey(0), 5)
    lidar_f = jax.random.normal(dk[0], (n_points, num_feats), jnp.float32)
    lidar_c = jnp.concatenate(
        [jax.random.uniform(dk[1], (n_points, 3), jnp.float32, 0.0, 1.6),
         jnp.zeros((n_points, 1), jnp.float32)], axis=1)
    image = jax.random.normal(dk[2], (1, 2, h_img, w_img), jnp.float32)
    py = jax.random.randint(dk[3], (n_points,), 0, h_img)
    px = jax.random.randint(dk[4], (n_points,), 0, w_img)

    fwd = jax.jit(functools.partial(rpvnet_forward, vsize=vsize))
    out = fwd(params, lidar_f, lidar_c, image, py, px)
    out = jax.block_until_ready(out)

    assert out.shape == (n_points, cs[6])
    assert out.dtype == jnp.float32
    assert bool(jnp.all(jnp.isfinite(out)))
    # rows are L2-normalized (normalization done in f32 inside the kernel)
    assert bool(jnp.allclose(jnp.linalg.norm(out, axis=1), 1.0, atol=1e-4))
    print("KERNEL_OK")
</pallas_src>

<mosaic_0001>
module attributes {stable_mosaic.version = 11 : i64} {
  func.func @_linear2_kernel(%arg0: i32, %arg1: memref<512x2xbf16, #tpu.memory_space<vmem>>, %arg2: memref<2x8xbf16, #tpu.memory_space<vmem>>, %arg3: memref<1x8xf32, #tpu.memory_space<vmem>>, %arg4: memref<8x8xbf16, #tpu.memory_space<vmem>>, %arg5: memref<1x8xf32, #tpu.memory_space<vmem>>, %arg6: memref<512x8xbf16, #tpu.memory_space<vmem>>) attributes {dimension_semantics = [#tpu.dimension_semantics<parallel>], iteration_bounds = array<i64: 1>, scalar_prefetch = 0 : i64, scratch_operands = 0 : i64, tpu.core_type = #tpu.core_type<tc>, window_params = [{transform_indices = @transform_0, window_bounds = array<i64: 512, 2>}, {pipeline_mode = #tpu.pipeline_mode<synchronous>, transform_indices = @transform_1, window_bounds = array<i64: 2, 8>}, {pipeline_mode = #tpu.pipeline_mode<synchronous>, transform_indices = @transform_2, window_bounds = array<i64: 1, 8>}, {pipeline_mode = #tpu.pipeline_mode<synchronous>, transform_indices = @transform_3, window_bounds = array<i64: 8, 8>}, {pipeline_mode = #tpu.pipeline_mode<synchronous>, transform_indices = @transform_4, window_bounds = array<i64: 1, 8>}, {transform_indices = @transform_5, window_bounds = array<i64: 512, 8>}]} {
    %c0 = arith.constant 0 : index
    %c0_0 = arith.constant 0 : index
    %0 = vector.load %arg1[%c0, %c0_0] : memref<512x2xbf16, #tpu.memory_space<vmem>>, vector<512x2xbf16>
    %c0_1 = arith.constant 0 : index
    %c0_2 = arith.constant 0 : index
    %1 = vector.load %arg2[%c0_1, %c0_2] : memref<2x8xbf16, #tpu.memory_space<vmem>>, vector<2x8xbf16>
    %cst = arith.constant dense<0.000000e+00> : vector<512x8xf32>
    %2 = tpu.matmul %0, %1, %cst {dimension_numbers = #tpu.dot_dimension_numbers<[1], [0], [0], [1], [0, 0, 1, 1], [], []>} : vector<512x2xbf16>, vector<2x8xbf16>, vector<512x8xf32> -> vector<512x8xf32>
    %c0_3 = arith.constant 0 : index
    %c0_4 = arith.constant 0 : index
    %3 = vector.load %arg3[%c0_3, %c0_4] : memref<1x8xf32, #tpu.memory_space<vmem>>, vector<1x8xf32>
    %4 = vector.broadcast %3 : vector<1x8xf32> to vector<512x8xf32>
    %5 = arith.addf %2, %4 : vector<512x8xf32>
    %cst_5 = arith.constant 0.000000e+00 : f32
    %6 = vector.broadcast %cst_5 : f32 to vector<512x8xf32>
    %7 = arith.maximumf %5, %6 : vector<512x8xf32>
    %8 = arith.truncf %7 : vector<512x8xf32> to vector<512x8xbf16>
    %c0_6 = arith.constant 0 : index
    %c0_7 = arith.constant 0 : index
    %9 = vector.load %arg4[%c0_6, %c0_7] : memref<8x8xbf16, #tpu.memory_space<vmem>>, vector<8x8xbf16>
    %cst_8 = arith.constant dense<0.000000e+00> : vector<512x8xf32>
    %10 = tpu.matmul %8, %9, %cst_8 {dimension_numbers = #tpu.dot_dimension_numbers<[1], [0], [0], [1], [0, 0, 1, 1], [], []>} : vector<512x8xbf16>, vector<8x8xbf16>, vector<512x8xf32> -> vector<512x8xf32>
    %c0_9 = arith.constant 0 : index
    %c0_10 = arith.constant 0 : index
    %11 = vector.load %arg5[%c0_9, %c0_10] : memref<1x8xf32, #tpu.memory_space<vmem>>, vector<1x8xf32>
    %12 = vector.broadcast %11 : vector<1x8xf32> to vector<512x8xf32>
    %13 = arith.addf %10, %12 : vector<512x8xf32>
    %cst_11 = arith.constant 0.000000e+00 : f32
    %14 = vector.broadcast %cst_11 : f32 to vector<512x8xf32>
    %15 = arith.maximumf %13, %14 : vector<512x8xf32>
    %16 = arith.truncf %15 : vector<512x8xf32> to vector<512x8xbf16>
    %c0_12 = arith.constant 0 : index
    %c0_13 = arith.constant 0 : index
    %17 = vector.load %arg6[%c0_12, %c0_13] : memref<512x8xbf16, #tpu.memory_space<vmem>>, vector<512x8xbf16>
    tpu.vector_store %arg6[%c0_12, %c0_13], %16 {strides = array<i32>} : memref<512x8xbf16, #tpu.memory_space<vmem>>, vector<512x8xbf16>,
    return
  }
  func.func @transform_0(%arg0: i32) -> (i32, i32) {
    %c0_i32 = arith.constant 0 : i32
    %c0_i32_0 = arith.constant 0 : i32
    return %arg0, %c0_i32 : i32, i32
  }
  func.func @transform_1(%arg0: i32) -> (i32, i32) {
    %c0_i32 = arith.constant 0 : i32
    %c0_i32_0 = arith.constant 0 : i32
    %c0_i32_1 = arith.constant 0 : i32
    return %c0_i32, %c0_i32_0 : i32, i32
  }
  func.func @transform_2(%arg0: i32) -> (i32, i32) {
    %c0_i32 = arith.constant 0 : i32
    %c0_i32_0 = arith.constant 0 : i32
    %c0_i32_1 = arith.constant 0 : i32
    return %c0_i32, %c0_i32_0 : i32, i32
  }
  func.func @transform_3(%arg0: i32) -> (i32, i32) {
    %c0_i32 = arith.constant 0 : i32
    %c0_i32_0 = arith.constant 0 : i32
    %c0_i32_1 = arith.constant 0 : i32
    return %c0_i32, %c0_i32_0 : i32, i32
  }
  func.func @transform_4(%arg0: i32) -> (i32, i32) {
    %c0_i32 = arith.constant 0 : i32
    %c0_i32_0 = arith.constant 0 : i32
    %c0_i32_1 = arith.constant 0 : i32
    return %c0_i32, %c0_i32_0 : i32, i32
  }
  func.func @transform_5(%arg0: i32) -> (i32, i32) {
    %c0_i32 = arith.constant 0 : i32
    %c0_i32_0 = arith.constant 0 : i32
    return %arg0, %c0_i32 : i32, i32
  }
}

module attributes {stable_mosaic.version = 11 : i64} {
  func.func @_linear2_kernel(%arg0: i32, %arg1: memref<64x4xbf16, #tpu.memory_space<vmem>>, %arg2: memref<4x8xbf16, #tpu.memory_space<vmem>>, %arg3: memref<1x8xf32, #tpu.memory_space<vmem>>, %arg4: memref<8x8xbf16, #tpu.memory_space<vmem>>, %arg5: memref<1x8xf32, #tpu.memory_space<vmem>>, %arg6: memref<64x8xbf16, #tpu.memory_space<vmem>>) attributes {dimension_semantics = [#tpu.dimension_semantics<parallel>], iteration_bounds = array<i64: 1>, scalar_prefetch = 0 : i64, scratch_operands = 0 : i64, tpu.core_type = #tpu.core_type<tc>, window_params = [{transform_indices = @transform_0, window_bounds = array<i64: 64, 4>}, {pipeline_mode = #tpu.pipeline_mode<synchronous>, transform_indices = @transform_1, window_bounds = array<i64: 4, 8>}, {pipeline_mode = #tpu.pipeline_mode<synchronous>, transform_indices = @transform_2, window_bounds = array<i64: 1, 8>}, {pipeline_mode = #tpu.pipeline_mode<synchronous>, transform_indices = @transform_3, window_bounds = array<i64: 8, 8>}, {pipeline_mode = #tpu.pipeline_mode<synchronous>, transform_indices = @transform_4, window_bounds = array<i64: 1, 8>}, {transform_indices = @transform_5, window_bounds = array<i64: 64, 8>}]} {
    %c0 = arith.constant 0 : index
    %c0_0 = arith.constant 0 : index
    %0 = vector.load %arg1[%c0, %c0_0] : memref<64x4xbf16, #tpu.memory_space<vmem>>, vector<64x4xbf16>
    %c0_1 = arith.constant 0 : index
    %c0_2 = arith.constant 0 : index
    %1 = vector.load %arg2[%c0_1, %c0_2] : memref<4x8xbf16, #tpu.memory_space<vmem>>, vector<4x8xbf16>
    %cst = arith.constant dense<0.000000e+00> : vector<64x8xf32>
    %2 = tpu.matmul %0, %1, %cst {dimension_numbers = #tpu.dot_dimension_numbers<[1], [0], [0], [1], [0, 0, 1, 1], [], []>} : vector<64x4xbf16>, vector<4x8xbf16>, vector<64x8xf32> -> vector<64x8xf32>
    %c0_3 = arith.constant 0 : index
    %c0_4 = arith.constant 0 : index
    %3 = vector.load %arg3[%c0_3, %c0_4] : memref<1x8xf32, #tpu.memory_space<vmem>>, vector<1x8xf32>
    %4 = vector.broadcast %3 : vector<1x8xf32> to vector<64x8xf32>
    %5 = arith.addf %2, %4 : vector<64x8xf32>
    %cst_5 = arith.constant 0.000000e+00 : f32
    %6 = vector.broadcast %cst_5 : f32 to vector<64x8xf32>
    %7 = arith.maximumf %5, %6 : vector<64x8xf32>
    %8 = arith.truncf %7 : vector<64x8xf32> to vector<64x8xbf16>
    %c0_6 = arith.constant 0 : index
    %c0_7 = arith.constant 0 : index
    %9 = vector.load %arg4[%c0_6, %c0_7] : memref<8x8xbf16, #tpu.memory_space<vmem>>, vector<8x8xbf16>
    %cst_8 = arith.constant dense<0.000000e+00> : vector<64x8xf32>
    %10 = tpu.matmul %8, %9, %cst_8 {dimension_numbers = #tpu.dot_dimension_numbers<[1], [0], [0], [1], [0, 0, 1, 1], [], []>} : vector<64x8xbf16>, vector<8x8xbf16>, vector<64x8xf32> -> vector<64x8xf32>
    %c0_9 = arith.constant 0 : index
    %c0_10 = arith.constant 0 : index
    %11 = vector.load %arg5[%c0_9, %c0_10] : memref<1x8xf32, #tpu.memory_space<vmem>>, vector<1x8xf32>
    %12 = vector.broadcast %11 : vector<1x8xf32> to vector<64x8xf32>
    %13 = arith.addf %10, %12 : vector<64x8xf32>
    %cst_11 = arith.constant 0.000000e+00 : f32
    %14 = vector.broadcast %cst_11 : f32 to vector<64x8xf32>
    %15 = arith.maximumf %13, %14 : vector<64x8xf32>
    %16 = arith.truncf %15 : vector<64x8xf32> to vector<64x8xbf16>
    %c0_12 = arith.constant 0 : index
    %c0_13 = arith.constant 0 : index
    %17 = vector.load %arg6[%c0_12, %c0_13] : memref<64x8xbf16, #tpu.memory_space<vmem>>, vector<64x8xbf16>
    tpu.vector_store %arg6[%c0_12, %c0_13], %16 {strides = array<i32>} : memref<64x8xbf16, #tpu.memory_space<vmem>>, vector<64x8xbf16>,
    return
  }
  func.func @transform_0(%arg0: i32) -> (i32, i32) {
    %c0_i32 = arith.constant 0 : i32
    %c0_i32_0 = arith.constant 0 : i32
    return %arg0, %c0_i32 : i32, i32
  }
  func.func @transform_1(%arg0: i32) -> (i32, i32) {
    %c0_i32 = arith.constant 0 : i32
    %c0_i32_0 = arith.constant 0 : i32
    %c0_i32_1 = arith.constant 0 : i32
    return %c0_i32, %c0_i32_0 : i32, i32
  }
  func.func @transform_2(%arg0: i32) -> (i32, i32) {
    %c0_i32 = arith.constant 0 : i32
    %c0_i32_0 = arith.constant 0 : i32
    %c0_i32_1 = arith.constant 0 : i32
    return %c0_i32, %c0_i32_0 : i32, i32
  }
  func.func @transform_3(%arg0: i32) -> (i32, i32) {
    %c0_i32 = arith.constant 0 : i32
    %c0_i32_0 = arith.constant 0 : i32
    %c0_i32_1 = arith.constant 0 : i32
    return %c0_i32, %c0_i32_0 : i32, i32
  }
  func.func @transform_4(%arg0: i32) -> (i32, i32) {
    %c0_i32 = arith.constant 0 : i32
    %c0_i32_0 = arith.constant 0 : i32
    %c0_i32_1 = arith.constant 0 : i32
    return %c0_i32, %c0_i32_0 : i32, i32
  }
  func.func @transform_5(%arg0: i32) -> (i32, i32) {
    %c0_i32 = arith.constant 0 : i32
    %c0_i32_0 = arith.constant 0 : i32
    return %arg0, %c0_i32 : i32, i32
  }
}

module attributes {stable_mosaic.version = 11 : i64} {
  func.func @_gfm_kernel(%arg0: i32, %arg1: memref<64x4xbf16, #tpu.memory_space<vmem>>, %arg2: memref<64x8xbf16, #tpu.memory_space<vmem>>, %arg3: memref<64x8xbf16, #tpu.memory_space<vmem>>, %arg4: memref<4x8xbf16, #tpu.memory_space<vmem>>, %arg5: memref<1x8xf32, #tpu.memory_space<vmem>>, %arg6: memref<8x3xbf16, #tpu.memory_space<vmem>>, %arg7: memref<8x3xbf16, #tpu.memory_space<vmem>>, %arg8: memref<8x3xbf16, #tpu.memory_space<vmem>>, %arg9: memref<1x3xf32, #tpu.memory_space<vmem>>, %arg10: memref<64x8xbf16, #tpu.memory_space<vmem>>) attributes {dimension_semantics = [#tpu.dimension_semantics<parallel>], iteration_bounds = array<i64: 1>, scalar_prefetch = 0 : i64, scratch_operands = 0 : i64, tpu.core_type = #tpu.core_type<tc>, window_params = [{transform_indices = @transform_0, window_bounds = array<i64: 64, 4>}, {transform_indices = @transform_1, window_bounds = array<i64: 64, 8>}, {transform_indices = @transform_2, window_bounds = array<i64: 64, 8>}, {pipeline_mode = #tpu.pipeline_mode<synchronous>, transform_indices = @transform_3, window_bounds = array<i64: 4, 8>}, {pipeline_mode = #tpu.pipeline_mode<synchronous>, transform_indices = @transform_4, window_bounds = array<i64: 1, 8>}, {pipeline_mode = #tpu.pipeline_mode<synchronous>, transform_indices = @transform_5, window_bounds = array<i64: 8, 3>}, {pipeline_mode = #tpu.pipeline_mode<synchronous>, transform_indices = @transform_6, window_bounds = array<i64: 8, 3>}, {pipeline_mode = #tpu.pipeline_mode<synchronous>, transform_indices = @transform_7, window_bounds = array<i64: 8, 3>}, {pipeline_mode = #tpu.pipeline_mode<synchronous>, transform_indices = @transform_8, window_bounds = array<i64: 1, 3>}, {transform_indices = @transform_9, window_bounds = array<i64: 64, 8>}]} {
    %c0 = arith.constant 0 : index
    %c0_0 = arith.constant 0 : index
    %0 = vector.load %arg1[%c0, %c0_0] : memref<64x4xbf16, #tpu.memory_space<vmem>>, vector<64x4xbf16>
    %c0_1 = arith.constant 0 : index
    %c0_2 = arith.constant 0 : index
    %1 = vector.load %arg4[%c0_1, %c0_2] : memref<4x8xbf16, #tpu.memory_space<vmem>>, vector<4x8xbf16>
    %cst = arith.constant dense<0.000000e+00> : vector<64x8xf32>
    %2 = tpu.matmul %0, %1, %cst {dimension_numbers = #tpu.dot_dimension_numbers<[1], [0], [0], [1], [0, 0, 1, 1], [], []>} : vector<64x4xbf16>, vector<4x8xbf16>, vector<64x8xf32> -> vector<64x8xf32>
    %c0_3 = arith.constant 0 : index
    %c0_4 = arith.constant 0 : index
    %3 = vector.load %arg5[%c0_3, %c0_4] : memref<1x8xf32, #tpu.memory_space<vmem>>, vector<1x8xf32>
    %4 = vector.broadcast %3 : vector<1x8xf32> to vector<64x8xf32>
    %5 = arith.addf %2, %4 : vector<64x8xf32>
    %cst_5 = arith.constant 0.000000e+00 : f32
    %6 = vector.broadcast %cst_5 : f32 to vector<64x8xf32>
    %7 = arith.maximumf %5, %6 : vector<64x8xf32>
    %c0_6 = arith.constant 0 : index
    %c0_7 = arith.constant 0 : index
    %8 = vector.load %arg2[%c0_6, %c0_7] : memref<64x8xbf16, #tpu.memory_space<vmem>>, vector<64x8xbf16>
    %9 = arith.extf %8 : vector<64x8xbf16> to vector<64x8xf32>
    %c0_8 = arith.constant 0 : index
    %c0_9 = arith.constant 0 : index
    %10 = vector.load %arg3[%c0_8, %c0_9] : memref<64x8xbf16, #tpu.memory_space<vmem>>, vector<64x8xbf16>
    %11 = arith.extf %10 : vector<64x8xbf16> to vector<64x8xf32>
    %c0_10 = arith.constant 0 : index
    %c0_11 = arith.constant 0 : index
    %12 = vector.load %arg2[%c0_10, %c0_11] : memref<64x8xbf16, #tpu.memory_space<vmem>>, vector<64x8xbf16>
    %c0_12 = arith.constant 0 : index
    %c0_13 = arith.constant 0 : index
    %13 = vector.load %arg6[%c0_12, %c0_13] : memref<8x3xbf16, #tpu.memory_space<vmem>>, vector<8x3xbf16>
    %cst_14 = arith.constant dense<0.000000e+00> : vector<64x3xf32>
    %14 = tpu.matmul %12, %13, %cst_14 {dimension_numbers = #tpu.dot_dimension_numbers<[1], [0], [0], [1], [0, 0, 1, 1], [], []>} : vector<64x8xbf16>, vector<8x3xbf16>, vector<64x3xf32> -> vector<64x3xf32>
    %15 = arith.truncf %7 : vector<64x8xf32> to vector<64x8xbf16>
    %c0_15 = arith.constant 0 : index
    %c0_16 = arith.constant 0 : index
    %16 = vector.load %arg7[%c0_15, %c0_16] : memref<8x3xbf16, #tpu.memory_space<vmem>>, vector<8x3xbf16>
    %cst_17 = arith.constant dense<0.000000e+00> : vector<64x3xf32>
    %17 = tpu.matmul %15, %16, %cst_17 {dimension_numbers = #tpu.dot_dimension_numbers<[1], [0], [0], [1], [0, 0, 1, 1], [], []>} : vector<64x8xbf16>, vector<8x3xbf16>, vector<64x3xf32> -> vector<64x3xf32>
    %18 = arith.addf %14, %17 : vector<64x3xf32>
    %c0_18 = arith.constant 0 : index
    %c0_19 = arith.constant 0 : index
    %19 = vector.load %arg3[%c0_18, %c0_19] : memref<64x8xbf16, #tpu.memory_space<vmem>>, vector<64x8xbf16>
    %c0_20 = arith.constant 0 : index
    %c0_21 = arith.constant 0 : index
    %20 = vector.load %arg8[%c0_20, %c0_21] : memref<8x3xbf16, #tpu.memory_space<vmem>>, vector<8x3xbf16>
    %cst_22 = arith.constant dense<0.000000e+00> : vector<64x3xf32>
    %21 = tpu.matmul %19, %20, %cst_22 {dimension_numbers = #tpu.dot_dimension_numbers<[1], [0], [0], [1], [0, 0, 1, 1], [], []>} : vector<64x8xbf16>, vector<8x3xbf16>, vector<64x3xf32> -> vector<64x3xf32>
    %22 = arith.addf %18, %21 : vector<64x3xf32>
    %c0_23 = arith.constant 0 : index
    %c0_24 = arith.constant 0 : index
    %23 = vector.load %arg9[%c0_23, %c0_24] : memref<1x3xf32, #tpu.memory_space<vmem>>, vector<1x3xf32>
    %24 = vector.broadcast %23 : vector<1x3xf32> to vector<64x3xf32>
    %25 = arith.addf %22, %24 : vector<64x3xf32>
    %cst_25 = arith.constant dense<0xFF800000> : vector<64xf32>
    %26 = vector.multi_reduction <maximumf>, %25, %cst_25 [1] : vector<64x3xf32> to vector<64xf32>
    %27 = vector.shape_cast %26 : vector<64xf32> to vector<64x1xf32>
    %28 = vector.broadcast %27 : vector<64x1xf32> to vector<64x3xf32>
    %29 = arith.subf %25, %28 : vector<64x3xf32>
    %30 = math.exp %29 : vector<64x3xf32>
    %cst_26 = arith.constant dense<0.000000e+00> : vector<64xf32>
    %31 = vector.multi_reduction <add>, %30, %cst_26 [1] : vector<64x3xf32> to vector<64xf32>
    %32 = vector.shape_cast %31 : vector<64xf32> to vector<64x1xf32>
    %33 = tpu.reciprocal %32 {approx = true} : vector<64x1xf32> -> vector<64x1xf32>
    %34 = vector.broadcast %33 : vector<64x1xf32> to vector<64x3xf32>
    %35 = arith.mulf %30, %34 : vector<64x3xf32>
    %36 = vector.extract_strided_slice %35 {offsets = [0, 0], sizes = [64, 1], strides = [1, 1]} : vector<64x3xf32> to vector<64x1xf32>
    %37 = vector.broadcast %36 : vector<64x1xf32> to vector<64x8xf32>
    %38 = arith.mulf %9, %37 : vector<64x8xf32>
    %39 = vector.extract_strided_slice %35 {offsets = [0, 1], sizes = [64, 1], strides = [1, 1]} : vector<64x3xf32> to vector<64x1xf32>
    %40 = vector.broadcast %39 : vector<64x1xf32> to vector<64x8xf32>
    %41 = arith.mulf %7, %40 : vector<64x8xf32>
    %42 = arith.addf %38, %41 : vector<64x8xf32>
    %43 = vector.extract_strided_slice %35 {offsets = [0, 2], sizes = [64, 1], strides = [1, 1]} : vector<64x3xf32> to vector<64x1xf32>
    %44 = vector.broadcast %43 : vector<64x1xf32> to vector<64x8xf32>
    %45 = arith.mulf %11, %44 : vector<64x8xf32>
    %46 = arith.addf %42, %45 : vector<64x8xf32>
    %47 = arith.truncf %46 : vector<64x8xf32> to vector<64x8xbf16>
    %c0_27 = arith.constant 0 : index
    %c0_28 = arith.constant 0 : index
    %48 = vector.load %arg10[%c0_27, %c0_28] : memref<64x8xbf16, #tpu.memory_space<vmem>>, vector<64x8xbf16>
    tpu.vector_store %arg10[%c0_27, %c0_28], %47 {strides = array<i32>} : memref<64x8xbf16, #tpu.memory_space<vmem>>, vector<64x8xbf16>,
    return
  }
  func.func @transform_0(%arg0: i32) -> (i32, i32) {
    %c0_i32 = arith.constant 0 : i32
    %c0_i32_0 = arith.constant 0 : i32
    return %arg0, %c0_i32 : i32, i32
  }
  func.func @transform_1(%arg0: i32) -> (i32, i32) {
    %c0_i32 = arith.constant 0 : i32
    %c0_i32_0 = arith.constant 0 : i32
    return %arg0, %c0_i32 : i32, i32
  }
  func.func @transform_2(%arg0: i32) -> (i32, i32) {
    %c0_i32 = arith.constant 0 : i32
    %c0_i32_0 = arith.constant 0 : i32
    return %arg0, %c0_i32 : i32, i32
  }
  func.func @transform_3(%arg0: i32) -> (i32, i32) {
    %c0_i32 = arith.constant 0 : i32
    %c0_i32_0 = arith.constant 0 : i32
    %c0_i32_1 = arith.constant 0 : i32
    return %c0_i32, %c0_i32_0 : i32, i32
  }
  func.func @transform_4(%arg0: i32) -> (i32, i32) {
    %c0_i32 = arith.constant 0 : i32
    %c0_i32_0 = arith.constant 0 : i32
    %c0_i32_1 = arith.constant 0 : i32
    return %c0_i32, %c0_i32_0 : i32, i32
  }
  func.func @transform_5(%arg0: i32) -> (i32, i32) {
    %c0_i32 = arith.constant 0 : i32
    %c0_i32_0 = arith.constant 0 : i32
    %c0_i32_1 = arith.constant 0 : i32
    return %c0_i32, %c0_i32_0 : i32, i32
  }
  func.func @transform_6(%arg0: i32) -> (i32, i32) {
    %c0_i32 = arith.constant 0 : i32
    %c0_i32_0 = arith.constant 0 : i32
    %c0_i32_1 = arith.constant 0 : i32
    return %c0_i32, %c0_i32_0 : i32, i32
  }
  func.func @transform_7(%arg0: i32) -> (i32, i32) {
    %c0_i32 = arith.constant 0 : i32
    %c0_i32_0 = arith.constant 0 : i32
    %c0_i32_1 = arith.constant 0 : i32
    return %c0_i32, %c0_i32_0 : i32, i32
  }
  func.func @transform_8(%arg0: i32) -> (i32, i32) {
    %c0_i32 = arith.constant 0 : i32
    %c0_i32_0 = arith.constant 0 : i32
    %c0_i32_1 = arith.constant 0 : i32
    return %c0_i32, %c0_i32_0 : i32, i32
  }
  func.func @transform_9(%arg0: i32) -> (i32, i32) {
    %c0_i32 = arith.constant 0 : i32
    %c0_i32_0 = arith.constant 0 : i32
    return %arg0, %c0_i32 : i32, i32
  }
}

module attributes {stable_mosaic.version = 11 : i64} {
  func.func @_linear_kernel(%arg0: i32, %arg1: memref<512x8xbf16, #tpu.memory_space<vmem>>, %arg2: memref<8x16xbf16, #tpu.memory_space<vmem>>, %arg3: memref<1x16xf32, #tpu.memory_space<vmem>>, %arg4: memref<512x16xbf16, #tpu.memory_space<vmem>>) attributes {dimension_semantics = [#tpu.dimension_semantics<parallel>], iteration_bounds = array<i64: 1>, scalar_prefetch = 0 : i64, scratch_operands = 0 : i64, tpu.core_type = #tpu.core_type<tc>, window_params = [{transform_indices = @transform_0, window_bounds = array<i64: 512, 8>}, {pipeline_mode = #tpu.pipeline_mode<synchronous>, transform_indices = @transform_1, window_bounds = array<i64: 8, 16>}, {pipeline_mode = #tpu.pipeline_mode<synchronous>, transform_indices = @transform_2, window_bounds = array<i64: 1, 16>}, {transform_indices = @transform_3, window_bounds = array<i64: 512, 16>}]} {
    %c0 = arith.constant 0 : index
    %c0_0 = arith.constant 0 : index
    %0 = vector.load %arg1[%c0, %c0_0] : memref<512x8xbf16, #tpu.memory_space<vmem>>, vector<512x8xbf16>
    %c0_1 = arith.constant 0 : index
    %c0_2 = arith.constant 0 : index
    %1 = vector.load %arg2[%c0_1, %c0_2] : memref<8x16xbf16, #tpu.memory_space<vmem>>, vector<8x16xbf16>
    %cst = arith.constant dense<0.000000e+00> : vector<512x16xf32>
    %2 = tpu.matmul %0, %1, %cst {dimension_numbers = #tpu.dot_dimension_numbers<[1], [0], [0], [1], [0, 0, 1, 1], [], []>} : vector<512x8xbf16>, vector<8x16xbf16>, vector<512x16xf32> -> vector<512x16xf32>
    %c0_3 = arith.constant 0 : index
    %c0_4 = arith.constant 0 : index
    %3 = vector.load %arg3[%c0_3, %c0_4] : memref<1x16xf32, #tpu.memory_space<vmem>>, vector<1x16xf32>
    %4 = vector.broadcast %3 : vector<1x16xf32> to vector<512x16xf32>
    %5 = arith.addf %2, %4 : vector<512x16xf32>
    %cst_5 = arith.constant 0.000000e+00 : f32
    %6 = vector.broadcast %cst_5 : f32 to vector<512x16xf32>
    %7 = arith.maximumf %5, %6 : vector<512x16xf32>
    %8 = arith.truncf %7 : vector<512x16xf32> to vector<512x16xbf16>
    %c0_6 = arith.constant 0 : index
    %c0_7 = arith.constant 0 : index
    %9 = vector.load %arg4[%c0_6, %c0_7] : memref<512x16xbf16, #tpu.memory_space<vmem>>, vector<512x16xbf16>
    tpu.vector_store %arg4[%c0_6, %c0_7], %8 {strides = array<i32>} : memref<512x16xbf16, #tpu.memory_space<vmem>>, vector<512x16xbf16>,
    return
  }
  func.func @transform_0(%arg0: i32) -> (i32, i32) {
    %c0_i32 = arith.constant 0 : i32
    %c0_i32_0 = arith.constant 0 : i32
    return %arg0, %c0_i32 : i32, i32
  }
  func.func @transform_1(%arg0: i32) -> (i32, i32) {
    %c0_i32 = arith.constant 0 : i32
    %c0_i32_0 = arith.constant 0 : i32
    %c0_i32_1 = arith.constant 0 : i32
    return %c0_i32, %c0_i32_0 : i32, i32
  }
  func.func @transform_2(%arg0: i32) -> (i32, i32) {
    %c0_i32 = arith.constant 0 : i32
    %c0_i32_0 = arith.constant 0 : i32
    %c0_i32_1 = arith.constant 0 : i32
    return %c0_i32, %c0_i32_0 : i32, i32
  }
  func.func @transform_3(%arg0: i32) -> (i32, i32) {
    %c0_i32 = arith.constant 0 : i32
    %c0_i32_0 = arith.constant 0 : i32
    return %arg0, %c0_i32 : i32, i32
  }
}

module attributes {stable_mosaic.version = 11 : i64} {
  func.func @_linear_kernel(%arg0: i32, %arg1: memref<128x16xbf16, #tpu.memory_space<vmem>>, %arg2: memref<16x32xbf16, #tpu.memory_space<vmem>>, %arg3: memref<1x32xf32, #tpu.memory_space<vmem>>, %arg4: memref<128x32xbf16, #tpu.memory_space<vmem>>) attributes {dimension_semantics = [#tpu.dimension_semantics<parallel>], iteration_bounds = array<i64: 1>, scalar_prefetch = 0 : i64, scratch_operands = 0 : i64, tpu.core_type = #tpu.core_type<tc>, window_params = [{transform_indices = @transform_0, window_bounds = array<i64: 128, 16>}, {pipeline_mode = #tpu.pipeline_mode<synchronous>, transform_indices = @transform_1, window_bounds = array<i64: 16, 32>}, {pipeline_mode = #tpu.pipeline_mode<synchronous>, transform_indices = @transform_2, window_bounds = array<i64: 1, 32>}, {transform_indices = @transform_3, window_bounds = array<i64: 128, 32>}]} {
    %c0 = arith.constant 0 : index
    %c0_0 = arith.constant 0 : index
    %0 = vector.load %arg1[%c0, %c0_0] : memref<128x16xbf16, #tpu.memory_space<vmem>>, vector<128x16xbf16>
    %c0_1 = arith.constant 0 : index
    %c0_2 = arith.constant 0 : index
    %1 = vector.load %arg2[%c0_1, %c0_2] : memref<16x32xbf16, #tpu.memory_space<vmem>>, vector<16x32xbf16>
    %cst = arith.constant dense<0.000000e+00> : vector<128x32xf32>
    %2 = tpu.matmul %0, %1, %cst {dimension_numbers = #tpu.dot_dimension_numbers<[1], [0], [0], [1], [0, 0, 1, 1], [], []>} : vector<128x16xbf16>, vector<16x32xbf16>, vector<128x32xf32> -> vector<128x32xf32>
    %c0_3 = arith.constant 0 : index
    %c0_4 = arith.constant 0 : index
    %3 = vector.load %arg3[%c0_3, %c0_4] : memref<1x32xf32, #tpu.memory_space<vmem>>, vector<1x32xf32>
    %4 = vector.broadcast %3 : vector<1x32xf32> to vector<128x32xf32>
    %5 = arith.addf %2, %4 : vector<128x32xf32>
    %cst_5 = arith.constant 0.000000e+00 : f32
    %6 = vector.broadcast %cst_5 : f32 to vector<128x32xf32>
    %7 = arith.maximumf %5, %6 : vector<128x32xf32>
    %8 = arith.truncf %7 : vector<128x32xf32> to vector<128x32xbf16>
    %c0_6 = arith.constant 0 : index
    %c0_7 = arith.constant 0 : index
    %9 = vector.load %arg4[%c0_6, %c0_7] : memref<128x32xbf16, #tpu.memory_space<vmem>>, vector<128x32xbf16>
    tpu.vector_store %arg4[%c0_6, %c0_7], %8 {strides = array<i32>} : memref<128x32xbf16, #tpu.memory_space<vmem>>, vector<128x32xbf16>,
    return
  }
  func.func @transform_0(%arg0: i32) -> (i32, i32) {
    %c0_i32 = arith.constant 0 : i32
    %c0_i32_0 = arith.constant 0 : i32
    return %arg0, %c0_i32 : i32, i32
  }
  func.func @transform_1(%arg0: i32) -> (i32, i32) {
    %c0_i32 = arith.constant 0 : i32
    %c0_i32_0 = arith.constant 0 : i32
    %c0_i32_1 = arith.constant 0 : i32
    return %c0_i32, %c0_i32_0 : i32, i32
  }
  func.func @transform_2(%arg0: i32) -> (i32, i32) {
    %c0_i32 = arith.constant 0 : i32
    %c0_i32_0 = arith.constant 0 : i32
    %c0_i32_1 = arith.constant 0 : i32
    return %c0_i32, %c0_i32_0 : i32, i32
  }
  func.func @transform_3(%arg0: i32) -> (i32, i32) {
    %c0_i32 = arith.constant 0 : i32
    %c0_i32_0 = arith.constant 0 : i32
    return %arg0, %c0_i32 : i32, i32
  }
}

module attributes {stable_mosaic.version = 11 : i64} {
  func.func @_linear_kernel(%arg0: i32, %arg1: memref<32x32xbf16, #tpu.memory_space<vmem>>, %arg2: memref<32x64xbf16, #tpu.memory_space<vmem>>, %arg3: memref<1x64xf32, #tpu.memory_space<vmem>>, %arg4: memref<32x64xbf16, #tpu.memory_space<vmem>>) attributes {dimension_semantics = [#tpu.dimension_semantics<parallel>], iteration_bounds = array<i64: 1>, scalar_prefetch = 0 : i64, scratch_operands = 0 : i64, tpu.core_type = #tpu.core_type<tc>, window_params = [{transform_indices = @transform_0, window_bounds = array<i64: 32, 32>}, {pipeline_mode = #tpu.pipeline_mode<synchronous>, transform_indices = @transform_1, window_bounds = array<i64: 32, 64>}, {pipeline_mode = #tpu.pipeline_mode<synchronous>, transform_indices = @transform_2, window_bounds = array<i64: 1, 64>}, {transform_indices = @transform_3, window_bounds = array<i64: 32, 64>}]} {
    %c0 = arith.constant 0 : index
    %c0_0 = arith.constant 0 : index
    %0 = vector.load %arg1[%c0, %c0_0] : memref<32x32xbf16, #tpu.memory_space<vmem>>, vector<32x32xbf16>
    %c0_1 = arith.constant 0 : index
    %c0_2 = arith.constant 0 : index
    %1 = vector.load %arg2[%c0_1, %c0_2] : memref<32x64xbf16, #tpu.memory_space<vmem>>, vector<32x64xbf16>
    %cst = arith.constant dense<0.000000e+00> : vector<32x64xf32>
    %2 = tpu.matmul %0, %1, %cst {dimension_numbers = #tpu.dot_dimension_numbers<[1], [0], [0], [1], [0, 0, 1, 1], [], []>} : vector<32x32xbf16>, vector<32x64xbf16>, vector<32x64xf32> -> vector<32x64xf32>
    %c0_3 = arith.constant 0 : index
    %c0_4 = arith.constant 0 : index
    %3 = vector.load %arg3[%c0_3, %c0_4] : memref<1x64xf32, #tpu.memory_space<vmem>>, vector<1x64xf32>
    %4 = vector.broadcast %3 : vector<1x64xf32> to vector<32x64xf32>
    %5 = arith.addf %2, %4 : vector<32x64xf32>
    %cst_5 = arith.constant 0.000000e+00 : f32
    %6 = vector.broadcast %cst_5 : f32 to vector<32x64xf32>
    %7 = arith.maximumf %5, %6 : vector<32x64xf32>
    %8 = arith.truncf %7 : vector<32x64xf32> to vector<32x64xbf16>
    %c0_6 = arith.constant 0 : index
    %c0_7 = arith.constant 0 : index
    %9 = vector.load %arg4[%c0_6, %c0_7] : memref<32x64xbf16, #tpu.memory_space<vmem>>, vector<32x64xbf16>
    tpu.vector_store %arg4[%c0_6, %c0_7], %8 {strides = array<i32>} : memref<32x64xbf16, #tpu.memory_space<vmem>>, vector<32x64xbf16>,
    return
  }
  func.func @transform_0(%arg0: i32) -> (i32, i32) {
    %c0_i32 = arith.constant 0 : i32
    %c0_i32_0 = arith.constant 0 : i32
    return %arg0, %c0_i32 : i32, i32
  }
  func.func @transform_1(%arg0: i32) -> (i32, i32) {
    %c0_i32 = arith.constant 0 : i32
    %c0_i32_0 = arith.constant 0 : i32
    %c0_i32_1 = arith.constant 0 : i32
    return %c0_i32, %c0_i32_0 : i32, i32
  }
  func.func @transform_2(%arg0: i32) -> (i32, i32) {
    %c0_i32 = arith.constant 0 : i32
    %c0_i32_0 = arith.constant 0 : i32
    %c0_i32_1 = arith.constant 0 : i32
    return %c0_i32, %c0_i32_0 : i32, i32
  }
  func.func @transform_3(%arg0: i32) -> (i32, i32) {
    %c0_i32 = arith.constant 0 : i32
    %c0_i32_0 = arith.constant 0 : i32
    return %arg0, %c0_i32 : i32, i32
  }
}

module attributes {stable_mosaic.version = 11 : i64} {
  func.func @_vdown_chain_kernel(%arg0: i32, %arg1: memref<64x8xbf16, #tpu.memory_space<vmem>>, %arg2: memref<8x16xbf16, #tpu.memory_space<vmem>>, %arg3: memref<1x16xf32, #tpu.memory_space<vmem>>, %arg4: memref<16x32xbf16, #tpu.memory_space<vmem>>, %arg5: memref<1x32xf32, #tpu.memory_space<vmem>>, %arg6: memref<32x64xbf16, #tpu.memory_space<vmem>>, %arg7: memref<1x64xf32, #tpu.memory_space<vmem>>, %arg8: memref<64x16xbf16, #tpu.memory_space<vmem>>, %arg9: memref<64x32xbf16, #tpu.memory_space<vmem>>, %arg10: memref<64x64xbf16, #tpu.memory_space<vmem>>) attributes {dimension_semantics = [#tpu.dimension_semantics<parallel>], iteration_bounds = array<i64: 1>, scalar_prefetch = 0 : i64, scratch_operands = 0 : i64, tpu.core_type = #tpu.core_type<tc>, window_params = [{transform_indices = @transform_0, window_bounds = array<i64: 64, 8>}, {pipeline_mode = #tpu.pipeline_mode<synchronous>, transform_indices = @transform_1, window_bounds = array<i64: 8, 16>}, {pipeline_mode = #tpu.pipeline_mode<synchronous>, transform_indices = @transform_2, window_bounds = array<i64: 1, 16>}, {pipeline_mode = #tpu.pipeline_mode<synchronous>, transform_indices = @transform_3, window_bounds = array<i64: 16, 32>}, {pipeline_mode = #tpu.pipeline_mode<synchronous>, transform_indices = @transform_4, window_bounds = array<i64: 1, 32>}, {pipeline_mode = #tpu.pipeline_mode<synchronous>, transform_indices = @transform_5, window_bounds = array<i64: 32, 64>}, {pipeline_mode = #tpu.pipeline_mode<synchronous>, transform_indices = @transform_6, window_bounds = array<i64: 1, 64>}, {transform_indices = @transform_7, window_bounds = array<i64: 64, 16>}, {transform_indices = @transform_8, window_bounds = array<i64: 64, 32>}, {transform_indices = @transform_9, window_bounds = array<i64: 64, 64>}]} {
    %c0 = arith.constant 0 : index
    %c0_0 = arith.constant 0 : index
    %0 = vector.load %arg1[%c0, %c0_0] : memref<64x8xbf16, #tpu.memory_space<vmem>>, vector<64x8xbf16>
    %c0_1 = arith.constant 0 : index
    %c0_2 = arith.constant 0 : index
    %1 = vector.load %arg2[%c0_1, %c0_2] : memref<8x16xbf16, #tpu.memory_space<vmem>>, vector<8x16xbf16>
    %cst = arith.constant dense<0.000000e+00> : vector<64x16xf32>
    %2 = tpu.matmul %0, %1, %cst {dimension_numbers = #tpu.dot_dimension_numbers<[1], [0], [0], [1], [0, 0, 1, 1], [], []>} : vector<64x8xbf16>, vector<8x16xbf16>, vector<64x16xf32> -> vector<64x16xf32>
    %c0_3 = arith.constant 0 : index
    %c0_4 = arith.constant 0 : index
    %3 = vector.load %arg3[%c0_3, %c0_4] : memref<1x16xf32, #tpu.memory_space<vmem>>, vector<1x16xf32>
    %4 = vector.broadcast %3 : vector<1x16xf32> to vector<64x16xf32>
    %5 = arith.addf %2, %4 : vector<64x16xf32>
    %cst_5 = arith.constant 0.000000e+00 : f32
    %6 = vector.broadcast %cst_5 : f32 to vector<64x16xf32>
    %7 = arith.maximumf %5, %6 : vector<64x16xf32>
    %8 = arith.truncf %7 : vector<64x16xf32> to vector<64x16xbf16>
    %c0_6 = arith.constant 0 : index
    %c0_7 = arith.constant 0 : index
    %9 = vector.load %arg8[%c0_6, %c0_7] : memref<64x16xbf16, #tpu.memory_space<vmem>>, vector<64x16xbf16>
    tpu.vector_store %arg8[%c0_6, %c0_7], %8 {strides = array<i32>} : memref<64x16xbf16, #tpu.memory_space<vmem>>, vector<64x16xbf16>,
    %10 = arith.truncf %7 : vector<64x16xf32> to vector<64x16xbf16>
    %c0_8 = arith.constant 0 : index
    %c0_9 = arith.constant 0 : index
    %11 = vector.load %arg4[%c0_8, %c0_9] : memref<16x32xbf16, #tpu.memory_space<vmem>>, vector<16x32xbf16>
    %cst_10 = arith.constant dense<0.000000e+00> : vector<64x32xf32>
    %12 = tpu.matmul %10, %11, %cst_10 {dimension_numbers = #tpu.dot_dimension_numbers<[1], [0], [0], [1], [0, 0, 1, 1], [], []>} : vector<64x16xbf16>, vector<16x32xbf16>, vector<64x32xf32> -> vector<64x32xf32>
    %c0_11 = arith.constant 0 : index
    %c0_12 = arith.constant 0 : index
    %13 = vector.load %arg5[%c0_11, %c0_12] : memref<1x32xf32, #tpu.memory_space<vmem>>, vector<1x32xf32>
    %14 = vector.broadcast %13 : vector<1x32xf32> to vector<64x32xf32>
    %15 = arith.addf %12, %14 : vector<64x32xf32>
    %cst_13 = arith.constant 0.000000e+00 : f32
    %16 = vector.broadcast %cst_13 : f32 to vector<64x32xf32>
    %17 = arith.maximumf %15, %16 : vector<64x32xf32>
    %18 = arith.truncf %17 : vector<64x32xf32> to vector<64x32xbf16>
    %c0_14 = arith.constant 0 : index
    %c0_15 = arith.constant 0 : index
    %19 = vector.load %arg9[%c0_14, %c0_15] : memref<64x32xbf16, #tpu.memory_space<vmem>>, vector<64x32xbf16>
    tpu.vector_store %arg9[%c0_14, %c0_15], %18 {strides = array<i32>} : memref<64x32xbf16, #tpu.memory_space<vmem>>, vector<64x32xbf16>,
    %20 = arith.truncf %17 : vector<64x32xf32> to vector<64x32xbf16>
    %c0_16 = arith.constant 0 : index
    %c0_17 = arith.constant 0 : index
    %21 = vector.load %arg6[%c0_16, %c0_17] : memref<32x64xbf16, #tpu.memory_space<vmem>>, vector<32x64xbf16>
    %cst_18 = arith.constant dense<0.000000e+00> : vector<64x64xf32>
    %22 = tpu.matmul %20, %21, %cst_18 {dimension_numbers = #tpu.dot_dimension_numbers<[1], [0], [0], [1], [0, 0, 1, 1], [], []>} : vector<64x32xbf16>, vector<32x64xbf16>, vector<64x64xf32> -> vector<64x64xf32>
    %c0_19 = arith.constant 0 : index
    %c0_20 = arith.constant 0 : index
    %23 = vector.load %arg7[%c0_19, %c0_20] : memref<1x64xf32, #tpu.memory_space<vmem>>, vector<1x64xf32>
    %24 = vector.broadcast %23 : vector<1x64xf32> to vector<64x64xf32>
    %25 = arith.addf %22, %24 : vector<64x64xf32>
    %cst_21 = arith.constant 0.000000e+00 : f32
    %26 = vector.broadcast %cst_21 : f32 to vector<64x64xf32>
    %27 = arith.maximumf %25, %26 : vector<64x64xf32>
    %28 = arith.truncf %27 : vector<64x64xf32> to vector<64x64xbf16>
    %c0_22 = arith.constant 0 : index
    %c0_23 = arith.constant 0 : index
    %29 = vector.load %arg10[%c0_22, %c0_23] : memref<64x64xbf16, #tpu.memory_space<vmem>>, vector<64x64xbf16>
    tpu.vector_store %arg10[%c0_22, %c0_23], %28 {strides = array<i32>} : memref<64x64xbf16, #tpu.memory_space<vmem>>, vector<64x64xbf16>,
    return
  }
  func.func @transform_0(%arg0: i32) -> (i32, i32) {
    %c0_i32 = arith.constant 0 : i32
    %c0_i32_0 = arith.constant 0 : i32
    return %arg0, %c0_i32 : i32, i32
  }
  func.func @transform_1(%arg0: i32) -> (i32, i32) {
    %c0_i32 = arith.constant 0 : i32
    %c0_i32_0 = arith.constant 0 : i32
    %c0_i32_1 = arith.constant 0 : i32
    return %c0_i32, %c0_i32_0 : i32, i32
  }
  func.func @transform_2(%arg0: i32) -> (i32, i32) {
    %c0_i32 = arith.constant 0 : i32
    %c0_i32_0 = arith.constant 0 : i32
    %c0_i32_1 = arith.constant 0 : i32
    return %c0_i32, %c0_i32_0 : i32, i32
  }
  func.func @transform_3(%arg0: i32) -> (i32, i32) {
    %c0_i32 = arith.constant 0 : i32
    %c0_i32_0 = arith.constant 0 : i32
    %c0_i32_1 = arith.constant 0 : i32
    return %c0_i32, %c0_i32_0 : i32, i32
  }
  func.func @transform_4(%arg0: i32) -> (i32, i32) {
    %c0_i32 = arith.constant 0 : i32
    %c0_i32_0 = arith.constant 0 : i32
    %c0_i32_1 = arith.constant 0 : i32
    return %c0_i32, %c0_i32_0 : i32, i32
  }
  func.func @transform_5(%arg0: i32) -> (i32, i32) {
    %c0_i32 = arith.constant 0 : i32
    %c0_i32_0 = arith.constant 0 : i32
    %c0_i32_1 = arith.constant 0 : i32
    return %c0_i32, %c0_i32_0 : i32, i32
  }
  func.func @transform_6(%arg0: i32) -> (i32, i32) {
    %c0_i32 = arith.constant 0 : i32
    %c0_i32_0 = arith.constant 0 : i32
    %c0_i32_1 = arith.constant 0 : i32
    return %c0_i32, %c0_i32_0 : i32, i32
  }
  func.func @transform_7(%arg0: i32) -> (i32, i32) {
    %c0_i32 = arith.constant 0 : i32
    %c0_i32_0 = arith.constant 0 : i32
    return %arg0, %c0_i32 : i32, i32
  }
  func.func @transform_8(%arg0: i32) -> (i32, i32) {
    %c0_i32 = arith.constant 0 : i32
    %c0_i32_0 = arith.constant 0 : i32
    return %arg0, %c0_i32 : i32, i32
  }
  func.func @transform_9(%arg0: i32) -> (i32, i32) {
    %c0_i32 = arith.constant 0 : i32
    %c0_i32_0 = arith.constant 0 : i32
    return %arg0, %c0_i32 : i32, i32
  }
}

module attributes {stable_mosaic.version = 11 : i64} {
  func.func @_gfm_kernel(%arg0: i32, %arg1: memref<64x8xbf16, #tpu.memory_space<vmem>>, %arg2: memref<64x64xbf16, #tpu.memory_space<vmem>>, %arg3: memref<64x64xbf16, #tpu.memory_space<vmem>>, %arg4: memref<8x64xbf16, #tpu.memory_space<vmem>>, %arg5: memref<1x64xf32, #tpu.memory_space<vmem>>, %arg6: memref<64x3xbf16, #tpu.memory_space<vmem>>, %arg7: memref<64x3xbf16, #tpu.memory_space<vmem>>, %arg8: memref<64x3xbf16, #tpu.memory_space<vmem>>, %arg9: memref<1x3xf32, #tpu.memory_space<vmem>>, %arg10: memref<64x64xbf16, #tpu.memory_space<vmem>>) attributes {dimension_semantics = [#tpu.dimension_semantics<parallel>], iteration_bounds = array<i64: 1>, scalar_prefetch = 0 : i64, scratch_operands = 0 : i64, tpu.core_type = #tpu.core_type<tc>, window_params = [{transform_indices = @transform_0, window_bounds = array<i64: 64, 8>}, {transform_indices = @transform_1, window_bounds = array<i64: 64, 64>}, {transform_indices = @transform_2, window_bounds = array<i64: 64, 64>}, {pipeline_mode = #tpu.pipeline_mode<synchronous>, transform_indices = @transform_3, window_bounds = array<i64: 8, 64>}, {pipeline_mode = #tpu.pipeline_mode<synchronous>, transform_indices = @transform_4, window_bounds = array<i64: 1, 64>}, {pipeline_mode = #tpu.pipeline_mode<synchronous>, transform_indices = @transform_5, window_bounds = array<i64: 64, 3>}, {pipeline_mode = #tpu.pipeline_mode<synchronous>, transform_indices = @transform_6, window_bounds = array<i64: 64, 3>}, {pipeline_mode = #tpu.pipeline_mode<synchronous>, transform_indices = @transform_7, window_bounds = array<i64: 64, 3>}, {pipeline_mode = #tpu.pipeline_mode<synchronous>, transform_indices = @transform_8, window_bounds = array<i64: 1, 3>}, {transform_indices = @transform_9, window_bounds = array<i64: 64, 64>}]} {
    %c0 = arith.constant 0 : index
    %c0_0 = arith.constant 0 : index
    %0 = vector.load %arg1[%c0, %c0_0] : memref<64x8xbf16, #tpu.memory_space<vmem>>, vector<64x8xbf16>
    %c0_1 = arith.constant 0 : index
    %c0_2 = arith.constant 0 : index
    %1 = vector.load %arg4[%c0_1, %c0_2] : memref<8x64xbf16, #tpu.memory_space<vmem>>, vector<8x64xbf16>
    %cst = arith.constant dense<0.000000e+00> : vector<64x64xf32>
    %2 = tpu.matmul %0, %1, %cst {dimension_numbers = #tpu.dot_dimension_numbers<[1], [0], [0], [1], [0, 0, 1, 1], [], []>} : vector<64x8xbf16>, vector<8x64xbf16>, vector<64x64xf32> -> vector<64x64xf32>
    %c0_3 = arith.constant 0 : index
    %c0_4 = arith.constant 0 : index
    %3 = vector.load %arg5[%c0_3, %c0_4] : memref<1x64xf32, #tpu.memory_space<vmem>>, vector<1x64xf32>
    %4 = vector.broadcast %3 : vector<1x64xf32> to vector<64x64xf32>
    %5 = arith.addf %2, %4 : vector<64x64xf32>
    %cst_5 = arith.constant 0.000000e+00 : f32
    %6 = vector.broadcast %cst_5 : f32 to vector<64x64xf32>
    %7 = arith.maximumf %5, %6 : vector<64x64xf32>
    %c0_6 = arith.constant 0 : index
    %c0_7 = arith.constant 0 : index
    %8 = vector.load %arg2[%c0_6, %c0_7] : memref<64x64xbf16, #tpu.memory_space<vmem>>, vector<64x64xbf16>
    %9 = arith.extf %8 : vector<64x64xbf16> to vector<64x64xf32>
    %c0_8 = arith.constant 0 : index
    %c0_9 = arith.constant 0 : index
    %10 = vector.load %arg3[%c0_8, %c0_9] : memref<64x64xbf16, #tpu.memory_space<vmem>>, vector<64x64xbf16>
    %11 = arith.extf %10 : vector<64x64xbf16> to vector<64x64xf32>
    %c0_10 = arith.constant 0 : index
    %c0_11 = arith.constant 0 : index
    %12 = vector.load %arg2[%c0_10, %c0_11] : memref<64x64xbf16, #tpu.memory_space<vmem>>, vector<64x64xbf16>
    %c0_12 = arith.constant 0 : index
    %c0_13 = arith.constant 0 : index
    %13 = vector.load %arg6[%c0_12, %c0_13] : memref<64x3xbf16, #tpu.memory_space<vmem>>, vector<64x3xbf16>
    %cst_14 = arith.constant dense<0.000000e+00> : vector<64x3xf32>
    %14 = tpu.matmul %12, %13, %cst_14 {dimension_numbers = #tpu.dot_dimension_numbers<[1], [0], [0], [1], [0, 0, 1, 1], [], []>} : vector<64x64xbf16>, vector<64x3xbf16>, vector<64x3xf32> -> vector<64x3xf32>
    %15 = arith.truncf %7 : vector<64x64xf32> to vector<64x64xbf16>
    %c0_15 = arith.constant 0 : index
    %c0_16 = arith.constant 0 : index
    %16 = vector.load %arg7[%c0_15, %c0_16] : memref<64x3xbf16, #tpu.memory_space<vmem>>, vector<64x3xbf16>
    %cst_17 = arith.constant dense<0.000000e+00> : vector<64x3xf32>
    %17 = tpu.matmul %15, %16, %cst_17 {dimension_numbers = #tpu.dot_dimension_numbers<[1], [0], [0], [1], [0, 0, 1, 1], [], []>} : vector<64x64xbf16>, vector<64x3xbf16>, vector<64x3xf32> -> vector<64x3xf32>
    %18 = arith.addf %14, %17 : vector<64x3xf32>
    %c0_18 = arith.constant 0 : index
    %c0_19 = arith.constant 0 : index
    %19 = vector.load %arg3[%c0_18, %c0_19] : memref<64x64xbf16, #tpu.memory_space<vmem>>, vector<64x64xbf16>
    %c0_20 = arith.constant 0 : index
    %c0_21 = arith.constant 0 : index
    %20 = vector.load %arg8[%c0_20, %c0_21] : memref<64x3xbf16, #tpu.memory_space<vmem>>, vector<64x3xbf16>
    %cst_22 = arith.constant dense<0.000000e+00> : vector<64x3xf32>
    %21 = tpu.matmul %19, %20, %cst_22 {dimension_numbers = #tpu.dot_dimension_numbers<[1], [0], [0], [1], [0, 0, 1, 1], [], []>} : vector<64x64xbf16>, vector<64x3xbf16>, vector<64x3xf32> -> vector<64x3xf32>
    %22 = arith.addf %18, %21 : vector<64x3xf32>
    %c0_23 = arith.constant 0 : index
    %c0_24 = arith.constant 0 : index
    %23 = vector.load %arg9[%c0_23, %c0_24] : memref<1x3xf32, #tpu.memory_space<vmem>>, vector<1x3xf32>
    %24 = vector.broadcast %23 : vector<1x3xf32> to vector<64x3xf32>
    %25 = arith.addf %22, %24 : vector<64x3xf32>
    %cst_25 = arith.constant dense<0xFF800000> : vector<64xf32>
    %26 = vector.multi_reduction <maximumf>, %25, %cst_25 [1] : vector<64x3xf32> to vector<64xf32>
    %27 = vector.shape_cast %26 : vector<64xf32> to vector<64x1xf32>
    %28 = vector.broadcast %27 : vector<64x1xf32> to vector<64x3xf32>
    %29 = arith.subf %25, %28 : vector<64x3xf32>
    %30 = math.exp %29 : vector<64x3xf32>
    %cst_26 = arith.constant dense<0.000000e+00> : vector<64xf32>
    %31 = vector.multi_reduction <add>, %30, %cst_26 [1] : vector<64x3xf32> to vector<64xf32>
    %32 = vector.shape_cast %31 : vector<64xf32> to vector<64x1xf32>
    %33 = tpu.reciprocal %32 {approx = true} : vector<64x1xf32> -> vector<64x1xf32>
    %34 = vector.broadcast %33 : vector<64x1xf32> to vector<64x3xf32>
    %35 = arith.mulf %30, %34 : vector<64x3xf32>
    %36 = vector.extract_strided_slice %35 {offsets = [0, 0], sizes = [64, 1], strides = [1, 1]} : vector<64x3xf32> to vector<64x1xf32>
    %37 = vector.broadcast %36 : vector<64x1xf32> to vector<64x64xf32>
    %38 = arith.mulf %9, %37 : vector<64x64xf32>
    %39 = vector.extract_strided_slice %35 {offsets = [0, 1], sizes = [64, 1], strides = [1, 1]} : vector<64x3xf32> to vector<64x1xf32>
    %40 = vector.broadcast %39 : vector<64x1xf32> to vector<64x64xf32>
    %41 = arith.mulf %7, %40 : vector<64x64xf32>
    %42 = arith.addf %38, %41 : vector<64x64xf32>
    %43 = vector.extract_strided_slice %35 {offsets = [0, 2], sizes = [64, 1], strides = [1, 1]} : vector<64x3xf32> to vector<64x1xf32>
    %44 = vector.broadcast %43 : vector<64x1xf32> to vector<64x64xf32>
    %45 = arith.mulf %11, %44 : vector<64x64xf32>
    %46 = arith.addf %42, %45 : vector<64x64xf32>
    %47 = arith.truncf %46 : vector<64x64xf32> to vector<64x64xbf16>
    %c0_27 = arith.constant 0 : index
    %c0_28 = arith.constant 0 : index
    %48 = vector.load %arg10[%c0_27, %c0_28] : memref<64x64xbf16, #tpu.memory_space<vmem>>, vector<64x64xbf16>
    tpu.vector_store %arg10[%c0_27, %c0_28], %47 {strides = array<i32>} : memref<64x64xbf16, #tpu.memory_space<vmem>>, vector<64x64xbf16>,
    return
  }
  func.func @transform_0(%arg0: i32) -> (i32, i32) {
    %c0_i32 = arith.constant 0 : i32
    %c0_i32_0 = arith.constant 0 : i32
    return %arg0, %c0_i32 : i32, i32
  }
  func.func @transform_1(%arg0: i32) -> (i32, i32) {
    %c0_i32 = arith.constant 0 : i32
    %c0_i32_0 = arith.constant 0 : i32
    return %arg0, %c0_i32 : i32, i32
  }
  func.func @transform_2(%arg0: i32) -> (i32, i32) {
    %c0_i32 = arith.constant 0 : i32
    %c0_i32_0 = arith.constant 0 : i32
    return %arg0, %c0_i32 : i32, i32
  }
  func.func @transform_3(%arg0: i32) -> (i32, i32) {
    %c0_i32 = arith.constant 0 : i32
    %c0_i32_0 = arith.constant 0 : i32
    %c0_i32_1 = arith.constant 0 : i32
    return %c0_i32, %c0_i32_0 : i32, i32
  }
  func.func @transform_4(%arg0: i32) -> (i32, i32) {
    %c0_i32 = arith.constant 0 : i32
    %c0_i32_0 = arith.constant 0 : i32
    %c0_i32_1 = arith.constant 0 : i32
    return %c0_i32, %c0_i32_0 : i32, i32
  }
  func.func @transform_5(%arg0: i32) -> (i32, i32) {
    %c0_i32 = arith.constant 0 : i32
    %c0_i32_0 = arith.constant 0 : i32
    %c0_i32_1 = arith.constant 0 : i32
    return %c0_i32, %c0_i32_0 : i32, i32
  }
  func.func @transform_6(%arg0: i32) -> (i32, i32) {
    %c0_i32 = arith.constant 0 : i32
    %c0_i32_0 = arith.constant 0 : i32
    %c0_i32_1 = arith.constant 0 : i32
    return %c0_i32, %c0_i32_0 : i32, i32
  }
  func.func @transform_7(%arg0: i32) -> (i32, i32) {
    %c0_i32 = arith.constant 0 : i32
    %c0_i32_0 = arith.constant 0 : i32
    %c0_i32_1 = arith.constant 0 : i32
    return %c0_i32, %c0_i32_0 : i32, i32
  }
  func.func @transform_8(%arg0: i32) -> (i32, i32) {
    %c0_i32 = arith.constant 0 : i32
    %c0_i32_0 = arith.constant 0 : i32
    %c0_i32_1 = arith.constant 0 : i32
    return %c0_i32, %c0_i32_0 : i32, i32
  }
  func.func @transform_9(%arg0: i32) -> (i32, i32) {
    %c0_i32 = arith.constant 0 : i32
    %c0_i32_0 = arith.constant 0 : i32
    return %arg0, %c0_i32 : i32, i32
  }
}

module attributes {stable_mosaic.version = 11 : i64} {
  func.func @_linear_cat2_kernel(%arg0: i32, %arg1: memref<32x64xbf16, #tpu.memory_space<vmem>>, %arg2: memref<32x32xbf16, #tpu.memory_space<vmem>>, %arg3: memref<64x48xbf16, #tpu.memory_space<vmem>>, %arg4: memref<32x48xbf16, #tpu.memory_space<vmem>>, %arg5: memref<1x48xf32, #tpu.memory_space<vmem>>, %arg6: memref<32x48xbf16, #tpu.memory_space<vmem>>) attributes {dimension_semantics = [#tpu.dimension_semantics<parallel>], iteration_bounds = array<i64: 1>, scalar_prefetch = 0 : i64, scratch_operands = 0 : i64, tpu.core_type = #tpu.core_type<tc>, window_params = [{transform_indices = @transform_0, window_bounds = array<i64: 32, 64>}, {transform_indices = @transform_1, window_bounds = array<i64: 32, 32>}, {pipeline_mode = #tpu.pipeline_mode<synchronous>, transform_indices = @transform_2, window_bounds = array<i64: 64, 48>}, {pipeline_mode = #tpu.pipeline_mode<synchronous>, transform_indices = @transform_3, window_bounds = array<i64: 32, 48>}, {pipeline_mode = #tpu.pipeline_mode<synchronous>, transform_indices = @transform_4, window_bounds = array<i64: 1, 48>}, {transform_indices = @transform_5, window_bounds = array<i64: 32, 48>}]} {
    %c0 = arith.constant 0 : index
    %c0_0 = arith.constant 0 : index
    %0 = vector.load %arg1[%c0, %c0_0] : memref<32x64xbf16, #tpu.memory_space<vmem>>, vector<32x64xbf16>
    %c0_1 = arith.constant 0 : index
    %c0_2 = arith.constant 0 : index
    %1 = vector.load %arg3[%c0_1, %c0_2] : memref<64x48xbf16, #tpu.memory_space<vmem>>, vector<64x48xbf16>
    %cst = arith.constant dense<0.000000e+00> : vector<32x48xf32>
    %2 = tpu.matmul %0, %1, %cst {dimension_numbers = #tpu.dot_dimension_numbers<[1], [0], [0], [1], [0, 0, 1, 1], [], []>} : vector<32x64xbf16>, vector<64x48xbf16>, vector<32x48xf32> -> vector<32x48xf32>
    %c0_3 = arith.constant 0 : index
    %c0_4 = arith.constant 0 : index
    %3 = vector.load %arg2[%c0_3, %c0_4] : memref<32x32xbf16, #tpu.memory_space<vmem>>, vector<32x32xbf16>
    %c0_5 = arith.constant 0 : index
    %c0_6 = arith.constant 0 : index
    %4 = vector.load %arg4[%c0_5, %c0_6] : memref<32x48xbf16, #tpu.memory_space<vmem>>, vector<32x48xbf16>
    %cst_7 = arith.constant dense<0.000000e+00> : vector<32x48xf32>
    %5 = tpu.matmul %3, %4, %cst_7 {dimension_numbers = #tpu.dot_dimension_numbers<[1], [0], [0], [1], [0, 0, 1, 1], [], []>} : vector<32x32xbf16>, vector<32x48xbf16>, vector<32x48xf32> -> vector<32x48xf32>
    %6 = arith.addf %2, %5 : vector<32x48xf32>
    %c0_8 = arith.constant 0 : index
    %c0_9 = arith.constant 0 : index
    %7 = vector.load %arg5[%c0_8, %c0_9] : memref<1x48xf32, #tpu.memory_space<vmem>>, vector<1x48xf32>
    %8 = vector.broadcast %7 : vector<1x48xf32> to vector<32x48xf32>
    %9 = arith.addf %6, %8 : vector<32x48xf32>
    %cst_10 = arith.constant 0.000000e+00 : f32
    %10 = vector.broadcast %cst_10 : f32 to vector<32x48xf32>
    %11 = arith.maximumf %9, %10 : vector<32x48xf32>
    %12 = arith.truncf %11 : vector<32x48xf32> to vector<32x48xbf16>
    %c0_11 = arith.constant 0 : index
    %c0_12 = arith.constant 0 : index
    %13 = vector.load %arg6[%c0_11, %c0_12] : memref<32x48xbf16, #tpu.memory_space<vmem>>, vector<32x48xbf16>
    tpu.vector_store %arg6[%c0_11, %c0_12], %12 {strides = array<i32>} : memref<32x48xbf16, #tpu.memory_space<vmem>>, vector<32x48xbf16>,
    return
  }
  func.func @transform_0(%arg0: i32) -> (i32, i32) {
    %c0_i32 = arith.constant 0 : i32
    %c0_i32_0 = arith.constant 0 : i32
    return %arg0, %c0_i32 : i32, i32
  }
  func.func @transform_1(%arg0: i32) -> (i32, i32) {
    %c0_i32 = arith.constant 0 : i32
    %c0_i32_0 = arith.constant 0 : i32
    return %arg0, %c0_i32 : i32, i32
  }
  func.func @transform_2(%arg0: i32) -> (i32, i32) {
    %c0_i32 = arith.constant 0 : i32
    %c0_i32_0 = arith.constant 0 : i32
    %c0_i32_1 = arith.constant 0 : i32
    return %c0_i32, %c0_i32_0 : i32, i32
  }
  func.func @transform_3(%arg0: i32) -> (i32, i32) {
    %c0_i32 = arith.constant 0 : i32
    %c0_i32_0 = arith.constant 0 : i32
    %c0_i32_1 = arith.constant 0 : i32
    return %c0_i32, %c0_i32_0 : i32, i32
  }
  func.func @transform_4(%arg0: i32) -> (i32, i32) {
    %c0_i32 = arith.constant 0 : i32
    %c0_i32_0 = arith.constant 0 : i32
    %c0_i32_1 = arith.constant 0 : i32
    return %c0_i32, %c0_i32_0 : i32, i32
  }
  func.func @transform_5(%arg0: i32) -> (i32, i32) {
    %c0_i32 = arith.constant 0 : i32
    %c0_i32_0 = arith.constant 0 : i32
    return %arg0, %c0_i32 : i32, i32
  }
}

module attributes {stable_mosaic.version = 11 : i64} {
  func.func @_linear_cat2_kernel(%arg0: i32, %arg1: memref<128x48xbf16, #tpu.memory_space<vmem>>, %arg2: memref<128x16xbf16, #tpu.memory_space<vmem>>, %arg3: memref<48x48xbf16, #tpu.memory_space<vmem>>, %arg4: memref<16x48xbf16, #tpu.memory_space<vmem>>, %arg5: memref<1x48xf32, #tpu.memory_space<vmem>>, %arg6: memref<128x48xbf16, #tpu.memory_space<vmem>>) attributes {dimension_semantics = [#tpu.dimension_semantics<parallel>], iteration_bounds = array<i64: 1>, scalar_prefetch = 0 : i64, scratch_operands = 0 : i64, tpu.core_type = #tpu.core_type<tc>, window_params = [{transform_indices = @transform_0, window_bounds = array<i64: 128, 48>}, {transform_indices = @transform_1, window_bounds = array<i64: 128, 16>}, {pipeline_mode = #tpu.pipeline_mode<synchronous>, transform_indices = @transform_2, window_bounds = array<i64: 48, 48>}, {pipeline_mode = #tpu.pipeline_mode<synchronous>, transform_indices = @transform_3, window_bounds = array<i64: 16, 48>}, {pipeline_mode = #tpu.pipeline_mode<synchronous>, transform_indices = @transform_4, window_bounds = array<i64: 1, 48>}, {transform_indices = @transform_5, window_bounds = array<i64: 128, 48>}]} {
    %c0 = arith.constant 0 : index
    %c0_0 = arith.constant 0 : index
    %0 = vector.load %arg1[%c0, %c0_0] : memref<128x48xbf16, #tpu.memory_space<vmem>>, vector<128x48xbf16>
    %c0_1 = arith.constant 0 : index
    %c0_2 = arith.constant 0 : index
    %1 = vector.load %arg3[%c0_1, %c0_2] : memref<48x48xbf16, #tpu.memory_space<vmem>>, vector<48x48xbf16>
    %cst = arith.constant dense<0.000000e+00> : vector<128x48xf32>
    %2 = tpu.matmul %0, %1, %cst {dimension_numbers = #tpu.dot_dimension_numbers<[1], [0], [0], [1], [0, 0, 1, 1], [], []>} : vector<128x48xbf16>, vector<48x48xbf16>, vector<128x48xf32> -> vector<128x48xf32>
    %c0_3 = arith.constant 0 : index
    %c0_4 = arith.constant 0 : index
    %3 = vector.load %arg2[%c0_3, %c0_4] : memref<128x16xbf16, #tpu.memory_space<vmem>>, vector<128x16xbf16>
    %c0_5 = arith.constant 0 : index
    %c0_6 = arith.constant 0 : index
    %4 = vector.load %arg4[%c0_5, %c0_6] : memref<16x48xbf16, #tpu.memory_space<vmem>>, vector<16x48xbf16>
    %cst_7 = arith.constant dense<0.000000e+00> : vector<128x48xf32>
    %5 = tpu.matmul %3, %4, %cst_7 {dimension_numbers = #tpu.dot_dimension_numbers<[1], [0], [0], [1], [0, 0, 1, 1], [], []>} : vector<128x16xbf16>, vector<16x48xbf16>, vector<128x48xf32> -> vector<128x48xf32>
    %6 = arith.addf %2, %5 : vector<128x48xf32>
    %c0_8 = arith.constant 0 : index
    %c0_9 = arith.constant 0 : index
    %7 = vector.load %arg5[%c0_8, %c0_9] : memref<1x48xf32, #tpu.memory_space<vmem>>, vector<1x48xf32>
    %8 = vector.broadcast %7 : vector<1x48xf32> to vector<128x48xf32>
    %9 = arith.addf %6, %8 : vector<128x48xf32>
    %cst_10 = arith.constant 0.000000e+00 : f32
    %10 = vector.broadcast %cst_10 : f32 to vector<128x48xf32>
    %11 = arith.maximumf %9, %10 : vector<128x48xf32>
    %12 = arith.truncf %11 : vector<128x48xf32> to vector<128x48xbf16>
    %c0_11 = arith.constant 0 : index
    %c0_12 = arith.constant 0 : index
    %13 = vector.load %arg6[%c0_11, %c0_12] : memref<128x48xbf16, #tpu.memory_space<vmem>>, vector<128x48xbf16>
    tpu.vector_store %arg6[%c0_11, %c0_12], %12 {strides = array<i32>} : memref<128x48xbf16, #tpu.memory_space<vmem>>, vector<128x48xbf16>,
    return
  }
  func.func @transform_0(%arg0: i32) -> (i32, i32) {
    %c0_i32 = arith.constant 0 : i32
    %c0_i32_0 = arith.constant 0 : i32
    return %arg0, %c0_i32 : i32, i32
  }
  func.func @transform_1(%arg0: i32) -> (i32, i32) {
    %c0_i32 = arith.constant 0 : i32
    %c0_i32_0 = arith.constant 0 : i32
    return %arg0, %c0_i32 : i32, i32
  }
  func.func @transform_2(%arg0: i32) -> (i32, i32) {
    %c0_i32 = arith.constant 0 : i32
    %c0_i32_0 = arith.constant 0 : i32
    %c0_i32_1 = arith.constant 0 : i32
    return %c0_i32, %c0_i32_0 : i32, i32
  }
  func.func @transform_3(%arg0: i32) -> (i32, i32) {
    %c0_i32 = arith.constant 0 : i32
    %c0_i32_0 = arith.constant 0 : i32
    %c0_i32_1 = arith.constant 0 : i32
    return %c0_i32, %c0_i32_0 : i32, i32
  }
  func.func @transform_4(%arg0: i32) -> (i32, i32) {
    %c0_i32 = arith.constant 0 : i32
    %c0_i32_0 = arith.constant 0 : i32
    %c0_i32_1 = arith.constant 0 : i32
    return %c0_i32, %c0_i32_0 : i32, i32
  }
  func.func @transform_5(%arg0: i32) -> (i32, i32) {
    %c0_i32 = arith.constant 0 : i32
    %c0_i32_0 = arith.constant 0 : i32
    return %arg0, %c0_i32 : i32, i32
  }
}

module attributes {stable_mosaic.version = 11 : i64} {
  func.func @_linear_cat2_kernel(%arg0: i32, %arg1: memref<64x64xbf16, #tpu.memory_space<vmem>>, %arg2: memref<64x32xbf16, #tpu.memory_space<vmem>>, %arg3: memref<64x48xbf16, #tpu.memory_space<vmem>>, %arg4: memref<32x48xbf16, #tpu.memory_space<vmem>>, %arg5: memref<1x48xf32, #tpu.memory_space<vmem>>, %arg6: memref<64x48xbf16, #tpu.memory_space<vmem>>) attributes {dimension_semantics = [#tpu.dimension_semantics<parallel>], iteration_bounds = array<i64: 1>, scalar_prefetch = 0 : i64, scratch_operands = 0 : i64, tpu.core_type = #tpu.core_type<tc>, window_params = [{transform_indices = @transform_0, window_bounds = array<i64: 64, 64>}, {transform_indices = @transform_1, window_bounds = array<i64: 64, 32>}, {pipeline_mode = #tpu.pipeline_mode<synchronous>, transform_indices = @transform_2, window_bounds = array<i64: 64, 48>}, {pipeline_mode = #tpu.pipeline_mode<synchronous>, transform_indices = @transform_3, window_bounds = array<i64: 32, 48>}, {pipeline_mode = #tpu.pipeline_mode<synchronous>, transform_indices = @transform_4, window_bounds = array<i64: 1, 48>}, {transform_indices = @transform_5, window_bounds = array<i64: 64, 48>}]} {
    %c0 = arith.constant 0 : index
    %c0_0 = arith.constant 0 : index
    %0 = vector.load %arg1[%c0, %c0_0] : memref<64x64xbf16, #tpu.memory_space<vmem>>, vector<64x64xbf16>
    %c0_1 = arith.constant 0 : index
    %c0_2 = arith.constant 0 : index
    %1 = vector.load %arg3[%c0_1, %c0_2] : memref<64x48xbf16, #tpu.memory_space<vmem>>, vector<64x48xbf16>
    %cst = arith.constant dense<0.000000e+00> : vector<64x48xf32>
    %2 = tpu.matmul %0, %1, %cst {dimension_numbers = #tpu.dot_dimension_numbers<[1], [0], [0], [1], [0, 0, 1, 1], [], []>} : vector<64x64xbf16>, vector<64x48xbf16>, vector<64x48xf32> -> vector<64x48xf32>
    %c0_3 = arith.constant 0 : index
    %c0_4 = arith.constant 0 : index
    %3 = vector.load %arg2[%c0_3, %c0_4] : memref<64x32xbf16, #tpu.memory_space<vmem>>, vector<64x32xbf16>
    %c0_5 = arith.constant 0 : index
    %c0_6 = arith.constant 0 : index
    %4 = vector.load %arg4[%c0_5, %c0_6] : memref<32x48xbf16, #tpu.memory_space<vmem>>, vector<32x48xbf16>
    %cst_7 = arith.constant dense<0.000000e+00> : vector<64x48xf32>
    %5 = tpu.matmul %3, %4, %cst_7 {dimension_numbers = #tpu.dot_dimension_numbers<[1], [0], [0], [1], [0, 0, 1, 1], [], []>} : vector<64x32xbf16>, vector<32x48xbf16>, vector<64x48xf32> -> vector<64x48xf32>
    %6 = arith.addf %2, %5 : vector<64x48xf32>
    %c0_8 = arith.constant 0 : index
    %c0_9 = arith.constant 0 : index
    %7 = vector.load %arg5[%c0_8, %c0_9] : memref<1x48xf32, #tpu.memory_space<vmem>>, vector<1x48xf32>
    %8 = vector.broadcast %7 : vector<1x48xf32> to vector<64x48xf32>
    %9 = arith.addf %6, %8 : vector<64x48xf32>
    %cst_10 = arith.constant 0.000000e+00 : f32
    %10 = vector.broadcast %cst_10 : f32 to vector<64x48xf32>
    %11 = arith.maximumf %9, %10 : vector<64x48xf32>
    %12 = arith.truncf %11 : vector<64x48xf32> to vector<64x48xbf16>
    %c0_11 = arith.constant 0 : index
    %c0_12 = arith.constant 0 : index
    %13 = vector.load %arg6[%c0_11, %c0_12] : memref<64x48xbf16, #tpu.memory_space<vmem>>, vector<64x48xbf16>
    tpu.vector_store %arg6[%c0_11, %c0_12], %12 {strides = array<i32>} : memref<64x48xbf16, #tpu.memory_space<vmem>>, vector<64x48xbf16>,
    return
  }
  func.func @transform_0(%arg0: i32) -> (i32, i32) {
    %c0_i32 = arith.constant 0 : i32
    %c0_i32_0 = arith.constant 0 : i32
    return %arg0, %c0_i32 : i32, i32
  }
  func.func @transform_1(%arg0: i32) -> (i32, i32) {
    %c0_i32 = arith.constant 0 : i32
    %c0_i32_0 = arith.constant 0 : i32
    return %arg0, %c0_i32 : i32, i32
  }
  func.func @transform_2(%arg0: i32) -> (i32, i32) {
    %c0_i32 = arith.constant 0 : i32
    %c0_i32_0 = arith.constant 0 : i32
    %c0_i32_1 = arith.constant 0 : i32
    return %c0_i32, %c0_i32_0 : i32, i32
  }
  func.func @transform_3(%arg0: i32) -> (i32, i32) {
    %c0_i32 = arith.constant 0 : i32
    %c0_i32_0 = arith.constant 0 : i32
    %c0_i32_1 = arith.constant 0 : i32
    return %c0_i32, %c0_i32_0 : i32, i32
  }
  func.func @transform_4(%arg0: i32) -> (i32, i32) {
    %c0_i32 = arith.constant 0 : i32
    %c0_i32_0 = arith.constant 0 : i32
    %c0_i32_1 = arith.constant 0 : i32
    return %c0_i32, %c0_i32_0 : i32, i32
  }
  func.func @transform_5(%arg0: i32) -> (i32, i32) {
    %c0_i32 = arith.constant 0 : i32
    %c0_i32_0 = arith.constant 0 : i32
    return %arg0, %c0_i32 : i32, i32
  }
}

module attributes {stable_mosaic.version = 11 : i64} {
  func.func @_linear_cat2_kernel(%arg0: i32, %arg1: memref<64x48xbf16, #tpu.memory_space<vmem>>, %arg2: memref<64x16xbf16, #tpu.memory_space<vmem>>, %arg3: memref<48x48xbf16, #tpu.memory_space<vmem>>, %arg4: memref<16x48xbf16, #tpu.memory_space<vmem>>, %arg5: memref<1x48xf32, #tpu.memory_space<vmem>>, %arg6: memref<64x48xbf16, #tpu.memory_space<vmem>>) attributes {dimension_semantics = [#tpu.dimension_semantics<parallel>], iteration_bounds = array<i64: 1>, scalar_prefetch = 0 : i64, scratch_operands = 0 : i64, tpu.core_type = #tpu.core_type<tc>, window_params = [{transform_indices = @transform_0, window_bounds = array<i64: 64, 48>}, {transform_indices = @transform_1, window_bounds = array<i64: 64, 16>}, {pipeline_mode = #tpu.pipeline_mode<synchronous>, transform_indices = @transform_2, window_bounds = array<i64: 48, 48>}, {pipeline_mode = #tpu.pipeline_mode<synchronous>, transform_indices = @transform_3, window_bounds = array<i64: 16, 48>}, {pipeline_mode = #tpu.pipeline_mode<synchronous>, transform_indices = @transform_4, window_bounds = array<i64: 1, 48>}, {transform_indices = @transform_5, window_bounds = array<i64: 64, 48>}]} {
    %c0 = arith.constant 0 : index
    %c0_0 = arith.constant 0 : index
    %0 = vector.load %arg1[%c0, %c0_0] : memref<64x48xbf16, #tpu.memory_space<vmem>>, vector<64x48xbf16>
    %c0_1 = arith.constant 0 : index
    %c0_2 = arith.constant 0 : index
    %1 = vector.load %arg3[%c0_1, %c0_2] : memref<48x48xbf16, #tpu.memory_space<vmem>>, vector<48x48xbf16>
    %cst = arith.constant dense<0.000000e+00> : vector<64x48xf32>
    %2 = tpu.matmul %0, %1, %cst {dimension_numbers = #tpu.dot_dimension_numbers<[1], [0], [0], [1], [0, 0, 1, 1], [], []>} : vector<64x48xbf16>, vector<48x48xbf16>, vector<64x48xf32> -> vector<64x48xf32>
    %c0_3 = arith.constant 0 : index
    %c0_4 = arith.constant 0 : index
    %3 = vector.load %arg2[%c0_3, %c0_4] : memref<64x16xbf16, #tpu.memory_space<vmem>>, vector<64x16xbf16>
    %c0_5 = arith.constant 0 : index
    %c0_6 = arith.constant 0 : index
    %4 = vector.load %arg4[%c0_5, %c0_6] : memref<16x48xbf16, #tpu.memory_space<vmem>>, vector<16x48xbf16>
    %cst_7 = arith.constant dense<0.000000e+00> : vector<64x48xf32>
    %5 = tpu.matmul %3, %4, %cst_7 {dimension_numbers = #tpu.dot_dimension_numbers<[1], [0], [0], [1], [0, 0, 1, 1], [], []>} : vector<64x16xbf16>, vector<16x48xbf16>, vector<64x48xf32> -> vector<64x48xf32>
    %6 = arith.addf %2, %5 : vector<64x48xf32>
    %c0_8 = arith.constant 0 : index
    %c0_9 = arith.constant 0 : index
    %7 = vector.load %arg5[%c0_8, %c0_9] : memref<1x48xf32, #tpu.memory_space<vmem>>, vector<1x48xf32>
    %8 = vector.broadcast %7 : vector<1x48xf32> to vector<64x48xf32>
    %9 = arith.addf %6, %8 : vector<64x48xf32>
    %cst_10 = arith.constant 0.000000e+00 : f32
    %10 = vector.broadcast %cst_10 : f32 to vector<64x48xf32>
    %11 = arith.maximumf %9, %10 : vector<64x48xf32>
    %12 = arith.truncf %11 : vector<64x48xf32> to vector<64x48xbf16>
    %c0_11 = arith.constant 0 : index
    %c0_12 = arith.constant 0 : index
    %13 = vector.load %arg6[%c0_11, %c0_12] : memref<64x48xbf16, #tpu.memory_space<vmem>>, vector<64x48xbf16>
    tpu.vector_store %arg6[%c0_11, %c0_12], %12 {strides = array<i32>} : memref<64x48xbf16, #tpu.memory_space<vmem>>, vector<64x48xbf16>,
    return
  }
  func.func @transform_0(%arg0: i32) -> (i32, i32) {
    %c0_i32 = arith.constant 0 : i32
    %c0_i32_0 = arith.constant 0 : i32
    return %arg0, %c0_i32 : i32, i32
  }
  func.func @transform_1(%arg0: i32) -> (i32, i32) {
    %c0_i32 = arith.constant 0 : i32
    %c0_i32_0 = arith.constant 0 : i32
    return %arg0, %c0_i32 : i32, i32
  }
  func.func @transform_2(%arg0: i32) -> (i32, i32) {
    %c0_i32 = arith.constant 0 : i32
    %c0_i32_0 = arith.constant 0 : i32
    %c0_i32_1 = arith.constant 0 : i32
    return %c0_i32, %c0_i32_0 : i32, i32
  }
  func.func @transform_3(%arg0: i32) -> (i32, i32) {
    %c0_i32 = arith.constant 0 : i32
    %c0_i32_0 = arith.constant 0 : i32
    %c0_i32_1 = arith.constant 0 : i32
    return %c0_i32, %c0_i32_0 : i32, i32
  }
  func.func @transform_4(%arg0: i32) -> (i32, i32) {
    %c0_i32 = arith.constant 0 : i32
    %c0_i32_0 = arith.constant 0 : i32
    %c0_i32_1 = arith.constant 0 : i32
    return %c0_i32, %c0_i32_0 : i32, i32
  }
  func.func @transform_5(%arg0: i32) -> (i32, i32) {
    %c0_i32 = arith.constant 0 : i32
    %c0_i32_0 = arith.constant 0 : i32
    return %arg0, %c0_i32 : i32, i32
  }
}

module attributes {stable_mosaic.version = 11 : i64} {
  func.func @_gfm_kernel(%arg0: i32, %arg1: memref<64x64xbf16, #tpu.memory_space<vmem>>, %arg2: memref<64x48xbf16, #tpu.memory_space<vmem>>, %arg3: memref<64x48xbf16, #tpu.memory_space<vmem>>, %arg4: memref<64x48xbf16, #tpu.memory_space<vmem>>, %arg5: memref<1x48xf32, #tpu.memory_space<vmem>>, %arg6: memref<48x3xbf16, #tpu.memory_space<vmem>>, %arg7: memref<48x3xbf16, #tpu.memory_space<vmem>>, %arg8: memref<48x3xbf16, #tpu.memory_space<vmem>>, %arg9: memref<1x3xf32, #tpu.memory_space<vmem>>, %arg10: memref<64x48xbf16, #tpu.memory_space<vmem>>) attributes {dimension_semantics = [#tpu.dimension_semantics<parallel>], iteration_bounds = array<i64: 1>, scalar_prefetch = 0 : i64, scratch_operands = 0 : i64, tpu.core_type = #tpu.core_type<tc>, window_params = [{transform_indices = @transform_0, window_bounds = array<i64: 64, 64>}, {transform_indices = @transform_1, window_bounds = array<i64: 64, 48>}, {transform_indices = @transform_2, window_bounds = array<i64: 64, 48>}, {pipeline_mode = #tpu.pipeline_mode<synchronous>, transform_indices = @transform_3, window_bounds = array<i64: 64, 48>}, {pipeline_mode = #tpu.pipeline_mode<synchronous>, transform_indices = @transform_4, window_bounds = array<i64: 1, 48>}, {pipeline_mode = #tpu.pipeline_mode<synchronous>, transform_indices = @transform_5, window_bounds = array<i64: 48, 3>}, {pipeline_mode = #tpu.pipeline_mode<synchronous>, transform_indices = @transform_6, window_bounds = array<i64: 48, 3>}, {pipeline_mode = #tpu.pipeline_mode<synchronous>, transform_indices = @transform_7, window_bounds = array<i64: 48, 3>}, {pipeline_mode = #tpu.pipeline_mode<synchronous>, transform_indices = @transform_8, window_bounds = array<i64: 1, 3>}, {transform_indices = @transform_9, window_bounds = array<i64: 64, 48>}]} {
    %c0 = arith.constant 0 : index
    %c0_0 = arith.constant 0 : index
    %0 = vector.load %arg1[%c0, %c0_0] : memref<64x64xbf16, #tpu.memory_space<vmem>>, vector<64x64xbf16>
    %c0_1 = arith.constant 0 : index
    %c0_2 = arith.constant 0 : index
    %1 = vector.load %arg4[%c0_1, %c0_2] : memref<64x48xbf16, #tpu.memory_space<vmem>>, vector<64x48xbf16>
    %cst = arith.constant dense<0.000000e+00> : vector<64x48xf32>
    %2 = tpu.matmul %0, %1, %cst {dimension_numbers = #tpu.dot_dimension_numbers<[1], [0], [0], [1], [0, 0, 1, 1], [], []>} : vector<64x64xbf16>, vector<64x48xbf16>, vector<64x48xf32> -> vector<64x48xf32>
    %c0_3 = arith.constant 0 : index
    %c0_4 = arith.constant 0 : index
    %3 = vector.load %arg5[%c0_3, %c0_4] : memref<1x48xf32, #tpu.memory_space<vmem>>, vector<1x48xf32>
    %4 = vector.broadcast %3 : vector<1x48xf32> to vector<64x48xf32>
    %5 = arith.addf %2, %4 : vector<64x48xf32>
    %cst_5 = arith.constant 0.000000e+00 : f32
    %6 = vector.broadcast %cst_5 : f32 to vector<64x48xf32>
    %7 = arith.maximumf %5, %6 : vector<64x48xf32>
    %c0_6 = arith.constant 0 : index
    %c0_7 = arith.constant 0 : index
    %8 = vector.load %arg2[%c0_6, %c0_7] : memref<64x48xbf16, #tpu.memory_space<vmem>>, vector<64x48xbf16>
    %9 = arith.extf %8 : vector<64x48xbf16> to vector<64x48xf32>
    %c0_8 = arith.constant 0 : index
    %c0_9 = arith.constant 0 : index
    %10 = vector.load %arg3[%c0_8, %c0_9] : memref<64x48xbf16, #tpu.memory_space<vmem>>, vector<64x48xbf16>
    %11 = arith.extf %10 : vector<64x48xbf16> to vector<64x48xf32>
    %c0_10 = arith.constant 0 : index
    %c0_11 = arith.constant 0 : index
    %12 = vector.load %arg2[%c0_10, %c0_11] : memref<64x48xbf16, #tpu.memory_space<vmem>>, vector<64x48xbf16>
    %c0_12 = arith.constant 0 : index
    %c0_13 = arith.constant 0 : index
    %13 = vector.load %arg6[%c0_12, %c0_13] : memref<48x3xbf16, #tpu.memory_space<vmem>>, vector<48x3xbf16>
    %cst_14 = arith.constant dense<0.000000e+00> : vector<64x3xf32>
    %14 = tpu.matmul %12, %13, %cst_14 {dimension_numbers = #tpu.dot_dimension_numbers<[1], [0], [0], [1], [0, 0, 1, 1], [], []>} : vector<64x48xbf16>, vector<48x3xbf16>, vector<64x3xf32> -> vector<64x3xf32>
    %15 = arith.truncf %7 : vector<64x48xf32> to vector<64x48xbf16>
    %c0_15 = arith.constant 0 : index
    %c0_16 = arith.constant 0 : index
    %16 = vector.load %arg7[%c0_15, %c0_16] : memref<48x3xbf16, #tpu.memory_space<vmem>>, vector<48x3xbf16>
    %cst_17 = arith.constant dense<0.000000e+00> : vector<64x3xf32>
    %17 = tpu.matmul %15, %16, %cst_17 {dimension_numbers = #tpu.dot_dimension_numbers<[1], [0], [0], [1], [0, 0, 1, 1], [], []>} : vector<64x48xbf16>, vector<48x3xbf16>, vector<64x3xf32> -> vector<64x3xf32>
    %18 = arith.addf %14, %17 : vector<64x3xf32>
    %c0_18 = arith.constant 0 : index
    %c0_19 = arith.constant 0 : index
    %19 = vector.load %arg3[%c0_18, %c0_19] : memref<64x48xbf16, #tpu.memory_space<vmem>>, vector<64x48xbf16>
    %c0_20 = arith.constant 0 : index
    %c0_21 = arith.constant 0 : index
    %20 = vector.load %arg8[%c0_20, %c0_21] : memref<48x3xbf16, #tpu.memory_space<vmem>>, vector<48x3xbf16>
    %cst_22 = arith.constant dense<0.000000e+00> : vector<64x3xf32>
    %21 = tpu.matmul %19, %20, %cst_22 {dimension_numbers = #tpu.dot_dimension_numbers<[1], [0], [0], [1], [0, 0, 1, 1], [], []>} : vector<64x48xbf16>, vector<48x3xbf16>, vector<64x3xf32> -> vector<64x3xf32>
    %22 = arith.addf %18, %21 : vector<64x3xf32>
    %c0_23 = arith.constant 0 : index
    %c0_24 = arith.constant 0 : index
    %23 = vector.load %arg9[%c0_23, %c0_24] : memref<1x3xf32, #tpu.memory_space<vmem>>, vector<1x3xf32>
    %24 = vector.broadcast %23 : vector<1x3xf32> to vector<64x3xf32>
    %25 = arith.addf %22, %24 : vector<64x3xf32>
    %cst_25 = arith.constant dense<0xFF800000> : vector<64xf32>
    %26 = vector.multi_reduction <maximumf>, %25, %cst_25 [1] : vector<64x3xf32> to vector<64xf32>
    %27 = vector.shape_cast %26 : vector<64xf32> to vector<64x1xf32>
    %28 = vector.broadcast %27 : vector<64x1xf32> to vector<64x3xf32>
    %29 = arith.subf %25, %28 : vector<64x3xf32>
    %30 = math.exp %29 : vector<64x3xf32>
    %cst_26 = arith.constant dense<0.000000e+00> : vector<64xf32>
    %31 = vector.multi_reduction <add>, %30, %cst_26 [1] : vector<64x3xf32> to vector<64xf32>
    %32 = vector.shape_cast %31 : vector<64xf32> to vector<64x1xf32>
    %33 = tpu.reciprocal %32 {approx = true} : vector<64x1xf32> -> vector<64x1xf32>
    %34 = vector.broadcast %33 : vector<64x1xf32> to vector<64x3xf32>
    %35 = arith.mulf %30, %34 : vector<64x3xf32>
    %36 = vector.extract_strided_slice %35 {offsets = [0, 0], sizes = [64, 1], strides = [1, 1]} : vector<64x3xf32> to vector<64x1xf32>
    %37 = vector.broadcast %36 : vector<64x1xf32> to vector<64x48xf32>
    %38 = arith.mulf %9, %37 : vector<64x48xf32>
    %39 = vector.extract_strided_slice %35 {offsets = [0, 1], sizes = [64, 1], strides = [1, 1]} : vector<64x3xf32> to vector<64x1xf32>
    %40 = vector.broadcast %39 : vector<64x1xf32> to vector<64x48xf32>
    %41 = arith.mulf %7, %40 : vector<64x48xf32>
    %42 = arith.addf %38, %41 : vector<64x48xf32>
    %43 = vector.extract_strided_slice %35 {offsets = [0, 2], sizes = [64, 1], strides = [1, 1]} : vector<64x3xf32> to vector<64x1xf32>
    %44 = vector.broadcast %43 : vector<64x1xf32> to vector<64x48xf32>
    %45 = arith.mulf %11, %44 : vector<64x48xf32>
    %46 = arith.addf %42, %45 : vector<64x48xf32>
    %47 = arith.truncf %46 : vector<64x48xf32> to vector<64x48xbf16>
    %c0_27 = arith.constant 0 : index
    %c0_28 = arith.constant 0 : index
    %48 = vector.load %arg10[%c0_27, %c0_28] : memref<64x48xbf16, #tpu.memory_space<vmem>>, vector<64x48xbf16>
    tpu.vector_store %arg10[%c0_27, %c0_28], %47 {strides = array<i32>} : memref<64x48xbf16, #tpu.memory_space<vmem>>, vector<64x48xbf16>,
    return
  }
  func.func @transform_0(%arg0: i32) -> (i32, i32) {
    %c0_i32 = arith.constant 0 : i32
    %c0_i32_0 = arith.constant 0 : i32
    return %arg0, %c0_i32 : i32, i32
  }
  func.func @transform_1(%arg0: i32) -> (i32, i32) {
    %c0_i32 = arith.constant 0 : i32
    %c0_i32_0 = arith.constant 0 : i32
    return %arg0, %c0_i32 : i32, i32
  }
  func.func @transform_2(%arg0: i32) -> (i32, i32) {
    %c0_i32 = arith.constant 0 : i32
    %c0_i32_0 = arith.constant 0 : i32
    return %arg0, %c0_i32 : i32, i32
  }
  func.func @transform_3(%arg0: i32) -> (i32, i32) {
    %c0_i32 = arith.constant 0 : i32
    %c0_i32_0 = arith.constant 0 : i32
    %c0_i32_1 = arith.constant 0 : i32
    return %c0_i32, %c0_i32_0 : i32, i32
  }
  func.func @transform_4(%arg0: i32) -> (i32, i32) {
    %c0_i32 = arith.constant 0 : i32
    %c0_i32_0 = arith.constant 0 : i32
    %c0_i32_1 = arith.constant 0 : i32
    return %c0_i32, %c0_i32_0 : i32, i32
  }
  func.func @transform_5(%arg0: i32) -> (i32, i32) {
    %c0_i32 = arith.constant 0 : i32
    %c0_i32_0 = arith.constant 0 : i32
    %c0_i32_1 = arith.constant 0 : i32
    return %c0_i32, %c0_i32_0 : i32, i32
  }
  func.func @transform_6(%arg0: i32) -> (i32, i32) {
    %c0_i32 = arith.constant 0 : i32
    %c0_i32_0 = arith.constant 0 : i32
    %c0_i32_1 = arith.constant 0 : i32
    return %c0_i32, %c0_i32_0 : i32, i32
  }
  func.func @transform_7(%arg0: i32) -> (i32, i32) {
    %c0_i32 = arith.constant 0 : i32
    %c0_i32_0 = arith.constant 0 : i32
    %c0_i32_1 = arith.constant 0 : i32
    return %c0_i32, %c0_i32_0 : i32, i32
  }
  func.func @transform_8(%arg0: i32) -> (i32, i32) {
    %c0_i32 = arith.constant 0 : i32
    %c0_i32_0 = arith.constant 0 : i32
    %c0_i32_1 = arith.constant 0 : i32
    return %c0_i32, %c0_i32_0 : i32, i32
  }
  func.func @transform_9(%arg0: i32) -> (i32, i32) {
    %c0_i32 = arith.constant 0 : i32
    %c0_i32_0 = arith.constant 0 : i32
    return %arg0, %c0_i32 : i32, i32
  }
}

module attributes {stable_mosaic.version = 11 : i64} {
  func.func @_linear_cat2_kernel(%arg0: i32, %arg1: memref<512x48xbf16, #tpu.memory_space<vmem>>, %arg2: memref<512x8xbf16, #tpu.memory_space<vmem>>, %arg3: memref<48x32xbf16, #tpu.memory_space<vmem>>, %arg4: memref<8x32xbf16, #tpu.memory_space<vmem>>, %arg5: memref<1x32xf32, #tpu.memory_space<vmem>>, %arg6: memref<512x32xbf16, #tpu.memory_space<vmem>>) attributes {dimension_semantics = [#tpu.dimension_semantics<parallel>], iteration_bounds = array<i64: 1>, scalar_prefetch = 0 : i64, scratch_operands = 0 : i64, tpu.core_type = #tpu.core_type<tc>, window_params = [{transform_indices = @transform_0, window_bounds = array<i64: 512, 48>}, {transform_indices = @transform_1, window_bounds = array<i64: 512, 8>}, {pipeline_mode = #tpu.pipeline_mode<synchronous>, transform_indices = @transform_2, window_bounds = array<i64: 48, 32>}, {pipeline_mode = #tpu.pipeline_mode<synchronous>, transform_indices = @transform_3, window_bounds = array<i64: 8, 32>}, {pipeline_mode = #tpu.pipeline_mode<synchronous>, transform_indices = @transform_4, window_bounds = array<i64: 1, 32>}, {transform_indices = @transform_5, window_bounds = array<i64: 512, 32>}]} {
    %c0 = arith.constant 0 : index
    %c0_0 = arith.constant 0 : index
    %0 = vector.load %arg1[%c0, %c0_0] : memref<512x48xbf16, #tpu.memory_space<vmem>>, vector<512x48xbf16>
    %c0_1 = arith.constant 0 : index
    %c0_2 = arith.constant 0 : index
    %1 = vector.load %arg3[%c0_1, %c0_2] : memref<48x32xbf16, #tpu.memory_space<vmem>>, vector<48x32xbf16>
    %cst = arith.constant dense<0.000000e+00> : vector<512x32xf32>
    %2 = tpu.matmul %0, %1, %cst {dimension_numbers = #tpu.dot_dimension_numbers<[1], [0], [0], [1], [0, 0, 1, 1], [], []>} : vector<512x48xbf16>, vector<48x32xbf16>, vector<512x32xf32> -> vector<512x32xf32>
    %c0_3 = arith.constant 0 : index
    %c0_4 = arith.constant 0 : index
    %3 = vector.load %arg2[%c0_3, %c0_4] : memref<512x8xbf16, #tpu.memory_space<vmem>>, vector<512x8xbf16>
    %c0_5 = arith.constant 0 : index
    %c0_6 = arith.constant 0 : index
    %4 = vector.load %arg4[%c0_5, %c0_6] : memref<8x32xbf16, #tpu.memory_space<vmem>>, vector<8x32xbf16>
    %cst_7 = arith.constant dense<0.000000e+00> : vector<512x32xf32>
    %5 = tpu.matmul %3, %4, %cst_7 {dimension_numbers = #tpu.dot_dimension_numbers<[1], [0], [0], [1], [0, 0, 1, 1], [], []>} : vector<512x8xbf16>, vector<8x32xbf16>, vector<512x32xf32> -> vector<512x32xf32>
    %6 = arith.addf %2, %5 : vector<512x32xf32>
    %c0_8 = arith.constant 0 : index
    %c0_9 = arith.constant 0 : index
    %7 = vector.load %arg5[%c0_8, %c0_9] : memref<1x32xf32, #tpu.memory_space<vmem>>, vector<1x32xf32>
    %8 = vector.broadcast %7 : vector<1x32xf32> to vector<512x32xf32>
    %9 = arith.addf %6, %8 : vector<512x32xf32>
    %cst_10 = arith.constant 0.000000e+00 : f32
    %10 = vector.broadcast %cst_10 : f32 to vector<512x32xf32>
    %11 = arith.maximumf %9, %10 : vector<512x32xf32>
    %12 = arith.truncf %11 : vector<512x32xf32> to vector<512x32xbf16>
    %c0_11 = arith.constant 0 : index
    %c0_12 = arith.constant 0 : index
    %13 = vector.load %arg6[%c0_11, %c0_12] : memref<512x32xbf16, #tpu.memory_space<vmem>>, vector<512x32xbf16>
    tpu.vector_store %arg6[%c0_11, %c0_12], %12 {strides = array<i32>} : memref<512x32xbf16, #tpu.memory_space<vmem>>, vector<512x32xbf16>,
    return
  }
  func.func @transform_0(%arg0: i32) -> (i32, i32) {
    %c0_i32 = arith.constant 0 : i32
    %c0_i32_0 = arith.constant 0 : i32
    return %arg0, %c0_i32 : i32, i32
  }
  func.func @transform_1(%arg0: i32) -> (i32, i32) {
    %c0_i32 = arith.constant 0 : i32
    %c0_i32_0 = arith.constant 0 : i32
    return %arg0, %c0_i32 : i32, i32
  }
  func.func @transform_2(%arg0: i32) -> (i32, i32) {
    %c0_i32 = arith.constant 0 : i32
    %c0_i32_0 = arith.constant 0 : i32
    %c0_i32_1 = arith.constant 0 : i32
    return %c0_i32, %c0_i32_0 : i32, i32
  }
  func.func @transform_3(%arg0: i32) -> (i32, i32) {
    %c0_i32 = arith.constant 0 : i32
    %c0_i32_0 = arith.constant 0 : i32
    %c0_i32_1 = arith.constant 0 : i32
    return %c0_i32, %c0_i32_0 : i32, i32
  }
  func.func @transform_4(%arg0: i32) -> (i32, i32) {
    %c0_i32 = arith.constant 0 : i32
    %c0_i32_0 = arith.constant 0 : i32
    %c0_i32_1 = arith.constant 0 : i32
    return %c0_i32, %c0_i32_0 : i32, i32
  }
  func.func @transform_5(%arg0: i32) -> (i32, i32) {
    %c0_i32 = arith.constant 0 : i32
    %c0_i32_0 = arith.constant 0 : i32
    return %arg0, %c0_i32 : i32, i32
  }
}

module attributes {stable_mosaic.version = 11 : i64} {
  func.func @_linear_cat2_kernel(%arg0: i32, %arg1: memref<64x48xbf16, #tpu.memory_space<vmem>>, %arg2: memref<64x8xbf16, #tpu.memory_space<vmem>>, %arg3: memref<48x32xbf16, #tpu.memory_space<vmem>>, %arg4: memref<8x32xbf16, #tpu.memory_space<vmem>>, %arg5: memref<1x32xf32, #tpu.memory_space<vmem>>, %arg6: memref<64x32xbf16, #tpu.memory_space<vmem>>) attributes {dimension_semantics = [#tpu.dimension_semantics<parallel>], iteration_bounds = array<i64: 1>, scalar_prefetch = 0 : i64, scratch_operands = 0 : i64, tpu.core_type = #tpu.core_type<tc>, window_params = [{transform_indices = @transform_0, window_bounds = array<i64: 64, 48>}, {transform_indices = @transform_1, window_bounds = array<i64: 64, 8>}, {pipeline_mode = #tpu.pipeline_mode<synchronous>, transform_indices = @transform_2, window_bounds = array<i64: 48, 32>}, {pipeline_mode = #tpu.pipeline_mode<synchronous>, transform_indices = @transform_3, window_bounds = array<i64: 8, 32>}, {pipeline_mode = #tpu.pipeline_mode<synchronous>, transform_indices = @transform_4, window_bounds = array<i64: 1, 32>}, {transform_indices = @transform_5, window_bounds = array<i64: 64, 32>}]} {
    %c0 = arith.constant 0 : index
    %c0_0 = arith.constant 0 : index
    %0 = vector.load %arg1[%c0, %c0_0] : memref<64x48xbf16, #tpu.memory_space<vmem>>, vector<64x48xbf16>
    %c0_1 = arith.constant 0 : index
    %c0_2 = arith.constant 0 : index
    %1 = vector.load %arg3[%c0_1, %c0_2] : memref<48x32xbf16, #tpu.memory_space<vmem>>, vector<48x32xbf16>
    %cst = arith.constant dense<0.000000e+00> : vector<64x32xf32>
    %2 = tpu.matmul %0, %1, %cst {dimension_numbers = #tpu.dot_dimension_numbers<[1], [0], [0], [1], [0, 0, 1, 1], [], []>} : vector<64x48xbf16>, vector<48x32xbf16>, vector<64x32xf32> -> vector<64x32xf32>
    %c0_3 = arith.constant 0 : index
    %c0_4 = arith.constant 0 : index
    %3 = vector.load %arg2[%c0_3, %c0_4] : memref<64x8xbf16, #tpu.memory_space<vmem>>, vector<64x8xbf16>
    %c0_5 = arith.constant 0 : index
    %c0_6 = arith.constant 0 : index
    %4 = vector.load %arg4[%c0_5, %c0_6] : memref<8x32xbf16, #tpu.memory_space<vmem>>, vector<8x32xbf16>
    %cst_7 = arith.constant dense<0.000000e+00> : vector<64x32xf32>
    %5 = tpu.matmul %3, %4, %cst_7 {dimension_numbers = #tpu.dot_dimension_numbers<[1], [0], [0], [1], [0, 0, 1, 1], [], []>} : vector<64x8xbf16>, vector<8x32xbf16>, vector<64x32xf32> -> vector<64x32xf32>
    %6 = arith.addf %2, %5 : vector<64x32xf32>
    %c0_8 = arith.constant 0 : index
    %c0_9 = arith.constant 0 : index
    %7 = vector.load %arg5[%c0_8, %c0_9] : memref<1x32xf32, #tpu.memory_space<vmem>>, vector<1x32xf32>
    %8 = vector.broadcast %7 : vector<1x32xf32> to vector<64x32xf32>
    %9 = arith.addf %6, %8 : vector<64x32xf32>
    %cst_10 = arith.constant 0.000000e+00 : f32
    %10 = vector.broadcast %cst_10 : f32 to vector<64x32xf32>
    %11 = arith.maximumf %9, %10 : vector<64x32xf32>
    %12 = arith.truncf %11 : vector<64x32xf32> to vector<64x32xbf16>
    %c0_11 = arith.constant 0 : index
    %c0_12 = arith.constant 0 : index
    %13 = vector.load %arg6[%c0_11, %c0_12] : memref<64x32xbf16, #tpu.memory_space<vmem>>, vector<64x32xbf16>
    tpu.vector_store %arg6[%c0_11, %c0_12], %12 {strides = array<i32>} : memref<64x32xbf16, #tpu.memory_space<vmem>>, vector<64x32xbf16>,
    return
  }
  func.func @transform_0(%arg0: i32) -> (i32, i32) {
    %c0_i32 = arith.constant 0 : i32
    %c0_i32_0 = arith.constant 0 : i32
    return %arg0, %c0_i32 : i32, i32
  }
  func.func @transform_1(%arg0: i32) -> (i32, i32) {
    %c0_i32 = arith.constant 0 : i32
    %c0_i32_0 = arith.constant 0 : i32
    return %arg0, %c0_i32 : i32, i32
  }
  func.func @transform_2(%arg0: i32) -> (i32, i32) {
    %c0_i32 = arith.constant 0 : i32
    %c0_i32_0 = arith.constant 0 : i32
    %c0_i32_1 = arith.constant 0 : i32
    return %c0_i32, %c0_i32_0 : i32, i32
  }
  func.func @transform_3(%arg0: i32) -> (i32, i32) {
    %c0_i32 = arith.constant 0 : i32
    %c0_i32_0 = arith.constant 0 : i32
    %c0_i32_1 = arith.constant 0 : i32
    return %c0_i32, %c0_i32_0 : i32, i32
  }
  func.func @transform_4(%arg0: i32) -> (i32, i32) {
    %c0_i32 = arith.constant 0 : i32
    %c0_i32_0 = arith.constant 0 : i32
    %c0_i32_1 = arith.constant 0 : i32
    return %c0_i32, %c0_i32_0 : i32, i32
  }
  func.func @transform_5(%arg0: i32) -> (i32, i32) {
    %c0_i32 = arith.constant 0 : i32
    %c0_i32_0 = arith.constant 0 : i32
    return %arg0, %c0_i32 : i32, i32
  }
}

module attributes {stable_mosaic.version = 11 : i64} {
  func.func @_gfm_kernel(%arg0: i32, %arg1: memref<64x48xbf16, #tpu.memory_space<vmem>>, %arg2: memref<64x32xbf16, #tpu.memory_space<vmem>>, %arg3: memref<64x32xbf16, #tpu.memory_space<vmem>>, %arg4: memref<48x32xbf16, #tpu.memory_space<vmem>>, %arg5: memref<1x32xf32, #tpu.memory_space<vmem>>, %arg6: memref<32x3xbf16, #tpu.memory_space<vmem>>, %arg7: memref<32x3xbf16, #tpu.memory_space<vmem>>, %arg8: memref<32x3xbf16, #tpu.memory_space<vmem>>, %arg9: memref<1x3xf32, #tpu.memory_space<vmem>>, %arg10: memref<64x32xbf16, #tpu.memory_space<vmem>>) attributes {dimension_semantics = [#tpu.dimension_semantics<parallel>], iteration_bounds = array<i64: 1>, scalar_prefetch = 0 : i64, scratch_operands = 0 : i64, tpu.core_type = #tpu.core_type<tc>, window_params = [{transform_indices = @transform_0, window_bounds = array<i64: 64, 48>}, {transform_indices = @transform_1, window_bounds = array<i64: 64, 32>}, {transform_indices = @transform_2, window_bounds = array<i64: 64, 32>}, {pipeline_mode = #tpu.pipeline_mode<synchronous>, transform_indices = @transform_3, window_bounds = array<i64: 48, 32>}, {pipeline_mode = #tpu.pipeline_mode<synchronous>, transform_indices = @transform_4, window_bounds = array<i64: 1, 32>}, {pipeline_mode = #tpu.pipeline_mode<synchronous>, transform_indices = @transform_5, window_bounds = array<i64: 32, 3>}, {pipeline_mode = #tpu.pipeline_mode<synchronous>, transform_indices = @transform_6, window_bounds = array<i64: 32, 3>}, {pipeline_mode = #tpu.pipeline_mode<synchronous>, transform_indices = @transform_7, window_bounds = array<i64: 32, 3>}, {pipeline_mode = #tpu.pipeline_mode<synchronous>, transform_indices = @transform_8, window_bounds = array<i64: 1, 3>}, {transform_indices = @transform_9, window_bounds = array<i64: 64, 32>}]} {
    %c0 = arith.constant 0 : index
    %c0_0 = arith.constant 0 : index
    %0 = vector.load %arg1[%c0, %c0_0] : memref<64x48xbf16, #tpu.memory_space<vmem>>, vector<64x48xbf16>
    %c0_1 = arith.constant 0 : index
    %c0_2 = arith.constant 0 : index
    %1 = vector.load %arg4[%c0_1, %c0_2] : memref<48x32xbf16, #tpu.memory_space<vmem>>, vector<48x32xbf16>
    %cst = arith.constant dense<0.000000e+00> : vector<64x32xf32>
    %2 = tpu.matmul %0, %1, %cst {dimension_numbers = #tpu.dot_dimension_numbers<[1], [0], [0], [1], [0, 0, 1, 1], [], []>} : vector<64x48xbf16>, vector<48x32xbf16>, vector<64x32xf32> -> vector<64x32xf32>
    %c0_3 = arith.constant 0 : index
    %c0_4 = arith.constant 0 : index
    %3 = vector.load %arg5[%c0_3, %c0_4] : memref<1x32xf32, #tpu.memory_space<vmem>>, vector<1x32xf32>
    %4 = vector.broadcast %3 : vector<1x32xf32> to vector<64x32xf32>
    %5 = arith.addf %2, %4 : vector<64x32xf32>
    %cst_5 = arith.constant 0.000000e+00 : f32
    %6 = vector.broadcast %cst_5 : f32 to vector<64x32xf32>
    %7 = arith.maximumf %5, %6 : vector<64x32xf32>
    %c0_6 = arith.constant 0 : index
    %c0_7 = arith.constant 0 : index
    %8 = vector.load %arg2[%c0_6, %c0_7] : memref<64x32xbf16, #tpu.memory_space<vmem>>, vector<64x32xbf16>
    %9 = arith.extf %8 : vector<64x32xbf16> to vector<64x32xf32>
    %c0_8 = arith.constant 0 : index
    %c0_9 = arith.constant 0 : index
    %10 = vector.load %arg3[%c0_8, %c0_9] : memref<64x32xbf16, #tpu.memory_space<vmem>>, vector<64x32xbf16>
    %11 = arith.extf %10 : vector<64x32xbf16> to vector<64x32xf32>
    %c0_10 = arith.constant 0 : index
    %c0_11 = arith.constant 0 : index
    %12 = vector.load %arg2[%c0_10, %c0_11] : memref<64x32xbf16, #tpu.memory_space<vmem>>, vector<64x32xbf16>
    %c0_12 = arith.constant 0 : index
    %c0_13 = arith.constant 0 : index
    %13 = vector.load %arg6[%c0_12, %c0_13] : memref<32x3xbf16, #tpu.memory_space<vmem>>, vector<32x3xbf16>
    %cst_14 = arith.constant dense<0.000000e+00> : vector<64x3xf32>
    %14 = tpu.matmul %12, %13, %cst_14 {dimension_numbers = #tpu.dot_dimension_numbers<[1], [0], [0], [1], [0, 0, 1, 1], [], []>} : vector<64x32xbf16>, vector<32x3xbf16>, vector<64x3xf32> -> vector<64x3xf32>
    %15 = arith.truncf %7 : vector<64x32xf32> to vector<64x32xbf16>
    %c0_15 = arith.constant 0 : index
    %c0_16 = arith.constant 0 : index
    %16 = vector.load %arg7[%c0_15, %c0_16] : memref<32x3xbf16, #tpu.memory_space<vmem>>, vector<32x3xbf16>
    %cst_17 = arith.constant dense<0.000000e+00> : vector<64x3xf32>
    %17 = tpu.matmul %15, %16, %cst_17 {dimension_numbers = #tpu.dot_dimension_numbers<[1], [0], [0], [1], [0, 0, 1, 1], [], []>} : vector<64x32xbf16>, vector<32x3xbf16>, vector<64x3xf32> -> vector<64x3xf32>
    %18 = arith.addf %14, %17 : vector<64x3xf32>
    %c0_18 = arith.constant 0 : index
    %c0_19 = arith.constant 0 : index
    %19 = vector.load %arg3[%c0_18, %c0_19] : memref<64x32xbf16, #tpu.memory_space<vmem>>, vector<64x32xbf16>
    %c0_20 = arith.constant 0 : index
    %c0_21 = arith.constant 0 : index
    %20 = vector.load %arg8[%c0_20, %c0_21] : memref<32x3xbf16, #tpu.memory_space<vmem>>, vector<32x3xbf16>
    %cst_22 = arith.constant dense<0.000000e+00> : vector<64x3xf32>
    %21 = tpu.matmul %19, %20, %cst_22 {dimension_numbers = #tpu.dot_dimension_numbers<[1], [0], [0], [1], [0, 0, 1, 1], [], []>} : vector<64x32xbf16>, vector<32x3xbf16>, vector<64x3xf32> -> vector<64x3xf32>
    %22 = arith.addf %18, %21 : vector<64x3xf32>
    %c0_23 = arith.constant 0 : index
    %c0_24 = arith.constant 0 : index
    %23 = vector.load %arg9[%c0_23, %c0_24] : memref<1x3xf32, #tpu.memory_space<vmem>>, vector<1x3xf32>
    %24 = vector.broadcast %23 : vector<1x3xf32> to vector<64x3xf32>
    %25 = arith.addf %22, %24 : vector<64x3xf32>
    %cst_25 = arith.constant dense<0xFF800000> : vector<64xf32>
    %26 = vector.multi_reduction <maximumf>, %25, %cst_25 [1] : vector<64x3xf32> to vector<64xf32>
    %27 = vector.shape_cast %26 : vector<64xf32> to vector<64x1xf32>
    %28 = vector.broadcast %27 : vector<64x1xf32> to vector<64x3xf32>
    %29 = arith.subf %25, %28 : vector<64x3xf32>
    %30 = math.exp %29 : vector<64x3xf32>
    %cst_26 = arith.constant dense<0.000000e+00> : vector<64xf32>
    %31 = vector.multi_reduction <add>, %30, %cst_26 [1] : vector<64x3xf32> to vector<64xf32>
    %32 = vector.shape_cast %31 : vector<64xf32> to vector<64x1xf32>
    %33 = tpu.reciprocal %32 {approx = true} : vector<64x1xf32> -> vector<64x1xf32>
    %34 = vector.broadcast %33 : vector<64x1xf32> to vector<64x3xf32>
    %35 = arith.mulf %30, %34 : vector<64x3xf32>
    %36 = vector.extract_strided_slice %35 {offsets = [0, 0], sizes = [64, 1], strides = [1, 1]} : vector<64x3xf32> to vector<64x1xf32>
    %37 = vector.broadcast %36 : vector<64x1xf32> to vector<64x32xf32>
    %38 = arith.mulf %9, %37 : vector<64x32xf32>
    %39 = vector.extract_strided_slice %35 {offsets = [0, 1], sizes = [64, 1], strides = [1, 1]} : vector<64x3xf32> to vector<64x1xf32>
    %40 = vector.broadcast %39 : vector<64x1xf32> to vector<64x32xf32>
    %41 = arith.mulf %7, %40 : vector<64x32xf32>
    %42 = arith.addf %38, %41 : vector<64x32xf32>
    %43 = vector.extract_strided_slice %35 {offsets = [0, 2], sizes = [64, 1], strides = [1, 1]} : vector<64x3xf32> to vector<64x1xf32>
    %44 = vector.broadcast %43 : vector<64x1xf32> to vector<64x32xf32>
    %45 = arith.mulf %11, %44 : vector<64x32xf32>
    %46 = arith.addf %42, %45 : vector<64x32xf32>
    %47 = arith.truncf %46 : vector<64x32xf32> to vector<64x32xbf16>
    %c0_27 = arith.constant 0 : index
    %c0_28 = arith.constant 0 : index
    %48 = vector.load %arg10[%c0_27, %c0_28] : memref<64x32xbf16, #tpu.memory_space<vmem>>, vector<64x32xbf16>
    tpu.vector_store %arg10[%c0_27, %c0_28], %47 {strides = array<i32>} : memref<64x32xbf16, #tpu.memory_space<vmem>>, vector<64x32xbf16>,
    return
  }
  func.func @transform_0(%arg0: i32) -> (i32, i32) {
    %c0_i32 = arith.constant 0 : i32
    %c0_i32_0 = arith.constant 0 : i32
    return %arg0, %c0_i32 : i32, i32
  }
  func.func @transform_1(%arg0: i32) -> (i32, i32) {
    %c0_i32 = arith.constant 0 : i32
    %c0_i32_0 = arith.constant 0 : i32
    return %arg0, %c0_i32 : i32, i32
  }
  func.func @transform_2(%arg0: i32) -> (i32, i32) {
    %c0_i32 = arith.constant 0 : i32
    %c0_i32_0 = arith.constant 0 : i32
    return %arg0, %c0_i32 : i32, i32
  }
  func.func @transform_3(%arg0: i32) -> (i32, i32) {
    %c0_i32 = arith.constant 0 : i32
    %c0_i32_0 = arith.constant 0 : i32
    %c0_i32_1 = arith.constant 0 : i32
    return %c0_i32, %c0_i32_0 : i32, i32
  }
  func.func @transform_4(%arg0: i32) -> (i32, i32) {
    %c0_i32 = arith.constant 0 : i32
    %c0_i32_0 = arith.constant 0 : i32
    %c0_i32_1 = arith.constant 0 : i32
    return %c0_i32, %c0_i32_0 : i32, i32
  }
  func.func @transform_5(%arg0: i32) -> (i32, i32) {
    %c0_i32 = arith.constant 0 : i32
    %c0_i32_0 = arith.constant 0 : i32
    %c0_i32_1 = arith.constant 0 : i32
    return %c0_i32, %c0_i32_0 : i32, i32
  }
  func.func @transform_6(%arg0: i32) -> (i32, i32) {
    %c0_i32 = arith.constant 0 : i32
    %c0_i32_0 = arith.constant 0 : i32
    %c0_i32_1 = arith.constant 0 : i32
    return %c0_i32, %c0_i32_0 : i32, i32
  }
  func.func @transform_7(%arg0: i32) -> (i32, i32) {
    %c0_i32 = arith.constant 0 : i32
    %c0_i32_0 = arith.constant 0 : i32
    %c0_i32_1 = arith.constant 0 : i32
    return %c0_i32, %c0_i32_0 : i32, i32
  }
  func.func @transform_8(%arg0: i32) -> (i32, i32) {
    %c0_i32 = arith.constant 0 : i32
    %c0_i32_0 = arith.constant 0 : i32
    %c0_i32_1 = arith.constant 0 : i32
    return %c0_i32, %c0_i32_0 : i32, i32
  }
  func.func @transform_9(%arg0: i32) -> (i32, i32) {
    %c0_i32 = arith.constant 0 : i32
    %c0_i32_0 = arith.constant 0 : i32
    return %arg0, %c0_i32 : i32, i32
  }
}

module attributes {stable_mosaic.version = 11 : i64} {
  func.func @_final_kernel(%arg0: i32, %arg1: memref<64x32xbf16, #tpu.memory_space<vmem>>, %arg2: memref<32x32xbf16, #tpu.memory_space<vmem>>, %arg3: memref<1x32xf32, #tpu.memory_space<vmem>>, %arg4: memref<64x32xf32, #tpu.memory_space<vmem>>) attributes {dimension_semantics = [#tpu.dimension_semantics<parallel>], iteration_bounds = array<i64: 1>, scalar_prefetch = 0 : i64, scratch_operands = 0 : i64, tpu.core_type = #tpu.core_type<tc>, window_params = [{transform_indices = @transform_0, window_bounds = array<i64: 64, 32>}, {pipeline_mode = #tpu.pipeline_mode<synchronous>, transform_indices = @transform_1, window_bounds = array<i64: 32, 32>}, {pipeline_mode = #tpu.pipeline_mode<synchronous>, transform_indices = @transform_2, window_bounds = array<i64: 1, 32>}, {transform_indices = @transform_3, window_bounds = array<i64: 64, 32>}]} {
    %c0 = arith.constant 0 : index
    %c0_0 = arith.constant 0 : index
    %0 = vector.load %arg1[%c0, %c0_0] : memref<64x32xbf16, #tpu.memory_space<vmem>>, vector<64x32xbf16>
    %c0_1 = arith.constant 0 : index
    %c0_2 = arith.constant 0 : index
    %1 = vector.load %arg2[%c0_1, %c0_2] : memref<32x32xbf16, #tpu.memory_space<vmem>>, vector<32x32xbf16>
    %cst = arith.constant dense<0.000000e+00> : vector<64x32xf32>
    %2 = tpu.matmul %0, %1, %cst {dimension_numbers = #tpu.dot_dimension_numbers<[1], [0], [0], [1], [0, 0, 1, 1], [], []>} : vector<64x32xbf16>, vector<32x32xbf16>, vector<64x32xf32> -> vector<64x32xf32>
    %c0_3 = arith.constant 0 : index
    %c0_4 = arith.constant 0 : index
    %3 = vector.load %arg3[%c0_3, %c0_4] : memref<1x32xf32, #tpu.memory_space<vmem>>, vector<1x32xf32>
    %4 = vector.broadcast %3 : vector<1x32xf32> to vector<64x32xf32>
    %5 = arith.addf %2, %4 : vector<64x32xf32>
    %6 = arith.mulf %5, %5 : vector<64x32xf32>
    %cst_5 = arith.constant dense<0.000000e+00> : vector<64xf32>
    %7 = vector.multi_reduction <add>, %6, %cst_5 [1] : vector<64x32xf32> to vector<64xf32>
    %8 = vector.shape_cast %7 : vector<64xf32> to vector<64x1xf32>
    %cst_6 = arith.constant 9.99999996E-13 : f32
    %9 = vector.broadcast %cst_6 : f32 to vector<64x1xf32>
    %10 = arith.addf %8, %9 : vector<64x1xf32>
    %11 = math.rsqrt %10 : vector<64x1xf32>
    %12 = vector.broadcast %11 : vector<64x1xf32> to vector<64x32xf32>
    %13 = arith.mulf %5, %12 : vector<64x32xf32>
    %c0_7 = arith.constant 0 : index
    %c0_8 = arith.constant 0 : index
    %14 = vector.load %arg4[%c0_7, %c0_8] : memref<64x32xf32, #tpu.memory_space<vmem>>, vector<64x32xf32>
    tpu.vector_store %arg4[%c0_7, %c0_8], %13 {strides = array<i32>} : memref<64x32xf32, #tpu.memory_space<vmem>>, vector<64x32xf32>,
    return
  }
  func.func @transform_0(%arg0: i32) -> (i32, i32) {
    %c0_i32 = arith.constant 0 : i32
    %c0_i32_0 = arith.constant 0 : i32
    return %arg0, %c0_i32 : i32, i32
  }
  func.func @transform_1(%arg0: i32) -> (i32, i32) {
    %c0_i32 = arith.constant 0 : i32
    %c0_i32_0 = arith.constant 0 : i32
    %c0_i32_1 = arith.constant 0 : i32
    return %c0_i32, %c0_i32_0 : i32, i32
  }
  func.func @transform_2(%arg0: i32) -> (i32, i32) {
    %c0_i32 = arith.constant 0 : i32
    %c0_i32_0 = arith.constant 0 : i32
    %c0_i32_1 = arith.constant 0 : i32
    return %c0_i32, %c0_i32_0 : i32, i32
  }
  func.func @transform_3(%arg0: i32) -> (i32, i32) {
    %c0_i32 = arith.constant 0 : i32
    %c0_i32_0 = arith.constant 0 : i32
    return %arg0, %c0_i32 : i32, i32
  }
}

</mosaic_0001>

<bundles_post_ra>
// kernel: rpvnet_forward.18
= control target key start
LH: loop header
LB: loop body
LE: loop exit
PB: predicated region body
PF: predicated region fallthrough
CT: control target
= control target key end

     0   :  { %vm350_vm0 = vcmask 1040384   ;;  %vm253_vm1 = vcmask 15360   ;;  %vm844_vm2 = vcmask 1043456   ;;  %vm747_vm3 = vcmask 64512   ;;  %s2574_s1 = inlined_call_operand.vmem [shape: bf16[2,8], index: 1, kind: input, shape index: {}]   ;;  %s2575_s0 = inlined_call_operand.vmem [shape: bf16[512,2], index: 0, kind: input, shape index: {}]   ;;  %s2576_s3 = inlined_call_operand.vmem [shape: bf16[8,8], index: 3, kind: input, shape index: {}]   ;;  %s2577_s2 = inlined_call_operand.vmem [shape: f32[1,8], index: 2, kind: input, shape index: {}]   ;;  %s2578_s4 = inlined_call_operand.vmem [shape: f32[1,8], index: 4, kind: input, shape index: {}]   ;;  %s2579_s5 = inlined_call_operand.vmem [shape: bf16[512,8], index: 5, kind: output, shape index: {}]  }
   0x1   :  { %v85_v0 = vld [vmem:[%s2574_s1] sm:$0x1]  ;;  %v1953_v3 = vld [vmem:[%s2575_s0 + $0x8] sm:$0xff]   ;;  %v1954_v4 = vld [vmem:[%s2575_s0 + $0x10] sm:$0xff]   ;;  %vm1457_vm4 = vcmask 60416  }
   0x2   :  { %1950 = vmatprep.subr.msk.bf16.mxu0 %vm350_vm0, %v85_v0  ;;  %v352_v1 = vsel %vm350_vm0, %v85_v0, 0  ;;  %v1952_v2 = vld [vmem:[%s2575_s0] sm:$0xff]   ;;  %v1955_v5 = vld [vmem:[%s2575_s0 + $0x18] sm:$0xff]   ;;  %v1957_v7 = vld [vmem:[%s2575_s0 + $0x28] sm:$0xff]  }
   0x3   :  { %1819 = vmatpush3.bf16.msra.mxu0 %v352_v1  ;;  %1820 = vmatprep.mubr.msk.bf16.mxu0 %vm253_vm1, %v1952_v2  ;;  %v1956_v6 = vld [vmem:[%s2575_s0 + $0x20] sm:$0xff]   ;;  %v1958_v8 = vld [vmem:[%s2575_s0 + $0x30] sm:$0xff]   ;;  %v1959_v9 = vld [vmem:[%s2575_s0 + $0x38] sm:$0xff]  }
   0x4   :  { %v1960_v10 = vld [vmem:[%s2575_s0 + $0x40] sm:$0xff]   ;;  %v1961_v11 = vld [vmem:[%s2575_s0 + $0x48] sm:$0xff]   ;;  %v1962_v12 = vld [vmem:[%s2575_s0 + $0x50] sm:$0xff]  }
   0x5   :  { %v1963_v13 = vld [vmem:[%s2575_s0 + $0x58] sm:$0xff]   ;;  %v1964_v14 = vld [vmem:[%s2575_s0 + $0x60] sm:$0xff]   ;;  %v1965_v15 = vld [vmem:[%s2575_s0 + $0x68] sm:$0xff]  }
   0x6   :  { %1821 = vmatmul.mubr.msk.bf16.vlgmr.msra.gmra.mrb[0].mxu0 %vm253_vm1, %v1953_v3  ;;  %v1966_v16 = vld [vmem:[%s2575_s0 + $0x70] sm:$0xff]   ;;  %v1967_v17 = vld [vmem:[%s2575_s0 + $0x78] sm:$0xff]   ;;  %v1968_v18 = vld [vmem:[%s2575_s0 + $0x80] sm:$0xff]  }
   0x7   :  { %1824 = vmatprep.mubr.msk.bf16.mxu0 %vm253_vm1, %v1954_v4  ;;  %v1969_v19 = vld [vmem:[%s2575_s0 + $0x88] sm:$0xff]   ;;  %v1970_v20 = vld [vmem:[%s2575_s0 + $0x90] sm:$0xff]   ;;  %v1971_v21 = vld [vmem:[%s2575_s0 + $0x98] sm:$0xff]  }
   0x8   :  { %v1972_v22 = vld [vmem:[%s2575_s0 + $0xa0] sm:$0xff]   ;;  %v1973_v23 = vld [vmem:[%s2575_s0 + $0xa8] sm:$0xff]   ;;  %v1974_v24 = vld [vmem:[%s2575_s0 + $0xb0] sm:$0xff]  }
   0x9   :  { %v1975_v25 = vld [vmem:[%s2575_s0 + $0xb8] sm:$0xff]   ;;  %v1976_v26 = vld [vmem:[%s2575_s0 + $0xc0] sm:$0xff]   ;;  %v1977_v29 = vld [vmem:[%s2575_s0 + $0xc8] sm:$0xff]  }
   0xa   :  { %v739_v27 = vld [vmem:[%s2576_s3] sm:$0xf]  ;;  %v1978_v30 = vld [vmem:[%s2575_s0 + $0xd0] sm:$0xff]   ;;  %v1979_v31 = vld [vmem:[%s2575_s0 + $0xd8] sm:$0xff]  }
   0xb   :  { %1951 = vmatprep.subr.msk.bf16.mxu1 %vm844_vm2, %v739_v27  ;;  %v846_v28 = vsel %vm844_vm2, %v739_v27, 0  ;;  %v1980_v32 = vld [vmem:[%s2575_s0 + $0xe0] sm:$0xff]   ;;  %v1981_v33 = vld [vmem:[%s2575_s0 + $0xe8] sm:$0xff]   ;;  %v1982_v34 = vld [vmem:[%s2575_s0 + $0xf0] sm:$0xff]  }
   0xc   :  { %1885 = vmatpush3.bf16.msra.mxu1 %v846_v28  ;;  %v1983_v35 = vld [vmem:[%s2575_s0 + $0xf8] sm:$0xff]   ;;  %v2151_v36 = vld [vmem:[%s2577_s2] ss:$0 sm:$0xff] }
   0xe   :  { %1825 = vmatmul.mubr.msk.bf16.gmra.mrb[4].mxu0 %vm253_vm1, %v1955_v5 }
   0xf   :  { %1828 = vmatprep.mubr.msk.bf16.mxu0 %vm253_vm1, %v1956_v6 }
  0x16   :  { %1829 = vmatmul.mubr.msk.bf16.gmra.mrb[8].mxu0 %vm253_vm1, %v1957_v7 }
  0x17   :  { %1832 = vmatprep.mubr.msk.bf16.mxu0 %vm253_vm1, %v1958_v8 }
  0x1e   :  { %1833 = vmatmul.mubr.msk.bf16.gmra.mrb[12].mxu0 %vm253_vm1, %v1959_v9 }
  0x1f   :  { %1836 = vmatprep.mubr.msk.bf16.mxu0 %vm253_vm1, %v1960_v10 }
  0x26   :  { %1837 = vmatmul.mubr.msk.bf16.gmra.mrb[16].mxu0 %vm253_vm1, %v1961_v11 }
  0x27   :  { %1840 = vmatprep.mubr.msk.bf16.mxu0 %vm253_vm1, %v1962_v12 }
  0x2e   :  { %1841 = vmatmul.mubr.msk.bf16.gmra.mrb[20].mxu0 %vm253_vm1, %v1963_v13 }
  0x2f   :  { %1844 = vmatprep.mubr.msk.bf16.mxu0 %vm253_vm1, %v1964_v14 }
  0x36   :  { %1845 = vmatmul.mubr.msk.bf16.gmra.mrb[24].mxu0 %vm253_vm1, %v1965_v15 }
  0x37   :  { %1848 = vmatprep.mubr.msk.bf16.mxu0 %vm253_vm1, %v1966_v16 }
  0x3e   :  { %1849 = vmatmul.mubr.msk.bf16.gmra.mrb[28].mxu0 %vm253_vm1, %v1967_v17 }
  0x3f   :  { %1852 = vmatprep.mubr.msk.bf16.mxu0 %vm253_vm1, %v1968_v18 }
  0x46   :  { %1853 = vmatmul.mubr.msk.bf16.gmra.mrb[32].mxu0 %vm253_vm1, %v1969_v19 }
  0x47   :  { %1856 = vmatprep.mubr.msk.bf16.mxu0 %vm253_vm1, %v1970_v20 }
  0x4e   :  { %1857 = vmatmul.mubr.msk.bf16.gmra.mrb[36].mxu0 %vm253_vm1, %v1971_v21 }
  0x4f   :  { %1860 = vmatprep.mubr.msk.bf16.mxu0 %vm253_vm1, %v1972_v22 }
  0x56   :  { %1861 = vmatmul.mubr.msk.bf16.gmra.mrb[40].mxu0 %vm253_vm1, %v1973_v23 }
  0x57   :  { %1864 = vmatprep.mubr.msk.bf16.mxu0 %vm253_vm1, %v1974_v24 }
  0x5e   :  { %1865 = vmatmul.mubr.msk.bf16.gmra.mrb[44].mxu0 %vm253_vm1, %v1975_v25 }
  0x5f   :  { %1868 = vmatprep.mubr.msk.bf16.mxu0 %vm253_vm1, %v1976_v26 }
  0x66   :  { %1869 = vmatmul.mubr.msk.bf16.gmra.mrb[48].mxu0 %vm253_vm1, %v1977_v29 }
  0x67   :  { %1872 = vmatprep.mubr.msk.bf16.mxu0 %vm253_vm1, %v1978_v30 }
  0x6e   :  { %1873 = vmatmul.mubr.msk.bf16.gmra.mrb[52].mxu0 %vm253_vm1, %v1979_v31 }
  0x6f   :  { %1876 = vmatprep.mubr.msk.bf16.mxu0 %vm253_vm1, %v1980_v32 }
  0x76   :  { %1877 = vmatmul.mubr.msk.bf16.gmra.mrb[56].mxu0 %vm253_vm1, %v1981_v33 }
  0x77   :  { %1880 = vmatprep.mubr.msk.bf16.mxu0 %vm253_vm1, %v1982_v34 }
  0x7e   :  { %1881 = vmatmul.mubr.msk.bf16.gmra.mrb[60].mxu0 %vm253_vm1, %v1983_v35 }
  0xd9   :  { %v1822_v37 = vpop.f32.mrb[0].mxu0 }
  0xda   :  { %v397_v38 = vadd.f32 %v1822_v37, %v2151_v36  ;;  %v388_v39 = vpop.f32.mrb[1].mxu0 }
  0xdb   :  { %v389_v40 = vadd.f32 %v2151_v36, %v388_v39  ;;  %v1823_v41 = vpop.f32.mrb[2].mxu0 }
  0xdc   :  { %v400_v42 = vadd.f32 %v1823_v41, %v2151_v36  ;;  %v391_v43 = vpop.f32.mrb[3].mxu0  ;;  %v645_v45 = vmax.f32 %v397_v38, 0.0 }
  0xdd   :  { %v392_v44 = vadd.f32 %v2151_v36, %v391_v43  ;;  %v643_v47 = vmax.f32 %v389_v40, 0.0 }
  0xde   :  { %v646_v46 = vmax.f32 %v400_v42, 0.0 }
  0xdf   :  { %v644_v48 = vmax.f32 %v392_v44, 0.0 }
  0xe0   :  { %v708_v49 = vpack.c.bf16 %v646_v46, %v645_v45 }
  0xe1   :  { %v1826_v50 = vpop.f32.mrb[4].mxu0  ;;  %v707_v51 = vpack.c.bf16 %v644_v48, %v643_v47 }
  0xe2   :  { %v413_v52 = vadd.f32 %v1826_v50, %v2151_v36  ;;  %v404_v53 = vpop.f32.mrb[5].mxu0 }
  0xe3   :  { %v405_v54 = vadd.f32 %v2151_v36, %v404_v53  ;;  %v1827_v55 = vpop.f32.mrb[6].mxu0  ;;  %1886 = vmatprep.mubr.msk.bf16.mxu1 %vm747_vm3, %v707_v51 }
  0xe4   :  { %v416_v56 = vadd.f32 %v1827_v55, %v2151_v36  ;;  %v407_v57 = vpop.f32.mrb[7].mxu0  ;;  %1887 = vmatmul.mubr.msk.bf16.vlgmr.msra.gmra.mrb[0].mxu1 %vm747_vm3, %v708_v49  ;;  %v649_v59 = vmax.f32 %v413_v52, 0.0 }
  0xe5   :  { %v408_v58 = vadd.f32 %v2151_v36, %v407_v57  ;;  %v647_v61 = vmax.f32 %v405_v54, 0.0 }
  0xe6   :  { %v650_v60 = vmax.f32 %v416_v56, 0.0 }
  0xe7   :  { %v648_v62 = vmax.f32 %v408_v58, 0.0 }
  0xe8   :  { %v710_v63 = vpack.c.bf16 %v650_v60, %v649_v59 }
  0xe9   :  { %v709_v0 = vpack.c.bf16 %v648_v62, %v647_v61  ;;  %v1830_v1 = vpop.f32.mrb[8].mxu0 }
  0xea   :  { %v429_v2 = vadd.f32 %v1830_v1, %v2151_v36  ;;  %v420_v3 = vpop.f32.mrb[9].mxu0 }
  0xeb   :  { %v421_v4 = vadd.f32 %v2151_v36, %v420_v3  ;;  %v1831_v5 = vpop.f32.mrb[10].mxu0  ;;  %1890 = vmatprep.mubr.msk.bf16.mxu1 %vm747_vm3, %v709_v0 }
  0xec   :  { %v432_v6 = vadd.f32 %v1831_v5, %v2151_v36  ;;  %v423_v7 = vpop.f32.mrb[11].mxu0  ;;  %1891 = vmatmul.mubr.msk.bf16.gmra.mrb[4].mxu1 %vm747_vm3, %v710_v63  ;;  %v653_v9 = vmax.f32 %v429_v2, 0.0 }
  0xed   :  { %v424_v8 = vadd.f32 %v2151_v36, %v423_v7  ;;  %v651_v11 = vmax.f32 %v421_v4, 0.0 }
  0xee   :  { %v654_v10 = vmax.f32 %v432_v6, 0.0 }
  0xef   :  { %v652_v12 = vmax.f32 %v424_v8, 0.0 }
  0xf0   :  { %v712_v13 = vpack.c.bf16 %v654_v10, %v653_v9 }
  0xf1   :  { %v711_v14 = vpack.c.bf16 %v652_v12, %v651_v11  ;;  %v1834_v15 = vpop.f32.mrb[12].mxu0 }
  0xf2   :  { %v445_v16 = vadd.f32 %v1834_v15, %v2151_v36  ;;  %v436_v17 = vpop.f32.mrb[13].mxu0 }
  0xf3   :  { %v437_v18 = vadd.f32 %v2151_v36, %v436_v17  ;;  %v1835_v19 = vpop.f32.mrb[14].mxu0  ;;  %1894 = vmatprep.mubr.msk.bf16.mxu1 %vm747_vm3, %v711_v14 }
  0xf4   :  { %v448_v20 = vadd.f32 %v1835_v19, %v2151_v36  ;;  %v439_v21 = vpop.f32.mrb[15].mxu0  ;;  %1895 = vmatmul.mubr.msk.bf16.gmra.mrb[8].mxu1 %vm747_vm3, %v712_v13  ;;  %v657_v23 = vmax.f32 %v445_v16, 0.0 }
  0xf5   :  { %v440_v22 = vadd.f32 %v2151_v36, %v439_v21  ;;  %v655_v25 = vmax.f32 %v437_v18, 0.0 }
  0xf6   :  { %v658_v24 = vmax.f32 %v448_v20, 0.0 }
  0xf7   :  { %v656_v26 = vmax.f32 %v440_v22, 0.0 }
  0xf8   :  { %v714_v27 = vpack.c.bf16 %v658_v24, %v657_v23 }
  0xf9   :  { %v713_v28 = vpack.c.bf16 %v656_v26, %v655_v25  ;;  %v1838_v29 = vpop.f32.mrb[16].mxu0 }
  0xfa   :  { %v461_v30 = vadd.f32 %v1838_v29, %v2151_v36  ;;  %v452_v31 = vpop.f32.mrb[17].mxu0 }
  0xfb   :  { %v453_v32 = vadd.f32 %v2151_v36, %v452_v31  ;;  %v1839_v33 = vpop.f32.mrb[18].mxu0  ;;  %1898 = vmatprep.mubr.msk.bf16.mxu1 %vm747_vm3, %v713_v28 }
  0xfc   :  { %v464_v34 = vadd.f32 %v1839_v33, %v2151_v36  ;;  %v455_v35 = vpop.f32.mrb[19].mxu0  ;;  %1899 = vmatmul.mubr.msk.bf16.gmra.mrb[12].mxu1 %vm747_vm3, %v714_v27  ;;  %v661_v38 = vmax.f32 %v461_v30, 0.0 }
  0xfd   :  { %v456_v37 = vadd.f32 %v2151_v36, %v455_v35  ;;  %v659_v40 = vmax.f32 %v453_v32, 0.0 }
  0xfe   :  { %v662_v39 = vmax.f32 %v464_v34, 0.0 }
  0xff   :  { %v660_v41 = vmax.f32 %v456_v37, 0.0 }
 0x100   :  { %v716_v42 = vpack.c.bf16 %v662_v39, %v661_v38 }
 0x101   :  { %v715_v43 = vpack.c.bf16 %v660_v41, %v659_v40  ;;  %v1842_v44 = vpop.f32.mrb[20].mxu0 }
 0x102   :  { %v477_v45 = vadd.f32 %v1842_v44, %v2151_v36  ;;  %v468_v46 = vpop.f32.mrb[21].mxu0 }
 0x103   :  { %v469_v47 = vadd.f32 %v2151_v36, %v468_v46  ;;  %v1843_v48 = vpop.f32.mrb[22].mxu0  ;;  %1902 = vmatprep.mubr.msk.bf16.mxu1 %vm747_vm3, %v715_v43 }
 0x104   :  { %v480_v49 = vadd.f32 %v1843_v48, %v2151_v36  ;;  %v471_v50 = vpop.f32.mrb[23].mxu0  ;;  %1903 = vmatmul.mubr.msk.bf16.gmra.mrb[16].mxu1 %vm747_vm3, %v716_v42  ;;  %v665_v52 = vmax.f32 %v477_v45, 0.0 }
 0x105   :  { %v472_v51 = vadd.f32 %v2151_v36, %v471_v50  ;;  %v663_v54 = vmax.f32 %v469_v47, 0.0 }
 0x106   :  { %v666_v53 = vmax.f32 %v480_v49, 0.0 }
 0x107   :  { %v664_v55 = vmax.f32 %v472_v51, 0.0 }
 0x108   :  { %v718_v56 = vpack.c.bf16 %v666_v53, %v665_v52 }
 0x109   :  { %v717_v57 = vpack.c.bf16 %v664_v55, %v663_v54  ;;  %v1846_v58 = vpop.f32.mrb[24].mxu0 }
 0x10a   :  { %v493_v59 = vadd.f32 %v1846_v58, %v2151_v36  ;;  %v484_v60 = vpop.f32.mrb[25].mxu0 }
 0x10b   :  { %v485_v61 = vadd.f32 %v2151_v36, %v484_v60  ;;  %v1847_v62 = vpop.f32.mrb[26].mxu0  ;;  %1906 = vmatprep.mubr.msk.bf16.mxu1 %vm747_vm3, %v717_v57 }
 0x10c   :  { %v496_v63 = vadd.f32 %v1847_v62, %v2151_v36  ;;  %v487_v0 = vpop.f32.mrb[27].mxu0  ;;  %1907 = vmatmul.mubr.msk.bf16.gmra.mrb[20].mxu1 %vm747_vm3, %v718_v56  ;;  %v669_v2 = vmax.f32 %v493_v59, 0.0 }
 0x10d   :  { %v488_v1 = vadd.f32 %v2151_v36, %v487_v0  ;;  %v667_v4 = vmax.f32 %v485_v61, 0.0 }
 0x10e   :  { %v670_v3 = vmax.f32 %v496_v63, 0.0 }
 0x10f   :  { %v668_v5 = vmax.f32 %v488_v1, 0.0 }
 0x110   :  { %v720_v6 = vpack.c.bf16 %v670_v3, %v669_v2 }
 0x111   :  { %v719_v7 = vpack.c.bf16 %v668_v5, %v667_v4  ;;  %v1850_v8 = vpop.f32.mrb[28].mxu0 }
 0x112   :  { %v509_v9 = vadd.f32 %v1850_v8, %v2151_v36  ;;  %v500_v10 = vpop.f32.mrb[29].mxu0 }
 0x113   :  { %v501_v11 = vadd.f32 %v2151_v36, %v500_v10  ;;  %v1851_v12 = vpop.f32.mrb[30].mxu0  ;;  %1910 = vmatprep.mubr.msk.bf16.mxu1 %vm747_vm3, %v719_v7 }
 0x114   :  { %v512_v13 = vadd.f32 %v1851_v12, %v2151_v36  ;;  %v503_v14 = vpop.f32.mrb[31].mxu0  ;;  %1911 = vmatmul.mubr.msk.bf16.gmra.mrb[24].mxu1 %vm747_vm3, %v720_v6  ;;  %v673_v16 = vmax.f32 %v509_v9, 0.0 }
 0x115   :  { %v504_v15 = vadd.f32 %v2151_v36, %v503_v14  ;;  %v671_v18 = vmax.f32 %v501_v11, 0.0 }
 0x116   :  { %v674_v17 = vmax.f32 %v512_v13, 0.0 }
 0x117   :  { %v672_v19 = vmax.f32 %v504_v15, 0.0 }
 0x118   :  { %v722_v20 = vpack.c.bf16 %v674_v17, %v673_v16 }
 0x119   :  { %v721_v21 = vpack.c.bf16 %v672_v19, %v671_v18  ;;  %v1854_v22 = vpop.f32.mrb[32].mxu0 }
 0x11a   :  { %v525_v23 = vadd.f32 %v1854_v22, %v2151_v36  ;;  %v516_v24 = vpop.f32.mrb[33].mxu0 }
 0x11b   :  { %v517_v25 = vadd.f32 %v2151_v36, %v516_v24  ;;  %v1855_v26 = vpop.f32.mrb[34].mxu0  ;;  %1914 = vmatprep.mubr.msk.bf16.mxu1 %vm747_vm3, %v721_v21 }
 0x11c   :  { %v528_v27 = vadd.f32 %v1855_v26, %v2151_v36  ;;  %v519_v28 = vpop.f32.mrb[35].mxu0  ;;  %1915 = vmatmul.mubr.msk.bf16.gmra.mrb[28].mxu1 %vm747_vm3, %v722_v20  ;;  %v677_v30 = vmax.f32 %v525_v23, 0.0 }
 0x11d   :  { %v520_v29 = vadd.f32 %v2151_v36, %v519_v28  ;;  %v675_v32 = vmax.f32 %v517_v25, 0.0 }
 0x11e   :  { %v678_v31 = vmax.f32 %v528_v27, 0.0 }
 0x11f   :  { %v676_v33 = vmax.f32 %v520_v29, 0.0 }
 0x120   :  { %v724_v34 = vpack.c.bf16 %v678_v31, %v677_v30 }
 0x121   :  { %v723_v35 = vpack.c.bf16 %v676_v33, %v675_v32  ;;  %v1858_v37 = vpop.f32.mrb[36].mxu0 }
 0x122   :  { %v541_v38 = vadd.f32 %v1858_v37, %v2151_v36  ;;  %v532_v39 = vpop.f32.mrb[37].mxu0 }
 0x123   :  { %v533_v40 = vadd.f32 %v2151_v36, %v532_v39  ;;  %v1859_v41 = vpop.f32.mrb[38].mxu0  ;;  %1918 = vmatprep.mubr.msk.bf16.mxu1 %vm747_vm3, %v723_v35 }
 0x124   :  { %v544_v42 = vadd.f32 %v1859_v41, %v2151_v36  ;;  %v535_v43 = vpop.f32.mrb[39].mxu0  ;;  %1919 = vmatmul.mubr.msk.bf16.gmra.mrb[32].mxu1 %vm747_vm3, %v724_v34  ;;  %v681_v45 = vmax.f32 %v541_v38, 0.0 }
 0x125   :  { %v536_v44 = vadd.f32 %v2151_v36, %v535_v43  ;;  %v679_v47 = vmax.f32 %v533_v40, 0.0 }
 0x126   :  { %v682_v46 = vmax.f32 %v544_v42, 0.0 }
 0x127   :  { %v680_v48 = vmax.f32 %v536_v44, 0.0 }
 0x128   :  { %v726_v49 = vpack.c.bf16 %v682_v46, %v681_v45 }
 0x129   :  { %v725_v50 = vpack.c.bf16 %v680_v48, %v679_v47  ;;  %v1862_v51 = vpop.f32.mrb[40].mxu0 }
 0x12a   :  { %v557_v52 = vadd.f32 %v1862_v51, %v2151_v36  ;;  %v548_v53 = vpop.f32.mrb[41].mxu0 }
 0x12b   :  { %v549_v54 = vadd.f32 %v2151_v36, %v548_v53  ;;  %v1863_v55 = vpop.f32.mrb[42].mxu0  ;;  %1922 = vmatprep.mubr.msk.bf16.mxu1 %vm747_vm3, %v725_v50 }
 0x12c   :  { %v560_v56 = vadd.f32 %v1863_v55, %v2151_v36  ;;  %v551_v57 = vpop.f32.mrb[43].mxu0  ;;  %1923 = vmatmul.mubr.msk.bf16.gmra.mrb[36].mxu1 %vm747_vm3, %v726_v49  ;;  %v685_v59 = vmax.f32 %v557_v52, 0.0 }
 0x12d   :  { %v552_v58 = vadd.f32 %v2151_v36, %v551_v57  ;;  %v683_v61 = vmax.f32 %v549_v54, 0.0 }
 0x12e   :  { %v686_v60 = vmax.f32 %v560_v56, 0.0 }
 0x12f   :  { %v684_v62 = vmax.f32 %v552_v58, 0.0 }
 0x130   :  { %v728_v63 = vpack.c.bf16 %v686_v60, %v685_v59 }
 0x131   :  { %v727_v0 = vpack.c.bf16 %v684_v62, %v683_v61  ;;  %v1866_v1 = vpop.f32.mrb[44].mxu0 }
 0x132   :  { %v573_v2 = vadd.f32 %v1866_v1, %v2151_v36  ;;  %v564_v3 = vpop.f32.mrb[45].mxu0 }
 0x133   :  { %v565_v4 = vadd.f32 %v2151_v36, %v564_v3  ;;  %v1867_v5 = vpop.f32.mrb[46].mxu0  ;;  %1926 = vmatprep.mubr.msk.bf16.mxu1 %vm747_vm3, %v727_v0 }
 0x134   :  { %v576_v6 = vadd.f32 %v1867_v5, %v2151_v36  ;;  %v567_v7 = vpop.f32.mrb[47].mxu0  ;;  %1927 = vmatmul.mubr.msk.bf16.gmra.mrb[40].mxu1 %vm747_vm3, %v728_v63  ;;  %v689_v9 = vmax.f32 %v573_v2, 0.0 }
 0x135   :  { %v568_v8 = vadd.f32 %v2151_v36, %v567_v7  ;;  %v687_v11 = vmax.f32 %v565_v4, 0.0 }
 0x136   :  { %v690_v10 = vmax.f32 %v576_v6, 0.0 }
 0x137   :  { %v688_v12 = vmax.f32 %v568_v8, 0.0  ;;  %v2252_v8 = vld [vmem:[%s2578_s4] ss:$0 sm:$0xff] }
 0x138   :  { %v730_v13 = vpack.c.bf16 %v690_v10, %v689_v9 }
 0x139   :  { %v729_v14 = vpack.c.bf16 %v688_v12, %v687_v11  ;;  %v1870_v15 = vpop.f32.mrb[48].mxu0 }
 0x13a   :  { %v589_v16 = vadd.f32 %v1870_v15, %v2151_v36  ;;  %v580_v17 = vpop.f32.mrb[49].mxu0 }
 0x13b   :  { %v581_v18 = vadd.f32 %v2151_v36, %v580_v17  ;;  %v1871_v19 = vpop.f32.mrb[50].mxu0  ;;  %1930 = vmatprep.mubr.msk.bf16.mxu1 %vm747_vm3, %v729_v14 }
 0x13c   :  { %v592_v20 = vadd.f32 %v1871_v19, %v2151_v36  ;;  %v583_v21 = vpop.f32.mrb[51].mxu0  ;;  %1931 = vmatmul.mubr.msk.bf16.gmra.mrb[44].mxu1 %vm747_vm3, %v730_v13  ;;  %v693_v23 = vmax.f32 %v589_v16, 0.0 }
 0x13d   :  { %v584_v22 = vadd.f32 %v2151_v36, %v583_v21  ;;  %v691_v25 = vmax.f32 %v581_v18, 0.0 }
 0x13e   :  { %v694_v24 = vmax.f32 %v592_v20, 0.0 }
 0x13f   :  { %v692_v26 = vmax.f32 %v584_v22, 0.0 }
 0x140   :  { %v732_v27 = vpack.c.bf16 %v694_v24, %v693_v23 }
 0x141   :  { %v731_v28 = vpack.c.bf16 %v692_v26, %v691_v25  ;;  %v1874_v29 = vpop.f32.mrb[52].mxu0 }
 0x142   :  { %v605_v30 = vadd.f32 %v1874_v29, %v2151_v36  ;;  %v596_v31 = vpop.f32.mrb[53].mxu0 }
 0x143   :  { %v597_v32 = vadd.f32 %v2151_v36, %v596_v31  ;;  %v1875_v33 = vpop.f32.mrb[54].mxu0  ;;  %1934 = vmatprep.mubr.msk.bf16.mxu1 %vm747_vm3, %v731_v28 }
 0x144   :  { %v608_v34 = vadd.f32 %v1875_v33, %v2151_v36  ;;  %v599_v35 = vpop.f32.mrb[55].mxu0  ;;  %1935 = vmatmul.mubr.msk.bf16.gmra.mrb[48].mxu1 %vm747_vm3, %v732_v27  ;;  %v697_v38 = vmax.f32 %v605_v30, 0.0 }
 0x145   :  { %v600_v37 = vadd.f32 %v2151_v36, %v599_v35  ;;  %v695_v40 = vmax.f32 %v597_v32, 0.0 }
 0x146   :  { %v698_v39 = vmax.f32 %v608_v34, 0.0 }
 0x147   :  { %v696_v41 = vmax.f32 %v600_v37, 0.0 }
 0x148   :  { %v734_v42 = vpack.c.bf16 %v698_v39, %v697_v38 }
 0x149   :  { %v733_v43 = vpack.c.bf16 %v696_v41, %v695_v40  ;;  %v1878_v44 = vpop.f32.mrb[56].mxu0 }
 0x14a   :  { %v621_v45 = vadd.f32 %v1878_v44, %v2151_v36  ;;  %v612_v46 = vpop.f32.mrb[57].mxu0 }
 0x14b   :  { %v613_v47 = vadd.f32 %v2151_v36, %v612_v46  ;;  %v1879_v48 = vpop.f32.mrb[58].mxu0  ;;  %1938 = vmatprep.mubr.msk.bf16.mxu1 %vm747_vm3, %v733_v43 }
 0x14c   :  { %v624_v49 = vadd.f32 %v1879_v48, %v2151_v36  ;;  %v615_v50 = vpop.f32.mrb[59].mxu0  ;;  %1939 = vmatmul.mubr.msk.bf16.gmra.mrb[52].mxu1 %vm747_vm3, %v734_v42  ;;  %v701_v52 = vmax.f32 %v621_v45, 0.0 }
 0x14d   :  { %v616_v51 = vadd.f32 %v2151_v36, %v615_v50  ;;  %v699_v54 = vmax.f32 %v613_v47, 0.0 }
 0x14e   :  { %v702_v53 = vmax.f32 %v624_v49, 0.0 }
 0x14f   :  { %v700_v55 = vmax.f32 %v616_v51, 0.0 }
 0x150   :  { %v736_v56 = vpack.c.bf16 %v702_v53, %v701_v52 }
 0x151   :  { %v735_v57 = vpack.c.bf16 %v700_v55, %v699_v54  ;;  %v1882_v58 = vpop.f32.mrb[60].mxu0 }
 0x152   :  { %v637_v59 = vadd.f32 %v1882_v58, %v2151_v36  ;;  %v628_v60 = vpop.f32.mrb[61].mxu0 }
 0x153   :  { %v629_v61 = vadd.f32 %v2151_v36, %v628_v60  ;;  %v1883_v62 = vpop.f32.mrb[62].mxu0  ;;  %1942 = vmatprep.mubr.msk.bf16.mxu1 %vm747_vm3, %v735_v57 }
 0x154   :  { %v640_v63 = vadd.f32 %v1883_v62, %v2151_v36  ;;  %v631_v0 = vpop.f32.mrb[63].mxu0  ;;  %1943 = vmatmul.mubr.msk.bf16.gmra.mrb[56].mxu1 %vm747_vm3, %v736_v56  ;;  %v705_v2 = vmax.f32 %v637_v59, 0.0 }
 0x155   :  { %v632_v1 = vadd.f32 %v2151_v36, %v631_v0  ;;  %v703_v4 = vmax.f32 %v629_v61, 0.0 }
 0x156   :  { %v706_v3 = vmax.f32 %v640_v63, 0.0 }
 0x157   :  { %v704_v5 = vmax.f32 %v632_v1, 0.0 }
 0x158   :  { %v738_v6 = vpack.c.bf16 %v706_v3, %v705_v2 }
 0x159   :  { %v737_v7 = vpack.c.bf16 %v704_v5, %v703_v4 }
 0x15b   :  { %1946 = vmatprep.mubr.msk.bf16.mxu1 %vm747_vm3, %v737_v7 }
 0x15c   :  { %1947 = vmatmul.mubr.msk.bf16.gmra.mrb[60].mxu1 %vm747_vm3, %v738_v6 }
 0x1b7   :  { %v1888_v9 = vpop.f32.mrb[0].mxu1 }
 0x1b8   :  { %v891_v10 = vadd.f32 %v1888_v9, %v2252_v8  ;;  %v882_v11 = vpop.f32.mrb[1].mxu1 }
 0x1b9   :  { %v883_v36 = vadd.f32 %v2252_v8, %v882_v11  ;;  %v1889_v12 = vpop.f32.mrb[2].mxu1 }
 0x1ba   :  { %v1139_v13 = vmax.f32 %v891_v10, 0.0  ;;  %v894_v14 = vadd.f32 %v1889_v12, %v2252_v8  ;;  %v885_v15 = vpop.f32.mrb[3].mxu1 }
 0x1bb   :  { %v1137_v16 = vmax.f32 %v883_v36, 0.0  ;;  %v886_v17 = vadd.f32 %v2252_v8, %v885_v15 }
 0x1bc   :  { %v1690_v18 = vpack.c.bf16 %v1139_v13, %v1139_v13  ;;  %v1140_v19 = vmax.f32 %v894_v14, 0.0 }
 0x1bd   :  { %v1688_v20 = vpack.c.bf16 %v1137_v16, %v1137_v16  ;;  %v1138_v21 = vmax.f32 %v886_v17, 0.0 }
 0x1be   :  { %1460 = vst.msk [vmem:[%s2579_s5 + $0x8] sm:$0xf] %vm1457_vm4, %v1690_v18  ;;  %v1691_v22 = vpack.c.bf16 %v1140_v19, %v1140_v19 }
 0x1bf   :  { %1458 = vst.msk [vmem:[%s2579_s5] sm:$0xf] %vm1457_vm4, %v1688_v20  ;;  %v1689_v23 = vpack.c.bf16 %v1138_v21, %v1138_v21  ;;  %v1892_v24 = vpop.f32.mrb[4].mxu1 }
 0x1c0   :  { %1461 = vst.msk [vmem:[%s2579_s5 + $0xc] sm:$0xf] %vm1457_vm4, %v1691_v22  ;;  %v907_v25 = vadd.f32 %v1892_v24, %v2252_v8  ;;  %v898_v26 = vpop.f32.mrb[5].mxu1 }
 0x1c1   :  { %1459 = vst.msk [vmem:[%s2579_s5 + $0x4] sm:$0xf] %vm1457_vm4, %v1689_v23  ;;  %v899_v27 = vadd.f32 %v2252_v8, %v898_v26  ;;  %v1893_v28 = vpop.f32.mrb[6].mxu1 }
 0x1c2   :  { %v1143_v29 = vmax.f32 %v907_v25, 0.0  ;;  %v910_v30 = vadd.f32 %v1893_v28, %v2252_v8  ;;  %v901_v31 = vpop.f32.mrb[7].mxu1 }
 0x1c3   :  { %v1141_v32 = vmax.f32 %v899_v27, 0.0  ;;  %v902_v33 = vadd.f32 %v2252_v8, %v901_v31 }
 0x1c4   :  { %v1694_v34 = vpack.c.bf16 %v1143_v29, %v1143_v29  ;;  %v1144_v35 = vmax.f32 %v910_v30, 0.0 }
 0x1c5   :  { %v1692_v37 = vpack.c.bf16 %v1141_v32, %v1141_v32  ;;  %v1142_v38 = vmax.f32 %v902_v33, 0.0 }
 0x1c6   :  { %1464 = vst.msk [vmem:[%s2579_s5 + $0x18] sm:$0xf] %vm1457_vm4, %v1694_v34  ;;  %v1695_v39 = vpack.c.bf16 %v1144_v35, %v1144_v35 }
 0x1c7   :  { %1462 = vst.msk [vmem:[%s2579_s5 + $0x10] sm:$0xf] %vm1457_vm4, %v1692_v37  ;;  %v1693_v40 = vpack.c.bf16 %v1142_v38, %v1142_v38  ;;  %v1896_v41 = vpop.f32.mrb[8].mxu1 }
 0x1c8   :  { %1465 = vst.msk [vmem:[%s2579_s5 + $0x1c] sm:$0xf] %vm1457_vm4, %v1695_v39  ;;  %v923_v42 = vadd.f32 %v1896_v41, %v2252_v8  ;;  %v914_v43 = vpop.f32.mrb[9].mxu1 }
 0x1c9   :  { %1463 = vst.msk [vmem:[%s2579_s5 + $0x14] sm:$0xf] %vm1457_vm4, %v1693_v40  ;;  %v915_v44 = vadd.f32 %v2252_v8, %v914_v43  ;;  %v1897_v45 = vpop.f32.mrb[10].mxu1 }
 0x1ca   :  { %v1147_v46 = vmax.f32 %v923_v42, 0.0  ;;  %v926_v47 = vadd.f32 %v1897_v45, %v2252_v8  ;;  %v917_v48 = vpop.f32.mrb[11].mxu1 }
 0x1cb   :  { %v1145_v49 = vmax.f32 %v915_v44, 0.0  ;;  %v918_v50 = vadd.f32 %v2252_v8, %v917_v48 }
 0x1cc   :  { %v1698_v51 = vpack.c.bf16 %v1147_v46, %v1147_v46  ;;  %v1148_v52 = vmax.f32 %v926_v47, 0.0 }
 0x1cd   :  { %v1696_v53 = vpack.c.bf16 %v1145_v49, %v1145_v49  ;;  %v1146_v54 = vmax.f32 %v918_v50, 0.0 }
 0x1ce   :  { %1468 = vst.msk [vmem:[%s2579_s5 + $0x28] sm:$0xf] %vm1457_vm4, %v1698_v51  ;;  %v1699_v55 = vpack.c.bf16 %v1148_v52, %v1148_v52 }
 0x1cf   :  { %1466 = vst.msk [vmem:[%s2579_s5 + $0x20] sm:$0xf] %vm1457_vm4, %v1696_v53  ;;  %v1697_v56 = vpack.c.bf16 %v1146_v54, %v1146_v54  ;;  %v1900_v57 = vpop.f32.mrb[12].mxu1 }
 0x1d0   :  { %1469 = vst.msk [vmem:[%s2579_s5 + $0x2c] sm:$0xf] %vm1457_vm4, %v1699_v55  ;;  %v939_v58 = vadd.f32 %v1900_v57, %v2252_v8  ;;  %v930_v59 = vpop.f32.mrb[13].mxu1 }
 0x1d1   :  { %1467 = vst.msk [vmem:[%s2579_s5 + $0x24] sm:$0xf] %vm1457_vm4, %v1697_v56  ;;  %v931_v60 = vadd.f32 %v2252_v8, %v930_v59  ;;  %v1901_v61 = vpop.f32.mrb[14].mxu1 }
 0x1d2   :  { %v1151_v62 = vmax.f32 %v939_v58, 0.0  ;;  %v942_v63 = vadd.f32 %v1901_v61, %v2252_v8  ;;  %v933_v0 = vpop.f32.mrb[15].mxu1 }
 0x1d3   :  { %v1149_v1 = vmax.f32 %v931_v60, 0.0  ;;  %v934_v2 = vadd.f32 %v2252_v8, %v933_v0 }
 0x1d4   :  { %v1702_v3 = vpack.c.bf16 %v1151_v62, %v1151_v62  ;;  %v1152_v4 = vmax.f32 %v942_v63, 0.0 }
 0x1d5   :  { %v1700_v5 = vpack.c.bf16 %v1149_v1, %v1149_v1  ;;  %v1150_v6 = vmax.f32 %v934_v2, 0.0 }
 0x1d6   :  { %1472 = vst.msk [vmem:[%s2579_s5 + $0x38] sm:$0xf] %vm1457_vm4, %v1702_v3  ;;  %v1703_v7 = vpack.c.bf16 %v1152_v4, %v1152_v4 }
 0x1d7   :  { %1470 = vst.msk [vmem:[%s2579_s5 + $0x30] sm:$0xf] %vm1457_vm4, %v1700_v5  ;;  %v1701_v9 = vpack.c.bf16 %v1150_v6, %v1150_v6  ;;  %v1904_v10 = vpop.f32.mrb[16].mxu1 }
 0x1d8   :  { %1473 = vst.msk [vmem:[%s2579_s5 + $0x3c] sm:$0xf] %vm1457_vm4, %v1703_v7  ;;  %v955_v11 = vadd.f32 %v1904_v10, %v2252_v8  ;;  %v946_v36 = vpop.f32.mrb[17].mxu1 }
 0x1d9   :  { %1471 = vst.msk [vmem:[%s2579_s5 + $0x34] sm:$0xf] %vm1457_vm4, %v1701_v9  ;;  %v947_v12 = vadd.f32 %v2252_v8, %v946_v36  ;;  %v1905_v13 = vpop.f32.mrb[18].mxu1 }
 0x1da   :  { %v1155_v14 = vmax.f32 %v955_v11, 0.0  ;;  %v958_v15 = vadd.f32 %v1905_v13, %v2252_v8  ;;  %v949_v16 = vpop.f32.mrb[19].mxu1 }
 0x1db   :  { %v1153_v17 = vmax.f32 %v947_v12, 0.0  ;;  %v950_v18 = vadd.f32 %v2252_v8, %v949_v16 }
 0x1dc   :  { %v1706_v19 = vpack.c.bf16 %v1155_v14, %v1155_v14  ;;  %v1156_v20 = vmax.f32 %v958_v15, 0.0 }
 0x1dd   :  { %v1704_v21 = vpack.c.bf16 %v1153_v17, %v1153_v17  ;;  %v1154_v22 = vmax.f32 %v950_v18, 0.0 }
 0x1de   :  { %1476 = vst.msk [vmem:[%s2579_s5 + $0x48] sm:$0xf] %vm1457_vm4, %v1706_v19  ;;  %v1707_v23 = vpack.c.bf16 %v1156_v20, %v1156_v20 }
 0x1df   :  { %1474 = vst.msk [vmem:[%s2579_s5 + $0x40] sm:$0xf] %vm1457_vm4, %v1704_v21  ;;  %v1705_v24 = vpack.c.bf16 %v1154_v22, %v1154_v22  ;;  %v1908_v25 = vpop.f32.mrb[20].mxu1 }
 0x1e0   :  { %1477 = vst.msk [vmem:[%s2579_s5 + $0x4c] sm:$0xf] %vm1457_vm4, %v1707_v23  ;;  %v971_v26 = vadd.f32 %v1908_v25, %v2252_v8  ;;  %v962_v27 = vpop.f32.mrb[21].mxu1 }
 0x1e1   :  { %1475 = vst.msk [vmem:[%s2579_s5 + $0x44] sm:$0xf] %vm1457_vm4, %v1705_v24  ;;  %v963_v28 = vadd.f32 %v2252_v8, %v962_v27  ;;  %v1909_v29 = vpop.f32.mrb[22].mxu1 }
 0x1e2   :  { %v1159_v30 = vmax.f32 %v971_v26, 0.0  ;;  %v974_v31 = vadd.f32 %v1909_v29, %v2252_v8  ;;  %v965_v32 = vpop.f32.mrb[23].mxu1 }
 0x1e3   :  { %v1157_v33 = vmax.f32 %v963_v28, 0.0  ;;  %v966_v34 = vadd.f32 %v2252_v8, %v965_v32 }
 0x1e4   :  { %v1710_v35 = vpack.c.bf16 %v1159_v30, %v1159_v30  ;;  %v1160_v37 = vmax.f32 %v974_v31, 0.0 }
 0x1e5   :  { %v1708_v38 = vpack.c.bf16 %v1157_v33, %v1157_v33  ;;  %v1158_v39 = vmax.f32 %v966_v34, 0.0 }
 0x1e6   :  { %1480 = vst.msk [vmem:[%s2579_s5 + $0x58] sm:$0xf] %vm1457_vm4, %v1710_v35  ;;  %v1711_v40 = vpack.c.bf16 %v1160_v37, %v1160_v37 }
 0x1e7   :  { %1478 = vst.msk [vmem:[%s2579_s5 + $0x50] sm:$0xf] %vm1457_vm4, %v1708_v38  ;;  %v1709_v41 = vpack.c.bf16 %v1158_v39, %v1158_v39  ;;  %v1912_v42 = vpop.f32.mrb[24].mxu1 }
 0x1e8   :  { %1481 = vst.msk [vmem:[%s2579_s5 + $0x5c] sm:$0xf] %vm1457_vm4, %v1711_v40  ;;  %v987_v43 = vadd.f32 %v1912_v42, %v2252_v8  ;;  %v978_v44 = vpop.f32.mrb[25].mxu1 }
 0x1e9   :  { %1479 = vst.msk [vmem:[%s2579_s5 + $0x54] sm:$0xf] %vm1457_vm4, %v1709_v41  ;;  %v979_v45 = vadd.f32 %v2252_v8, %v978_v44  ;;  %v1913_v46 = vpop.f32.mrb[26].mxu1 }
 0x1ea   :  { %v1163_v47 = vmax.f32 %v987_v43, 0.0  ;;  %v990_v48 = vadd.f32 %v1913_v46, %v2252_v8  ;;  %v981_v49 = vpop.f32.mrb[27].mxu1 }
 0x1eb   :  { %v1161_v50 = vmax.f32 %v979_v45, 0.0  ;;  %v982_v51 = vadd.f32 %v2252_v8, %v981_v49 }
 0x1ec   :  { %v1714_v52 = vpack.c.bf16 %v1163_v47, %v1163_v47  ;;  %v1164_v53 = vmax.f32 %v990_v48, 0.0 }
 0x1ed   :  { %v1712_v54 = vpack.c.bf16 %v1161_v50, %v1161_v50  ;;  %v1162_v55 = vmax.f32 %v982_v51, 0.0 }
 0x1ee   :  { %1484 = vst.msk [vmem:[%s2579_s5 + $0x68] sm:$0xf] %vm1457_vm4, %v1714_v52  ;;  %v1715_v56 = vpack.c.bf16 %v1164_v53, %v1164_v53 }
 0x1ef   :  { %1482 = vst.msk [vmem:[%s2579_s5 + $0x60] sm:$0xf] %vm1457_vm4, %v1712_v54  ;;  %v1713_v57 = vpack.c.bf16 %v1162_v55, %v1162_v55  ;;  %v1916_v58 = vpop.f32.mrb[28].mxu1 }
 0x1f0   :  { %1485 = vst.msk [vmem:[%s2579_s5 + $0x6c] sm:$0xf] %vm1457_vm4, %v1715_v56  ;;  %v1003_v59 = vadd.f32 %v1916_v58, %v2252_v8  ;;  %v994_v60 = vpop.f32.mrb[29].mxu1 }
 0x1f1   :  { %1483 = vst.msk [vmem:[%s2579_s5 + $0x64] sm:$0xf] %vm1457_vm4, %v1713_v57  ;;  %v995_v61 = vadd.f32 %v2252_v8, %v994_v60  ;;  %v1917_v62 = vpop.f32.mrb[30].mxu1 }
 0x1f2   :  { %v1167_v63 = vmax.f32 %v1003_v59, 0.0  ;;  %v1006_v0 = vadd.f32 %v1917_v62, %v2252_v8  ;;  %v997_v1 = vpop.f32.mrb[31].mxu1 }
 0x1f3   :  { %v1165_v2 = vmax.f32 %v995_v61, 0.0  ;;  %v998_v3 = vadd.f32 %v2252_v8, %v997_v1 }
 0x1f4   :  { %v1718_v4 = vpack.c.bf16 %v1167_v63, %v1167_v63  ;;  %v1168_v5 = vmax.f32 %v1006_v0, 0.0 }
 0x1f5   :  { %v1716_v6 = vpack.c.bf16 %v1165_v2, %v1165_v2  ;;  %v1166_v7 = vmax.f32 %v998_v3, 0.0 }
 0x1f6   :  { %1488 = vst.msk [vmem:[%s2579_s5 + $0x78] sm:$0xf] %vm1457_vm4, %v1718_v4  ;;  %v1719_v9 = vpack.c.bf16 %v1168_v5, %v1168_v5 }
 0x1f7   :  { %1486 = vst.msk [vmem:[%s2579_s5 + $0x70] sm:$0xf] %vm1457_vm4, %v1716_v6  ;;  %v1717_v10 = vpack.c.bf16 %v1166_v7, %v1166_v7  ;;  %v1920_v11 = vpop.f32.mrb[32].mxu1 }
 0x1f8   :  { %1489 = vst.msk [vmem:[%s2579_s5 + $0x7c] sm:$0xf] %vm1457_vm4, %v1719_v9  ;;  %v1019_v36 = vadd.f32 %v1920_v11, %v2252_v8  ;;  %v1010_v12 = vpop.f32.mrb[33].mxu1 }
 0x1f9   :  { %1487 = vst.msk [vmem:[%s2579_s5 + $0x74] sm:$0xf] %vm1457_vm4, %v1717_v10  ;;  %v1011_v13 = vadd.f32 %v2252_v8, %v1010_v12  ;;  %v1921_v14 = vpop.f32.mrb[34].mxu1 }
 0x1fa   :  { %v1171_v15 = vmax.f32 %v1019_v36, 0.0  ;;  %v1022_v16 = vadd.f32 %v1921_v14, %v2252_v8  ;;  %v1013_v17 = vpop.f32.mrb[35].mxu1 }
 0x1fb   :  { %v1169_v18 = vmax.f32 %v1011_v13, 0.0  ;;  %v1014_v19 = vadd.f32 %v2252_v8, %v1013_v17 }
 0x1fc   :  { %v1722_v20 = vpack.c.bf16 %v1171_v15, %v1171_v15  ;;  %v1172_v21 = vmax.f32 %v1022_v16, 0.0 }
 0x1fd   :  { %v1720_v22 = vpack.c.bf16 %v1169_v18, %v1169_v18  ;;  %v1170_v23 = vmax.f32 %v1014_v19, 0.0 }
 0x1fe   :  { %1492 = vst.msk [vmem:[%s2579_s5 + $0x88] sm:$0xf] %vm1457_vm4, %v1722_v20  ;;  %v1723_v24 = vpack.c.bf16 %v1172_v21, %v1172_v21 }
 0x1ff   :  { %1490 = vst.msk [vmem:[%s2579_s5 + $0x80] sm:$0xf] %vm1457_vm4, %v1720_v22  ;;  %v1721_v25 = vpack.c.bf16 %v1170_v23, %v1170_v23  ;;  %v1924_v26 = vpop.f32.mrb[36].mxu1 }
 0x200   :  { %1493 = vst.msk [vmem:[%s2579_s5 + $0x8c] sm:$0xf] %vm1457_vm4, %v1723_v24  ;;  %v1035_v27 = vadd.f32 %v1924_v26, %v2252_v8  ;;  %v1026_v28 = vpop.f32.mrb[37].mxu1 }
 0x201   :  { %1491 = vst.msk [vmem:[%s2579_s5 + $0x84] sm:$0xf] %vm1457_vm4, %v1721_v25  ;;  %v1027_v29 = vadd.f32 %v2252_v8, %v1026_v28  ;;  %v1925_v30 = vpop.f32.mrb[38].mxu1 }
 0x202   :  { %v1175_v31 = vmax.f32 %v1035_v27, 0.0  ;;  %v1038_v32 = vadd.f32 %v1925_v30, %v2252_v8  ;;  %v1029_v33 = vpop.f32.mrb[39].mxu1 }
 0x203   :  { %v1173_v34 = vmax.f32 %v1027_v29, 0.0  ;;  %v1030_v35 = vadd.f32 %v2252_v8, %v1029_v33 }
 0x204   :  { %v1726_v37 = vpack.c.bf16 %v1175_v31, %v1175_v31  ;;  %v1176_v38 = vmax.f32 %v1038_v32, 0.0 }
 0x205   :  { %v1724_v39 = vpack.c.bf16 %v1173_v34, %v1173_v34  ;;  %v1174_v40 = vmax.f32 %v1030_v35, 0.0 }
 0x206   :  { %1496 = vst.msk [vmem:[%s2579_s5 + $0x98] sm:$0xf] %vm1457_vm4, %v1726_v37  ;;  %v1727_v41 = vpack.c.bf16 %v1176_v38, %v1176_v38 }
 0x207   :  { %1494 = vst.msk [vmem:[%s2579_s5 + $0x90] sm:$0xf] %vm1457_vm4, %v1724_v39  ;;  %v1725_v42 = vpack.c.bf16 %v1174_v40, %v1174_v40  ;;  %v1928_v43 = vpop.f32.mrb[40].mxu1 }
 0x208   :  { %1497 = vst.msk [vmem:[%s2579_s5 + $0x9c] sm:$0xf] %vm1457_vm4, %v1727_v41  ;;  %v1051_v44 = vadd.f32 %v1928_v43, %v2252_v8  ;;  %v1042_v45 = vpop.f32.mrb[41].mxu1 }
 0x209   :  { %1495 = vst.msk [vmem:[%s2579_s5 + $0x94] sm:$0xf] %vm1457_vm4, %v1725_v42  ;;  %v1043_v46 = vadd.f32 %v2252_v8, %v1042_v45  ;;  %v1929_v47 = vpop.f32.mrb[42].mxu1 }
 0x20a   :  { %v1179_v48 = vmax.f32 %v1051_v44, 0.0  ;;  %v1054_v49 = vadd.f32 %v1929_v47, %v2252_v8  ;;  %v1045_v50 = vpop.f32.mrb[43].mxu1 }
 0x20b   :  { %v1177_v51 = vmax.f32 %v1043_v46, 0.0  ;;  %v1046_v52 = vadd.f32 %v2252_v8, %v1045_v50 }
 0x20c   :  { %v1730_v53 = vpack.c.bf16 %v1179_v48, %v1179_v48  ;;  %v1180_v54 = vmax.f32 %v1054_v49, 0.0 }
 0x20d   :  { %v1728_v55 = vpack.c.bf16 %v1177_v51, %v1177_v51  ;;  %v1178_v56 = vmax.f32 %v1046_v52, 0.0 }
 0x20e   :  { %1500 = vst.msk [vmem:[%s2579_s5 + $0xa8] sm:$0xf] %vm1457_vm4, %v1730_v53  ;;  %v1731_v57 = vpack.c.bf16 %v1180_v54, %v1180_v54 }
 0x20f   :  { %1498 = vst.msk [vmem:[%s2579_s5 + $0xa0] sm:$0xf] %vm1457_vm4, %v1728_v55  ;;  %v1729_v58 = vpack.c.bf16 %v1178_v56, %v1178_v56  ;;  %v1932_v59 = vpop.f32.mrb[44].mxu1 }
 0x210   :  { %1501 = vst.msk [vmem:[%s2579_s5 + $0xac] sm:$0xf] %vm1457_vm4, %v1731_v57  ;;  %v1067_v60 = vadd.f32 %v1932_v59, %v2252_v8  ;;  %v1058_v61 = vpop.f32.mrb[45].mxu1 }
 0x211   :  { %1499 = vst.msk [vmem:[%s2579_s5 + $0xa4] sm:$0xf] %vm1457_vm4, %v1729_v58  ;;  %v1059_v62 = vadd.f32 %v2252_v8, %v1058_v61  ;;  %v1933_v63 = vpop.f32.mrb[46].mxu1 }
 0x212   :  { %v1183_v0 = vmax.f32 %v1067_v60, 0.0  ;;  %v1070_v1 = vadd.f32 %v1933_v63, %v2252_v8  ;;  %v1061_v2 = vpop.f32.mrb[47].mxu1 }
 0x213   :  { %v1181_v3 = vmax.f32 %v1059_v62, 0.0  ;;  %v1062_v4 = vadd.f32 %v2252_v8, %v1061_v2 }
 0x214   :  { %v1734_v5 = vpack.c.bf16 %v1183_v0, %v1183_v0  ;;  %v1184_v6 = vmax.f32 %v1070_v1, 0.0 }
 0x215   :  { %v1732_v7 = vpack.c.bf16 %v1181_v3, %v1181_v3  ;;  %v1182_v9 = vmax.f32 %v1062_v4, 0.0 }
 0x216   :  { %1504 = vst.msk [vmem:[%s2579_s5 + $0xb8] sm:$0xf] %vm1457_vm4, %v1734_v5  ;;  %v1735_v10 = vpack.c.bf16 %v1184_v6, %v1184_v6 }
 0x217   :  { %1502 = vst.msk [vmem:[%s2579_s5 + $0xb0] sm:$0xf] %vm1457_vm4, %v1732_v7  ;;  %v1733_v11 = vpack.c.bf16 %v1182_v9, %v1182_v9  ;;  %v1936_v36 = vpop.f32.mrb[48].mxu1 }
 0x218   :  { %1505 = vst.msk [vmem:[%s2579_s5 + $0xbc] sm:$0xf] %vm1457_vm4, %v1735_v10  ;;  %v1083_v12 = vadd.f32 %v1936_v36, %v2252_v8  ;;  %v1074_v13 = vpop.f32.mrb[49].mxu1 }
 0x219   :  { %1503 = vst.msk [vmem:[%s2579_s5 + $0xb4] sm:$0xf] %vm1457_vm4, %v1733_v11  ;;  %v1075_v14 = vadd.f32 %v2252_v8, %v1074_v13  ;;  %v1937_v15 = vpop.f32.mrb[50].mxu1 }
 0x21a   :  { %v1187_v16 = vmax.f32 %v1083_v12, 0.0  ;;  %v1086_v17 = vadd.f32 %v1937_v15, %v2252_v8  ;;  %v1077_v18 = vpop.f32.mrb[51].mxu1 }
 0x21b   :  { %v1185_v19 = vmax.f32 %v1075_v14, 0.0  ;;  %v1078_v20 = vadd.f32 %v2252_v8, %v1077_v18 }
 0x21c   :  { %v1738_v21 = vpack.c.bf16 %v1187_v16, %v1187_v16  ;;  %v1188_v22 = vmax.f32 %v1086_v17, 0.0 }
 0x21d   :  { %v1736_v23 = vpack.c.bf16 %v1185_v19, %v1185_v19  ;;  %v1186_v24 = vmax.f32 %v1078_v20, 0.0 }
 0x21e   :  { %1508 = vst.msk [vmem:[%s2579_s5 + $0xc8] sm:$0xf] %vm1457_vm4, %v1738_v21  ;;  %v1739_v25 = vpack.c.bf16 %v1188_v22, %v1188_v22 }
 0x21f   :  { %1506 = vst.msk [vmem:[%s2579_s5 + $0xc0] sm:$0xf] %vm1457_vm4, %v1736_v23  ;;  %v1737_v26 = vpack.c.bf16 %v1186_v24, %v1186_v24  ;;  %v1940_v27 = vpop.f32.mrb[52].mxu1 }
 0x220   :  { %1509 = vst.msk [vmem:[%s2579_s5 + $0xcc] sm:$0xf] %vm1457_vm4, %v1739_v25  ;;  %v1099_v28 = vadd.f32 %v1940_v27, %v2252_v8  ;;  %v1090_v29 = vpop.f32.mrb[53].mxu1 }
 0x221   :  { %1507 = vst.msk [vmem:[%s2579_s5 + $0xc4] sm:$0xf] %vm1457_vm4, %v1737_v26  ;;  %v1091_v30 = vadd.f32 %v2252_v8, %v1090_v29  ;;  %v1941_v31 = vpop.f32.mrb[54].mxu1 }
 0x222   :  { %v1191_v32 = vmax.f32 %v1099_v28, 0.0  ;;  %v1102_v33 = vadd.f32 %v1941_v31, %v2252_v8  ;;  %v1093_v34 = vpop.f32.mrb[55].mxu1 }
 0x223   :  { %v1189_v35 = vmax.f32 %v1091_v30, 0.0  ;;  %v1094_v37 = vadd.f32 %v2252_v8, %v1093_v34 }
 0x224   :  { %v1742_v38 = vpack.c.bf16 %v1191_v32, %v1191_v32  ;;  %v1192_v39 = vmax.f32 %v1102_v33, 0.0 }
 0x225   :  { %v1740_v40 = vpack.c.bf16 %v1189_v35, %v1189_v35  ;;  %v1190_v41 = vmax.f32 %v1094_v37, 0.0 }
 0x226   :  { %1512 = vst.msk [vmem:[%s2579_s5 + $0xd8] sm:$0xf] %vm1457_vm4, %v1742_v38  ;;  %v1743_v42 = vpack.c.bf16 %v1192_v39, %v1192_v39 }
 0x227   :  { %1510 = vst.msk [vmem:[%s2579_s5 + $0xd0] sm:$0xf] %vm1457_vm4, %v1740_v40  ;;  %v1741_v43 = vpack.c.bf16 %v1190_v41, %v1190_v41  ;;  %v1944_v44 = vpop.f32.mrb[56].mxu1 }
 0x228   :  { %1513 = vst.msk [vmem:[%s2579_s5 + $0xdc] sm:$0xf] %vm1457_vm4, %v1743_v42  ;;  %v1115_v45 = vadd.f32 %v1944_v44, %v2252_v8  ;;  %v1106_v46 = vpop.f32.mrb[57].mxu1 }
 0x229   :  { %1511 = vst.msk [vmem:[%s2579_s5 + $0xd4] sm:$0xf] %vm1457_vm4, %v1741_v43  ;;  %v1107_v47 = vadd.f32 %v2252_v8, %v1106_v46  ;;  %v1945_v48 = vpop.f32.mrb[58].mxu1 }
 0x22a   :  { %v1195_v49 = vmax.f32 %v1115_v45, 0.0  ;;  %v1118_v50 = vadd.f32 %v1945_v48, %v2252_v8  ;;  %v1109_v51 = vpop.f32.mrb[59].mxu1 }
 0x22b   :  { %v1193_v52 = vmax.f32 %v1107_v47, 0.0  ;;  %v1110_v53 = vadd.f32 %v2252_v8, %v1109_v51 }
 0x22c   :  { %v1746_v54 = vpack.c.bf16 %v1195_v49, %v1195_v49  ;;  %v1196_v55 = vmax.f32 %v1118_v50, 0.0 }
 0x22d   :  { %v1744_v56 = vpack.c.bf16 %v1193_v52, %v1193_v52  ;;  %v1194_v57 = vmax.f32 %v1110_v53, 0.0 }
 0x22e   :  { %1516 = vst.msk [vmem:[%s2579_s5 + $0xe8] sm:$0xf] %vm1457_vm4, %v1746_v54  ;;  %v1747_v58 = vpack.c.bf16 %v1196_v55, %v1196_v55 }
 0x22f   :  { %1514 = vst.msk [vmem:[%s2579_s5 + $0xe0] sm:$0xf] %vm1457_vm4, %v1744_v56  ;;  %v1745_v59 = vpack.c.bf16 %v1194_v57, %v1194_v57  ;;  %v1948_v60 = vpop.f32.mrb[60].mxu1 }
 0x230   :  { %1517 = vst.msk [vmem:[%s2579_s5 + $0xec] sm:$0xf] %vm1457_vm4, %v1747_v58  ;;  %v1131_v61 = vadd.f32 %v1948_v60, %v2252_v8  ;;  %v1122_v62 = vpop.f32.mrb[61].mxu1 }
 0x231   :  { %1515 = vst.msk [vmem:[%s2579_s5 + $0xe4] sm:$0xf] %vm1457_vm4, %v1745_v59  ;;  %v1123_v63 = vadd.f32 %v2252_v8, %v1122_v62  ;;  %v1949_v0 = vpop.f32.mrb[62].mxu1 }
 0x232   :  { %v1199_v1 = vmax.f32 %v1131_v61, 0.0  ;;  %v1134_v2 = vadd.f32 %v1949_v0, %v2252_v8  ;;  %v1125_v3 = vpop.f32.mrb[63].mxu1 }
 0x233   :  { %v1197_v4 = vmax.f32 %v1123_v63, 0.0  ;;  %v1126_v5 = vadd.f32 %v2252_v8, %v1125_v3 }
 0x234   :  { %v1750_v6 = vpack.c.bf16 %v1199_v1, %v1199_v1  ;;  %v1200_v7 = vmax.f32 %v1134_v2, 0.0 }
 0x235   :  { %v1748_v9 = vpack.c.bf16 %v1197_v4, %v1197_v4  ;;  %v1198_v10 = vmax.f32 %v1126_v5, 0.0 }
 0x236   :  { %1520 = vst.msk [vmem:[%s2579_s5 + $0xf8] sm:$0xf] %vm1457_vm4, %v1750_v6  ;;  %v1751_v11 = vpack.c.bf16 %v1200_v7, %v1200_v7 }
 0x237   :  { %1518 = vst.msk [vmem:[%s2579_s5 + $0xf0] sm:$0xf] %vm1457_vm4, %v1748_v9  ;;  %v1749_v36 = vpack.c.bf16 %v1198_v10, %v1198_v10 }
 0x238   :  { %1521 = vst.msk [vmem:[%s2579_s5 + $0xfc] sm:$0xf] %vm1457_vm4, %v1751_v11 }
 0x239   :  { %1519 = vst.msk [vmem:[%s2579_s5 + $0xf4] sm:$0xf] %vm1457_vm4, %v1749_v36 }

// kernel: rpvnet_forward.17
= control target key start
LH: loop header
LB: loop body
LE: loop exit
PB: predicated region body
PF: predicated region fallthrough
CT: control target
= control target key end

     0   :  { %vm70_vm0 = vcmask 1041408   ;;  %vm57_vm1 = vcmask 31744   ;;  %vm172_vm2 = vcmask 1043456   ;;  %vm159_vm3 = vcmask 64512   ;;  %s450_s1 = inlined_call_operand.vmem [shape: bf16[4,8], index: 1, kind: input, shape index: {}]   ;;  %s451_s0 = inlined_call_operand.vmem [shape: bf16[64,4], index: 0, kind: input, shape index: {}]   ;;  %s452_s3 = inlined_call_operand.vmem [shape: bf16[8,8], index: 3, kind: input, shape index: {}]   ;;  %s453_s2 = inlined_call_operand.vmem [shape: f32[1,8], index: 2, kind: input, shape index: {}]   ;;  %s454_s4 = inlined_call_operand.vmem [shape: f32[1,8], index: 4, kind: input, shape index: {}]   ;;  %s455_s5 = inlined_call_operand.vmem [shape: bf16[64,8], index: 5, kind: output, shape index: {}]  }
   0x1   :  { %v29_v0 = vld [vmem:[%s450_s1] sm:$0x3]  ;;  %v357_v3 = vld [vmem:[%s451_s0 + $0x8] sm:$0xff]   ;;  %v358_v4 = vld [vmem:[%s451_s0 + $0x10] sm:$0xff]   ;;  %vm281_vm4 = vcmask 60416  }
   0x2   :  { %354 = vmatprep.subr.msk.bf16.mxu0 %vm70_vm0, %v29_v0  ;;  %v72_v1 = vsel %vm70_vm0, %v29_v0, 0  ;;  %v356_v2 = vld [vmem:[%s451_s0] sm:$0xff]   ;;  %v359_v5 = vld [vmem:[%s451_s0 + $0x18] sm:$0xff]  }
   0x3   :  { %335 = vmatpush3.bf16.msra.mxu0 %v72_v1  ;;  %336 = vmatprep.mubr.msk.bf16.mxu0 %vm57_vm1, %v356_v2  ;;  %v151_v6 = vld [vmem:[%s452_s3] sm:$0xf] }
   0x4   :  { %355 = vmatprep.subr.msk.bf16.mxu1 %vm172_vm2, %v151_v6  ;;  %v174_v7 = vsel %vm172_vm2, %v151_v6, 0  ;;  %v294_v8 = vld [vmem:[%s453_s2] ss:$0 sm:$0xff] }
   0x5   :  { %345 = vmatpush3.bf16.msra.mxu1 %v174_v7  ;;  %v303_v37 = vld [vmem:[%s454_s4] ss:$0 sm:$0xff] }
   0x6   :  { %337 = vmatmul.mubr.msk.bf16.vlgmr.msra.gmra.mrb[0].mxu0 %vm57_vm1, %v357_v3 }
   0x7   :  { %340 = vmatprep.mubr.msk.bf16.mxu0 %vm57_vm1, %v358_v4 }
   0xe   :  { %341 = vmatmul.mubr.msk.bf16.gmra.mrb[4].mxu0 %vm57_vm1, %v359_v5 }
  0xd9   :  { %v338_v9 = vpop.f32.mrb[0].mxu0 }
  0xda   :  { %v117_v10 = vadd.f32 %v338_v9, %v294_v8  ;;  %v108_v11 = vpop.f32.mrb[1].mxu0 }
  0xdb   :  { %v109_v12 = vadd.f32 %v294_v8, %v108_v11  ;;  %v339_v13 = vpop.f32.mrb[2].mxu0 }
  0xdc   :  { %v120_v14 = vadd.f32 %v339_v13, %v294_v8  ;;  %v111_v15 = vpop.f32.mrb[3].mxu0  ;;  %v141_v17 = vmax.f32 %v117_v10, 0.0 }
  0xdd   :  { %v112_v16 = vadd.f32 %v294_v8, %v111_v15  ;;  %v139_v19 = vmax.f32 %v109_v12, 0.0 }
  0xde   :  { %v142_v18 = vmax.f32 %v120_v14, 0.0 }
  0xdf   :  { %v140_v20 = vmax.f32 %v112_v16, 0.0 }
  0xe0   :  { %v148_v21 = vpack.c.bf16 %v142_v18, %v141_v17 }
  0xe1   :  { %v342_v22 = vpop.f32.mrb[4].mxu0  ;;  %v147_v23 = vpack.c.bf16 %v140_v20, %v139_v19 }
  0xe2   :  { %v133_v24 = vadd.f32 %v342_v22, %v294_v8  ;;  %v124_v25 = vpop.f32.mrb[5].mxu0 }
  0xe3   :  { %v125_v26 = vadd.f32 %v294_v8, %v124_v25  ;;  %v343_v27 = vpop.f32.mrb[6].mxu0  ;;  %346 = vmatprep.mubr.msk.bf16.mxu1 %vm159_vm3, %v147_v23 }
  0xe4   :  { %v136_v28 = vadd.f32 %v343_v27, %v294_v8  ;;  %v127_v29 = vpop.f32.mrb[7].mxu0  ;;  %347 = vmatmul.mubr.msk.bf16.vlgmr.msra.gmra.mrb[0].mxu1 %vm159_vm3, %v148_v21  ;;  %v145_v31 = vmax.f32 %v133_v24, 0.0 }
  0xe5   :  { %v128_v30 = vadd.f32 %v294_v8, %v127_v29  ;;  %v143_v33 = vmax.f32 %v125_v26, 0.0 }
  0xe6   :  { %v146_v32 = vmax.f32 %v136_v28, 0.0 }
  0xe7   :  { %v144_v34 = vmax.f32 %v128_v30, 0.0 }
  0xe8   :  { %v150_v35 = vpack.c.bf16 %v146_v32, %v145_v31 }
  0xe9   :  { %v149_v36 = vpack.c.bf16 %v144_v34, %v143_v33 }
  0xeb   :  { %350 = vmatprep.mubr.msk.bf16.mxu1 %vm159_vm3, %v149_v36 }
  0xec   :  { %351 = vmatmul.mubr.msk.bf16.gmra.mrb[4].mxu1 %vm159_vm3, %v150_v35 }
 0x1b7   :  { %v348_v38 = vpop.f32.mrb[0].mxu1 }
 0x1b8   :  { %v219_v39 = vadd.f32 %v348_v38, %v303_v37  ;;  %v210_v40 = vpop.f32.mrb[1].mxu1 }
 0x1b9   :  { %v211_v41 = vadd.f32 %v303_v37, %v210_v40  ;;  %v349_v42 = vpop.f32.mrb[2].mxu1 }
 0x1ba   :  { %v243_v43 = vmax.f32 %v219_v39, 0.0  ;;  %v222_v44 = vadd.f32 %v349_v42, %v303_v37  ;;  %v213_v45 = vpop.f32.mrb[3].mxu1 }
 0x1bb   :  { %v241_v46 = vmax.f32 %v211_v41, 0.0  ;;  %v214_v47 = vadd.f32 %v303_v37, %v213_v45 }
 0x1bc   :  { %v318_v48 = vpack.c.bf16 %v243_v43, %v243_v43  ;;  %v244_v49 = vmax.f32 %v222_v44, 0.0 }
 0x1bd   :  { %v316_v50 = vpack.c.bf16 %v241_v46, %v241_v46  ;;  %v242_v51 = vmax.f32 %v214_v47, 0.0 }
 0x1be   :  { %284 = vst.msk [vmem:[%s455_s5 + $0x8] sm:$0xf] %vm281_vm4, %v318_v48  ;;  %v319_v52 = vpack.c.bf16 %v244_v49, %v244_v49 }
 0x1bf   :  { %282 = vst.msk [vmem:[%s455_s5] sm:$0xf] %vm281_vm4, %v316_v50  ;;  %v317_v53 = vpack.c.bf16 %v242_v51, %v242_v51  ;;  %v352_v54 = vpop.f32.mrb[4].mxu1 }
 0x1c0   :  { %285 = vst.msk [vmem:[%s455_s5 + $0xc] sm:$0xf] %vm281_vm4, %v319_v52  ;;  %v235_v55 = vadd.f32 %v352_v54, %v303_v37  ;;  %v226_v56 = vpop.f32.mrb[5].mxu1 }
 0x1c1   :  { %283 = vst.msk [vmem:[%s455_s5 + $0x4] sm:$0xf] %vm281_vm4, %v317_v53  ;;  %v227_v57 = vadd.f32 %v303_v37, %v226_v56  ;;  %v353_v58 = vpop.f32.mrb[6].mxu1 }
 0x1c2   :  { %v247_v59 = vmax.f32 %v235_v55, 0.0  ;;  %v238_v60 = vadd.f32 %v353_v58, %v303_v37  ;;  %v229_v61 = vpop.f32.mrb[7].mxu1 }
 0x1c3   :  { %v245_v62 = vmax.f32 %v227_v57, 0.0  ;;  %v230_v63 = vadd.f32 %v303_v37, %v229_v61 }
 0x1c4   :  { %v322_v0 = vpack.c.bf16 %v247_v59, %v247_v59  ;;  %v248_v1 = vmax.f32 %v238_v60, 0.0 }
 0x1c5   :  { %v320_v2 = vpack.c.bf16 %v245_v62, %v245_v62  ;;  %v246_v3 = vmax.f32 %v230_v63, 0.0 }
 0x1c6   :  { %288 = vst.msk [vmem:[%s455_s5 + $0x18] sm:$0xf] %vm281_vm4, %v322_v0  ;;  %v323_v4 = vpack.c.bf16 %v248_v1, %v248_v1 }
 0x1c7   :  { %286 = vst.msk [vmem:[%s455_s5 + $0x10] sm:$0xf] %vm281_vm4, %v320_v2  ;;  %v321_v5 = vpack.c.bf16 %v246_v3, %v246_v3 }
 0x1c8   :  { %289 = vst.msk [vmem:[%s455_s5 + $0x1c] sm:$0xf] %vm281_vm4, %v323_v4 }
 0x1c9   :  { %287 = vst.msk [vmem:[%s455_s5 + $0x14] sm:$0xf] %vm281_vm4, %v321_v5 }

// kernel: rpvnet_forward.19
= control target key start
LH: loop header
LB: loop body
LE: loop exit
PB: predicated region body
PF: predicated region fallthrough
CT: control target
= control target key end

     0   :  { %vm82_vm0 = vcmask 1041408   ;;  %vm69_vm1 = vcmask 31744   ;;  %vm210_vm2 = vcmask 1043456   ;;  %vm197_vm3 = vcmask 64512   ;;  %s1269_s3 = inlined_call_operand.vmem [shape: bf16[4,8], index: 3, kind: input, shape index: {}]   ;;  %s1270_s0 = inlined_call_operand.vmem [shape: bf16[64,4], index: 0, kind: input, shape index: {}]   ;;  %s1271_s5 = inlined_call_operand.vmem [shape: bf16[8,3], index: 5, kind: input, shape index: {}]   ;;  %s1272_s1 = inlined_call_operand.vmem [shape: bf16[64,8], index: 1, kind: input, shape index: {}]   ;;  %s1273_s7 = inlined_call_operand.vmem [shape: bf16[8,3], index: 7, kind: input, shape index: {}]   ;;  %s1274_s6 = inlined_call_operand.vmem [shape: bf16[8,3], index: 6, kind: input, shape index: {}]   ;;  %s1275_s2 = inlined_call_operand.vmem [shape: bf16[64,8], index: 2, kind: input, shape index: {}]   ;;  %s1276_s4 = inlined_call_operand.vmem [shape: f32[1,8], index: 4, kind: input, shape index: {}]   ;;  %s1277_s8 = inlined_call_operand.vmem [shape: f32[1,3], index: 8, kind: input, shape index: {}]   ;;  %s1278_s9 = inlined_call_operand.vmem [shape: bf16[64,8], index: 9, kind: output, shape index: {}]  }
   0x1   :  { %v41_v0 = vld [vmem:[%s1269_s3] sm:$0x3]  ;;  %v930_v3 = vld [vmem:[%s1270_s0 + $0x8] sm:$0xff]   ;;  %v931_v4 = vld [vmem:[%s1270_s0 + $0x10] sm:$0xff]   ;;  %vm503_vm4 = vcmask 23552   ;;  %vm768_vm5 = vcmask 60416  }
   0x2   :  { %903 = vmatprep.subr.msk.bf16.mxu0 %vm82_vm0, %v41_v0  ;;  %v84_v1 = vsel %vm82_vm0, %v41_v0, 0  ;;  %v929_v2 = vld [vmem:[%s1270_s0] sm:$0xff]   ;;  %v1061_v8 = vld [vmem:[%s1272_s1 + $0x8] sm:$0xff]   ;;  %v1066_v9 = vld [vmem:[%s1272_s1 + $0x10] sm:$0xff]  }
   0x3   :  { %848 = vmatpush3.bf16.msra.mxu0 %v84_v1  ;;  %849 = vmatprep.mubr.msk.bf16.mxu0 %vm69_vm1, %v929_v2  ;;  %v191_v5 = vld [vmem:[%s1271_s5] sm:$0xf]  ;;  %v932_v14 = vld [vmem:[%s1270_s0 + $0x18] sm:$0xff]   ;;  %v1106_v17 = vld [vmem:[%s1275_s2 + $0x8] sm:$0xff]  }
   0x4   :  { %v1053_v6 = vld [vmem:[%s1272_s1] sm:$0xff]   ;;  %905 = vmatprep.subr.msk.bf16.mxu1 %vm210_vm2, %v191_v5  ;;  %v312_v7 = vsel %vm210_vm2, %v191_v5, 0  ;;  %v1091_v15 = vld [vmem:[%s1272_s1 + $0x18] sm:$0xff]   ;;  %v1111_v18 = vld [vmem:[%s1275_s2 + $0x10] sm:$0xff]  }
   0x5   :  { %868 = vmatpush3.bf16.msra.mxu1 %v312_v7  ;;  %v379_v10 = vld [vmem:[%s1273_s7] sm:$0xf]  ;;  %869 = vmatprep.mubr.msk.bf16.mxu1 %vm197_vm3, %v1053_v6  ;;  %v1120_v19 = vld [vmem:[%s1275_s2 + $0x18] sm:$0xff]  }
   0x6   :  { %850 = vmatmul.mubr.msk.bf16.vlgmr.msra.gmra.mrb[0].mxu0 %vm69_vm1, %v930_v3  ;;  %906 = vmatprep.subr.msk.bf16.mxu1 %vm210_vm2, %v379_v10  ;;  %v413_v11 = vsel %vm210_vm2, %v379_v10, 0  ;;  %v196_v12 = vld [vmem:[%s1274_s6] sm:$0xf] }
   0x7   :  { %853 = vmatprep.mubr.msk.bf16.mxu0 %vm69_vm1, %v931_v4  ;;  %904 = vmatprep.subr.msk.bf16.mxu0 %vm210_vm2, %v196_v12  ;;  %v212_v13 = vsel %vm210_vm2, %v196_v12, 0  ;;  %v1096_v16 = vld [vmem:[%s1275_s2] sm:$0xff]  }
   0x8   :  { %870 = vmatmul.mubr.msk.bf16.vlgmr.msra.gmra.mrb[0].mxu1 %vm197_vm3, %v1061_v8  ;;  %858 = vmatpush3.bf16.msra.mxu0 %v212_v13  ;;  %v781_v20 = vld [vmem:[%s1276_s4] ss:$0 sm:$0xff] }
   0x9   :  { %873 = vmatprep.mubr.msk.bf16.mxu1 %vm197_vm3, %v1066_v9  ;;  %878 = vmatpush3.bf16.msra.mxu1 %v413_v11  ;;  %v810_v58 = vld [vmem:[%s1277_s8] ss:$0 sm:$0xff] }
   0xe   :  { %854 = vmatmul.mubr.msk.bf16.gmra.mrb[4].mxu0 %vm69_vm1, %v932_v14 }
  0x10   :  { %874 = vmatmul.mubr.msk.bf16.gmra.mrb[4].mxu1 %vm197_vm3, %v1091_v15 }
  0x11   :  { %879 = vmatprep.mubr.msk.bf16.mxu1 %vm197_vm3, %v1096_v16 }
  0x18   :  { %880 = vmatmul.mubr.msk.bf16.vlgmr.msra.gmra.mrb[0].mxu1 %vm197_vm3, %v1106_v17 }
  0x19   :  { %883 = vmatprep.mubr.msk.bf16.mxu1 %vm197_vm3, %v1111_v18 }
  0x20   :  { %884 = vmatmul.mubr.msk.bf16.gmra.mrb[4].mxu1 %vm197_vm3, %v1120_v19 }
  0xd9   :  { %v851_v21 = vpop.f32.mrb[0].mxu0 }
  0xda   :  { %v120_v22 = vpop.f32.mrb[1].mxu0  ;;  %v1129_v25 = vadd.f32 %v851_v21, %v781_v20 }
  0xdb   :  { %v1127_v23 = vadd.f32 %v781_v20, %v120_v22  ;;  %v852_v24 = vpop.f32.mrb[2].mxu0 }
  0xdc   :  { %v1131_v26 = vadd.f32 %v852_v24, %v781_v20  ;;  %v123_v27 = vpop.f32.mrb[3].mxu0  ;;  %v153_v32 = vmax.f32 %v1129_v25, 0.0 }
  0xdd   :  { %v1133_v28 = vadd.f32 %v781_v20, %v123_v27  ;;  %v151_v30 = vmax.f32 %v1127_v23, 0.0 }
  0xde   :  { %v154_v29 = vmax.f32 %v1131_v26, 0.0 }
  0xdf   :  { %v152_v31 = vmax.f32 %v1133_v28, 0.0 }
  0xe0   :  { %v193_v35 = vpack.c.bf16 %v154_v29, %v153_v32 }
  0xe1   :  { %v192_v33 = vpack.c.bf16 %v152_v31, %v151_v30  ;;  %v855_v34 = vpop.f32.mrb[4].mxu0 }
  0xe2   :  { %v1147_v36 = vadd.f32 %v855_v34, %v781_v20  ;;  %v136_v37 = vpop.f32.mrb[5].mxu0 }
  0xe3   :  { %v1149_v38 = vadd.f32 %v781_v20, %v136_v37  ;;  %v856_v39 = vpop.f32.mrb[6].mxu0  ;;  %859 = vmatprep.mubr.msk.bf16.mxu0 %vm197_vm3, %v192_v33 }
  0xe4   :  { %v157_v40 = vmax.f32 %v1147_v36, 0.0  ;;  %v1153_v41 = vadd.f32 %v856_v39, %v781_v20  ;;  %v139_v42 = vpop.f32.mrb[7].mxu0  ;;  %860 = vmatmul.mubr.msk.bf16.vlgmr.msra.gmra.mrb[8].mxu0 %vm197_vm3, %v193_v35 }
  0xe5   :  { %v155_v43 = vmax.f32 %v1149_v38, 0.0  ;;  %v1157_v44 = vadd.f32 %v781_v20, %v139_v42 }
  0xe6   :  { %v158_v45 = vmax.f32 %v1153_v41, 0.0 }
  0xe7   :  { %v156_v46 = vmax.f32 %v1157_v44, 0.0 }
  0xe8   :  { %v195_v47 = vpack.c.bf16 %v158_v45, %v157_v40 }
  0xe9   :  { %v194_v48 = vpack.c.bf16 %v156_v46, %v155_v43 }
  0xeb   :  { %863 = vmatprep.mubr.msk.bf16.mxu0 %vm197_vm3, %v194_v48  ;;  %v881_v49 = vpop.f32.mrb[0].mxu1 }
  0xec   :  { %864 = vmatmul.mubr.msk.bf16.gmra.mrb[12].mxu0 %vm197_vm3, %v195_v47  ;;  %v449_v50 = vpop.f32.mrb[1].mxu1 }
  0xed   :  { %v882_v51 = vpop.f32.mrb[2].mxu1 }
  0xee   :  { %v452_v52 = vpop.f32.mrb[3].mxu1 }
  0xf3   :  { %v885_v53 = vpop.f32.mrb[4].mxu1 }
  0xf4   :  { %v465_v54 = vpop.f32.mrb[5].mxu1 }
  0xf5   :  { %v886_v55 = vpop.f32.mrb[6].mxu1 }
  0xf6   :  { %v468_v56 = vpop.f32.mrb[7].mxu1 }
 0x1b7   :  { %v861_v57 = vpop.f32.mrb[8].mxu0 }
 0x1b8   :  { %v887_v59 = vadd.f32 %v881_v49, %v861_v57  ;;  %v248_v60 = vpop.f32.mrb[9].mxu0 }
 0x1b9   :  { %v888_v61 = vadd.f32 %v449_v50, %v248_v60  ;;  %v862_v62 = vpop.f32.mrb[10].mxu0 }
 0x1ba   :  { %v889_v63 = vadd.f32 %v882_v51, %v862_v62  ;;  %v251_v0 = vpop.f32.mrb[11].mxu0  ;;  %v497_v1 = vadd.f32 %v887_v59, %v810_v58 }
 0x1bb   :  { %v890_v2 = vadd.f32 %v452_v52, %v251_v0  ;;  %v495_v3 = vadd.f32 %v888_v61, %v810_v58 }
 0x1bc   :  { %v510_v4 = vsel %vm503_vm4, %v497_v1, -inf  ;;  %v498_v5 = vadd.f32 %v889_v63, %v810_v58 }
 0x1bd   :  { %511 = vmax.xlane.f32.xlu1 %v510_v4  ;;  %v504_v7 = vsel %vm503_vm4, %v495_v3, -inf  ;;  %v496_v10 = vadd.f32 %v890_v2, %v810_v58 }
 0x1be   :  { %505 = vmax.xlane.f32.xlu0 %v504_v7  ;;  %v513_v14 = vsel %vm503_vm4, %v498_v5, -inf }
 0x1bf   :  { %v865_v11 = vpop.f32.mrb[12].mxu0  ;;  %v507_v22 = vsel %vm503_vm4, %v496_v10, -inf }
 0x1c0   :  { %v891_v12 = vadd.f32 %v885_v53, %v865_v11  ;;  %v264_v13 = vpop.f32.mrb[13].mxu0 }
 0x1c1   :  { %v892_v20 = vadd.f32 %v465_v54, %v264_v13  ;;  %514 = vmax.xlane.f32.xlu1 %v513_v14  ;;  %v866_v21 = vpop.f32.mrb[14].mxu0 }
 0x1c2   :  { %v893_v24 = vadd.f32 %v886_v55, %v866_v21  ;;  %508 = vmax.xlane.f32.xlu0 %v507_v22  ;;  %v267_v27 = vpop.f32.mrb[15].mxu0  ;;  %v501_v39 = vadd.f32 %v891_v12, %v810_v58 }
 0x1c3   :  { %v894_v33 = vadd.f32 %v468_v56, %v267_v27  ;;  %v499_v34 = vadd.f32 %v892_v20, %v810_v58 }
 0x1c4   :  { %v502_v47 = vadd.f32 %v893_v24, %v810_v58  ;;  %v522_v48 = vsel %vm503_vm4, %v501_v39, -inf }
 0x1c5   :  { %v516_v35 = vsel %vm503_vm4, %v499_v34, -inf  ;;  %v500_v37 = vadd.f32 %v894_v33, %v810_v58 }
 0x1c6   :  { %517 = vmax.xlane.f32.xlu0 %v516_v35  ;;  %v525_v49 = vsel %vm503_vm4, %v502_v47, -inf }
 0x1c7   :  { %v519_v42 = vsel %vm503_vm4, %v500_v37, -inf }
 0x1c8   :  { %520 = vmax.xlane.f32.xlu1 %v519_v42 }
 0x1ca   :  { %523 = vmax.xlane.f32.xlu0 %v522_v48 }
 0x1cc   :  { %526 = vmax.xlane.f32.xlu1 %v525_v49 }
 0x24a   :  { %v512_v50 = vpop.xlane.xlu1 %511 }
 0x24b   :  { %v530_v51 = vsub.f32 %v497_v1, %v512_v50  ;;  %v506_v52 = vpop.xlane.xlu0 %505  ;;  %v981_v50 = vmov 0  }
 0x24c   :  { %v528_v53 = vsub.f32 %v495_v3, %v506_v52  ;;  %910 = vset.pattern.permute.xlu1 %v981_v50  ;;  %913 = vset.pattern.permute.xlu0 %v981_v50 }
 0x24d   :  { %v540_v54 = vmul.f32 1.442695, %v530_v51 }
 0x24e   :  { %v536_v55 = vmul.f32 1.442695, %v528_v53  ;;  %v515_v56 = vpop.xlane.xlu1 %514 }
 0x24f   :  { %949 = vpow2.f32 %v540_v54  ;;  %v531_v57 = vsub.f32 %v498_v5, %v515_v56  ;;  %v509_v59 = vpop.xlane.xlu0 %508 }
 0x250   :  { %v529_v60 = vsub.f32 %v496_v10, %v509_v59  ;;  %951 = vpow2.f32 %v536_v55 }
 0x251   :  { %v542_v58 = vmul.f32 1.442695, %v531_v57 }
 0x252   :  { %v538_v61 = vmul.f32 1.442695, %v529_v60 }
 0x253   :  { %953 = vpow2.f32 %v542_v58  ;;  %v518_v62 = vpop.xlane.xlu0 %517 }
 0x254   :  { %v532_v63 = vsub.f32 %v499_v34, %v518_v62  ;;  %955 = vpow2.f32 %v538_v61  ;;  %v982_v61 = vmov 1  }
 0x255   :  { %v521_v0 = vpop.xlane.xlu1 %520 }
 0x256   :  { %v544_v2 = vmul.f32 1.442695, %v532_v63  ;;  %v533_v1 = vsub.f32 %v500_v37, %v521_v0  ;;  %v983_v0 = vmov 2  }
 0x257   :  { %v524_v4 = vpop.xlane.xlu0 %523 }
 0x258   :  { %957 = vpow2.f32 %v544_v2  ;;  %v534_v3 = vsub.f32 %v501_v39, %v524_v4  ;;  %v546_v14 = vmul.f32 1.442695, %v533_v1 }
 0x259   :  { %v950_v7 = vpop.eup %949  ;;  %v527_v11 = vpop.xlane.xlu1 %526 }
 0x25a   :  { %v548_v12 = vmul.f32 1.442695, %v534_v3  ;;  %v535_v13 = vsub.f32 %v502_v47, %v527_v11  ;;  %v558_v5 = vsel %vm503_vm4, %v950_v7, 0.0  ;;  %v952_v10 = vpop.eup %951 }
 0x25b   :  { %559 = vadd.xlane.f32.xlu0 %v558_v5  ;;  %v552_v22 = vsel %vm503_vm4, %v952_v10, 0.0 }
 0x25c   :  { %959 = vpow2.f32 %v548_v12  ;;  %v550_v20 = vmul.f32 1.442695, %v535_v13 }
 0x25d   :  { %v954_v21 = vpop.eup %953 }
 0x25e   :  { %961 = vpow2.f32 %v550_v20  ;;  %v561_v24 = vsel %vm503_vm4, %v954_v21, 0.0  ;;  %v956_v27 = vpop.eup %955 }
 0x25f   :  { %553 = vadd.xlane.f32.xlu0 %v552_v22  ;;  %562 = vadd.xlane.f32.xlu1 %v561_v24  ;;  %963 = vpow2.f32 %v546_v14  ;;  %v555_v34 = vsel %vm503_vm4, %v956_v27, 0.0  ;;  %v169_v22 = vunpack.c.l.bf16 %v1061_v8 }
 0x262   :  { %v1185_v33 = vpop.eup %957 }
 0x263   :  { %556 = vadd.xlane.f32.xlu1 %v555_v34  ;;  %v564_v35 = vsel %vm503_vm4, %v1185_v33, 0.0 }
 0x264   :  { %565 = vadd.xlane.f32.xlu0 %v564_v35 }
 0x266   :  { %v960_v37 = vpop.eup %959 }
 0x267   :  { %v570_v39 = vsel %vm503_vm4, %v960_v37, 0.0 }
 0x268   :  { %v1191_v42 = vpop.eup %961  ;;  %571 = vadd.xlane.f32.xlu0 %v570_v39 }
 0x269   :  { %v573_v47 = vsel %vm503_vm4, %v1191_v42, 0.0  ;;  %v964_v48 = vpop.eup %963 }
 0x26a   :  { %574 = vadd.xlane.f32.xlu1 %v573_v47  ;;  %v567_v49 = vsel %vm503_vm4, %v964_v48, 0.0  ;;  %v167_v47 = vunpack.c.l.bf16 %v1053_v6 }
 0x26e   :  { %568 = vadd.xlane.f32.xlu1 %v567_v49  ;;  %v183_v49 = vunpack.c.l.bf16 %v1096_v16 }
 0x2e8   :  { %v560_v51 = vpop.xlane.xlu0 %559 }
 0x2e9   :  { %965 = vrcp.f32 %v560_v51 }
 0x2ec   :  { %v554_v52 = vpop.xlane.xlu0 %553  ;;  %v563_v53 = vpop.xlane.xlu1 %562 }
 0x2ed   :  { %967 = vrcp.f32 %v554_v52 }
 0x2ee   :  { %969 = vrcp.f32 %v563_v53 }
 0x2f0   :  { %v557_v57 = vpop.xlane.xlu1 %556 }
 0x2f1   :  { %v566_v55 = vpop.xlane.xlu0 %565  ;;  %971 = vrcp.f32 %v557_v57 }
 0x2f3   :  { %v966_v54 = vpop.eup %965 }
 0x2f4   :  { %v586_v56 = vmul.f32 %v966_v54, %v950_v7 }
 0x2f5   :  { %v572_v58 = vpop.xlane.xlu0 %571 }
 0x2f6   :  { %604 = vperm.xlu1 %910, %v586_v56   ;;  %973 = vrcp.f32 %v572_v58 }
 0x2f7   :  { %v968_v59 = vpop.eup %967  ;;  %v575_v62 = vpop.xlane.xlu1 %574  ;;  %975 = vrcp.f32 %v566_v55 }
 0x2f8   :  { %v584_v60 = vmul.f32 %v968_v59, %v952_v10  ;;  %v970_v63 = vpop.eup %969  ;;  %v170_v59 = vunpack.c.h.bf16 %v1061_v8 }
 0x2f9   :  { %v587_v2 = vmul.f32 %v970_v63, %v954_v21 }
 0x2fa   :  { %594 = vperm.xlu0 %913, %v584_v60   ;;  %911 = vset.pattern.permute.xlu1 %v982_v61 }
 0x2fb   :  { %649 = vperm.xlu1 %911, %v586_v56   ;;  %v972_v4 = vpop.eup %971  ;;  %v569_v1 = vpop.xlane.xlu1 %568 }
 0x2fc   :  { %977 = vrcp.f32 %v569_v1  ;;  %v585_v3 = vmul.f32 %v972_v4, %v956_v27 }
 0x2fd   :  { %979 = vrcp.f32 %v575_v62 }
 0x2fe   :  { %915 = vset.pattern.permute.xlu0 %v983_v0 }
 0x2ff   :  { %689 = vperm.xlu0 %915, %v584_v60   ;;  %912 = vset.pattern.permute.xlu1 %v983_v0 }
 0x300   :  { %697 = vperm.xlu1 %912, %v586_v56   ;;  %v974_v7 = vpop.eup %973 }
 0x301   :  { %v590_v11 = vmul.f32 %v974_v7, %v960_v37  ;;  %v976_v12 = vpop.eup %975 }
 0x302   :  { %v588_v13 = vmul.f32 %v976_v12, %v1185_v33  ;;  %v185_v33 = vunpack.c.l.bf16 %v1106_v17 }
 0x303   :  { %701 = vperm.xlu0 %915, %v587_v2  }
 0x304   :  { %914 = vset.pattern.permute.xlu1 %v982_v61 }
 0x305   :  { %641 = vperm.xlu1 %914, %v584_v60   ;;  %v186_v60 = vunpack.c.h.bf16 %v1106_v17 }
 0x306   :  { %v978_v5 = vpop.eup %977 }
 0x307   :  { %919 = vset.pattern.permute.xlu0 %v982_v61  ;;  %v589_v10 = vmul.f32 %v978_v5, %v964_v48  ;;  %v980_v14 = vpop.eup %979 }
 0x308   :  { %645 = vperm.xlu0 %919, %v585_v3   ;;  %v591_v20 = vmul.f32 %v980_v14, %v1191_v42  ;;  %v187_v14 = vunpack.c.l.bf16 %v1111_v18 }
 0x309   :  { %916 = vset.pattern.permute.xlu1 %v981_v50 }
 0x30a   :  { %609 = vperm.xlu1 %916, %v587_v2  }
 0x30c   :  { %665 = vperm.xlu0 %919, %v590_v11  }
 0x30e   :  { %917 = vset.pattern.permute.xlu1 %v982_v61 }
 0x30f   :  { %653 = vperm.xlu1 %917, %v587_v2  }
 0x310   :  { %657 = vperm.xlu0 %919, %v588_v13  }
 0x313   :  { %918 = vset.pattern.permute.xlu1 %v981_v50 }
 0x314   :  { %927 = vset.pattern.permute.xlu0 %v983_v0  ;;  %599 = vperm.xlu1 %918, %v585_v3  }
 0x315   :  { %709 = vperm.xlu0 %927, %v589_v10  }
 0x318   :  { %920 = vset.pattern.permute.xlu1 %v983_v0 }
 0x319   :  { %693 = vperm.xlu1 %920, %v585_v3   ;;  %717 = vperm.xlu0 %927, %v591_v20   ;;  %v184_v3 = vunpack.c.h.bf16 %v1096_v16  ;;  %v171_v16 = vunpack.c.l.bf16 %v1066_v9 }
 0x31d   :  { %921 = vset.pattern.permute.xlu1 %v981_v50 }
 0x31e   :  { %624 = vperm.xlu1 %921, %v590_v11  }
 0x322   :  { %614 = vperm.xlu1 %921, %v588_v13  }
 0x326   :  { %922 = vset.pattern.permute.xlu1 %v983_v0 }
 0x327   :  { %705 = vperm.xlu1 %922, %v588_v13  }
 0x32b   :  { %923 = vset.pattern.permute.xlu1 %v981_v50 }
 0x32c   :  { %629 = vperm.xlu1 %923, %v591_v20  }
 0x330   :  { %924 = vset.pattern.permute.xlu1 %v982_v61 }
 0x331   :  { %669 = vperm.xlu1 %924, %v591_v20  }
 0x335   :  { %925 = vset.pattern.permute.xlu1 %v981_v50 }
 0x336   :  { %619 = vperm.xlu1 %925, %v589_v10  }
 0x33a   :  { %926 = vset.pattern.permute.xlu1 %v982_v61 }
 0x33b   :  { %661 = vperm.xlu1 %926, %v589_v10  }
 0x33f   :  { %928 = vset.pattern.permute.xlu1 %v983_v0  ;;  %v168_v0 = vunpack.c.h.bf16 %v1053_v6 }
 0x340   :  { %713 = vperm.xlu1 %928, %v590_v11  }
 0x375   :  { %v605_v21 = vpop.permute.xlu1 %604 }
 0x376   :  { %v634_v34 = vmul.f32 %v605_v21, %v169_v22 }
 0x379   :  { %v595_v35 = vpop.permute.xlu0 %594 }
 0x37a   :  { %v650_v24 = vpop.permute.xlu1 %649  ;;  %v632_v53 = vmul.f32 %v595_v35, %v167_v47 }
 0x37b   :  { %v674_v27 = vmul.f32 %v650_v24, %v153_v32 }
 0x37d   :  { %v682_v39 = vadd.f32 %v674_v27, %v634_v34 }
 0x37e   :  { %v690_v50 = vpop.permute.xlu0 %689 }
 0x37f   :  { %v698_v37 = vpop.permute.xlu1 %697  ;;  %v720_v32 = vmul.f32 %v690_v50, %v183_v49 }
 0x380   :  { %v722_v42 = vmul.f32 %v698_v37, %v185_v33  ;;  %v174_v37 = vunpack.c.h.bf16 %v1091_v15 }
 0x382   :  { %v730_v48 = vadd.f32 %v722_v42, %v682_v39  ;;  %v702_v23 = vpop.permute.xlu0 %701  ;;  %v190_v39 = vunpack.c.h.bf16 %v1120_v19 }
 0x383   :  { %v723_v62 = vmul.f32 %v702_v23, %v186_v60 }
 0x384   :  { %v821_v51 = vpack.c.bf16 %v730_v48, %v730_v48  ;;  %v642_v52 = vpop.permute.xlu1 %641 }
 0x385   :  { %v672_v25 = vmul.f32 %v642_v52, %v151_v30 }
 0x386   :  { %771 = vst.msk [vmem:[%s1278_s9 + $0x8] sm:$0xf] %vm768_vm5, %v821_v51 }
 0x387   :  { %v680_v54 = vadd.f32 %v672_v25, %v632_v53  ;;  %v646_v8 = vpop.permute.xlu0 %645  ;;  %v172_v53 = vunpack.c.h.bf16 %v1066_v9  ;;  %v173_v25 = vunpack.c.l.bf16 %v1091_v15 }
 0x388   :  { %v673_v7 = vmul.f32 %v646_v8, %v152_v31 }
 0x389   :  { %v728_v55 = vadd.f32 %v720_v32, %v680_v54  ;;  %v610_v56 = vpop.permute.xlu1 %609  ;;  %v188_v32 = vunpack.c.h.bf16 %v1111_v18 }
 0x38a   :  { %v635_v58 = vmul.f32 %v610_v56, %v170_v59  ;;  %v189_v56 = vunpack.c.l.bf16 %v1120_v19 }
 0x38b   :  { %v819_v57 = vpack.c.bf16 %v728_v55, %v728_v55  ;;  %v666_v6 = vpop.permute.xlu0 %665 }
 0x38c   :  { %v678_v9 = vmul.f32 %v666_v6, %v157_v40 }
 0x38d   :  { %769 = vst.msk [vmem:[%s1278_s9] sm:$0xf] %vm768_vm5, %v819_v57 }
 0x38e   :  { %v654_v30 = vpop.permute.xlu1 %653 }
 0x38f   :  { %v675_v61 = vmul.f32 %v654_v30, %v154_v29  ;;  %v658_v31 = vpop.permute.xlu0 %657 }
 0x390   :  { %v676_v20 = vmul.f32 %v658_v31, %v155_v43 }
 0x391   :  { %v683_v63 = vadd.f32 %v675_v61, %v635_v58 }
 0x393   :  { %v731_v2 = vadd.f32 %v723_v62, %v683_v63  ;;  %v600_v4 = vpop.permute.xlu1 %599 }
 0x394   :  { %v633_v17 = vmul.f32 %v600_v4, %v168_v0  ;;  %v710_v33 = vpop.permute.xlu0 %709 }
 0x395   :  { %v822_v1 = vpack.c.bf16 %v731_v2, %v731_v2  ;;  %v725_v57 = vmul.f32 %v710_v33, %v188_v32 }
 0x396   :  { %v681_v29 = vadd.f32 %v673_v7, %v633_v17 }
 0x397   :  { %772 = vst.msk [vmem:[%s1278_s9 + $0xc] sm:$0xf] %vm768_vm5, %v822_v1 }
 0x398   :  { %v694_v26 = vpop.permute.xlu1 %693  ;;  %v718_v42 = vpop.permute.xlu0 %717 }
 0x399   :  { %v721_v11 = vmul.f32 %v694_v26, %v184_v3  ;;  %v727_v48 = vmul.f32 %v718_v42, %v190_v39 }
 0x39b   :  { %v729_v12 = vadd.f32 %v721_v11, %v681_v29 }
 0x39d   :  { %v820_v13 = vpack.c.bf16 %v729_v12, %v729_v12  ;;  %v625_v5 = vpop.permute.xlu1 %624 }
 0x39f   :  { %770 = vst.msk [vmem:[%s1278_s9 + $0x4] sm:$0xf] %vm768_vm5, %v820_v13 }
 0x3a1   :  { %v615_v28 = vpop.permute.xlu1 %614 }
 0x3a2   :  { %v636_v10 = vmul.f32 %v615_v28, %v171_v16 }
 0x3a4   :  { %v684_v22 = vadd.f32 %v676_v20, %v636_v10 }
 0x3a6   :  { %v706_v21 = vpop.permute.xlu1 %705 }
 0x3a7   :  { %v724_v24 = vmul.f32 %v706_v21, %v187_v14 }
 0x3a9   :  { %v732_v27 = vadd.f32 %v724_v24, %v684_v22 }
 0x3ab   :  { %v823_v34 = vpack.c.bf16 %v732_v27, %v732_v27  ;;  %v630_v35 = vpop.permute.xlu1 %629 }
 0x3ac   :  { %v639_v38 = vmul.f32 %v630_v35, %v174_v37 }
 0x3ad   :  { %773 = vst.msk [vmem:[%s1278_s9 + $0x10] sm:$0xf] %vm768_vm5, %v823_v34 }
 0x3b0   :  { %v670_v47 = vpop.permute.xlu1 %669 }
 0x3b1   :  { %v679_v43 = vmul.f32 %v670_v47, %v158_v45  ;;  %v638_v45 = vmul.f32 %v625_v5, %v173_v25 }
 0x3b3   :  { %v687_v49 = vadd.f32 %v679_v43, %v639_v38  ;;  %v686_v60 = vadd.f32 %v678_v9, %v638_v45 }
 0x3b5   :  { %v735_v50 = vadd.f32 %v727_v48, %v687_v49  ;;  %v620_v51 = vpop.permute.xlu1 %619 }
 0x3b6   :  { %v637_v55 = vmul.f32 %v620_v51, %v172_v53 }
 0x3b7   :  { %v826_v52 = vpack.c.bf16 %v735_v50, %v735_v50 }
 0x3b9   :  { %776 = vst.msk [vmem:[%s1278_s9 + $0x1c] sm:$0xf] %vm768_vm5, %v826_v52 }
 0x3ba   :  { %v662_v54 = vpop.permute.xlu1 %661 }
 0x3bb   :  { %v677_v41 = vmul.f32 %v662_v54, %v156_v46 }
 0x3bd   :  { %v685_v59 = vadd.f32 %v677_v41, %v637_v55 }
 0x3bf   :  { %v733_v15 = vadd.f32 %v725_v57, %v685_v59  ;;  %v714_v18 = vpop.permute.xlu1 %713 }
 0x3c0   :  { %v726_v23 = vmul.f32 %v714_v18, %v189_v56 }
 0x3c1   :  { %v824_v30 = vpack.c.bf16 %v733_v15, %v733_v15 }
 0x3c2   :  { %v734_v58 = vadd.f32 %v726_v23, %v686_v60 }
 0x3c3   :  { %774 = vst.msk [vmem:[%s1278_s9 + $0x14] sm:$0xf] %vm768_vm5, %v824_v30 }
 0x3c4   :  { %v825_v44 = vpack.c.bf16 %v734_v58, %v734_v58 }
 0x3c6   :  { %775 = vst.msk [vmem:[%s1278_s9 + $0x18] sm:$0xf] %vm768_vm5, %v825_v44 }

// kernel: rpvnet_forward.21
= control target key start
LH: loop header
LB: loop body
LE: loop exit
PB: predicated region body
PF: predicated region fallthrough
CT: control target
= control target key end

     0   :  { %vm344_vm0 = vcmask 1043456   ;;  %vm247_vm1 = vcmask 64512   ;;  %vm957_vm2 = vcmask 125952   ;;  %s1830_s1 = inlined_call_operand.vmem [shape: bf16[8,16], index: 1, kind: input, shape index: {}]   ;;  %s1831_s0 = inlined_call_operand.vmem [shape: bf16[512,8], index: 0, kind: input, shape index: {}]   ;;  %s1832_s2 = inlined_call_operand.vmem [shape: f32[1,16], index: 2, kind: input, shape index: {}]   ;;  %s1833_s3 = inlined_call_operand.vmem [shape: bf16[512,16], index: 3, kind: output, shape index: {}]  }
   0x1   :  { %v79_v0 = vld [vmem:[%s1830_s1] sm:$0xf]  ;;  %v1324_v4 = vld [vmem:[%s1831_s0 + $0x8] sm:$0xff]   ;;  %v1326_v6 = vld [vmem:[%s1831_s0 + $0x10] sm:$0xff]  }
   0x2   :  { %1320 = vmatprep.subr.msk.bf16.mxu0 %vm344_vm0, %v79_v0  ;;  %1321 = vmatprep.subr.msk.bf16.mxu1 %vm344_vm0, %v79_v0  ;;  %v346_v1 = vsel %vm344_vm0, %v79_v0, 0  ;;  %v1322_v2 = vld [vmem:[%s1831_s0] sm:$0xff]   ;;  %v1325_v5 = vld [vmem:[%s1831_s0 + $0x88] sm:$0xff]   ;;  %v1327_v7 = vld [vmem:[%s1831_s0 + $0x90] sm:$0xff]  }
   0x3   :  { %1253 = vmatpush3.bf16.msra.mxu0 %v346_v1  ;;  %1319 = vmatpush3.bf16.msra.mxu1 %v346_v1  ;;  %v1323_v3 = vld [vmem:[%s1831_s0 + $0x80] sm:$0xff]   ;;  %v1328_v8 = vld [vmem:[%s1831_s0 + $0x18] sm:$0xff]   ;;  %v1332_v12 = vld [vmem:[%s1831_s0 + $0x28] sm:$0xff]  }
   0x4   :  { %1254 = vmatprep.mubr.msk.bf16.mxu0 %vm247_vm1, %v1322_v2  ;;  %1286 = vmatprep.mubr.msk.bf16.mxu1 %vm247_vm1, %v1323_v3  ;;  %v1329_v9 = vld [vmem:[%s1831_s0 + $0x98] sm:$0xff]   ;;  %v1330_v10 = vld [vmem:[%s1831_s0 + $0x20] sm:$0xff]   ;;  %v1333_v13 = vld [vmem:[%s1831_s0 + $0xa8] sm:$0xff]  }
   0x5   :  { %v1331_v11 = vld [vmem:[%s1831_s0 + $0xa0] sm:$0xff]   ;;  %v1334_v14 = vld [vmem:[%s1831_s0 + $0x30] sm:$0xff]   ;;  %v1336_v16 = vld [vmem:[%s1831_s0 + $0x38] sm:$0xff]  }
   0x6   :  { %1255 = vmatmul.mubr.msk.bf16.vlgmr.msra.gmra.mrb[0].mxu0 %vm247_vm1, %v1324_v4  ;;  %1287 = vmatmul.mubr.msk.bf16.vlgmr.msra.gmra.mrb[0].mxu1 %vm247_vm1, %v1325_v5  ;;  %v1335_v15 = vld [vmem:[%s1831_s0 + $0xb0] sm:$0xff]   ;;  %v1337_v17 = vld [vmem:[%s1831_s0 + $0xb8] sm:$0xff]   ;;  %v1338_v18 = vld [vmem:[%s1831_s0 + $0x40] sm:$0xff]  }
   0x7   :  { %1258 = vmatprep.mubr.msk.bf16.mxu0 %vm247_vm1, %v1326_v6  ;;  %1290 = vmatprep.mubr.msk.bf16.mxu1 %vm247_vm1, %v1327_v7  ;;  %v1339_v19 = vld [vmem:[%s1831_s0 + $0xc0] sm:$0xff]   ;;  %v1340_v20 = vld [vmem:[%s1831_s0 + $0x48] sm:$0xff]   ;;  %v1342_v22 = vld [vmem:[%s1831_s0 + $0x50] sm:$0xff]  }
   0x8   :  { %v1341_v21 = vld [vmem:[%s1831_s0 + $0xc8] sm:$0xff]   ;;  %v1343_v23 = vld [vmem:[%s1831_s0 + $0xd0] sm:$0xff]   ;;  %v1344_v24 = vld [vmem:[%s1831_s0 + $0x58] sm:$0xff]  }
   0x9   :  { %v1345_v25 = vld [vmem:[%s1831_s0 + $0xd8] sm:$0xff]   ;;  %v1346_v26 = vld [vmem:[%s1831_s0 + $0x60] sm:$0xff]   ;;  %v1348_v28 = vld [vmem:[%s1831_s0 + $0x68] sm:$0xff]  }
   0xa   :  { %v1347_v27 = vld [vmem:[%s1831_s0 + $0xe0] sm:$0xff]   ;;  %v1349_v29 = vld [vmem:[%s1831_s0 + $0xe8] sm:$0xff]   ;;  %v1350_v30 = vld [vmem:[%s1831_s0 + $0x70] sm:$0xff]  }
   0xb   :  { %v1351_v31 = vld [vmem:[%s1831_s0 + $0xf0] sm:$0xff]   ;;  %v1352_v32 = vld [vmem:[%s1831_s0 + $0x78] sm:$0xff]   ;;  %v1508_v34 = vld [vmem:[%s1832_s2] ss:$0 sm:$0xff] }
   0xc   :  { %v1353_v33 = vld [vmem:[%s1831_s0 + $0xf8] sm:$0xff]  }
   0xe   :  { %1259 = vmatmul.mubr.msk.bf16.gmra.mrb[4].mxu0 %vm247_vm1, %v1328_v8  ;;  %1291 = vmatmul.mubr.msk.bf16.gmra.mrb[4].mxu1 %vm247_vm1, %v1329_v9 }
   0xf   :  { %1262 = vmatprep.mubr.msk.bf16.mxu0 %vm247_vm1, %v1330_v10  ;;  %1294 = vmatprep.mubr.msk.bf16.mxu1 %vm247_vm1, %v1331_v11 }
  0x16   :  { %1263 = vmatmul.mubr.msk.bf16.gmra.mrb[8].mxu0 %vm247_vm1, %v1332_v12  ;;  %1295 = vmatmul.mubr.msk.bf16.gmra.mrb[8].mxu1 %vm247_vm1, %v1333_v13 }
  0x17   :  { %1266 = vmatprep.mubr.msk.bf16.mxu0 %vm247_vm1, %v1334_v14  ;;  %1298 = vmatprep.mubr.msk.bf16.mxu1 %vm247_vm1, %v1335_v15 }
  0x1e   :  { %1267 = vmatmul.mubr.msk.bf16.gmra.mrb[12].mxu0 %vm247_vm1, %v1336_v16  ;;  %1299 = vmatmul.mubr.msk.bf16.gmra.mrb[12].mxu1 %vm247_vm1, %v1337_v17 }
  0x1f   :  { %1270 = vmatprep.mubr.msk.bf16.mxu0 %vm247_vm1, %v1338_v18  ;;  %1302 = vmatprep.mubr.msk.bf16.mxu1 %vm247_vm1, %v1339_v19 }
  0x26   :  { %1271 = vmatmul.mubr.msk.bf16.gmra.mrb[16].mxu0 %vm247_vm1, %v1340_v20  ;;  %1303 = vmatmul.mubr.msk.bf16.gmra.mrb[16].mxu1 %vm247_vm1, %v1341_v21 }
  0x27   :  { %1274 = vmatprep.mubr.msk.bf16.mxu0 %vm247_vm1, %v1342_v22  ;;  %1306 = vmatprep.mubr.msk.bf16.mxu1 %vm247_vm1, %v1343_v23 }
  0x2e   :  { %1275 = vmatmul.mubr.msk.bf16.gmra.mrb[20].mxu0 %vm247_vm1, %v1344_v24  ;;  %1307 = vmatmul.mubr.msk.bf16.gmra.mrb[20].mxu1 %vm247_vm1, %v1345_v25 }
  0x2f   :  { %1278 = vmatprep.mubr.msk.bf16.mxu0 %vm247_vm1, %v1346_v26  ;;  %1310 = vmatprep.mubr.msk.bf16.mxu1 %vm247_vm1, %v1347_v27 }
  0x36   :  { %1279 = vmatmul.mubr.msk.bf16.gmra.mrb[24].mxu0 %vm247_vm1, %v1348_v28  ;;  %1311 = vmatmul.mubr.msk.bf16.gmra.mrb[24].mxu1 %vm247_vm1, %v1349_v29 }
  0x37   :  { %1282 = vmatprep.mubr.msk.bf16.mxu0 %vm247_vm1, %v1350_v30  ;;  %1314 = vmatprep.mubr.msk.bf16.mxu1 %vm247_vm1, %v1351_v31 }
  0x3e   :  { %1283 = vmatmul.mubr.msk.bf16.gmra.mrb[28].mxu0 %vm247_vm1, %v1352_v32  ;;  %1315 = vmatmul.mubr.msk.bf16.gmra.mrb[28].mxu1 %vm247_vm1, %v1353_v33 }
  0xd9   :  { %v1256_v35 = vpop.f32.mrb[0].mxu0  ;;  %v1288_v37 = vpop.f32.mrb[0].mxu1 }
  0xda   :  { %v391_v36 = vadd.f32 %v1256_v35, %v1508_v34  ;;  %v382_v38 = vpop.f32.mrb[1].mxu0  ;;  %v519_v39 = vadd.f32 %v1288_v37, %v1508_v34  ;;  %v510_v41 = vpop.f32.mrb[1].mxu1 }
  0xdb   :  { %v383_v40 = vadd.f32 %v1508_v34, %v382_v38  ;;  %v1257_v42 = vpop.f32.mrb[2].mxu0  ;;  %v511_v44 = vadd.f32 %v1508_v34, %v510_v41  ;;  %v1289_v46 = vpop.f32.mrb[2].mxu1 }
  0xdc   :  { %v639_v43 = vmax.f32 %v391_v36, 0.0  ;;  %v394_v45 = vadd.f32 %v1257_v42, %v1508_v34  ;;  %v385_v47 = vpop.f32.mrb[3].mxu0  ;;  %v671_v48 = vmax.f32 %v519_v39, 0.0  ;;  %v522_v50 = vadd.f32 %v1289_v46, %v1508_v34  ;;  %v513_v52 = vpop.f32.mrb[3].mxu1 }
  0xdd   :  { %v637_v49 = vmax.f32 %v383_v40, 0.0  ;;  %v386_v51 = vadd.f32 %v1508_v34, %v385_v47  ;;  %v669_v54 = vmax.f32 %v511_v44, 0.0  ;;  %v514_v56 = vadd.f32 %v1508_v34, %v513_v52 }
  0xde   :  { %v1157_v53 = vpack.c.bf16 %v639_v43, %v639_v43  ;;  %v640_v55 = vmax.f32 %v394_v45, 0.0  ;;  %v1189_v57 = vpack.c.bf16 %v671_v48, %v671_v48  ;;  %v672_v59 = vmax.f32 %v522_v50, 0.0 }
  0xdf   :  { %v1155_v58 = vpack.c.bf16 %v637_v49, %v637_v49  ;;  %v638_v60 = vmax.f32 %v386_v51, 0.0  ;;  %v1187_v61 = vpack.c.bf16 %v669_v54, %v669_v54  ;;  %v670_v63 = vmax.f32 %v514_v56, 0.0 }
  0xe0   :  { %960 = vst.msk [vmem:[%s1833_s3 + $0x8] sm:$0xf] %vm957_vm2, %v1157_v53  ;;  %v1158_v62 = vpack.c.bf16 %v640_v55, %v640_v55  ;;  %992 = vst.msk [vmem:[%s1833_s3 + $0x88] sm:$0xf] %vm957_vm2, %v1189_v57  ;;  %v1190_v0 = vpack.c.bf16 %v672_v59, %v672_v59 }
  0xe1   :  { %958 = vst.msk [vmem:[%s1833_s3] sm:$0xf] %vm957_vm2, %v1155_v58  ;;  %v1156_v1 = vpack.c.bf16 %v638_v60, %v638_v60  ;;  %v1260_v2 = vpop.f32.mrb[4].mxu0  ;;  %990 = vst.msk [vmem:[%s1833_s3 + $0x80] sm:$0xf] %vm957_vm2, %v1187_v61  ;;  %v1188_v3 = vpack.c.bf16 %v670_v63, %v670_v63  ;;  %v1292_v5 = vpop.f32.mrb[4].mxu1 }
  0xe2   :  { %961 = vst.msk [vmem:[%s1833_s3 + $0xc] sm:$0xf] %vm957_vm2, %v1158_v62  ;;  %v407_v4 = vadd.f32 %v1260_v2, %v1508_v34  ;;  %v398_v6 = vpop.f32.mrb[5].mxu0  ;;  %993 = vst.msk [vmem:[%s1833_s3 + $0x8c] sm:$0xf] %vm957_vm2, %v1190_v0  ;;  %v535_v7 = vadd.f32 %v1292_v5, %v1508_v34  ;;  %v526_v9 = vpop.f32.mrb[5].mxu1 }
  0xe3   :  { %959 = vst.msk [vmem:[%s1833_s3 + $0x4] sm:$0xf] %vm957_vm2, %v1156_v1  ;;  %v399_v8 = vadd.f32 %v1508_v34, %v398_v6  ;;  %v1261_v10 = vpop.f32.mrb[6].mxu0  ;;  %991 = vst.msk [vmem:[%s1833_s3 + $0x84] sm:$0xf] %vm957_vm2, %v1188_v3  ;;  %v527_v12 = vadd.f32 %v1508_v34, %v526_v9  ;;  %v1293_v14 = vpop.f32.mrb[6].mxu1 }
  0xe4   :  { %v643_v11 = vmax.f32 %v407_v4, 0.0  ;;  %v410_v13 = vadd.f32 %v1261_v10, %v1508_v34  ;;  %v401_v15 = vpop.f32.mrb[7].mxu0  ;;  %v675_v16 = vmax.f32 %v535_v7, 0.0  ;;  %v538_v18 = vadd.f32 %v1293_v14, %v1508_v34  ;;  %v529_v20 = vpop.f32.mrb[7].mxu1 }
  0xe5   :  { %v641_v17 = vmax.f32 %v399_v8, 0.0  ;;  %v402_v19 = vadd.f32 %v1508_v34, %v401_v15  ;;  %v673_v22 = vmax.f32 %v527_v12, 0.0  ;;  %v530_v24 = vadd.f32 %v1508_v34, %v529_v20 }
  0xe6   :  { %v1161_v21 = vpack.c.bf16 %v643_v11, %v643_v11  ;;  %v644_v23 = vmax.f32 %v410_v13, 0.0  ;;  %v1193_v25 = vpack.c.bf16 %v675_v16, %v675_v16  ;;  %v676_v27 = vmax.f32 %v538_v18, 0.0 }
  0xe7   :  { %v1159_v26 = vpack.c.bf16 %v641_v17, %v641_v17  ;;  %v642_v28 = vmax.f32 %v402_v19, 0.0  ;;  %v1191_v29 = vpack.c.bf16 %v673_v22, %v673_v22  ;;  %v674_v31 = vmax.f32 %v530_v24, 0.0 }
  0xe8   :  { %964 = vst.msk [vmem:[%s1833_s3 + $0x18] sm:$0xf] %vm957_vm2, %v1161_v21  ;;  %v1162_v30 = vpack.c.bf16 %v644_v23, %v644_v23  ;;  %996 = vst.msk [vmem:[%s1833_s3 + $0x98] sm:$0xf] %vm957_vm2, %v1193_v25  ;;  %v1194_v32 = vpack.c.bf16 %v676_v27, %v676_v27 }
  0xe9   :  { %962 = vst.msk [vmem:[%s1833_s3 + $0x10] sm:$0xf] %vm957_vm2, %v1159_v26  ;;  %v1160_v33 = vpack.c.bf16 %v642_v28, %v642_v28  ;;  %v1264_v35 = vpop.f32.mrb[8].mxu0  ;;  %994 = vst.msk [vmem:[%s1833_s3 + $0x90] sm:$0xf] %vm957_vm2, %v1191_v29  ;;  %v1192_v36 = vpack.c.bf16 %v674_v31, %v674_v31  ;;  %v1296_v38 = vpop.f32.mrb[8].mxu1 }
  0xea   :  { %965 = vst.msk [vmem:[%s1833_s3 + $0x1c] sm:$0xf] %vm957_vm2, %v1162_v30  ;;  %v423_v37 = vadd.f32 %v1264_v35, %v1508_v34  ;;  %v414_v39 = vpop.f32.mrb[9].mxu0  ;;  %997 = vst.msk [vmem:[%s1833_s3 + $0x9c] sm:$0xf] %vm957_vm2, %v1194_v32  ;;  %v551_v40 = vadd.f32 %v1296_v38, %v1508_v34  ;;  %v542_v42 = vpop.f32.mrb[9].mxu1 }
  0xeb   :  { %963 = vst.msk [vmem:[%s1833_s3 + $0x14] sm:$0xf] %vm957_vm2, %v1160_v33  ;;  %v415_v41 = vadd.f32 %v1508_v34, %v414_v39  ;;  %v1265_v43 = vpop.f32.mrb[10].mxu0  ;;  %995 = vst.msk [vmem:[%s1833_s3 + $0x94] sm:$0xf] %vm957_vm2, %v1192_v36  ;;  %v543_v45 = vadd.f32 %v1508_v34, %v542_v42  ;;  %v1297_v47 = vpop.f32.mrb[10].mxu1 }
  0xec   :  { %v647_v44 = vmax.f32 %v423_v37, 0.0  ;;  %v426_v46 = vadd.f32 %v1265_v43, %v1508_v34  ;;  %v417_v48 = vpop.f32.mrb[11].mxu0  ;;  %v679_v49 = vmax.f32 %v551_v40, 0.0  ;;  %v554_v51 = vadd.f32 %v1297_v47, %v1508_v34  ;;  %v545_v53 = vpop.f32.mrb[11].mxu1 }
  0xed   :  { %v645_v50 = vmax.f32 %v415_v41, 0.0  ;;  %v418_v52 = vadd.f32 %v1508_v34, %v417_v48  ;;  %v677_v55 = vmax.f32 %v543_v45, 0.0  ;;  %v546_v57 = vadd.f32 %v1508_v34, %v545_v53 }
  0xee   :  { %v1165_v54 = vpack.c.bf16 %v647_v44, %v647_v44  ;;  %v648_v56 = vmax.f32 %v426_v46, 0.0  ;;  %v1197_v58 = vpack.c.bf16 %v679_v49, %v679_v49  ;;  %v680_v60 = vmax.f32 %v554_v51, 0.0 }
  0xef   :  { %v1163_v59 = vpack.c.bf16 %v645_v50, %v645_v50  ;;  %v646_v61 = vmax.f32 %v418_v52, 0.0  ;;  %v1195_v62 = vpack.c.bf16 %v677_v55, %v677_v55  ;;  %v678_v0 = vmax.f32 %v546_v57, 0.0 }
  0xf0   :  { %968 = vst.msk [vmem:[%s1833_s3 + $0x28] sm:$0xf] %vm957_vm2, %v1165_v54  ;;  %v1166_v63 = vpack.c.bf16 %v648_v56, %v648_v56  ;;  %1000 = vst.msk [vmem:[%s1833_s3 + $0xa8] sm:$0xf] %vm957_vm2, %v1197_v58  ;;  %v1198_v1 = vpack.c.bf16 %v680_v60, %v680_v60 }
  0xf1   :  { %966 = vst.msk [vmem:[%s1833_s3 + $0x20] sm:$0xf] %vm957_vm2, %v1163_v59  ;;  %v1164_v2 = vpack.c.bf16 %v646_v61, %v646_v61  ;;  %v1268_v3 = vpop.f32.mrb[12].mxu0  ;;  %998 = vst.msk [vmem:[%s1833_s3 + $0xa0] sm:$0xf] %vm957_vm2, %v1195_v62  ;;  %v1196_v4 = vpack.c.bf16 %v678_v0, %v678_v0  ;;  %v1300_v6 = vpop.f32.mrb[12].mxu1 }
  0xf2   :  { %969 = vst.msk [vmem:[%s1833_s3 + $0x2c] sm:$0xf] %vm957_vm2, %v1166_v63  ;;  %v439_v5 = vadd.f32 %v1268_v3, %v1508_v34  ;;  %v430_v7 = vpop.f32.mrb[13].mxu0  ;;  %1001 = vst.msk [vmem:[%s1833_s3 + $0xac] sm:$0xf] %vm957_vm2, %v1198_v1  ;;  %v567_v8 = vadd.f32 %v1300_v6, %v1508_v34  ;;  %v558_v10 = vpop.f32.mrb[13].mxu1 }
  0xf3   :  { %967 = vst.msk [vmem:[%s1833_s3 + $0x24] sm:$0xf] %vm957_vm2, %v1164_v2  ;;  %v431_v9 = vadd.f32 %v1508_v34, %v430_v7  ;;  %v1269_v11 = vpop.f32.mrb[14].mxu0  ;;  %999 = vst.msk [vmem:[%s1833_s3 + $0xa4] sm:$0xf] %vm957_vm2, %v1196_v4  ;;  %v559_v13 = vadd.f32 %v1508_v34, %v558_v10  ;;  %v1301_v15 = vpop.f32.mrb[14].mxu1 }
  0xf4   :  { %v651_v12 = vmax.f32 %v439_v5, 0.0  ;;  %v442_v14 = vadd.f32 %v1269_v11, %v1508_v34  ;;  %v433_v16 = vpop.f32.mrb[15].mxu0  ;;  %v683_v17 = vmax.f32 %v567_v8, 0.0  ;;  %v570_v19 = vadd.f32 %v1301_v15, %v1508_v34  ;;  %v561_v21 = vpop.f32.mrb[15].mxu1 }
  0xf5   :  { %v649_v18 = vmax.f32 %v431_v9, 0.0  ;;  %v434_v20 = vadd.f32 %v1508_v34, %v433_v16  ;;  %v681_v23 = vmax.f32 %v559_v13, 0.0  ;;  %v562_v25 = vadd.f32 %v1508_v34, %v561_v21 }
  0xf6   :  { %v1169_v22 = vpack.c.bf16 %v651_v12, %v651_v12  ;;  %v652_v24 = vmax.f32 %v442_v14, 0.0  ;;  %v1201_v26 = vpack.c.bf16 %v683_v17, %v683_v17  ;;  %v684_v28 = vmax.f32 %v570_v19, 0.0 }
  0xf7   :  { %v1167_v27 = vpack.c.bf16 %v649_v18, %v649_v18  ;;  %v650_v29 = vmax.f32 %v434_v20, 0.0  ;;  %v1199_v30 = vpack.c.bf16 %v681_v23, %v681_v23  ;;  %v682_v32 = vmax.f32 %v562_v25, 0.0 }
  0xf8   :  { %972 = vst.msk [vmem:[%s1833_s3 + $0x38] sm:$0xf] %vm957_vm2, %v1169_v22  ;;  %v1170_v31 = vpack.c.bf16 %v652_v24, %v652_v24  ;;  %1004 = vst.msk [vmem:[%s1833_s3 + $0xb8] sm:$0xf] %vm957_vm2, %v1201_v26  ;;  %v1202_v33 = vpack.c.bf16 %v684_v28, %v684_v28 }
  0xf9   :  { %970 = vst.msk [vmem:[%s1833_s3 + $0x30] sm:$0xf] %vm957_vm2, %v1167_v27  ;;  %v1168_v35 = vpack.c.bf16 %v650_v29, %v650_v29  ;;  %v1272_v36 = vpop.f32.mrb[16].mxu0  ;;  %1002 = vst.msk [vmem:[%s1833_s3 + $0xb0] sm:$0xf] %vm957_vm2, %v1199_v30  ;;  %v1200_v37 = vpack.c.bf16 %v682_v32, %v682_v32  ;;  %v1304_v39 = vpop.f32.mrb[16].mxu1 }
  0xfa   :  { %973 = vst.msk [vmem:[%s1833_s3 + $0x3c] sm:$0xf] %vm957_vm2, %v1170_v31  ;;  %v455_v38 = vadd.f32 %v1272_v36, %v1508_v34  ;;  %v446_v40 = vpop.f32.mrb[17].mxu0  ;;  %1005 = vst.msk [vmem:[%s1833_s3 + $0xbc] sm:$0xf] %vm957_vm2, %v1202_v33  ;;  %v583_v41 = vadd.f32 %v1304_v39, %v1508_v34  ;;  %v574_v43 = vpop.f32.mrb[17].mxu1 }
  0xfb   :  { %971 = vst.msk [vmem:[%s1833_s3 + $0x34] sm:$0xf] %vm957_vm2, %v1168_v35  ;;  %v447_v42 = vadd.f32 %v1508_v34, %v446_v40  ;;  %v1273_v44 = vpop.f32.mrb[18].mxu0  ;;  %1003 = vst.msk [vmem:[%s1833_s3 + $0xb4] sm:$0xf] %vm957_vm2, %v1200_v37  ;;  %v575_v46 = vadd.f32 %v1508_v34, %v574_v43  ;;  %v1305_v48 = vpop.f32.mrb[18].mxu1 }
  0xfc   :  { %v655_v45 = vmax.f32 %v455_v38, 0.0  ;;  %v458_v47 = vadd.f32 %v1273_v44, %v1508_v34  ;;  %v449_v49 = vpop.f32.mrb[19].mxu0  ;;  %v687_v50 = vmax.f32 %v583_v41, 0.0  ;;  %v586_v52 = vadd.f32 %v1305_v48, %v1508_v34  ;;  %v577_v54 = vpop.f32.mrb[19].mxu1 }
  0xfd   :  { %v653_v51 = vmax.f32 %v447_v42, 0.0  ;;  %v450_v53 = vadd.f32 %v1508_v34, %v449_v49  ;;  %v685_v56 = vmax.f32 %v575_v46, 0.0  ;;  %v578_v58 = vadd.f32 %v1508_v34, %v577_v54 }
  0xfe   :  { %v1173_v55 = vpack.c.bf16 %v655_v45, %v655_v45  ;;  %v656_v57 = vmax.f32 %v458_v47, 0.0  ;;  %v1205_v59 = vpack.c.bf16 %v687_v50, %v687_v50  ;;  %v688_v61 = vmax.f32 %v586_v52, 0.0 }
  0xff   :  { %v1171_v60 = vpack.c.bf16 %v653_v51, %v653_v51  ;;  %v654_v62 = vmax.f32 %v450_v53, 0.0  ;;  %v1203_v63 = vpack.c.bf16 %v685_v56, %v685_v56  ;;  %v686_v1 = vmax.f32 %v578_v58, 0.0 }
 0x100   :  { %976 = vst.msk [vmem:[%s1833_s3 + $0x48] sm:$0xf] %vm957_vm2, %v1173_v55  ;;  %v1174_v0 = vpack.c.bf16 %v656_v57, %v656_v57  ;;  %1008 = vst.msk [vmem:[%s1833_s3 + $0xc8] sm:$0xf] %vm957_vm2, %v1205_v59  ;;  %v1206_v2 = vpack.c.bf16 %v688_v61, %v688_v61 }
 0x101   :  { %974 = vst.msk [vmem:[%s1833_s3 + $0x40] sm:$0xf] %vm957_vm2, %v1171_v60  ;;  %v1172_v3 = vpack.c.bf16 %v654_v62, %v654_v62  ;;  %v1276_v4 = vpop.f32.mrb[20].mxu0  ;;  %1006 = vst.msk [vmem:[%s1833_s3 + $0xc0] sm:$0xf] %vm957_vm2, %v1203_v63  ;;  %v1204_v5 = vpack.c.bf16 %v686_v1, %v686_v1  ;;  %v1308_v7 = vpop.f32.mrb[20].mxu1 }
 0x102   :  { %977 = vst.msk [vmem:[%s1833_s3 + $0x4c] sm:$0xf] %vm957_vm2, %v1174_v0  ;;  %v471_v6 = vadd.f32 %v1276_v4, %v1508_v34  ;;  %v462_v8 = vpop.f32.mrb[21].mxu0  ;;  %1009 = vst.msk [vmem:[%s1833_s3 + $0xcc] sm:$0xf] %vm957_vm2, %v1206_v2  ;;  %v599_v9 = vadd.f32 %v1308_v7, %v1508_v34  ;;  %v590_v11 = vpop.f32.mrb[21].mxu1 }
 0x103   :  { %975 = vst.msk [vmem:[%s1833_s3 + $0x44] sm:$0xf] %vm957_vm2, %v1172_v3  ;;  %v463_v10 = vadd.f32 %v1508_v34, %v462_v8  ;;  %v1277_v12 = vpop.f32.mrb[22].mxu0  ;;  %1007 = vst.msk [vmem:[%s1833_s3 + $0xc4] sm:$0xf] %vm957_vm2, %v1204_v5  ;;  %v591_v14 = vadd.f32 %v1508_v34, %v590_v11  ;;  %v1309_v16 = vpop.f32.mrb[22].mxu1 }
 0x104   :  { %v659_v13 = vmax.f32 %v471_v6, 0.0  ;;  %v474_v15 = vadd.f32 %v1277_v12, %v1508_v34  ;;  %v465_v17 = vpop.f32.mrb[23].mxu0  ;;  %v691_v18 = vmax.f32 %v599_v9, 0.0  ;;  %v602_v20 = vadd.f32 %v1309_v16, %v1508_v34  ;;  %v593_v22 = vpop.f32.mrb[23].mxu1 }
 0x105   :  { %v657_v19 = vmax.f32 %v463_v10, 0.0  ;;  %v466_v21 = vadd.f32 %v1508_v34, %v465_v17  ;;  %v689_v24 = vmax.f32 %v591_v14, 0.0  ;;  %v594_v26 = vadd.f32 %v1508_v34, %v593_v22 }
 0x106   :  { %v1177_v23 = vpack.c.bf16 %v659_v13, %v659_v13  ;;  %v660_v25 = vmax.f32 %v474_v15, 0.0  ;;  %v1209_v27 = vpack.c.bf16 %v691_v18, %v691_v18  ;;  %v692_v29 = vmax.f32 %v602_v20, 0.0 }
 0x107   :  { %v1175_v28 = vpack.c.bf16 %v657_v19, %v657_v19  ;;  %v658_v30 = vmax.f32 %v466_v21, 0.0  ;;  %v1207_v31 = vpack.c.bf16 %v689_v24, %v689_v24  ;;  %v690_v33 = vmax.f32 %v594_v26, 0.0 }
 0x108   :  { %980 = vst.msk [vmem:[%s1833_s3 + $0x58] sm:$0xf] %vm957_vm2, %v1177_v23  ;;  %v1178_v32 = vpack.c.bf16 %v660_v25, %v660_v25  ;;  %1012 = vst.msk [vmem:[%s1833_s3 + $0xd8] sm:$0xf] %vm957_vm2, %v1209_v27  ;;  %v1210_v35 = vpack.c.bf16 %v692_v29, %v692_v29 }
 0x109   :  { %978 = vst.msk [vmem:[%s1833_s3 + $0x50] sm:$0xf] %vm957_vm2, %v1175_v28  ;;  %v1176_v36 = vpack.c.bf16 %v658_v30, %v658_v30  ;;  %v1280_v37 = vpop.f32.mrb[24].mxu0  ;;  %1010 = vst.msk [vmem:[%s1833_s3 + $0xd0] sm:$0xf] %vm957_vm2, %v1207_v31  ;;  %v1208_v38 = vpack.c.bf16 %v690_v33, %v690_v33  ;;  %v1312_v40 = vpop.f32.mrb[24].mxu1 }
 0x10a   :  { %981 = vst.msk [vmem:[%s1833_s3 + $0x5c] sm:$0xf] %vm957_vm2, %v1178_v32  ;;  %v487_v39 = vadd.f32 %v1280_v37, %v1508_v34  ;;  %v478_v41 = vpop.f32.mrb[25].mxu0  ;;  %1013 = vst.msk [vmem:[%s1833_s3 + $0xdc] sm:$0xf] %vm957_vm2, %v1210_v35  ;;  %v615_v42 = vadd.f32 %v1312_v40, %v1508_v34  ;;  %v606_v44 = vpop.f32.mrb[25].mxu1 }
 0x10b   :  { %979 = vst.msk [vmem:[%s1833_s3 + $0x54] sm:$0xf] %vm957_vm2, %v1176_v36  ;;  %v479_v43 = vadd.f32 %v1508_v34, %v478_v41  ;;  %v1281_v45 = vpop.f32.mrb[26].mxu0  ;;  %1011 = vst.msk [vmem:[%s1833_s3 + $0xd4] sm:$0xf] %vm957_vm2, %v1208_v38  ;;  %v607_v47 = vadd.f32 %v1508_v34, %v606_v44  ;;  %v1313_v49 = vpop.f32.mrb[26].mxu1 }
 0x10c   :  { %v663_v46 = vmax.f32 %v487_v39, 0.0  ;;  %v490_v48 = vadd.f32 %v1281_v45, %v1508_v34  ;;  %v481_v50 = vpop.f32.mrb[27].mxu0  ;;  %v695_v51 = vmax.f32 %v615_v42, 0.0  ;;  %v618_v53 = vadd.f32 %v1313_v49, %v1508_v34  ;;  %v609_v55 = vpop.f32.mrb[27].mxu1 }
 0x10d   :  { %v661_v52 = vmax.f32 %v479_v43, 0.0  ;;  %v482_v54 = vadd.f32 %v1508_v34, %v481_v50  ;;  %v693_v57 = vmax.f32 %v607_v47, 0.0  ;;  %v610_v59 = vadd.f32 %v1508_v34, %v609_v55 }
 0x10e   :  { %v1181_v56 = vpack.c.bf16 %v663_v46, %v663_v46  ;;  %v664_v58 = vmax.f32 %v490_v48, 0.0  ;;  %v1213_v60 = vpack.c.bf16 %v695_v51, %v695_v51  ;;  %v696_v62 = vmax.f32 %v618_v53, 0.0 }
 0x10f   :  { %v1179_v61 = vpack.c.bf16 %v661_v52, %v661_v52  ;;  %v662_v63 = vmax.f32 %v482_v54, 0.0  ;;  %v1211_v0 = vpack.c.bf16 %v693_v57, %v693_v57  ;;  %v694_v2 = vmax.f32 %v610_v59, 0.0 }
 0x110   :  { %984 = vst.msk [vmem:[%s1833_s3 + $0x68] sm:$0xf] %vm957_vm2, %v1181_v56  ;;  %v1182_v1 = vpack.c.bf16 %v664_v58, %v664_v58  ;;  %1016 = vst.msk [vmem:[%s1833_s3 + $0xe8] sm:$0xf] %vm957_vm2, %v1213_v60  ;;  %v1214_v3 = vpack.c.bf16 %v696_v62, %v696_v62 }
 0x111   :  { %982 = vst.msk [vmem:[%s1833_s3 + $0x60] sm:$0xf] %vm957_vm2, %v1179_v61  ;;  %v1180_v4 = vpack.c.bf16 %v662_v63, %v662_v63  ;;  %v1284_v5 = vpop.f32.mrb[28].mxu0  ;;  %1014 = vst.msk [vmem:[%s1833_s3 + $0xe0] sm:$0xf] %vm957_vm2, %v1211_v0  ;;  %v1212_v6 = vpack.c.bf16 %v694_v2, %v694_v2  ;;  %v1316_v8 = vpop.f32.mrb[28].mxu1 }
 0x112   :  { %985 = vst.msk [vmem:[%s1833_s3 + $0x6c] sm:$0xf] %vm957_vm2, %v1182_v1  ;;  %v503_v7 = vadd.f32 %v1284_v5, %v1508_v34  ;;  %v494_v9 = vpop.f32.mrb[29].mxu0  ;;  %1017 = vst.msk [vmem:[%s1833_s3 + $0xec] sm:$0xf] %vm957_vm2, %v1214_v3  ;;  %v631_v10 = vadd.f32 %v1316_v8, %v1508_v34  ;;  %v622_v12 = vpop.f32.mrb[29].mxu1 }
 0x113   :  { %983 = vst.msk [vmem:[%s1833_s3 + $0x64] sm:$0xf] %vm957_vm2, %v1180_v4  ;;  %v495_v11 = vadd.f32 %v1508_v34, %v494_v9  ;;  %v1285_v13 = vpop.f32.mrb[30].mxu0  ;;  %1015 = vst.msk [vmem:[%s1833_s3 + $0xe4] sm:$0xf] %vm957_vm2, %v1212_v6  ;;  %v623_v15 = vadd.f32 %v1508_v34, %v622_v12  ;;  %v1317_v17 = vpop.f32.mrb[30].mxu1 }
 0x114   :  { %v667_v14 = vmax.f32 %v503_v7, 0.0  ;;  %v506_v16 = vadd.f32 %v1285_v13, %v1508_v34  ;;  %v497_v18 = vpop.f32.mrb[31].mxu0  ;;  %v699_v19 = vmax.f32 %v631_v10, 0.0  ;;  %v634_v21 = vadd.f32 %v1317_v17, %v1508_v34  ;;  %v625_v23 = vpop.f32.mrb[31].mxu1 }
 0x115   :  { %v665_v20 = vmax.f32 %v495_v11, 0.0  ;;  %v498_v22 = vadd.f32 %v1508_v34, %v497_v18  ;;  %v697_v25 = vmax.f32 %v623_v15, 0.0  ;;  %v626_v27 = vadd.f32 %v1508_v34, %v625_v23 }
 0x116   :  { %v1185_v24 = vpack.c.bf16 %v667_v14, %v667_v14  ;;  %v668_v26 = vmax.f32 %v506_v16, 0.0  ;;  %v1217_v28 = vpack.c.bf16 %v699_v19, %v699_v19  ;;  %v700_v30 = vmax.f32 %v634_v21, 0.0 }
 0x117   :  { %v1183_v29 = vpack.c.bf16 %v665_v20, %v665_v20  ;;  %v666_v31 = vmax.f32 %v498_v22, 0.0  ;;  %v1215_v32 = vpack.c.bf16 %v697_v25, %v697_v25  ;;  %v698_v35 = vmax.f32 %v626_v27, 0.0 }
 0x118   :  { %988 = vst.msk [vmem:[%s1833_s3 + $0x78] sm:$0xf] %vm957_vm2, %v1185_v24  ;;  %v1186_v33 = vpack.c.bf16 %v668_v26, %v668_v26  ;;  %1020 = vst.msk [vmem:[%s1833_s3 + $0xf8] sm:$0xf] %vm957_vm2, %v1217_v28  ;;  %v1218_v34 = vpack.c.bf16 %v700_v30, %v700_v30 }
 0x119   :  { %986 = vst.msk [vmem:[%s1833_s3 + $0x70] sm:$0xf] %vm957_vm2, %v1183_v29  ;;  %v1184_v36 = vpack.c.bf16 %v666_v31, %v666_v31  ;;  %1018 = vst.msk [vmem:[%s1833_s3 + $0xf0] sm:$0xf] %vm957_vm2, %v1215_v32  ;;  %v1216_v37 = vpack.c.bf16 %v698_v35, %v698_v35 }
 0x11a   :  { %989 = vst.msk [vmem:[%s1833_s3 + $0x7c] sm:$0xf] %vm957_vm2, %v1186_v33  ;;  %1021 = vst.msk [vmem:[%s1833_s3 + $0xfc] sm:$0xf] %vm957_vm2, %v1218_v34 }
 0x11b   :  { %987 = vst.msk [vmem:[%s1833_s3 + $0x74] sm:$0xf] %vm957_vm2, %v1184_v36  ;;  %1019 = vst.msk [vmem:[%s1833_s3 + $0xf4] sm:$0xf] %vm957_vm2, %v1216_v37 }

// kernel: rpvnet_forward.22
= control target key start
LH: loop header
LB: loop body
LE: loop exit
PB: predicated region body
PF: predicated region fallthrough
CT: control target
= control target key end

     0   :  { %vm86_vm0 = vcmask 130048   ;;  %vm288_vm1 = vcmask 257024   ;;  %s519_s1 = inlined_call_operand.vmem [shape: bf16[16,32], index: 1, kind: input, shape index: {}]   ;;  %s520_s0 = inlined_call_operand.vmem [shape: bf16[128,16], index: 0, kind: input, shape index: {}]   ;;  %s521_s2 = inlined_call_operand.vmem [shape: f32[1,32], index: 2, kind: input, shape index: {}]   ;;  %s522_s3 = inlined_call_operand.vmem [shape: bf16[128,32], index: 3, kind: output, shape index: {}]  }
   0x1   :  { %v388_v0 = vld [vmem:[%s519_s1] sm:$0xff]   ;;  %v391_v3 = vld [vmem:[%s520_s0 + $0x8] sm:$0xff]   ;;  %v393_v5 = vld [vmem:[%s520_s0 + $0x10] sm:$0xff]  }
   0x2   :  { %v389_v1 = vld [vmem:[%s520_s0] sm:$0xff]   ;;  %368 = vmatprep.subr.bf16.mxu0 %v388_v0  ;;  %386 = vmatprep.subr.bf16.mxu1 %v388_v0  ;;  %v392_v4 = vld [vmem:[%s520_s0 + $0x28] sm:$0xff]   ;;  %v394_v6 = vld [vmem:[%s520_s0 + $0x30] sm:$0xff]  }
   0x3   :  { %v390_v2 = vld [vmem:[%s520_s0 + $0x20] sm:$0xff]   ;;  %369 = vmatpush3.bf16.msra.mxu0 %v388_v0  ;;  %387 = vmatpush3.bf16.msra.mxu1 %v388_v0  ;;  %v395_v7 = vld [vmem:[%s520_s0 + $0x18] sm:$0xff]  }
   0x4   :  { %370 = vmatprep.mubr.msk.bf16.mxu0 %vm86_vm0, %v389_v1  ;;  %378 = vmatprep.mubr.msk.bf16.mxu1 %vm86_vm0, %v390_v2  ;;  %v396_v8 = vld [vmem:[%s520_s0 + $0x38] sm:$0xff]   ;;  %v309_v9 = vld [vmem:[%s521_s2] ss:$0 sm:$0xff] }
   0x6   :  { %371 = vmatmul.mubr.msk.bf16.vlgmr.msra.gmra.mrb[0].mxu0 %vm86_vm0, %v391_v3  ;;  %379 = vmatmul.mubr.msk.bf16.vlgmr.msra.gmra.mrb[0].mxu1 %vm86_vm0, %v392_v4 }
   0x7   :  { %374 = vmatprep.mubr.msk.bf16.mxu0 %vm86_vm0, %v393_v5  ;;  %382 = vmatprep.mubr.msk.bf16.mxu1 %vm86_vm0, %v394_v6 }
   0xe   :  { %375 = vmatmul.mubr.msk.bf16.gmra.mrb[4].mxu0 %vm86_vm0, %v395_v7  ;;  %383 = vmatmul.mubr.msk.bf16.gmra.mrb[4].mxu1 %vm86_vm0, %v396_v8 }
  0xd9   :  { %v372_v10 = vpop.f32.mrb[0].mxu0  ;;  %v380_v11 = vpop.f32.mrb[0].mxu1 }
  0xda   :  { %v154_v12 = vadd.f32 %v372_v10, %v309_v9  ;;  %v186_v13 = vadd.f32 %v380_v11, %v309_v9  ;;  %v145_v14 = vpop.f32.mrb[1].mxu0  ;;  %v177_v15 = vpop.f32.mrb[1].mxu1 }
  0xdb   :  { %v146_v16 = vadd.f32 %v309_v9, %v145_v14  ;;  %v178_v17 = vadd.f32 %v309_v9, %v177_v15  ;;  %v373_v18 = vpop.f32.mrb[2].mxu0  ;;  %v381_v19 = vpop.f32.mrb[2].mxu1 }
  0xdc   :  { %v210_v20 = vmax.f32 %v154_v12, 0.0  ;;  %v218_v21 = vmax.f32 %v186_v13, 0.0  ;;  %v157_v22 = vadd.f32 %v373_v18, %v309_v9  ;;  %v189_v23 = vadd.f32 %v381_v19, %v309_v9  ;;  %v148_v24 = vpop.f32.mrb[3].mxu0  ;;  %v180_v25 = vpop.f32.mrb[3].mxu1 }
  0xdd   :  { %v208_v26 = vmax.f32 %v146_v16, 0.0  ;;  %v216_v27 = vmax.f32 %v178_v17, 0.0  ;;  %v149_v28 = vadd.f32 %v309_v9, %v148_v24  ;;  %v181_v29 = vadd.f32 %v309_v9, %v180_v25 }
  0xde   :  { %v345_v30 = vpack.c.bf16 %v210_v20, %v210_v20  ;;  %v353_v31 = vpack.c.bf16 %v218_v21, %v218_v21  ;;  %v211_v32 = vmax.f32 %v157_v22, 0.0  ;;  %v219_v33 = vmax.f32 %v189_v23, 0.0 }
  0xdf   :  { %v343_v34 = vpack.c.bf16 %v208_v26, %v208_v26  ;;  %v351_v35 = vpack.c.bf16 %v216_v27, %v216_v27  ;;  %v209_v36 = vmax.f32 %v149_v28, 0.0  ;;  %v217_v37 = vmax.f32 %v181_v29, 0.0 }
  0xe0   :  { %291 = vst.msk [vmem:[%s522_s3 + $0x8] sm:$0xf] %vm288_vm1, %v345_v30  ;;  %299 = vst.msk [vmem:[%s522_s3 + $0x28] sm:$0xf] %vm288_vm1, %v353_v31  ;;  %v346_v38 = vpack.c.bf16 %v211_v32, %v211_v32  ;;  %v354_v39 = vpack.c.bf16 %v219_v33, %v219_v33 }
  0xe1   :  { %289 = vst.msk [vmem:[%s522_s3] sm:$0xf] %vm288_vm1, %v343_v34  ;;  %297 = vst.msk [vmem:[%s522_s3 + $0x20] sm:$0xf] %vm288_vm1, %v351_v35  ;;  %v344_v40 = vpack.c.bf16 %v209_v36, %v209_v36  ;;  %v352_v41 = vpack.c.bf16 %v217_v37, %v217_v37  ;;  %v376_v42 = vpop.f32.mrb[4].mxu0  ;;  %v384_v43 = vpop.f32.mrb[4].mxu1 }
  0xe2   :  { %292 = vst.msk [vmem:[%s522_s3 + $0xc] sm:$0xf] %vm288_vm1, %v346_v38  ;;  %300 = vst.msk [vmem:[%s522_s3 + $0x2c] sm:$0xf] %vm288_vm1, %v354_v39  ;;  %v170_v44 = vadd.f32 %v376_v42, %v309_v9  ;;  %v202_v45 = vadd.f32 %v384_v43, %v309_v9  ;;  %v161_v46 = vpop.f32.mrb[5].mxu0  ;;  %v193_v47 = vpop.f32.mrb[5].mxu1 }
  0xe3   :  { %290 = vst.msk [vmem:[%s522_s3 + $0x4] sm:$0xf] %vm288_vm1, %v344_v40  ;;  %298 = vst.msk [vmem:[%s522_s3 + $0x24] sm:$0xf] %vm288_vm1, %v352_v41  ;;  %v162_v48 = vadd.f32 %v309_v9, %v161_v46  ;;  %v194_v49 = vadd.f32 %v309_v9, %v193_v47  ;;  %v377_v50 = vpop.f32.mrb[6].mxu0  ;;  %v385_v51 = vpop.f32.mrb[6].mxu1 }
  0xe4   :  { %v214_v52 = vmax.f32 %v170_v44, 0.0  ;;  %v222_v53 = vmax.f32 %v202_v45, 0.0  ;;  %v173_v54 = vadd.f32 %v377_v50, %v309_v9  ;;  %v205_v55 = vadd.f32 %v385_v51, %v309_v9  ;;  %v164_v56 = vpop.f32.mrb[7].mxu0  ;;  %v196_v57 = vpop.f32.mrb[7].mxu1 }
  0xe5   :  { %v212_v58 = vmax.f32 %v162_v48, 0.0  ;;  %v220_v59 = vmax.f32 %v194_v49, 0.0  ;;  %v165_v60 = vadd.f32 %v309_v9, %v164_v56  ;;  %v197_v61 = vadd.f32 %v309_v9, %v196_v57 }
  0xe6   :  { %v349_v62 = vpack.c.bf16 %v214_v52, %v214_v52  ;;  %v357_v63 = vpack.c.bf16 %v222_v53, %v222_v53  ;;  %v215_v0 = vmax.f32 %v173_v54, 0.0  ;;  %v223_v1 = vmax.f32 %v205_v55, 0.0 }
  0xe7   :  { %v347_v2 = vpack.c.bf16 %v212_v58, %v212_v58  ;;  %v355_v3 = vpack.c.bf16 %v220_v59, %v220_v59  ;;  %v213_v4 = vmax.f32 %v165_v60, 0.0  ;;  %v221_v5 = vmax.f32 %v197_v61, 0.0 }
  0xe8   :  { %295 = vst.msk [vmem:[%s522_s3 + $0x18] sm:$0xf] %vm288_vm1, %v349_v62  ;;  %303 = vst.msk [vmem:[%s522_s3 + $0x38] sm:$0xf] %vm288_vm1, %v357_v63  ;;  %v350_v6 = vpack.c.bf16 %v215_v0, %v215_v0  ;;  %v358_v7 = vpack.c.bf16 %v223_v1, %v223_v1 }
  0xe9   :  { %293 = vst.msk [vmem:[%s522_s3 + $0x10] sm:$0xf] %vm288_vm1, %v347_v2  ;;  %301 = vst.msk [vmem:[%s522_s3 + $0x30] sm:$0xf] %vm288_vm1, %v355_v3  ;;  %v348_v8 = vpack.c.bf16 %v213_v4, %v213_v4  ;;  %v356_v9 = vpack.c.bf16 %v221_v5, %v221_v5 }
  0xea   :  { %296 = vst.msk [vmem:[%s522_s3 + $0x1c] sm:$0xf] %vm288_vm1, %v350_v6  ;;  %304 = vst.msk [vmem:[%s522_s3 + $0x3c] sm:$0xf] %vm288_vm1, %v358_v7 }
  0xeb   :  { %294 = vst.msk [vmem:[%s522_s3 + $0x14] sm:$0xf] %vm288_vm1, %v348_v8  ;;  %302 = vst.msk [vmem:[%s522_s3 + $0x34] sm:$0xf] %vm288_vm1, %v356_v9 }

// kernel: rpvnet_forward.23
= control target key start
LH: loop header
LB: loop body
LE: loop exit
PB: predicated region body
PF: predicated region fallthrough
CT: control target
= control target key end

     0   :  { %vm52_vm0 = vcmask 261120   ;;  %vm128_vm1 = vcmask 519168   ;;  %s215_s1 = inlined_call_operand.vmem [shape: bf16[32,64], index: 1, kind: input, shape index: {}]   ;;  %s216_s0 = inlined_call_operand.vmem [shape: bf16[32,32], index: 0, kind: input, shape index: {}]   ;;  %s217_s2 = inlined_call_operand.vmem [shape: f32[1,64], index: 2, kind: input, shape index: {}]   ;;  %s218_s3 = inlined_call_operand.vmem [shape: bf16[32,64], index: 3, kind: output, shape index: {}]  }
   0x1   :  { %v164_v0 = vld [vmem:[%s215_s1] sm:$0xff]   ;;  %v165_v1 = vld [vmem:[%s215_s1 + $0x8] sm:$0xff]  }
   0x2   :  { %156 = vmatprep.subr.bf16.mxu0 %v164_v0  ;;  %v166_v2 = vld [vmem:[%s216_s0] sm:$0xff]   ;;  %v167_v3 = vld [vmem:[%s216_s0 + $0x8] sm:$0xff]  }
   0x3   :  { %157 = vmatpush3.bf16.msra.mxu0 %v164_v0  ;;  %160 = vmatprep.mubr.msk.bf16.mxu0 %vm52_vm0, %v166_v2  ;;  %v137_v4 = vld [vmem:[%s217_s2] ss:$0 sm:$0xff] }
   0x4   :  { %158 = vmatprep.subr.bf16.mxu0 %v165_v1 }
   0x7   :  { %159 = vmatpush3.bf16.msra.mxu0 %v165_v1 }
   0xa   :  { %161 = vmatmul.mubr.msk.bf16.vlgmr.msra.gmra.mrb[0].mxu0 %vm52_vm0, %v167_v3 }
  0xdd   :  { %v162_v5 = vpop.f32.mrb[0].mxu0 }
  0xde   :  { %v102_v6 = vadd.f32 %v162_v5, %v137_v4  ;;  %v93_v7 = vpop.f32.mrb[1].mxu0 }
  0xdf   :  { %v94_v8 = vadd.f32 %v137_v4, %v93_v7  ;;  %v163_v9 = vpop.f32.mrb[2].mxu0 }
  0xe0   :  { %v110_v10 = vmax.f32 %v102_v6, 0.0  ;;  %v105_v11 = vadd.f32 %v163_v9, %v137_v4  ;;  %v96_v12 = vpop.f32.mrb[3].mxu0 }
  0xe1   :  { %v108_v13 = vmax.f32 %v94_v8, 0.0  ;;  %v97_v14 = vadd.f32 %v137_v4, %v96_v12 }
  0xe2   :  { %v150_v15 = vpack.c.bf16 %v110_v10, %v110_v10  ;;  %v111_v16 = vmax.f32 %v105_v11, 0.0 }
  0xe3   :  { %v148_v17 = vpack.c.bf16 %v108_v13, %v108_v13  ;;  %v109_v18 = vmax.f32 %v97_v14, 0.0 }
  0xe4   :  { %131 = vst.msk [vmem:[%s218_s3 + $0x8] sm:$0xf] %vm128_vm1, %v150_v15  ;;  %v151_v19 = vpack.c.bf16 %v111_v16, %v111_v16 }
  0xe5   :  { %129 = vst.msk [vmem:[%s218_s3] sm:$0xf] %vm128_vm1, %v148_v17  ;;  %v149_v20 = vpack.c.bf16 %v109_v18, %v109_v18 }
  0xe6   :  { %132 = vst.msk [vmem:[%s218_s3 + $0xc] sm:$0xf] %vm128_vm1, %v151_v19 }
  0xe7   :  { %130 = vst.msk [vmem:[%s218_s3 + $0x4] sm:$0xf] %vm128_vm1, %v149_v20 }

// kernel: rpvnet_forward.20
= control target key start
LH: loop header
LB: loop body
LE: loop exit
PB: predicated region body
PF: predicated region fallthrough
CT: control target
= control target key end

     0   :  { %vm79_vm0 = vcmask 1043456   ;;  %vm66_vm1 = vcmask 64512   ;;  %vm188_vm2 = vcmask 125952   ;;  %vm212_vm3 = vcmask 130048   ;;  %s817_s1 = inlined_call_operand.vmem [shape: bf16[8,16], index: 1, kind: input, shape index: {}]   ;;  %s818_s0 = inlined_call_operand.vmem [shape: bf16[64,8], index: 0, kind: input, shape index: {}]   ;;  %s819_s3 = inlined_call_operand.vmem [shape: bf16[16,32], index: 3, kind: input, shape index: {}]   ;;  %s820_s2 = inlined_call_operand.vmem [shape: f32[1,16], index: 2, kind: input, shape index: {}]   ;;  %s821_s7 = inlined_call_operand.vmem [shape: bf16[64,16], index: 7, kind: output, shape index: {0}]   ;;  %s822_s5 = inlined_call_operand.vmem [shape: bf16[32,64], index: 5, kind: input, shape index: {}]   ;;  %s823_s4 = inlined_call_operand.vmem [shape: f32[1,32], index: 4, kind: input, shape index: {}]   ;;  %s824_s8 = inlined_call_operand.vmem [shape: bf16[64,32], index: 8, kind: output, shape index: {1}]   ;;  %s825_s6 = inlined_call_operand.vmem [shape: f32[1,64], index: 6, kind: input, shape index: {}]   ;;  %s826_s9 = inlined_call_operand.vmem [shape: bf16[64,64], index: 9, kind: output, shape index: {2}]  }
   0x1   :  { %v38_v0 = vld [vmem:[%s817_s1] sm:$0xf]  ;;  %v624_v3 = vld [vmem:[%s818_s0 + $0x8] sm:$0xff]   ;;  %v625_v4 = vld [vmem:[%s818_s0 + $0x10] sm:$0xff]   ;;  %vm330_vm4 = vcmask 257024   ;;  %vm362_vm5 = vcmask 261120  }
   0x2   :  { %621 = vmatprep.subr.msk.bf16.mxu0 %vm79_vm0, %v38_v0  ;;  %v81_v1 = vsel %vm79_vm0, %v38_v0, 0  ;;  %v623_v2 = vld [vmem:[%s818_s0] sm:$0xff]   ;;  %622 = vmatprep.subr.msk.bf16.mxu1 %vm79_vm0, %v38_v0  ;;  %v626_v5 = vld [vmem:[%s818_s0 + $0x18] sm:$0xff]   ;;  %v629_v45 = vld [vmem:[%s822_s5 + $0x8] sm:$0xff]   ;;  %vm480_vm6 = vcmask 519168  }
   0x3   :  { %588 = vmatpush3.bf16.msra.mxu0 %v81_v1  ;;  %620 = vmatpush3.bf16.msra.mxu1 %v81_v1  ;;  %v627_v6 = vld [vmem:[%s819_s3] sm:$0xff]  }
   0x4   :  { %589 = vmatprep.mubr.msk.bf16.mxu0 %vm66_vm1, %v623_v2  ;;  %593 = vmatprep.mubr.msk.bf16.mxu1 %vm66_vm1, %v625_v4  ;;  %v501_v7 = vld [vmem:[%s820_s2] ss:$0 sm:$0xff] }
   0x5   :  { %597 = vmatprep.subr.bf16.mxu1 %v627_v6  ;;  %v628_v44 = vld [vmem:[%s822_s5] sm:$0xff]  }
   0x6   :  { %590 = vmatmul.mubr.msk.bf16.vlgmr.msra.gmra.mrb[0].mxu0 %vm66_vm1, %v624_v3  ;;  %594 = vmatmul.mubr.msk.bf16.vlgmr.msra.gmra.mrb[0].mxu1 %vm66_vm1, %v626_v5  ;;  %v518_v46 = vld [vmem:[%s823_s4] ss:$0 sm:$0xff] }
   0x7   :  { %598 = vmatpush3.bf16.msra.mxu1 %v627_v6  ;;  %607 = vmatprep.subr.bf16.mxu0 %v628_v44 }
   0x8   :  { %608 = vmatpush3.bf16.msra.mxu0 %v628_v44 }
   0x9   :  { %609 = vmatprep.subr.bf16.mxu0 %v629_v45 }
   0xc   :  { %610 = vmatpush3.bf16.msra.mxu0 %v629_v45 }
  0xd9   :  { %v591_v8 = vpop.f32.mrb[0].mxu0  ;;  %v595_v11 = vpop.f32.mrb[0].mxu1 }
  0xda   :  { %v126_v9 = vadd.f32 %v591_v8, %v501_v7  ;;  %v117_v10 = vpop.f32.mrb[1].mxu0  ;;  %v142_v14 = vadd.f32 %v595_v11, %v501_v7  ;;  %v133_v15 = vpop.f32.mrb[1].mxu1 }
  0xdb   :  { %v118_v12 = vadd.f32 %v501_v7, %v117_v10  ;;  %v592_v13 = vpop.f32.mrb[2].mxu0  ;;  %v134_v19 = vadd.f32 %v501_v7, %v133_v15  ;;  %v596_v20 = vpop.f32.mrb[2].mxu1 }
  0xdc   :  { %v150_v16 = vmax.f32 %v126_v9, 0.0  ;;  %v129_v17 = vadd.f32 %v592_v13, %v501_v7  ;;  %v120_v18 = vpop.f32.mrb[3].mxu0  ;;  %v154_v23 = vmax.f32 %v142_v14, 0.0  ;;  %v145_v24 = vadd.f32 %v596_v20, %v501_v7  ;;  %v136_v25 = vpop.f32.mrb[3].mxu1 }
  0xdd   :  { %v148_v21 = vmax.f32 %v118_v12, 0.0  ;;  %v121_v22 = vadd.f32 %v501_v7, %v120_v18  ;;  %v152_v28 = vmax.f32 %v134_v19, 0.0  ;;  %v137_v29 = vadd.f32 %v501_v7, %v136_v25  ;;  %v532_v19 = vld [vmem:[%s825_s6] ss:$0 sm:$0xff] }
  0xde   :  { %v549_v26 = vpack.c.bf16 %v150_v16, %v150_v16  ;;  %v151_v27 = vmax.f32 %v129_v17, 0.0  ;;  %v553_v32 = vpack.c.bf16 %v154_v23, %v154_v23  ;;  %v155_v33 = vmax.f32 %v145_v24, 0.0 }
  0xdf   :  { %v547_v30 = vpack.c.bf16 %v148_v21, %v148_v21  ;;  %v149_v31 = vmax.f32 %v121_v22, 0.0  ;;  %v551_v36 = vpack.c.bf16 %v152_v28, %v152_v28  ;;  %v153_v37 = vmax.f32 %v137_v29, 0.0 }
  0xe0   :  { %191 = vst.msk [vmem:[%s821_s7 + $0x8] sm:$0xf] %vm188_vm2, %v549_v26  ;;  %v157_v34 = vpack.c.bf16 %v151_v27, %v150_v16  ;;  %v550_v35 = vpack.c.bf16 %v151_v27, %v151_v27  ;;  %195 = vst.msk [vmem:[%s821_s7 + $0x18] sm:$0xf] %vm188_vm2, %v553_v32  ;;  %v159_v40 = vpack.c.bf16 %v155_v33, %v154_v23 }
  0xe1   :  { %189 = vst.msk [vmem:[%s821_s7] sm:$0xf] %vm188_vm2, %v547_v30  ;;  %v156_v38 = vpack.c.bf16 %v149_v31, %v148_v21  ;;  %v548_v39 = vpack.c.bf16 %v149_v31, %v149_v31  ;;  %v554_v41 = vpack.c.bf16 %v155_v33, %v155_v33  ;;  %193 = vst.msk [vmem:[%s821_s7 + $0x10] sm:$0xf] %vm188_vm2, %v551_v36 }
  0xe2   :  { %192 = vst.msk [vmem:[%s821_s7 + $0xc] sm:$0xf] %vm188_vm2, %v550_v35  ;;  %v158_v42 = vpack.c.bf16 %v153_v37, %v152_v28  ;;  %v552_v43 = vpack.c.bf16 %v153_v37, %v153_v37 }
  0xe3   :  { %190 = vst.msk [vmem:[%s821_s7 + $0x4] sm:$0xf] %vm188_vm2, %v548_v39  ;;  %196 = vst.msk [vmem:[%s821_s7 + $0x1c] sm:$0xf] %vm188_vm2, %v554_v41  ;;  %599 = vmatprep.mubr.msk.bf16.mxu1 %vm212_vm3, %v156_v38 }
  0xe4   :  { %194 = vst.msk [vmem:[%s821_s7 + $0x14] sm:$0xf] %vm188_vm2, %v552_v43  ;;  %600 = vmatmul.mubr.msk.bf16.vlgmr.msra.gmra.mrb[4].mxu1 %vm212_vm3, %v157_v34 }
  0xe5   :  { %603 = vmatprep.mubr.msk.bf16.mxu1 %vm212_vm3, %v158_v42 }
  0xec   :  { %604 = vmatmul.mubr.msk.bf16.gmra.mrb[8].mxu1 %vm212_vm3, %v159_v40 }
 0x1b7   :  { %v601_v47 = vpop.f32.mrb[4].mxu1 }
 0x1b8   :  { %v268_v48 = vadd.f32 %v601_v47, %v518_v46  ;;  %v259_v49 = vpop.f32.mrb[5].mxu1 }
 0x1b9   :  { %v260_v50 = vadd.f32 %v518_v46, %v259_v49  ;;  %v602_v51 = vpop.f32.mrb[6].mxu1 }
 0x1ba   :  { %v292_v52 = vmax.f32 %v268_v48, 0.0  ;;  %v271_v53 = vadd.f32 %v602_v51, %v518_v46  ;;  %v262_v54 = vpop.f32.mrb[7].mxu1 }
 0x1bb   :  { %v290_v55 = vmax.f32 %v260_v50, 0.0  ;;  %v263_v56 = vadd.f32 %v518_v46, %v262_v54 }
 0x1bc   :  { %v557_v57 = vpack.c.bf16 %v292_v52, %v292_v52  ;;  %v293_v58 = vmax.f32 %v271_v53, 0.0 }
 0x1bd   :  { %v555_v59 = vpack.c.bf16 %v290_v55, %v290_v55  ;;  %v291_v60 = vmax.f32 %v263_v56, 0.0 }
 0x1be   :  { %333 = vst.msk [vmem:[%s824_s8 + $0x8] sm:$0xf] %vm330_vm4, %v557_v57  ;;  %v299_v61 = vpack.c.bf16 %v293_v58, %v292_v52  ;;  %v558_v62 = vpack.c.bf16 %v293_v58, %v293_v58 }
 0x1bf   :  { %331 = vst.msk [vmem:[%s824_s8] sm:$0xf] %vm330_vm4, %v555_v59  ;;  %v298_v63 = vpack.c.bf16 %v291_v60, %v290_v55  ;;  %v556_v0 = vpack.c.bf16 %v291_v60, %v291_v60  ;;  %v605_v1 = vpop.f32.mrb[8].mxu1 }
 0x1c0   :  { %334 = vst.msk [vmem:[%s824_s8 + $0xc] sm:$0xf] %vm330_vm4, %v558_v62  ;;  %v284_v2 = vadd.f32 %v605_v1, %v518_v46  ;;  %v275_v3 = vpop.f32.mrb[9].mxu1 }
 0x1c1   :  { %332 = vst.msk [vmem:[%s824_s8 + $0x4] sm:$0xf] %vm330_vm4, %v556_v0  ;;  %v276_v4 = vadd.f32 %v518_v46, %v275_v3  ;;  %v606_v5 = vpop.f32.mrb[10].mxu1  ;;  %611 = vmatprep.mubr.msk.bf16.mxu0 %vm362_vm5, %v298_v63 }
 0x1c2   :  { %v296_v6 = vmax.f32 %v284_v2, 0.0  ;;  %v287_v7 = vadd.f32 %v606_v5, %v518_v46  ;;  %v278_v8 = vpop.f32.mrb[11].mxu1  ;;  %612 = vmatmul.mubr.msk.bf16.vlgmr.msra.gmra.mrb[4].mxu0 %vm362_vm5, %v299_v61 }
 0x1c3   :  { %v294_v9 = vmax.f32 %v276_v4, 0.0  ;;  %v279_v10 = vadd.f32 %v518_v46, %v278_v8 }
 0x1c4   :  { %v561_v11 = vpack.c.bf16 %v296_v6, %v296_v6  ;;  %v297_v12 = vmax.f32 %v287_v7, 0.0 }
 0x1c5   :  { %v559_v13 = vpack.c.bf16 %v294_v9, %v294_v9  ;;  %v295_v14 = vmax.f32 %v279_v10, 0.0 }
 0x1c6   :  { %337 = vst.msk [vmem:[%s824_s8 + $0x18] sm:$0xf] %vm330_vm4, %v561_v11  ;;  %v301_v15 = vpack.c.bf16 %v297_v12, %v296_v6  ;;  %v562_v16 = vpack.c.bf16 %v297_v12, %v297_v12 }
 0x1c7   :  { %335 = vst.msk [vmem:[%s824_s8 + $0x10] sm:$0xf] %vm330_vm4, %v559_v13  ;;  %v300_v17 = vpack.c.bf16 %v295_v14, %v294_v9  ;;  %v560_v18 = vpack.c.bf16 %v295_v14, %v295_v14 }
 0x1c8   :  { %338 = vst.msk [vmem:[%s824_s8 + $0x1c] sm:$0xf] %vm330_vm4, %v562_v16 }
 0x1c9   :  { %336 = vst.msk [vmem:[%s824_s8 + $0x14] sm:$0xf] %vm330_vm4, %v560_v18  ;;  %615 = vmatprep.mubr.msk.bf16.mxu0 %vm362_vm5, %v300_v17 }
 0x1ca   :  { %616 = vmatmul.mubr.msk.bf16.gmra.mrb[8].mxu0 %vm362_vm5, %v301_v15 }
 0x295   :  { %v613_v20 = vpop.f32.mrb[4].mxu0 }
 0x296   :  { %v418_v21 = vadd.f32 %v613_v20, %v532_v19  ;;  %v409_v22 = vpop.f32.mrb[5].mxu0 }
 0x297   :  { %v410_v23 = vadd.f32 %v532_v19, %v409_v22  ;;  %v614_v24 = vpop.f32.mrb[6].mxu0 }
 0x298   :  { %v442_v25 = vmax.f32 %v418_v21, 0.0  ;;  %v421_v26 = vadd.f32 %v614_v24, %v532_v19  ;;  %v412_v27 = vpop.f32.mrb[7].mxu0 }
 0x299   :  { %v440_v28 = vmax.f32 %v410_v23, 0.0  ;;  %v413_v29 = vadd.f32 %v532_v19, %v412_v27 }
 0x29a   :  { %v565_v30 = vpack.c.bf16 %v442_v25, %v442_v25  ;;  %v443_v31 = vmax.f32 %v421_v26, 0.0 }
 0x29b   :  { %v563_v32 = vpack.c.bf16 %v440_v28, %v440_v28  ;;  %v441_v33 = vmax.f32 %v413_v29, 0.0 }
 0x29c   :  { %483 = vst.msk [vmem:[%s826_s9 + $0x8] sm:$0xf] %vm480_vm6, %v565_v30  ;;  %v566_v34 = vpack.c.bf16 %v443_v31, %v443_v31 }
 0x29d   :  { %481 = vst.msk [vmem:[%s826_s9] sm:$0xf] %vm480_vm6, %v563_v32  ;;  %v564_v35 = vpack.c.bf16 %v441_v33, %v441_v33  ;;  %v617_v36 = vpop.f32.mrb[8].mxu0 }
 0x29e   :  { %484 = vst.msk [vmem:[%s826_s9 + $0xc] sm:$0xf] %vm480_vm6, %v566_v34  ;;  %v434_v37 = vadd.f32 %v617_v36, %v532_v19  ;;  %v425_v38 = vpop.f32.mrb[9].mxu0 }
 0x29f   :  { %482 = vst.msk [vmem:[%s826_s9 + $0x4] sm:$0xf] %vm480_vm6, %v564_v35  ;;  %v426_v39 = vadd.f32 %v532_v19, %v425_v38  ;;  %v618_v40 = vpop.f32.mrb[10].mxu0 }
 0x2a0   :  { %v446_v41 = vmax.f32 %v434_v37, 0.0  ;;  %v437_v42 = vadd.f32 %v618_v40, %v532_v19  ;;  %v428_v43 = vpop.f32.mrb[11].mxu0 }
 0x2a1   :  { %v444_v44 = vmax.f32 %v426_v39, 0.0  ;;  %v429_v45 = vadd.f32 %v532_v19, %v428_v43 }
 0x2a2   :  { %v569_v46 = vpack.c.bf16 %v446_v41, %v446_v41  ;;  %v447_v47 = vmax.f32 %v437_v42, 0.0 }
 0x2a3   :  { %v567_v48 = vpack.c.bf16 %v444_v44, %v444_v44  ;;  %v445_v49 = vmax.f32 %v429_v45, 0.0 }
 0x2a4   :  { %487 = vst.msk [vmem:[%s826_s9 + $0x18] sm:$0xf] %vm480_vm6, %v569_v46  ;;  %v570_v50 = vpack.c.bf16 %v447_v47, %v447_v47 }
 0x2a5   :  { %485 = vst.msk [vmem:[%s826_s9 + $0x10] sm:$0xf] %vm480_vm6, %v567_v48  ;;  %v568_v51 = vpack.c.bf16 %v445_v49, %v445_v49 }
 0x2a6   :  { %488 = vst.msk [vmem:[%s826_s9 + $0x1c] sm:$0xf] %vm480_vm6, %v570_v50 }
 0x2a7   :  { %486 = vst.msk [vmem:[%s826_s9 + $0x14] sm:$0xf] %vm480_vm6, %v568_v51 }

// kernel: rpvnet_forward.24
= control target key start
LH: loop header
LB: loop body
LE: loop exit
PB: predicated region body
PF: predicated region fallthrough
CT: control target
= control target key end

     0   :  { %vm82_vm0 = vcmask 1043456   ;;  %vm69_vm1 = vcmask 64512   ;;  %vm235_vm2 = vcmask 523264   ;;  %vm586_vm3 = vcmask 23552   ;;  %s1436_s3 = inlined_call_operand.vmem [shape: bf16[8,64], index: 3, kind: input, shape index: {}]   ;;  %s1437_s0 = inlined_call_operand.vmem [shape: bf16[64,8], index: 0, kind: input, shape index: {}]   ;;  %s1438_s5 = inlined_call_operand.vmem [shape: bf16[64,3], index: 5, kind: input, shape index: {}]   ;;  %s1439_s1 = inlined_call_operand.vmem [shape: bf16[64,64], index: 1, kind: input, shape index: {}]   ;;  %s1440_s7 = inlined_call_operand.vmem [shape: bf16[64,3], index: 7, kind: input, shape index: {}]   ;;  %s1441_s6 = inlined_call_operand.vmem [shape: bf16[64,3], index: 6, kind: input, shape index: {}]   ;;  %s1442_s2 = inlined_call_operand.vmem [shape: bf16[64,64], index: 2, kind: input, shape index: {}]   ;;  %s1443_s4 = inlined_call_operand.vmem [shape: f32[1,64], index: 4, kind: input, shape index: {}]   ;;  %s1444_s8 = inlined_call_operand.vmem [shape: f32[1,3], index: 8, kind: input, shape index: {}]   ;;  %s1445_s9 = inlined_call_operand.vmem [shape: bf16[64,64], index: 9, kind: output, shape index: {}]  }
   0x1   :  { %v41_v0 = vld [vmem:[%s1436_s3] sm:$0xf]  ;;  %v1058_v3 = vld [vmem:[%s1437_s0 + $0x8] sm:$0xff]   ;;  %v1059_v4 = vld [vmem:[%s1437_s0 + $0x10] sm:$0xff]   ;;  %vm851_vm4 = vcmask 519168  }
   0x2   :  { %1033 = vmatprep.subr.msk.bf16.mxu0 %vm82_vm0, %v41_v0  ;;  %v84_v1 = vsel %vm82_vm0, %v41_v0, 0  ;;  %v1057_v2 = vld [vmem:[%s1437_s0] sm:$0xff]   ;;  %v1062_v6 = vld [vmem:[%s1438_s5 + $0x8] sm:$0xff]   ;;  %v1060_v7 = vld [vmem:[%s1437_s0 + $0x18] sm:$0xff]  }
   0x3   :  { %952 = vmatpush3.bf16.msra.mxu0 %v84_v1  ;;  %953 = vmatprep.mubr.msk.bf16.mxu0 %vm69_vm1, %v1057_v2  ;;  %v1061_v5 = vld [vmem:[%s1438_s5] sm:$0xff]   ;;  %v1063_v9 = vld [vmem:[%s1438_s5 + $0x10] sm:$0xff]   ;;  %v1064_v11 = vld [vmem:[%s1438_s5 + $0x18] sm:$0xff]  }
   0x4   :  { %977 = vmatprep.subr.bf16.mxu1 %v1061_v5  ;;  %v1201_v8 = vld [vmem:[%s1439_s1] sm:$0xff]   ;;  %v1072_v12 = vld [vmem:[%s1441_s6 + $0x8] sm:$0xff]   ;;  %v1229_v15 = vld [vmem:[%s1439_s1 + $0x10] sm:$0xff]  }
   0x5   :  { %978 = vmatpush3.bf16.msra.mxu1 %v1061_v5  ;;  %985 = vmatprep.mubr.msk.bf16.mxu1 %vm235_vm2, %v1201_v8  ;;  %v1069_v10 = vld [vmem:[%s1441_s6] sm:$0xff]   ;;  %v1221_v13 = vld [vmem:[%s1439_s1 + $0x8] sm:$0xff]   ;;  %v1241_v17 = vld [vmem:[%s1439_s1 + $0x18] sm:$0xff]  }
   0x6   :  { %954 = vmatmul.mubr.msk.bf16.vlgmr.msra.gmra.mrb[0].mxu0 %vm69_vm1, %v1058_v3  ;;  %979 = vmatprep.subr.bf16.mxu1 %v1062_v6  ;;  %v1067_v14 = vld [vmem:[%s1440_s7] sm:$0xff]   ;;  %v1071_v16 = vld [vmem:[%s1440_s7 + $0x8] sm:$0xff]   ;;  %v1073_v18 = vld [vmem:[%s1440_s7 + $0x10] sm:$0xff]  }
   0x7   :  { %957 = vmatprep.mubr.msk.bf16.mxu0 %vm69_vm1, %v1059_v4  ;;  %961 = vmatprep.subr.bf16.mxu0 %v1069_v10  ;;  %v1075_v19 = vld [vmem:[%s1440_s7 + $0x18] sm:$0xff]   ;;  %v1074_v20 = vld [vmem:[%s1441_s6 + $0x10] sm:$0xff]   ;;  %v864_v24 = vld [vmem:[%s1443_s4] ss:$0 sm:$0xff] }
   0x8   :  { %962 = vmatpush3.bf16.msra.mxu0 %v1069_v10  ;;  %v1257_v21 = vld [vmem:[%s1442_s2 + $0x10] sm:$0xff]   ;;  %v1262_v22 = vld [vmem:[%s1442_s2 + $0x18] sm:$0xff]   ;;  %v1308_v48 = vld [vmem:[%s1442_s2] sm:$0xff]  }
   0x9   :  { %980 = vmatpush3.bf16.msra.mxu1 %v1062_v6  ;;  %963 = vmatprep.subr.bf16.mxu0 %v1072_v12  ;;  %v1077_v23 = vld [vmem:[%s1441_s6 + $0x18] sm:$0xff]   ;;  %v1328_v56 = vld [vmem:[%s1442_s2 + $0x8] sm:$0xff]  }
   0xa   :  { %981 = vmatprep.subr.bf16.mxu1 %v1063_v9 }
   0xc   :  { %964 = vmatpush3.bf16.msra.mxu0 %v1072_v12 }
   0xd   :  { %982 = vmatpush3.bf16.msra.mxu1 %v1063_v9  ;;  %965 = vmatprep.subr.bf16.mxu0 %v1074_v20 }
   0xe   :  { %958 = vmatmul.mubr.msk.bf16.gmra.mrb[4].mxu0 %vm69_vm1, %v1060_v7  ;;  %983 = vmatprep.subr.bf16.mxu1 %v1064_v11 }
  0x10   :  { %966 = vmatpush3.bf16.msra.mxu0 %v1074_v20 }
  0x11   :  { %984 = vmatpush3.bf16.msra.mxu1 %v1064_v11  ;;  %967 = vmatprep.subr.bf16.mxu0 %v1077_v23  ;;  %v905_v11 = vld [vmem:[%s1444_s8] ss:$0 sm:$0xff] }
  0x12   :  { %1009 = vmatprep.subr.bf16.mxu1 %v1067_v14 }
  0x14   :  { %986 = vmatmul.mubr.msk.bf16.vlgmr.msra.gmra.mrb[0].mxu1 %vm235_vm2, %v1221_v13  ;;  %968 = vmatpush3.bf16.msra.mxu0 %v1077_v23 }
  0x15   :  { %1013 = vmatpush3.bf16.msra.mxu1 %v1067_v14  ;;  %989 = vmatprep.mubr.msk.bf16.mxu1 %vm235_vm2, %v1229_v15 }
  0x16   :  { %1010 = vmatprep.subr.bf16.mxu1 %v1071_v16  ;;  %993 = vmatprep.subr.bf16.mxu0 %v1067_v14 }
  0x19   :  { %1014 = vmatpush3.bf16.msra.mxu1 %v1071_v16 }
  0x1a   :  { %1011 = vmatprep.subr.bf16.mxu1 %v1073_v18 }
  0x1c   :  { %990 = vmatmul.mubr.msk.bf16.gmra.mrb[4].mxu1 %vm235_vm2, %v1241_v17 }
  0x1d   :  { %1015 = vmatpush3.bf16.msra.mxu1 %v1073_v18  ;;  %1005 = vmatprep.mubr.msk.bf16.mxu1 %vm235_vm2, %v1257_v21 }
  0x1e   :  { %1012 = vmatprep.subr.bf16.mxu1 %v1075_v19 }
  0x21   :  { %1016 = vmatpush3.bf16.msra.mxu1 %v1075_v19 }
  0x28   :  { %1006 = vmatmul.mubr.msk.bf16.vlgmr.msra.gmra.mrb[4].mxu1 %vm235_vm2, %v1262_v22 }
  0xd9   :  { %v955_v25 = vpop.f32.mrb[0].mxu0 }
  0xda   :  { %v120_v26 = vpop.f32.mrb[1].mxu0  ;;  %v1276_v29 = vadd.f32 %v955_v25, %v864_v24 }
  0xdb   :  { %v1274_v27 = vadd.f32 %v864_v24, %v120_v26  ;;  %v956_v28 = vpop.f32.mrb[2].mxu0 }
  0xdc   :  { %v1278_v30 = vadd.f32 %v956_v28, %v864_v24  ;;  %v123_v31 = vpop.f32.mrb[3].mxu0  ;;  %v153_v36 = vmax.f32 %v1276_v29, 0.0 }
  0xdd   :  { %v1280_v32 = vadd.f32 %v864_v24, %v123_v31  ;;  %v151_v34 = vmax.f32 %v1274_v27, 0.0 }
  0xde   :  { %v154_v33 = vmax.f32 %v1278_v30, 0.0 }
  0xdf   :  { %v152_v35 = vmax.f32 %v1280_v32, 0.0 }
  0xe0   :  { %v200_v39 = vpack.c.bf16 %v154_v33, %v153_v36 }
  0xe1   :  { %v199_v37 = vpack.c.bf16 %v152_v35, %v151_v34  ;;  %v959_v38 = vpop.f32.mrb[4].mxu0 }
  0xe2   :  { %v136_v40 = vpop.f32.mrb[5].mxu0  ;;  %v1297_v43 = vadd.f32 %v959_v38, %v864_v24 }
  0xe3   :  { %v1294_v41 = vadd.f32 %v864_v24, %v136_v40  ;;  %v960_v42 = vpop.f32.mrb[6].mxu0  ;;  %969 = vmatprep.mubr.msk.bf16.mxu0 %vm235_vm2, %v199_v37 }
  0xe4   :  { %v1299_v44 = vadd.f32 %v960_v42, %v864_v24  ;;  %v139_v45 = vpop.f32.mrb[7].mxu0  ;;  %970 = vmatmul.mubr.msk.bf16.vlgmr.msra.gmra.mrb[8].mxu0 %vm235_vm2, %v200_v39  ;;  %v157_v51 = vmax.f32 %v1297_v43, 0.0 }
  0xe5   :  { %v1302_v46 = vadd.f32 %v864_v24, %v139_v45  ;;  %994 = vmatpush3.bf16.msra.mxu0 %v1067_v14  ;;  %v155_v49 = vmax.f32 %v1294_v41, 0.0 }
  0xe6   :  { %v158_v47 = vmax.f32 %v1299_v44, 0.0  ;;  %995 = vmatprep.subr.bf16.mxu0 %v1071_v16 }
  0xe7   :  { %v156_v50 = vmax.f32 %v1302_v46, 0.0  ;;  %v987_v54 = vpop.f32.mrb[0].mxu1  ;;  %v169_v46 = vunpack.c.l.bf16 %v1221_v13 }
  0xe8   :  { %v202_v53 = vpack.c.bf16 %v158_v47, %v157_v51  ;;  %v403_v55 = vpop.f32.mrb[1].mxu1 }
  0xe9   :  { %v201_v52 = vpack.c.bf16 %v156_v50, %v155_v49  ;;  %996 = vmatpush3.bf16.msra.mxu0 %v1071_v16  ;;  %v988_v57 = vpop.f32.mrb[2].mxu1 }
  0xea   :  { %997 = vmatprep.subr.bf16.mxu0 %v1073_v18  ;;  %v406_v58 = vpop.f32.mrb[3].mxu1 }
  0xeb   :  { %973 = vmatprep.mubr.msk.bf16.mxu0 %vm235_vm2, %v201_v52 }
  0xec   :  { %974 = vmatmul.mubr.msk.bf16.gmra.mrb[12].mxu0 %vm235_vm2, %v202_v53 }
  0xed   :  { %998 = vmatpush3.bf16.msra.mxu0 %v1073_v18  ;;  %1001 = vmatprep.mubr.msk.bf16.mxu0 %vm235_vm2, %v1308_v48 }
  0xee   :  { %999 = vmatprep.subr.bf16.mxu0 %v1075_v19 }
  0xf1   :  { %1000 = vmatpush3.bf16.msra.mxu0 %v1075_v19 }
  0xf4   :  { %1002 = vmatmul.mubr.msk.bf16.vlgmr.msra.gmra.mrb[16].mxu0 %vm235_vm2, %v1328_v56 }
  0xfb   :  { %v1007_v59 = vpop.f32.mrb[4].mxu1 }
  0xfc   :  { %v548_v60 = vpop.f32.mrb[5].mxu1 }
  0xfd   :  { %v1008_v61 = vpop.f32.mrb[6].mxu1 }
  0xfe   :  { %v551_v62 = vpop.f32.mrb[7].mxu1 }
 0x1b7   :  { %v971_v63 = vpop.f32.mrb[8].mxu0 }
 0x1b8   :  { %v412_v0 = vadd.f32 %v987_v54, %v971_v63  ;;  %v282_v1 = vpop.f32.mrb[9].mxu0 }
 0x1b9   :  { %v404_v2 = vadd.f32 %v403_v55, %v282_v1  ;;  %v972_v3 = vpop.f32.mrb[10].mxu0 }
 0x1ba   :  { %v415_v4 = vadd.f32 %v988_v57, %v972_v3  ;;  %v285_v5 = vpop.f32.mrb[11].mxu0 }
 0x1bb   :  { %v407_v6 = vadd.f32 %v406_v58, %v285_v5 }
 0x1bf   :  { %v975_v7 = vpop.f32.mrb[12].mxu0 }
 0x1c0   :  { %v1025_v9 = vadd.f32 %v1007_v59, %v975_v7  ;;  %v298_v10 = vpop.f32.mrb[13].mxu0 }
 0x1c1   :  { %v1026_v12 = vadd.f32 %v548_v60, %v298_v10  ;;  %v976_v14 = vpop.f32.mrb[14].mxu0 }
 0x1c2   :  { %v1027_v16 = vadd.f32 %v1008_v61, %v976_v14  ;;  %v301_v18 = vpop.f32.mrb[15].mxu0  ;;  %v584_v61 = vadd.f32 %v1025_v9, %v905_v11 }
 0x1c3   :  { %v1028_v19 = vadd.f32 %v551_v62, %v301_v18  ;;  %v582_v20 = vadd.f32 %v1026_v12, %v905_v11 }
 0x1c4   :  { %v585_v59 = vadd.f32 %v1027_v16, %v905_v11  ;;  %v605_v63 = vsel %vm586_vm3, %v584_v61, -inf }
 0x1c5   :  { %v599_v23 = vsel %vm586_vm3, %v582_v20, -inf  ;;  %v583_v24 = vadd.f32 %v1028_v19, %v905_v11 }
 0x1c6   :  { %600 = vmax.xlane.f32.xlu0 %v599_v23  ;;  %v608_v62 = vsel %vm586_vm3, %v585_v59, -inf }
 0x1c7   :  { %v1003_v25 = vpop.f32.mrb[16].mxu0  ;;  %v602_v26 = vsel %vm586_vm3, %v583_v24, -inf }
 0x1c8   :  { %v565_v28 = vadd.f32 %v1003_v25, %v412_v0  ;;  %603 = vmax.xlane.f32.xlu1 %v602_v26  ;;  %v532_v31 = vpop.f32.mrb[17].mxu0 }
 0x1c9   :  { %v563_v37 = vadd.f32 %v532_v31, %v404_v2  ;;  %v1004_v38 = vpop.f32.mrb[18].mxu0 }
 0x1ca   :  { %v566_v39 = vadd.f32 %v1004_v38, %v415_v4  ;;  %v535_v40 = vpop.f32.mrb[19].mxu0  ;;  %v580_v42 = vadd.f32 %v905_v11, %v565_v28 }
 0x1cb   :  { %v564_v45 = vadd.f32 %v535_v40, %v407_v6  ;;  %v578_v52 = vadd.f32 %v905_v11, %v563_v37 }
 0x1cc   :  { %v593_v53 = vsel %vm586_vm3, %v580_v42, -inf  ;;  %v581_v54 = vadd.f32 %v905_v11, %v566_v39 }
 0x1cd   :  { %594 = vmax.xlane.f32.xlu1 %v593_v53  ;;  %v587_v55 = vsel %vm586_vm3, %v578_v52, -inf  ;;  %v579_v57 = vadd.f32 %v905_v11, %v564_v45 }
 0x1ce   :  { %588 = vmax.xlane.f32.xlu0 %v587_v55  ;;  %v596_v58 = vsel %vm586_vm3, %v581_v54, -inf }
 0x1cf   :  { %v590_v60 = vsel %vm586_vm3, %v579_v57, -inf }
 0x1d1   :  { %597 = vmax.xlane.f32.xlu1 %v596_v58 }
 0x1d2   :  { %591 = vmax.xlane.f32.xlu0 %v590_v60 }
 0x1d5   :  { %609 = vmax.xlane.f32.xlu1 %v608_v62 }
 0x1d6   :  { %606 = vmax.xlane.f32.xlu0 %v605_v63 }
 0x253   :  { %v601_v0 = vpop.xlane.xlu0 %600 }
 0x254   :  { %v615_v1 = vsub.f32 %v582_v20, %v601_v0  ;;  %v1121_v0 = vmov 1  }
 0x255   :  { %v604_v2 = vpop.xlane.xlu1 %603  ;;  %1038 = vset.pattern.permute.xlu0 %v1121_v0 }
 0x256   :  { %v627_v3 = vmul.f32 1.442695, %v615_v1  ;;  %v616_v4 = vsub.f32 %v583_v24, %v604_v2  ;;  %v1122_v1 = vmov 0  }
 0x257   :  { %1037 = vset.pattern.permute.xlu1 %v1122_v1 }
 0x258   :  { %1089 = vpow2.f32 %v627_v3  ;;  %v629_v5 = vmul.f32 1.442695, %v616_v4 }
 0x25a   :  { %1091 = vpow2.f32 %v629_v5  ;;  %v595_v6 = vpop.xlane.xlu1 %594 }
 0x25b   :  { %v613_v7 = vsub.f32 %v580_v42, %v595_v6  ;;  %v589_v10 = vpop.xlane.xlu0 %588 }
 0x25c   :  { %v611_v12 = vsub.f32 %v578_v52, %v589_v10 }
 0x25d   :  { %v623_v9 = vmul.f32 1.442695, %v613_v7 }
 0x25e   :  { %v619_v11 = vmul.f32 1.442695, %v611_v12  ;;  %v598_v14 = vpop.xlane.xlu1 %597 }
 0x25f   :  { %1093 = vpow2.f32 %v623_v9  ;;  %v592_v16 = vpop.xlane.xlu0 %591  ;;  %v614_v18 = vsub.f32 %v581_v54, %v598_v14 }
 0x260   :  { %1095 = vpow2.f32 %v619_v11  ;;  %v612_v37 = vsub.f32 %v579_v57, %v592_v16 }
 0x261   :  { %v625_v31 = vmul.f32 1.442695, %v614_v18 }
 0x262   :  { %v1090_v19 = vpop.eup %1089  ;;  %v610_v23 = vpop.xlane.xlu1 %609  ;;  %v621_v45 = vmul.f32 1.442695, %v612_v37 }
 0x263   :  { %v618_v20 = vsub.f32 %v585_v59, %v610_v23  ;;  %v607_v25 = vpop.xlane.xlu0 %606  ;;  %v647_v24 = vsel %vm586_vm3, %v1090_v19, 0.0 }
 0x264   :  { %v1092_v26 = vpop.eup %1091  ;;  %v617_v28 = vsub.f32 %v584_v61, %v607_v25  ;;  %648 = vadd.xlane.f32.xlu0 %v647_v24 }
 0x265   :  { %v633_v38 = vmul.f32 1.442695, %v618_v20  ;;  %v650_v39 = vsel %vm586_vm3, %v1092_v26, 0.0  ;;  %v1123_v20 = vmov 2  }
 0x266   :  { %v631_v40 = vmul.f32 1.442695, %v617_v28  ;;  %651 = vadd.xlane.f32.xlu1 %v650_v39 }
 0x267   :  { %1097 = vpow2.f32 %v633_v38 }
 0x268   :  { %1099 = vpow2.f32 %v631_v40 }
 0x269   :  { %v1345_v42 = vpop.eup %1093  ;;  %1101 = vpow2.f32 %v625_v31 }
 0x26a   :  { %v641_v52 = vsel %vm586_vm3, %v1345_v42, 0.0  ;;  %v1096_v53 = vpop.eup %1095  ;;  %1103 = vpow2.f32 %v621_v45 }
 0x26b   :  { %642 = vadd.xlane.f32.xlu0 %v641_v52  ;;  %v635_v54 = vsel %vm586_vm3, %v1096_v53, 0.0 }
 0x26f   :  { %636 = vadd.xlane.f32.xlu0 %v635_v54 }
 0x271   :  { %v1098_v55 = vpop.eup %1097 }
 0x272   :  { %v1100_v57 = vpop.eup %1099  ;;  %v656_v58 = vsel %vm586_vm3, %v1098_v55, 0.0 }
 0x273   :  { %v1102_v59 = vpop.eup %1101  ;;  %657 = vadd.xlane.f32.xlu1 %v656_v58  ;;  %v653_v60 = vsel %vm586_vm3, %v1100_v57, 0.0 }
 0x274   :  { %654 = vadd.xlane.f32.xlu0 %v653_v60  ;;  %v644_v61 = vsel %vm586_vm3, %v1102_v59, 0.0  ;;  %v1104_v62 = vpop.eup %1103 }
 0x275   :  { %v638_v63 = vsel %vm586_vm3, %v1104_v62, 0.0 }
 0x277   :  { %645 = vadd.xlane.f32.xlu1 %v644_v61 }
 0x27b   :  { %639 = vadd.xlane.f32.xlu1 %v638_v63 }
 0x2f1   :  { %v649_v2 = vpop.xlane.xlu0 %648 }
 0x2f3   :  { %v652_v6 = vpop.xlane.xlu1 %651 }
 0x2f8   :  { %v643_v3 = vpop.xlane.xlu0 %642 }
 0x2fc   :  { %v637_v4 = vpop.xlane.xlu0 %636 }
 0x300   :  { %v658_v7 = vpop.xlane.xlu1 %657 }
 0x301   :  { %v655_v5 = vpop.xlane.xlu0 %654 }
 0x302   :  { %1105 = vrcp.f32 %v655_v5 }
 0x303   :  { %1107 = vrcp.f32 %v649_v2 }
 0x304   :  { %1109 = vrcp.f32 %v652_v6  ;;  %v646_v16 = vpop.xlane.xlu1 %645 }
 0x305   :  { %1111 = vrcp.f32 %v637_v4 }
 0x306   :  { %1113 = vrcp.f32 %v658_v7  ;;  %v172_v7 = vunpack.c.h.bf16 %v1229_v15 }
 0x307   :  { %1115 = vrcp.f32 %v646_v16 }
 0x308   :  { %v640_v24 = vpop.xlane.xlu1 %639 }
 0x309   :  { %1117 = vrcp.f32 %v640_v24 }
 0x30a   :  { %1119 = vrcp.f32 %v643_v3 }
 0x30c   :  { %v1106_v10 = vpop.eup %1105 }
 0x30d   :  { %v673_v12 = vmul.f32 %v1106_v10, %v1100_v57  ;;  %v1108_v9 = vpop.eup %1107  ;;  %v188_v10 = vunpack.c.h.bf16 %v1257_v21 }
 0x30e   :  { %v671_v11 = vmul.f32 %v1108_v9, %v1090_v19  ;;  %v1110_v14 = vpop.eup %1109 }
 0x30f   :  { %748 = vperm.xlu0 %1038, %v673_v12   ;;  %707 = vperm.xlu1 %1037, %v673_v12   ;;  %v672_v18 = vmul.f32 %v1110_v14, %v1092_v26  ;;  %v1112_v23 = vpop.eup %1111 }
 0x310   :  { %v1114_v25 = vpop.eup %1113  ;;  %v667_v28 = vmul.f32 %v1112_v23, %v1096_v53  ;;  %v190_v23 = vunpack.c.h.bf16 %v1262_v22 }
 0x311   :  { %v674_v31 = vmul.f32 %v1114_v25, %v1098_v55  ;;  %v1116_v19 = vpop.eup %1115  ;;  %v171_v55 = vunpack.c.l.bf16 %v1229_v15 }
 0x312   :  { %v670_v26 = vmul.f32 %v1116_v19, %v1102_v59 }
 0x313   :  { %740 = vperm.xlu0 %1038, %v671_v11   ;;  %697 = vperm.xlu1 %1037, %v671_v11   ;;  %v1118_v37 = vpop.eup %1117 }
 0x314   :  { %v668_v38 = vmul.f32 %v1118_v37, %v1104_v62  ;;  %v1120_v39 = vpop.eup %1119  ;;  %v187_v62 = vunpack.c.l.bf16 %v1257_v21  ;;  %v185_v37 = vunpack.c.l.bf16 %v1328_v56 }
 0x315   :  { %v669_v40 = vmul.f32 %v1120_v39, %v1345_v42  ;;  %v173_v42 = vunpack.c.l.bf16 %v1241_v17 }
 0x317   :  { %1044 = vset.pattern.permute.xlu0 %v1123_v20  ;;  %1039 = vset.pattern.permute.xlu1 %v1123_v20 }
 0x318   :  { %792 = vperm.xlu0 %1044, %v672_v18   ;;  %788 = vperm.xlu1 %1039, %v671_v11  }
 0x31c   :  { %1048 = vset.pattern.permute.xlu0 %v1122_v1  ;;  %1040 = vset.pattern.permute.xlu1 %v1122_v1 }
 0x31d   :  { %677 = vperm.xlu0 %1048, %v667_v28   ;;  %712 = vperm.xlu1 %1040, %v674_v31  }
 0x321   :  { %1050 = vset.pattern.permute.xlu0 %v1123_v20  ;;  %1041 = vset.pattern.permute.xlu1 %v1121_v0 }
 0x322   :  { %772 = vperm.xlu0 %1050, %v667_v28   ;;  %752 = vperm.xlu1 %1041, %v674_v31  }
 0x326   :  { %784 = vperm.xlu0 %1050, %v670_v26   ;;  %1042 = vset.pattern.permute.xlu1 %v1122_v1 }
 0x327   :  { %702 = vperm.xlu1 %1042, %v672_v18  }
 0x32a   :  { %1054 = vset.pattern.permute.xlu0 %v1121_v0 }
 0x32b   :  { %728 = vperm.xlu0 %1054, %v668_v38   ;;  %1043 = vset.pattern.permute.xlu1 %v1121_v0 }
 0x32c   :  { %744 = vperm.xlu1 %1043, %v672_v18  }
 0x32f   :  { %1056 = vset.pattern.permute.xlu0 %v1123_v20 }
 0x330   :  { %800 = vperm.xlu0 %1056, %v674_v31   ;;  %1045 = vset.pattern.permute.xlu1 %v1122_v1 }
 0x331   :  { %687 = vperm.xlu1 %1045, %v669_v40  }
 0x335   :  { %1046 = vset.pattern.permute.xlu1 %v1121_v0 }
 0x336   :  { %732 = vperm.xlu1 %1046, %v669_v40  }
 0x33a   :  { %1047 = vset.pattern.permute.xlu1 %v1123_v20 }
 0x33b   :  { %780 = vperm.xlu1 %1047, %v669_v40  }
 0x33f   :  { %1049 = vset.pattern.permute.xlu1 %v1121_v0 }
 0x340   :  { %724 = vperm.xlu1 %1049, %v667_v28  }
 0x344   :  { %1051 = vset.pattern.permute.xlu1 %v1122_v1 }
 0x345   :  { %692 = vperm.xlu1 %1051, %v670_v26  }
 0x349   :  { %1052 = vset.pattern.permute.xlu1 %v1121_v0 }
 0x34a   :  { %736 = vperm.xlu1 %1052, %v670_v26  }
 0x34e   :  { %1053 = vset.pattern.permute.xlu1 %v1122_v1 }
 0x34f   :  { %682 = vperm.xlu1 %1053, %v668_v38  }
 0x353   :  { %1055 = vset.pattern.permute.xlu1 %v1123_v20 }
 0x354   :  { %776 = vperm.xlu1 %1055, %v668_v38  }
 0x358   :  { %796 = vperm.xlu1 %1055, %v673_v12   ;;  %v174_v12 = vunpack.c.h.bf16 %v1241_v17 }
 0x38e   :  { %v749_v45 = vpop.permute.xlu0 %748  ;;  %v708_v52 = vpop.permute.xlu1 %707 }
 0x38f   :  { %v761_v53 = vmul.f32 %v749_v45, %v157_v51  ;;  %v721_v54 = vmul.f32 %v708_v52, %v173_v42  ;;  %v167_v45 = vunpack.c.l.bf16 %v1201_v8 }
 0x391   :  { %v1373_v57 = vadd.f32 %v761_v53, %v721_v54  ;;  %v183_v53 = vunpack.c.l.bf16 %v1308_v48 }
 0x392   :  { %v741_v58 = vpop.permute.xlu0 %740  ;;  %v698_v59 = vpop.permute.xlu1 %697 }
 0x393   :  { %v759_v60 = vmul.f32 %v741_v58, %v155_v49  ;;  %v719_v61 = vmul.f32 %v698_v59, %v171_v55 }
 0x395   :  { %v767_v1 = vadd.f32 %v759_v60, %v719_v61 }
 0x397   :  { %v793_v63 = vpop.permute.xlu0 %792  ;;  %v789_v0 = vpop.permute.xlu1 %788 }
 0x398   :  { %v807_v2 = vmul.f32 %v789_v0, %v187_v62  ;;  %v808_v20 = vmul.f32 %v793_v63, %v188_v10  ;;  %v170_v63 = vunpack.c.h.bf16 %v1221_v13  ;;  %v186_v0 = vunpack.c.h.bf16 %v1328_v56 }
 0x399   :  { %v184_v56 = vunpack.c.h.bf16 %v1308_v48 }
 0x39a   :  { %v815_v3 = vadd.f32 %v807_v2, %v767_v1 }
 0x39c   :  { %v918_v43 = vpack.c.bf16 %v815_v3, %v815_v3  ;;  %v678_v51 = vpop.permute.xlu0 %677  ;;  %v713_v4 = vpop.permute.xlu1 %712 }
 0x39d   :  { %v722_v25 = vmul.f32 %v713_v4, %v174_v12  ;;  %v715_v58 = vmul.f32 %v678_v51, %v167_v45 }
 0x39e   :  { %856 = vst.msk [vmem:[%s1445_s9 + $0x10] sm:$0xf] %vm851_vm4, %v918_v43  ;;  %v168_v43 = vunpack.c.h.bf16 %v1201_v8 }
 0x3a1   :  { %v773_v5 = vpop.permute.xlu0 %772  ;;  %v753_v41 = vpop.permute.xlu1 %752 }
 0x3a2   :  { %v762_v14 = vmul.f32 %v753_v41, %v158_v47  ;;  %v803_v29 = vmul.f32 %v773_v5, %v183_v53 }
 0x3a4   :  { %v770_v15 = vadd.f32 %v762_v14, %v722_v25 }
 0x3a5   :  { %v785_v49 = vpop.permute.xlu0 %784 }
 0x3a6   :  { %v703_v6 = vpop.permute.xlu1 %702  ;;  %v806_v2 = vmul.f32 %v785_v49, %v186_v0 }
 0x3a7   :  { %v720_v16 = vmul.f32 %v703_v6, %v172_v7  ;;  %v189_v6 = vunpack.c.l.bf16 %v1262_v22 }
 0x3aa   :  { %v729_v9 = vpop.permute.xlu0 %728 }
 0x3ab   :  { %v745_v11 = vpop.permute.xlu1 %744  ;;  %v756_v41 = vmul.f32 %v729_v9, %v152_v35 }
 0x3ac   :  { %v760_v18 = vmul.f32 %v745_v11, %v156_v50 }
 0x3ae   :  { %v768_v24 = vadd.f32 %v760_v18, %v720_v16 }
 0x3af   :  { %v801_v28 = vpop.permute.xlu0 %800 }
 0x3b0   :  { %v816_v31 = vadd.f32 %v808_v20, %v768_v24  ;;  %v810_v21 = vmul.f32 %v801_v28, %v190_v23  ;;  %v688_v19 = vpop.permute.xlu1 %687 }
 0x3b1   :  { %v717_v38 = vmul.f32 %v688_v19, %v169_v46 }
 0x3b2   :  { %v919_v17 = vpack.c.bf16 %v816_v31, %v816_v31  ;;  %v818_v26 = vadd.f32 %v810_v21, %v770_v15 }
 0x3b4   :  { %857 = vst.msk [vmem:[%s1445_s9 + $0x14] sm:$0xf] %vm851_vm4, %v919_v17  ;;  %v921_v44 = vpack.c.bf16 %v818_v26, %v818_v26 }
 0x3b5   :  { %v733_v47 = vpop.permute.xlu1 %732 }
 0x3b6   :  { %859 = vst.msk [vmem:[%s1445_s9 + $0x1c] sm:$0xf] %vm851_vm4, %v921_v44  ;;  %v757_v50 = vmul.f32 %v733_v47, %v153_v36 }
 0x3b8   :  { %v765_v40 = vadd.f32 %v757_v50, %v717_v38 }
 0x3ba   :  { %v781_v39 = vpop.permute.xlu1 %780 }
 0x3bb   :  { %v805_v42 = vmul.f32 %v781_v39, %v185_v37 }
 0x3bd   :  { %v813_v52 = vadd.f32 %v805_v42, %v765_v40 }
 0x3bf   :  { %v916_v54 = vpack.c.bf16 %v813_v52, %v813_v52  ;;  %v725_v55 = vpop.permute.xlu1 %724 }
 0x3c0   :  { %v755_v59 = vmul.f32 %v725_v55, %v151_v34 }
 0x3c1   :  { %854 = vst.msk [vmem:[%s1445_s9 + $0x8] sm:$0xf] %vm851_vm4, %v916_v54 }
 0x3c2   :  { %v763_v36 = vadd.f32 %v755_v59, %v715_v58 }
 0x3c4   :  { %v811_v60 = vadd.f32 %v803_v29, %v763_v36  ;;  %v693_v61 = vpop.permute.xlu1 %692 }
 0x3c5   :  { %v718_v34 = vmul.f32 %v693_v61, %v170_v63 }
 0x3c6   :  { %v914_v62 = vpack.c.bf16 %v811_v60, %v811_v60 }
 0x3c8   :  { %852 = vst.msk [vmem:[%s1445_s9] sm:$0xf] %vm851_vm4, %v914_v62 }
 0x3c9   :  { %v737_v27 = vpop.permute.xlu1 %736 }
 0x3ca   :  { %v758_v1 = vmul.f32 %v737_v27, %v154_v33 }
 0x3cc   :  { %v766_v3 = vadd.f32 %v758_v1, %v718_v34 }
 0x3ce   :  { %v814_v51 = vadd.f32 %v806_v2, %v766_v3  ;;  %v683_v4 = vpop.permute.xlu1 %682 }
 0x3cf   :  { %v716_v13 = vmul.f32 %v683_v4, %v168_v43 }
 0x3d0   :  { %v917_v5 = vpack.c.bf16 %v814_v51, %v814_v51 }
 0x3d1   :  { %v764_v33 = vadd.f32 %v756_v41, %v716_v13 }
 0x3d2   :  { %855 = vst.msk [vmem:[%s1445_s9 + $0xc] sm:$0xf] %vm851_vm4, %v917_v5 }
 0x3d3   :  { %v777_v30 = vpop.permute.xlu1 %776 }
 0x3d4   :  { %v804_v49 = vmul.f32 %v777_v30, %v184_v56 }
 0x3d6   :  { %v812_v8 = vadd.f32 %v804_v49, %v764_v33 }
 0x3d7   :  { %v797_v7 = vpop.permute.xlu1 %796 }
 0x3d8   :  { %v915_v10 = vpack.c.bf16 %v812_v8, %v812_v8  ;;  %v809_v12 = vmul.f32 %v797_v7, %v189_v6 }
 0x3da   :  { %853 = vst.msk [vmem:[%s1445_s9 + $0x4] sm:$0xf] %vm851_vm4, %v915_v10  ;;  %v817_v32 = vadd.f32 %v809_v12, %v1373_v57 }
 0x3dc   :  { %v920_v35 = vpack.c.bf16 %v817_v32, %v817_v32 }
 0x3de   :  { %858 = vst.msk [vmem:[%s1445_s9 + $0x18] sm:$0xf] %vm851_vm4, %v920_v35 }

// kernel: rpvnet_forward.27
= control target key start
LH: loop header
LB: loop body
LE: loop exit
PB: predicated region body
PF: predicated region fallthrough
CT: control target
= control target key end

     0   :  { %vm63_vm0 = vcmask 261120   ;;  %vm153_vm1 = vcmask 523264   ;;  %vm240_vm2 = vcmask 388096   ;;  %s393_s2 = inlined_call_operand.vmem [shape: bf16[64,48], index: 2, kind: input, shape index: {}]   ;;  %s394_s3 = inlined_call_operand.vmem [shape: bf16[32,48], index: 3, kind: input, shape index: {}]   ;;  %s395_s1 = inlined_call_operand.vmem [shape: bf16[32,32], index: 1, kind: input, shape index: {}]   ;;  %s396_s0 = inlined_call_operand.vmem [shape: bf16[32,64], index: 0, kind: input, shape index: {}]   ;;  %s397_s4 = inlined_call_operand.vmem [shape: f32[1,48], index: 4, kind: input, shape index: {}]   ;;  %s398_s5 = inlined_call_operand.vmem [shape: bf16[32,48], index: 5, kind: output, shape index: {}]  }
   0x1   :  { %v306_v0 = vld [vmem:[%s393_s2] sm:$0xff]   ;;  %v307_v1 = vld [vmem:[%s393_s2 + $0x8] sm:$0xff]   ;;  %v309_v3 = vld [vmem:[%s393_s2 + $0x10] sm:$0xff]  }
   0x2   :  { %290 = vmatprep.subr.bf16.mxu0 %v306_v0  ;;  %v308_v2 = vld [vmem:[%s394_s3] sm:$0xff]   ;;  %v310_v4 = vld [vmem:[%s394_s3 + $0x8] sm:$0xff]   ;;  %v312_v6 = vld [vmem:[%s393_s2 + $0x18] sm:$0xff]  }
   0x3   :  { %291 = vmatpush3.bf16.msra.mxu0 %v306_v0  ;;  %282 = vmatprep.subr.bf16.mxu1 %v308_v2  ;;  %v311_v5 = vld [vmem:[%s395_s1] sm:$0xff]   ;;  %v313_v7 = vld [vmem:[%s395_s1 + $0x8] sm:$0xff]  }
   0x4   :  { %292 = vmatprep.subr.bf16.mxu0 %v307_v1  ;;  %283 = vmatpush3.bf16.msra.mxu1 %v308_v2  ;;  %v314_v8 = vld [vmem:[%s396_s0] sm:$0xff]   ;;  %v315_v9 = vld [vmem:[%s396_s0 + $0x8] sm:$0xff]  }
   0x5   :  { %284 = vmatprep.subr.bf16.mxu1 %v310_v4  ;;  %286 = vmatprep.mubr.msk.bf16.mxu1 %vm63_vm0, %v311_v5  ;;  %v263_v15 = vld [vmem:[%s397_s4] ss:$0 sm:$0xff] }
   0x6   :  { %298 = vmatprep.mubr.msk.bf16.mxu0 %vm153_vm1, %v314_v8 }
   0x7   :  { %293 = vmatpush3.bf16.msra.mxu0 %v307_v1 }
   0x8   :  { %294 = vmatprep.subr.bf16.mxu0 %v309_v3  ;;  %285 = vmatpush3.bf16.msra.mxu1 %v310_v4 }
   0xb   :  { %295 = vmatpush3.bf16.msra.mxu0 %v309_v3  ;;  %287 = vmatmul.mubr.msk.bf16.vlgmr.msra.gmra.mrb[0].mxu1 %vm63_vm0, %v313_v7 }
   0xc   :  { %296 = vmatprep.subr.bf16.mxu0 %v312_v6 }
   0xf   :  { %297 = vmatpush3.bf16.msra.mxu0 %v312_v6 }
  0x12   :  { %299 = vmatmul.mubr.msk.bf16.vlgmr.msra.gmra.mrb[0].mxu0 %vm153_vm1, %v315_v9 }
  0xde   :  { %v288_v10 = vpop.f32.mrb[0].mxu1 }
  0xdf   :  { %v104_v11 = vpop.f32.mrb[1].mxu1 }
  0xe0   :  { %v289_v12 = vpop.f32.mrb[2].mxu1 }
  0xe1   :  { %v107_v13 = vpop.f32.mrb[3].mxu1 }
  0xe5   :  { %v300_v14 = vpop.f32.mrb[0].mxu0 }
  0xe6   :  { %v203_v16 = vadd.f32 %v300_v14, %v288_v10  ;;  %v194_v17 = vpop.f32.mrb[1].mxu0 }
  0xe7   :  { %v195_v18 = vadd.f32 %v194_v17, %v104_v11  ;;  %v301_v19 = vpop.f32.mrb[2].mxu0 }
  0xe8   :  { %v218_v20 = vadd.f32 %v263_v15, %v203_v16  ;;  %v206_v21 = vadd.f32 %v301_v19, %v289_v12  ;;  %v197_v22 = vpop.f32.mrb[3].mxu0 }
  0xe9   :  { %v216_v23 = vadd.f32 %v263_v15, %v195_v18  ;;  %v198_v24 = vadd.f32 %v197_v22, %v107_v13 }
  0xea   :  { %v222_v25 = vmax.f32 %v218_v20, 0.0  ;;  %v219_v26 = vadd.f32 %v263_v15, %v206_v21 }
  0xeb   :  { %v220_v27 = vmax.f32 %v216_v23, 0.0  ;;  %v217_v28 = vadd.f32 %v263_v15, %v198_v24 }
  0xec   :  { %v270_v29 = vpack.c.bf16 %v222_v25, %v222_v25  ;;  %v223_v30 = vmax.f32 %v219_v26, 0.0 }
  0xed   :  { %v268_v31 = vpack.c.bf16 %v220_v27, %v220_v27  ;;  %v221_v32 = vmax.f32 %v217_v28, 0.0 }
  0xee   :  { %243 = vst.msk [vmem:[%s398_s5 + $0x8] sm:$0xf] %vm240_vm2, %v270_v29  ;;  %v271_v33 = vpack.c.bf16 %v223_v30, %v223_v30 }
  0xef   :  { %241 = vst.msk [vmem:[%s398_s5] sm:$0xf] %vm240_vm2, %v268_v31  ;;  %v269_v34 = vpack.c.bf16 %v221_v32, %v221_v32 }
  0xf0   :  { %244 = vst.msk [vmem:[%s398_s5 + $0xc] sm:$0xf] %vm240_vm2, %v271_v33 }
  0xf1   :  { %242 = vst.msk [vmem:[%s398_s5 + $0x4] sm:$0xf] %vm240_vm2, %v269_v34 }

// kernel: rpvnet_forward.28
= control target key start
LH: loop header
LB: loop body
LE: loop exit
PB: predicated region body
PF: predicated region fallthrough
CT: control target
= control target key end

     0   :  { %vm107_vm0 = vcmask 130048   ;;  %vm287_vm1 = vcmask 392192   ;;  %vm512_vm2 = vcmask 388096   ;;  %s889_s2 = inlined_call_operand.vmem [shape: bf16[48,48], index: 2, kind: input, shape index: {}]   ;;  %s890_s3 = inlined_call_operand.vmem [shape: bf16[16,48], index: 3, kind: input, shape index: {}]   ;;  %s891_s1 = inlined_call_operand.vmem [shape: bf16[128,16], index: 1, kind: input, shape index: {}]   ;;  %s892_s0 = inlined_call_operand.vmem [shape: bf16[128,48], index: 0, kind: input, shape index: {}]   ;;  %s893_s4 = inlined_call_operand.vmem [shape: f32[1,48], index: 4, kind: input, shape index: {}]   ;;  %s894_s5 = inlined_call_operand.vmem [shape: bf16[128,48], index: 5, kind: output, shape index: {}]  }
   0x1   :  { %v678_v0 = vld [vmem:[%s889_s2] sm:$0xff]   ;;  %v679_v1 = vld [vmem:[%s889_s2 + $0x8] sm:$0xff]   ;;  %v682_v4 = vld [vmem:[%s889_s2 + $0x10] sm:$0xff]  }
   0x2   :  { %640 = vmatprep.subr.bf16.mxu0 %v678_v0  ;;  %v680_v2 = vld [vmem:[%s890_s3] sm:$0xff]   ;;  %v683_v5 = vld [vmem:[%s891_s1 + $0x8] sm:$0xff]   ;;  %v686_v7 = vld [vmem:[%s891_s1 + $0x10] sm:$0xff]  }
   0x3   :  { %641 = vmatpush3.bf16.msra.mxu0 %v678_v0  ;;  %v681_v3 = vld [vmem:[%s891_s1] sm:$0xff]   ;;  %622 = vmatprep.subr.bf16.mxu1 %v680_v2  ;;  %v685_v8 = vld [vmem:[%s892_s0 + $0x8] sm:$0xff]   ;;  %v688_v9 = vld [vmem:[%s892_s0 + $0x10] sm:$0xff]  }
   0x4   :  { %642 = vmatprep.subr.bf16.mxu0 %v679_v1  ;;  %623 = vmatpush3.bf16.msra.mxu1 %v680_v2  ;;  %v684_v6 = vld [vmem:[%s892_s0] sm:$0xff]   ;;  %v687_v10 = vld [vmem:[%s891_s1 + $0x18] sm:$0xff]   ;;  %v691_v14 = vld [vmem:[%s891_s1 + $0x28] sm:$0xff]  }
   0x5   :  { %624 = vmatprep.mubr.msk.bf16.mxu1 %vm107_vm0, %v681_v3  ;;  %646 = vmatprep.mubr.msk.bf16.mxu0 %vm287_vm1, %v684_v6  ;;  %v690_v11 = vld [vmem:[%s891_s1 + $0x20] sm:$0xff]   ;;  %v689_v12 = vld [vmem:[%s892_s0 + $0x18] sm:$0xff]   ;;  %v694_v15 = vld [vmem:[%s891_s1 + $0x30] sm:$0xff]  }
   0x6   :  { %v692_v13 = vld [vmem:[%s892_s0 + $0x20] sm:$0xff]   ;;  %v693_v16 = vld [vmem:[%s892_s0 + $0x28] sm:$0xff]   ;;  %v696_v17 = vld [vmem:[%s892_s0 + $0x30] sm:$0xff]  }
   0x7   :  { %643 = vmatpush3.bf16.msra.mxu0 %v679_v1  ;;  %625 = vmatmul.mubr.msk.bf16.vlgmr.msra.gmra.mrb[0].mxu1 %vm107_vm0, %v683_v5  ;;  %v695_v18 = vld [vmem:[%s891_s1 + $0x38] sm:$0xff]   ;;  %v807_v25 = vld [vmem:[%s893_s4] ss:$0 sm:$0xff] }
   0x8   :  { %644 = vmatprep.subr.bf16.mxu0 %v682_v4  ;;  %628 = vmatprep.mubr.msk.bf16.mxu1 %vm107_vm0, %v686_v7  ;;  %v697_v19 = vld [vmem:[%s892_s0 + $0x38] sm:$0xff]  }
   0xb   :  { %645 = vmatpush3.bf16.msra.mxu0 %v682_v4 }
   0xe   :  { %647 = vmatmul.mubr.msk.bf16.vlgmr.msra.gmra.mrb[0].mxu0 %vm287_vm1, %v685_v8 }
   0xf   :  { %650 = vmatprep.mubr.msk.bf16.mxu0 %vm287_vm1, %v688_v9  ;;  %629 = vmatmul.mubr.msk.bf16.gmra.mrb[4].mxu1 %vm107_vm0, %v687_v10 }
  0x10   :  { %632 = vmatprep.mubr.msk.bf16.mxu1 %vm107_vm0, %v690_v11 }
  0x16   :  { %651 = vmatmul.mubr.msk.bf16.gmra.mrb[4].mxu0 %vm287_vm1, %v689_v12 }
  0x17   :  { %654 = vmatprep.mubr.msk.bf16.mxu0 %vm287_vm1, %v692_v13  ;;  %633 = vmatmul.mubr.msk.bf16.gmra.mrb[8].mxu1 %vm107_vm0, %v691_v14 }
  0x18   :  { %636 = vmatprep.mubr.msk.bf16.mxu1 %vm107_vm0, %v694_v15 }
  0x1e   :  { %655 = vmatmul.mubr.msk.bf16.gmra.mrb[8].mxu0 %vm287_vm1, %v693_v16 }
  0x1f   :  { %658 = vmatprep.mubr.msk.bf16.mxu0 %vm287_vm1, %v696_v17  ;;  %637 = vmatmul.mubr.msk.bf16.gmra.mrb[12].mxu1 %vm107_vm0, %v695_v18 }
  0x26   :  { %659 = vmatmul.mubr.msk.bf16.gmra.mrb[12].mxu0 %vm287_vm1, %v697_v19 }
  0xda   :  { %v626_v20 = vpop.f32.mrb[0].mxu1 }
  0xdb   :  { %v166_v21 = vpop.f32.mrb[1].mxu1 }
  0xdc   :  { %v627_v22 = vpop.f32.mrb[2].mxu1 }
  0xdd   :  { %v169_v23 = vpop.f32.mrb[3].mxu1 }
  0xe1   :  { %v648_v24 = vpop.f32.mrb[0].mxu0 }
  0xe2   :  { %v355_v26 = vadd.f32 %v648_v24, %v626_v20  ;;  %v346_v27 = vpop.f32.mrb[1].mxu0  ;;  %v630_v30 = vpop.f32.mrb[4].mxu1 }
  0xe3   :  { %v347_v28 = vadd.f32 %v346_v27, %v166_v21  ;;  %v649_v29 = vpop.f32.mrb[2].mxu0  ;;  %v182_v34 = vpop.f32.mrb[5].mxu1 }
  0xe4   :  { %v418_v31 = vadd.f32 %v807_v25, %v355_v26  ;;  %v358_v32 = vadd.f32 %v649_v29, %v627_v22  ;;  %v349_v33 = vpop.f32.mrb[3].mxu0  ;;  %v631_v37 = vpop.f32.mrb[6].mxu1 }
  0xe5   :  { %v416_v35 = vadd.f32 %v807_v25, %v347_v28  ;;  %v350_v36 = vadd.f32 %v349_v33, %v169_v23  ;;  %v185_v40 = vpop.f32.mrb[7].mxu1 }
  0xe6   :  { %v434_v38 = vmax.f32 %v418_v31, 0.0  ;;  %v419_v39 = vadd.f32 %v807_v25, %v358_v32 }
  0xe7   :  { %v432_v41 = vmax.f32 %v416_v35, 0.0  ;;  %v417_v42 = vadd.f32 %v807_v25, %v350_v36 }
  0xe8   :  { %v588_v43 = vpack.c.bf16 %v434_v38, %v434_v38  ;;  %v435_v44 = vmax.f32 %v419_v39, 0.0 }
  0xe9   :  { %v586_v45 = vpack.c.bf16 %v432_v41, %v432_v41  ;;  %v433_v46 = vmax.f32 %v417_v42, 0.0  ;;  %v652_v47 = vpop.f32.mrb[4].mxu0 }
  0xea   :  { %515 = vst.msk [vmem:[%s894_s5 + $0x8] sm:$0xf] %vm512_vm2, %v588_v43  ;;  %v589_v48 = vpack.c.bf16 %v435_v44, %v435_v44  ;;  %v371_v49 = vadd.f32 %v652_v47, %v630_v30  ;;  %v362_v50 = vpop.f32.mrb[5].mxu0  ;;  %v634_v54 = vpop.f32.mrb[8].mxu1 }
  0xeb   :  { %513 = vst.msk [vmem:[%s894_s5] sm:$0xf] %vm512_vm2, %v586_v45  ;;  %v587_v51 = vpack.c.bf16 %v433_v46, %v433_v46  ;;  %v363_v52 = vadd.f32 %v362_v50, %v182_v34  ;;  %v653_v53 = vpop.f32.mrb[6].mxu0  ;;  %v198_v58 = vpop.f32.mrb[9].mxu1 }
  0xec   :  { %516 = vst.msk [vmem:[%s894_s5 + $0xc] sm:$0xf] %vm512_vm2, %v589_v48  ;;  %v422_v55 = vadd.f32 %v807_v25, %v371_v49  ;;  %v374_v56 = vadd.f32 %v653_v53, %v631_v37  ;;  %v365_v57 = vpop.f32.mrb[7].mxu0  ;;  %v635_v61 = vpop.f32.mrb[10].mxu1 }
  0xed   :  { %514 = vst.msk [vmem:[%s894_s5 + $0x4] sm:$0xf] %vm512_vm2, %v587_v51  ;;  %v420_v59 = vadd.f32 %v807_v25, %v363_v52  ;;  %v366_v60 = vadd.f32 %v365_v57, %v185_v40  ;;  %v201_v0 = vpop.f32.mrb[11].mxu1 }
  0xee   :  { %v438_v62 = vmax.f32 %v422_v55, 0.0  ;;  %v423_v63 = vadd.f32 %v807_v25, %v374_v56 }
  0xef   :  { %v436_v1 = vmax.f32 %v420_v59, 0.0  ;;  %v421_v2 = vadd.f32 %v807_v25, %v366_v60 }
  0xf0   :  { %v592_v3 = vpack.c.bf16 %v438_v62, %v438_v62  ;;  %v439_v4 = vmax.f32 %v423_v63, 0.0 }
  0xf1   :  { %v590_v5 = vpack.c.bf16 %v436_v1, %v436_v1  ;;  %v437_v6 = vmax.f32 %v421_v2, 0.0  ;;  %v656_v7 = vpop.f32.mrb[8].mxu0 }
  0xf2   :  { %519 = vst.msk [vmem:[%s894_s5 + $0x18] sm:$0xf] %vm512_vm2, %v592_v3  ;;  %v593_v8 = vpack.c.bf16 %v439_v4, %v439_v4  ;;  %v387_v9 = vadd.f32 %v656_v7, %v634_v54  ;;  %v378_v10 = vpop.f32.mrb[9].mxu0  ;;  %v638_v14 = vpop.f32.mrb[12].mxu1 }
  0xf3   :  { %517 = vst.msk [vmem:[%s894_s5 + $0x10] sm:$0xf] %vm512_vm2, %v590_v5  ;;  %v591_v11 = vpack.c.bf16 %v437_v6, %v437_v6  ;;  %v379_v12 = vadd.f32 %v378_v10, %v198_v58  ;;  %v657_v13 = vpop.f32.mrb[10].mxu0  ;;  %v214_v18 = vpop.f32.mrb[13].mxu1 }
  0xf4   :  { %520 = vst.msk [vmem:[%s894_s5 + $0x1c] sm:$0xf] %vm512_vm2, %v593_v8  ;;  %v426_v15 = vadd.f32 %v807_v25, %v387_v9  ;;  %v390_v16 = vadd.f32 %v657_v13, %v635_v61  ;;  %v381_v17 = vpop.f32.mrb[11].mxu0  ;;  %v639_v21 = vpop.f32.mrb[14].mxu1 }
  0xf5   :  { %518 = vst.msk [vmem:[%s894_s5 + $0x14] sm:$0xf] %vm512_vm2, %v591_v11  ;;  %v424_v19 = vadd.f32 %v807_v25, %v379_v12  ;;  %v382_v20 = vadd.f32 %v381_v17, %v201_v0  ;;  %v217_v24 = vpop.f32.mrb[15].mxu1 }
  0xf6   :  { %v442_v22 = vmax.f32 %v426_v15, 0.0  ;;  %v427_v23 = vadd.f32 %v807_v25, %v390_v16 }
  0xf7   :  { %v440_v26 = vmax.f32 %v424_v19, 0.0  ;;  %v425_v27 = vadd.f32 %v807_v25, %v382_v20 }
  0xf8   :  { %v596_v28 = vpack.c.bf16 %v442_v22, %v442_v22  ;;  %v443_v29 = vmax.f32 %v427_v23, 0.0 }
  0xf9   :  { %v594_v30 = vpack.c.bf16 %v440_v26, %v440_v26  ;;  %v441_v31 = vmax.f32 %v425_v27, 0.0  ;;  %v660_v32 = vpop.f32.mrb[12].mxu0 }
  0xfa   :  { %523 = vst.msk [vmem:[%s894_s5 + $0x28] sm:$0xf] %vm512_vm2, %v596_v28  ;;  %v597_v33 = vpack.c.bf16 %v443_v29, %v443_v29  ;;  %v403_v34 = vadd.f32 %v660_v32, %v638_v14  ;;  %v394_v35 = vpop.f32.mrb[13].mxu0 }
  0xfb   :  { %521 = vst.msk [vmem:[%s894_s5 + $0x20] sm:$0xf] %vm512_vm2, %v594_v30  ;;  %v595_v36 = vpack.c.bf16 %v441_v31, %v441_v31  ;;  %v395_v37 = vadd.f32 %v394_v35, %v214_v18  ;;  %v661_v38 = vpop.f32.mrb[14].mxu0 }
  0xfc   :  { %524 = vst.msk [vmem:[%s894_s5 + $0x2c] sm:$0xf] %vm512_vm2, %v597_v33  ;;  %v430_v39 = vadd.f32 %v807_v25, %v403_v34  ;;  %v406_v40 = vadd.f32 %v661_v38, %v639_v21  ;;  %v397_v41 = vpop.f32.mrb[15].mxu0 }
  0xfd   :  { %522 = vst.msk [vmem:[%s894_s5 + $0x24] sm:$0xf] %vm512_vm2, %v595_v36  ;;  %v428_v42 = vadd.f32 %v807_v25, %v395_v37  ;;  %v398_v43 = vadd.f32 %v397_v41, %v217_v24 }
  0xfe   :  { %v446_v44 = vmax.f32 %v430_v39, 0.0  ;;  %v431_v45 = vadd.f32 %v807_v25, %v406_v40 }
  0xff   :  { %v444_v46 = vmax.f32 %v428_v42, 0.0  ;;  %v429_v47 = vadd.f32 %v807_v25, %v398_v43 }
 0x100   :  { %v600_v48 = vpack.c.bf16 %v446_v44, %v446_v44  ;;  %v447_v49 = vmax.f32 %v431_v45, 0.0 }
 0x101   :  { %v598_v50 = vpack.c.bf16 %v444_v46, %v444_v46  ;;  %v445_v51 = vmax.f32 %v429_v47, 0.0 }
 0x102   :  { %527 = vst.msk [vmem:[%s894_s5 + $0x38] sm:$0xf] %vm512_vm2, %v600_v48  ;;  %v601_v52 = vpack.c.bf16 %v447_v49, %v447_v49 }
 0x103   :  { %525 = vst.msk [vmem:[%s894_s5 + $0x30] sm:$0xf] %vm512_vm2, %v598_v50  ;;  %v599_v53 = vpack.c.bf16 %v445_v51, %v445_v51 }
 0x104   :  { %528 = vst.msk [vmem:[%s894_s5 + $0x3c] sm:$0xf] %vm512_vm2, %v601_v52 }
 0x105   :  { %526 = vst.msk [vmem:[%s894_s5 + $0x34] sm:$0xf] %vm512_vm2, %v599_v53 }

// kernel: rpvnet_forward.25
= control target key start
LH: loop header
LB: loop body
LE: loop exit
PB: predicated region body
PF: predicated region fallthrough
CT: control target
= control target key end

     0   :  { %vm81_vm0 = vcmask 261120   ;;  %vm203_vm1 = vcmask 523264   ;;  %vm336_vm2 = vcmask 388096   ;;  %s567_s2 = inlined_call_operand.vmem [shape: bf16[64,48], index: 2, kind: input, shape index: {}]   ;;  %s568_s3 = inlined_call_operand.vmem [shape: bf16[32,48], index: 3, kind: input, shape index: {}]   ;;  %s569_s1 = inlined_call_operand.vmem [shape: bf16[64,32], index: 1, kind: input, shape index: {}]   ;;  %s570_s0 = inlined_call_operand.vmem [shape: bf16[64,64], index: 0, kind: input, shape index: {}]   ;;  %s571_s4 = inlined_call_operand.vmem [shape: f32[1,48], index: 4, kind: input, shape index: {}]   ;;  %s572_s5 = inlined_call_operand.vmem [shape: bf16[64,48], index: 5, kind: output, shape index: {}]  }
   0x1   :  { %v438_v0 = vld [vmem:[%s567_s2] sm:$0xff]   ;;  %v439_v1 = vld [vmem:[%s567_s2 + $0x8] sm:$0xff]   ;;  %v441_v3 = vld [vmem:[%s567_s2 + $0x10] sm:$0xff]  }
   0x2   :  { %414 = vmatprep.subr.bf16.mxu0 %v438_v0  ;;  %v440_v2 = vld [vmem:[%s568_s3] sm:$0xff]   ;;  %v442_v4 = vld [vmem:[%s568_s3 + $0x8] sm:$0xff]   ;;  %v444_v6 = vld [vmem:[%s567_s2 + $0x18] sm:$0xff]  }
   0x3   :  { %415 = vmatpush3.bf16.msra.mxu0 %v438_v0  ;;  %402 = vmatprep.subr.bf16.mxu1 %v440_v2  ;;  %v443_v5 = vld [vmem:[%s569_s1] sm:$0xff]   ;;  %v445_v7 = vld [vmem:[%s569_s1 + $0x8] sm:$0xff]   ;;  %v448_v9 = vld [vmem:[%s569_s1 + $0x10] sm:$0xff]  }
   0x4   :  { %416 = vmatprep.subr.bf16.mxu0 %v439_v1  ;;  %403 = vmatpush3.bf16.msra.mxu1 %v440_v2  ;;  %v446_v8 = vld [vmem:[%s570_s0] sm:$0xff]   ;;  %v447_v10 = vld [vmem:[%s570_s0 + $0x8] sm:$0xff]   ;;  %v450_v11 = vld [vmem:[%s570_s0 + $0x10] sm:$0xff]  }
   0x5   :  { %404 = vmatprep.subr.bf16.mxu1 %v442_v4  ;;  %406 = vmatprep.mubr.msk.bf16.mxu1 %vm81_vm0, %v443_v5  ;;  %v449_v12 = vld [vmem:[%s569_s1 + $0x18] sm:$0xff]   ;;  %v371_v19 = vld [vmem:[%s571_s4] ss:$0 sm:$0xff] }
   0x6   :  { %422 = vmatprep.mubr.msk.bf16.mxu0 %vm203_vm1, %v446_v8  ;;  %v451_v13 = vld [vmem:[%s570_s0 + $0x18] sm:$0xff]  }
   0x7   :  { %417 = vmatpush3.bf16.msra.mxu0 %v439_v1 }
   0x8   :  { %418 = vmatprep.subr.bf16.mxu0 %v441_v3  ;;  %405 = vmatpush3.bf16.msra.mxu1 %v442_v4 }
   0xb   :  { %419 = vmatpush3.bf16.msra.mxu0 %v441_v3  ;;  %407 = vmatmul.mubr.msk.bf16.vlgmr.msra.gmra.mrb[0].mxu1 %vm81_vm0, %v445_v7 }
   0xc   :  { %420 = vmatprep.subr.bf16.mxu0 %v444_v6  ;;  %410 = vmatprep.mubr.msk.bf16.mxu1 %vm81_vm0, %v448_v9 }
   0xf   :  { %421 = vmatpush3.bf16.msra.mxu0 %v444_v6 }
  0x12   :  { %423 = vmatmul.mubr.msk.bf16.vlgmr.msra.gmra.mrb[0].mxu0 %vm203_vm1, %v447_v10 }
  0x13   :  { %426 = vmatprep.mubr.msk.bf16.mxu0 %vm203_vm1, %v450_v11  ;;  %411 = vmatmul.mubr.msk.bf16.gmra.mrb[4].mxu1 %vm81_vm0, %v449_v12 }
  0x1a   :  { %427 = vmatmul.mubr.msk.bf16.gmra.mrb[4].mxu0 %vm203_vm1, %v451_v13 }
  0xde   :  { %v408_v14 = vpop.f32.mrb[0].mxu1 }
  0xdf   :  { %v128_v15 = vpop.f32.mrb[1].mxu1 }
  0xe0   :  { %v409_v16 = vpop.f32.mrb[2].mxu1 }
  0xe1   :  { %v131_v17 = vpop.f32.mrb[3].mxu1 }
  0xe5   :  { %v424_v18 = vpop.f32.mrb[0].mxu0 }
  0xe6   :  { %v259_v20 = vadd.f32 %v424_v18, %v408_v14  ;;  %v250_v21 = vpop.f32.mrb[1].mxu0  ;;  %v412_v24 = vpop.f32.mrb[4].mxu1 }
  0xe7   :  { %v251_v22 = vadd.f32 %v250_v21, %v128_v15  ;;  %v425_v23 = vpop.f32.mrb[2].mxu0  ;;  %v144_v28 = vpop.f32.mrb[5].mxu1 }
  0xe8   :  { %v290_v25 = vadd.f32 %v371_v19, %v259_v20  ;;  %v262_v26 = vadd.f32 %v425_v23, %v409_v16  ;;  %v253_v27 = vpop.f32.mrb[3].mxu0  ;;  %v413_v31 = vpop.f32.mrb[6].mxu1 }
  0xe9   :  { %v288_v29 = vadd.f32 %v371_v19, %v251_v22  ;;  %v254_v30 = vadd.f32 %v253_v27, %v131_v17  ;;  %v147_v34 = vpop.f32.mrb[7].mxu1 }
  0xea   :  { %v298_v32 = vmax.f32 %v290_v25, 0.0  ;;  %v291_v33 = vadd.f32 %v371_v19, %v262_v26 }
  0xeb   :  { %v296_v35 = vmax.f32 %v288_v29, 0.0  ;;  %v289_v36 = vadd.f32 %v371_v19, %v254_v30 }
  0xec   :  { %v382_v37 = vpack.c.bf16 %v298_v32, %v298_v32  ;;  %v299_v38 = vmax.f32 %v291_v33, 0.0 }
  0xed   :  { %v380_v39 = vpack.c.bf16 %v296_v35, %v296_v35  ;;  %v297_v40 = vmax.f32 %v289_v36, 0.0  ;;  %v428_v41 = vpop.f32.mrb[4].mxu0 }
  0xee   :  { %339 = vst.msk [vmem:[%s572_s5 + $0x8] sm:$0xf] %vm336_vm2, %v382_v37  ;;  %v383_v42 = vpack.c.bf16 %v299_v38, %v299_v38  ;;  %v275_v43 = vadd.f32 %v428_v41, %v412_v24  ;;  %v266_v44 = vpop.f32.mrb[5].mxu0 }
  0xef   :  { %337 = vst.msk [vmem:[%s572_s5] sm:$0xf] %vm336_vm2, %v380_v39  ;;  %v381_v45 = vpack.c.bf16 %v297_v40, %v297_v40  ;;  %v267_v46 = vadd.f32 %v266_v44, %v144_v28  ;;  %v429_v47 = vpop.f32.mrb[6].mxu0 }
  0xf0   :  { %340 = vst.msk [vmem:[%s572_s5 + $0xc] sm:$0xf] %vm336_vm2, %v383_v42  ;;  %v294_v48 = vadd.f32 %v371_v19, %v275_v43  ;;  %v278_v49 = vadd.f32 %v429_v47, %v413_v31  ;;  %v269_v50 = vpop.f32.mrb[7].mxu0 }
  0xf1   :  { %338 = vst.msk [vmem:[%s572_s5 + $0x4] sm:$0xf] %vm336_vm2, %v381_v45  ;;  %v292_v51 = vadd.f32 %v371_v19, %v267_v46  ;;  %v270_v52 = vadd.f32 %v269_v50, %v147_v34 }
  0xf2   :  { %v302_v53 = vmax.f32 %v294_v48, 0.0  ;;  %v295_v54 = vadd.f32 %v371_v19, %v278_v49 }
  0xf3   :  { %v300_v55 = vmax.f32 %v292_v51, 0.0  ;;  %v293_v56 = vadd.f32 %v371_v19, %v270_v52 }
  0xf4   :  { %v386_v57 = vpack.c.bf16 %v302_v53, %v302_v53  ;;  %v303_v58 = vmax.f32 %v295_v54, 0.0 }
  0xf5   :  { %v384_v59 = vpack.c.bf16 %v300_v55, %v300_v55  ;;  %v301_v60 = vmax.f32 %v293_v56, 0.0 }
  0xf6   :  { %343 = vst.msk [vmem:[%s572_s5 + $0x18] sm:$0xf] %vm336_vm2, %v386_v57  ;;  %v387_v61 = vpack.c.bf16 %v303_v58, %v303_v58 }
  0xf7   :  { %341 = vst.msk [vmem:[%s572_s5 + $0x10] sm:$0xf] %vm336_vm2, %v384_v59  ;;  %v385_v62 = vpack.c.bf16 %v301_v60, %v301_v60 }
  0xf8   :  { %344 = vst.msk [vmem:[%s572_s5 + $0x1c] sm:$0xf] %vm336_vm2, %v387_v61 }
  0xf9   :  { %342 = vst.msk [vmem:[%s572_s5 + $0x14] sm:$0xf] %vm336_vm2, %v385_v62 }

// kernel: rpvnet_forward.26
= control target key start
LH: loop header
LB: loop body
LE: loop exit
PB: predicated region body
PF: predicated region fallthrough
CT: control target
= control target key end

     0   :  { %vm71_vm0 = vcmask 130048   ;;  %vm187_vm1 = vcmask 392192   ;;  %vm320_vm2 = vcmask 388096   ;;  %s531_s2 = inlined_call_operand.vmem [shape: bf16[48,48], index: 2, kind: input, shape index: {}]   ;;  %s532_s3 = inlined_call_operand.vmem [shape: bf16[16,48], index: 3, kind: input, shape index: {}]   ;;  %s533_s1 = inlined_call_operand.vmem [shape: bf16[64,16], index: 1, kind: input, shape index: {}]   ;;  %s534_s0 = inlined_call_operand.vmem [shape: bf16[64,48], index: 0, kind: input, shape index: {}]   ;;  %s535_s4 = inlined_call_operand.vmem [shape: f32[1,48], index: 4, kind: input, shape index: {}]   ;;  %s536_s5 = inlined_call_operand.vmem [shape: bf16[64,48], index: 5, kind: output, shape index: {}]  }
   0x1   :  { %v414_v0 = vld [vmem:[%s531_s2] sm:$0xff]   ;;  %v415_v1 = vld [vmem:[%s531_s2 + $0x8] sm:$0xff]   ;;  %v418_v4 = vld [vmem:[%s531_s2 + $0x10] sm:$0xff]  }
   0x2   :  { %392 = vmatprep.subr.bf16.mxu0 %v414_v0  ;;  %v416_v2 = vld [vmem:[%s532_s3] sm:$0xff]   ;;  %v419_v5 = vld [vmem:[%s533_s1 + $0x8] sm:$0xff]   ;;  %v422_v7 = vld [vmem:[%s533_s1 + $0x10] sm:$0xff]  }
   0x3   :  { %393 = vmatpush3.bf16.msra.mxu0 %v414_v0  ;;  %v417_v3 = vld [vmem:[%s533_s1] sm:$0xff]   ;;  %382 = vmatprep.subr.bf16.mxu1 %v416_v2  ;;  %v421_v8 = vld [vmem:[%s534_s0 + $0x8] sm:$0xff]   ;;  %v424_v9 = vld [vmem:[%s534_s0 + $0x10] sm:$0xff]  }
   0x4   :  { %394 = vmatprep.subr.bf16.mxu0 %v415_v1  ;;  %383 = vmatpush3.bf16.msra.mxu1 %v416_v2  ;;  %v420_v6 = vld [vmem:[%s534_s0] sm:$0xff]   ;;  %v423_v10 = vld [vmem:[%s533_s1 + $0x18] sm:$0xff]  }
   0x5   :  { %384 = vmatprep.mubr.msk.bf16.mxu1 %vm71_vm0, %v417_v3  ;;  %398 = vmatprep.mubr.msk.bf16.mxu0 %vm187_vm1, %v420_v6  ;;  %v425_v11 = vld [vmem:[%s534_s0 + $0x18] sm:$0xff]   ;;  %v353_v17 = vld [vmem:[%s535_s4] ss:$0 sm:$0xff] }
   0x7   :  { %395 = vmatpush3.bf16.msra.mxu0 %v415_v1  ;;  %385 = vmatmul.mubr.msk.bf16.vlgmr.msra.gmra.mrb[0].mxu1 %vm71_vm0, %v419_v5 }
   0x8   :  { %396 = vmatprep.subr.bf16.mxu0 %v418_v4  ;;  %388 = vmatprep.mubr.msk.bf16.mxu1 %vm71_vm0, %v422_v7 }
   0xb   :  { %397 = vmatpush3.bf16.msra.mxu0 %v418_v4 }
   0xe   :  { %399 = vmatmul.mubr.msk.bf16.vlgmr.msra.gmra.mrb[0].mxu0 %vm187_vm1, %v421_v8 }
   0xf   :  { %402 = vmatprep.mubr.msk.bf16.mxu0 %vm187_vm1, %v424_v9  ;;  %389 = vmatmul.mubr.msk.bf16.gmra.mrb[4].mxu1 %vm71_vm0, %v423_v10 }
  0x16   :  { %403 = vmatmul.mubr.msk.bf16.gmra.mrb[4].mxu0 %vm187_vm1, %v425_v11 }
  0xda   :  { %v386_v12 = vpop.f32.mrb[0].mxu1 }
  0xdb   :  { %v118_v13 = vpop.f32.mrb[1].mxu1 }
  0xdc   :  { %v387_v14 = vpop.f32.mrb[2].mxu1 }
  0xdd   :  { %v121_v15 = vpop.f32.mrb[3].mxu1 }
  0xe1   :  { %v400_v16 = vpop.f32.mrb[0].mxu0 }
  0xe2   :  { %v243_v18 = vadd.f32 %v400_v16, %v386_v12  ;;  %v234_v19 = vpop.f32.mrb[1].mxu0  ;;  %v390_v22 = vpop.f32.mrb[4].mxu1 }
  0xe3   :  { %v235_v20 = vadd.f32 %v234_v19, %v118_v13  ;;  %v401_v21 = vpop.f32.mrb[2].mxu0  ;;  %v134_v26 = vpop.f32.mrb[5].mxu1 }
  0xe4   :  { %v274_v23 = vadd.f32 %v353_v17, %v243_v18  ;;  %v246_v24 = vadd.f32 %v401_v21, %v387_v14  ;;  %v237_v25 = vpop.f32.mrb[3].mxu0  ;;  %v391_v29 = vpop.f32.mrb[6].mxu1 }
  0xe5   :  { %v272_v27 = vadd.f32 %v353_v17, %v235_v20  ;;  %v238_v28 = vadd.f32 %v237_v25, %v121_v15  ;;  %v137_v32 = vpop.f32.mrb[7].mxu1 }
  0xe6   :  { %v282_v30 = vmax.f32 %v274_v23, 0.0  ;;  %v275_v31 = vadd.f32 %v353_v17, %v246_v24 }
  0xe7   :  { %v280_v33 = vmax.f32 %v272_v27, 0.0  ;;  %v273_v34 = vadd.f32 %v353_v17, %v238_v28 }
  0xe8   :  { %v364_v35 = vpack.c.bf16 %v282_v30, %v282_v30  ;;  %v283_v36 = vmax.f32 %v275_v31, 0.0 }
  0xe9   :  { %v362_v37 = vpack.c.bf16 %v280_v33, %v280_v33  ;;  %v281_v38 = vmax.f32 %v273_v34, 0.0  ;;  %v404_v39 = vpop.f32.mrb[4].mxu0 }
  0xea   :  { %323 = vst.msk [vmem:[%s536_s5 + $0x8] sm:$0xf] %vm320_vm2, %v364_v35  ;;  %v365_v40 = vpack.c.bf16 %v283_v36, %v283_v36  ;;  %v259_v41 = vadd.f32 %v404_v39, %v390_v22  ;;  %v250_v42 = vpop.f32.mrb[5].mxu0 }
  0xeb   :  { %321 = vst.msk [vmem:[%s536_s5] sm:$0xf] %vm320_vm2, %v362_v37  ;;  %v363_v43 = vpack.c.bf16 %v281_v38, %v281_v38  ;;  %v251_v44 = vadd.f32 %v250_v42, %v134_v26  ;;  %v405_v45 = vpop.f32.mrb[6].mxu0 }
  0xec   :  { %324 = vst.msk [vmem:[%s536_s5 + $0xc] sm:$0xf] %vm320_vm2, %v365_v40  ;;  %v278_v46 = vadd.f32 %v353_v17, %v259_v41  ;;  %v262_v47 = vadd.f32 %v405_v45, %v391_v29  ;;  %v253_v48 = vpop.f32.mrb[7].mxu0 }
  0xed   :  { %322 = vst.msk [vmem:[%s536_s5 + $0x4] sm:$0xf] %vm320_vm2, %v363_v43  ;;  %v276_v49 = vadd.f32 %v353_v17, %v251_v44  ;;  %v254_v50 = vadd.f32 %v253_v48, %v137_v32 }
  0xee   :  { %v286_v51 = vmax.f32 %v278_v46, 0.0  ;;  %v279_v52 = vadd.f32 %v353_v17, %v262_v47 }
  0xef   :  { %v284_v53 = vmax.f32 %v276_v49, 0.0  ;;  %v277_v54 = vadd.f32 %v353_v17, %v254_v50 }
  0xf0   :  { %v368_v55 = vpack.c.bf16 %v286_v51, %v286_v51  ;;  %v287_v56 = vmax.f32 %v279_v52, 0.0 }
  0xf1   :  { %v366_v57 = vpack.c.bf16 %v284_v53, %v284_v53  ;;  %v285_v58 = vmax.f32 %v277_v54, 0.0 }
  0xf2   :  { %327 = vst.msk [vmem:[%s536_s5 + $0x18] sm:$0xf] %vm320_vm2, %v368_v55  ;;  %v369_v59 = vpack.c.bf16 %v287_v56, %v287_v56 }
  0xf3   :  { %325 = vst.msk [vmem:[%s536_s5 + $0x10] sm:$0xf] %vm320_vm2, %v366_v57  ;;  %v367_v60 = vpack.c.bf16 %v285_v58, %v285_v58 }
  0xf4   :  { %328 = vst.msk [vmem:[%s536_s5 + $0x1c] sm:$0xf] %vm320_vm2, %v369_v59 }
  0xf5   :  { %326 = vst.msk [vmem:[%s536_s5 + $0x14] sm:$0xf] %vm320_vm2, %v367_v60 }

// kernel: rpvnet_forward.29
= control target key start
LH: loop header
LB: loop body
LE: loop exit
PB: predicated region body
PF: predicated region fallthrough
CT: control target
= control target key end

     0   :  { %vm100_vm0 = vcmask 523264   ;;  %vm252_vm1 = vcmask 392192   ;;  %vm589_vm2 = vcmask 23552   ;;  %vm854_vm3 = vcmask 388096   ;;  %s1425_s3 = inlined_call_operand.vmem [shape: bf16[64,48], index: 3, kind: input, shape index: {}]   ;;  %s1426_s0 = inlined_call_operand.vmem [shape: bf16[64,64], index: 0, kind: input, shape index: {}]   ;;  %s1427_s5 = inlined_call_operand.vmem [shape: bf16[48,3], index: 5, kind: input, shape index: {}]   ;;  %s1428_s1 = inlined_call_operand.vmem [shape: bf16[64,48], index: 1, kind: input, shape index: {}]   ;;  %s1429_s7 = inlined_call_operand.vmem [shape: bf16[48,3], index: 7, kind: input, shape index: {}]   ;;  %s1430_s6 = inlined_call_operand.vmem [shape: bf16[48,3], index: 6, kind: input, shape index: {}]   ;;  %s1431_s2 = inlined_call_operand.vmem [shape: bf16[64,48], index: 2, kind: input, shape index: {}]   ;;  %s1432_s4 = inlined_call_operand.vmem [shape: f32[1,48], index: 4, kind: input, shape index: {}]   ;;  %s1433_s8 = inlined_call_operand.vmem [shape: f32[1,3], index: 8, kind: input, shape index: {}]   ;;  %s1434_s9 = inlined_call_operand.vmem [shape: bf16[64,48], index: 9, kind: output, shape index: {}]  }
   0x1   :  { %v1051_v0 = vld [vmem:[%s1425_s3] sm:$0xff]   ;;  %v1052_v1 = vld [vmem:[%s1425_s3 + $0x8] sm:$0xff]   ;;  %v1053_v2 = vld [vmem:[%s1425_s3 + $0x10] sm:$0xff]  }
   0x2   :  { %955 = vmatprep.subr.bf16.mxu0 %v1051_v0  ;;  %v1055_v3 = vld [vmem:[%s1426_s0] sm:$0xff]   ;;  %v1054_v4 = vld [vmem:[%s1425_s3 + $0x18] sm:$0xff]   ;;  %v1060_v6 = vld [vmem:[%s1427_s5 + $0x8] sm:$0xff]  }
   0x3   :  { %956 = vmatpush3.bf16.msra.mxu0 %v1051_v0  ;;  %963 = vmatprep.mubr.msk.bf16.mxu0 %vm100_vm0, %v1055_v3  ;;  %v1059_v5 = vld [vmem:[%s1427_s5] sm:$0xff]   ;;  %v1061_v8 = vld [vmem:[%s1427_s5 + $0x10] sm:$0xff]   ;;  %v1056_v9 = vld [vmem:[%s1426_s0 + $0x8] sm:$0xff]  }
   0x4   :  { %957 = vmatprep.subr.bf16.mxu0 %v1052_v1  ;;  %985 = vmatprep.subr.bf16.mxu1 %v1059_v5  ;;  %v1194_v7 = vld [vmem:[%s1428_s1] sm:$0xff]   ;;  %v1057_v10 = vld [vmem:[%s1426_s0 + $0x10] sm:$0xff]   ;;  %v1210_v11 = vld [vmem:[%s1428_s1 + $0x8] sm:$0xff]  }
   0x5   :  { %986 = vmatpush3.bf16.msra.mxu1 %v1059_v5  ;;  %991 = vmatprep.mubr.msk.bf16.mxu1 %vm252_vm1, %v1194_v7  ;;  %v1064_v12 = vld [vmem:[%s1429_s7] sm:$0xff]   ;;  %v1218_v13 = vld [vmem:[%s1428_s1 + $0x10] sm:$0xff]   ;;  %v1067_v15 = vld [vmem:[%s1429_s7 + $0x8] sm:$0xff]  }
   0x6   :  { %987 = vmatprep.subr.bf16.mxu1 %v1060_v6  ;;  %v1071_v14 = vld [vmem:[%s1430_s6] sm:$0xff]   ;;  %v1058_v16 = vld [vmem:[%s1426_s0 + $0x18] sm:$0xff]   ;;  %v1068_v18 = vld [vmem:[%s1429_s7 + $0x10] sm:$0xff]  }
   0x7   :  { %958 = vmatpush3.bf16.msra.mxu0 %v1052_v1  ;;  %v1238_v17 = vld [vmem:[%s1428_s1 + $0x18] sm:$0xff]   ;;  %v1246_v19 = vld [vmem:[%s1431_s2] sm:$0xff]   ;;  %v1256_v20 = vld [vmem:[%s1431_s2 + $0x8] sm:$0xff]  }
   0x8   :  { %959 = vmatprep.subr.bf16.mxu0 %v1053_v2  ;;  %v1261_v21 = vld [vmem:[%s1431_s2 + $0x10] sm:$0xff]   ;;  %v1270_v22 = vld [vmem:[%s1431_s2 + $0x18] sm:$0xff]   ;;  %v1073_v23 = vld [vmem:[%s1430_s6 + $0x8] sm:$0xff]  }
   0x9   :  { %988 = vmatpush3.bf16.msra.mxu1 %v1060_v6  ;;  %v1075_v24 = vld [vmem:[%s1430_s6 + $0x10] sm:$0xff]   ;;  %v867_v25 = vld [vmem:[%s1432_s4] ss:$0 sm:$0xff] }
   0xa   :  { %989 = vmatprep.subr.bf16.mxu1 %v1061_v8  ;;  %v909_v63 = vld [vmem:[%s1433_s8] ss:$0 sm:$0xff] }
   0xb   :  { %960 = vmatpush3.bf16.msra.mxu0 %v1053_v2 }
   0xc   :  { %961 = vmatprep.subr.bf16.mxu0 %v1054_v4 }
   0xd   :  { %990 = vmatpush3.bf16.msra.mxu1 %v1061_v8 }
   0xe   :  { %999 = vmatprep.subr.bf16.mxu1 %v1064_v12 }
   0xf   :  { %962 = vmatpush3.bf16.msra.mxu0 %v1054_v4 }
  0x10   :  { %971 = vmatprep.subr.bf16.mxu0 %v1071_v14  ;;  %992 = vmatmul.mubr.msk.bf16.vlgmr.msra.gmra.mrb[0].mxu1 %vm252_vm1, %v1210_v11 }
  0x11   :  { %1000 = vmatpush3.bf16.msra.mxu1 %v1064_v12  ;;  %995 = vmatprep.mubr.msk.bf16.mxu1 %vm252_vm1, %v1218_v13 }
  0x12   :  { %964 = vmatmul.mubr.msk.bf16.vlgmr.msra.gmra.mrb[0].mxu0 %vm100_vm0, %v1056_v9  ;;  %1001 = vmatprep.subr.bf16.mxu1 %v1067_v15 }
  0x13   :  { %967 = vmatprep.mubr.msk.bf16.mxu0 %vm100_vm0, %v1057_v10  ;;  %972 = vmatpush3.bf16.msra.mxu0 %v1071_v14 }
  0x14   :  { %973 = vmatprep.subr.bf16.mxu0 %v1073_v23 }
  0x15   :  { %1002 = vmatpush3.bf16.msra.mxu1 %v1067_v15 }
  0x16   :  { %1003 = vmatprep.subr.bf16.mxu1 %v1068_v18 }
  0x17   :  { %974 = vmatpush3.bf16.msra.mxu0 %v1073_v23 }
  0x18   :  { %996 = vmatmul.mubr.msk.bf16.gmra.mrb[4].mxu1 %vm252_vm1, %v1238_v17  ;;  %975 = vmatprep.subr.bf16.mxu0 %v1075_v24 }
  0x19   :  { %1004 = vmatpush3.bf16.msra.mxu1 %v1068_v18  ;;  %1005 = vmatprep.mubr.msk.bf16.mxu1 %vm252_vm1, %v1246_v19 }
  0x1a   :  { %968 = vmatmul.mubr.msk.bf16.gmra.mrb[4].mxu0 %vm100_vm0, %v1058_v16 }
  0x1b   :  { %976 = vmatpush3.bf16.msra.mxu0 %v1075_v24 }
  0x20   :  { %1006 = vmatmul.mubr.msk.bf16.vlgmr.msra.gmra.mrb[0].mxu1 %vm252_vm1, %v1256_v20 }
  0x21   :  { %1009 = vmatprep.mubr.msk.bf16.mxu1 %vm252_vm1, %v1261_v21 }
  0x28   :  { %1010 = vmatmul.mubr.msk.bf16.gmra.mrb[4].mxu1 %vm252_vm1, %v1270_v22 }
  0xe5   :  { %v965_v26 = vpop.f32.mrb[0].mxu0 }
  0xe6   :  { %v147_v27 = vpop.f32.mrb[1].mxu0  ;;  %v1285_v30 = vadd.f32 %v965_v26, %v867_v25 }
  0xe7   :  { %v1283_v28 = vadd.f32 %v867_v25, %v147_v27  ;;  %v966_v29 = vpop.f32.mrb[2].mxu0 }
  0xe8   :  { %v1287_v31 = vadd.f32 %v966_v29, %v867_v25  ;;  %v150_v32 = vpop.f32.mrb[3].mxu0  ;;  %v180_v37 = vmax.f32 %v1285_v30, 0.0 }
  0xe9   :  { %v1289_v33 = vadd.f32 %v867_v25, %v150_v32  ;;  %v178_v35 = vmax.f32 %v1283_v28, 0.0 }
  0xea   :  { %v181_v34 = vmax.f32 %v1287_v31, 0.0 }
  0xeb   :  { %v179_v36 = vmax.f32 %v1289_v33, 0.0 }
  0xec   :  { %v225_v40 = vpack.c.bf16 %v181_v34, %v180_v37 }
  0xed   :  { %v224_v38 = vpack.c.bf16 %v179_v36, %v178_v35  ;;  %v969_v39 = vpop.f32.mrb[4].mxu0 }
  0xee   :  { %v1303_v41 = vadd.f32 %v969_v39, %v867_v25  ;;  %v163_v42 = vpop.f32.mrb[5].mxu0 }
  0xef   :  { %v1305_v43 = vadd.f32 %v867_v25, %v163_v42  ;;  %v970_v44 = vpop.f32.mrb[6].mxu0  ;;  %977 = vmatprep.mubr.msk.bf16.mxu0 %vm252_vm1, %v224_v38 }
  0xf0   :  { %v184_v45 = vmax.f32 %v1303_v41, 0.0  ;;  %v1309_v46 = vadd.f32 %v970_v44, %v867_v25  ;;  %v166_v47 = vpop.f32.mrb[7].mxu0  ;;  %978 = vmatmul.mubr.msk.bf16.vlgmr.msra.gmra.mrb[8].mxu0 %vm252_vm1, %v225_v40 }
  0xf1   :  { %v182_v48 = vmax.f32 %v1305_v43, 0.0  ;;  %v1313_v49 = vadd.f32 %v867_v25, %v166_v47 }
  0xf2   :  { %v185_v50 = vmax.f32 %v1309_v46, 0.0 }
  0xf3   :  { %v183_v51 = vmax.f32 %v1313_v49, 0.0  ;;  %v1007_v54 = vpop.f32.mrb[0].mxu1 }
  0xf4   :  { %v227_v52 = vpack.c.bf16 %v185_v50, %v184_v45  ;;  %v535_v55 = vpop.f32.mrb[1].mxu1 }
  0xf5   :  { %v226_v53 = vpack.c.bf16 %v183_v51, %v182_v48  ;;  %v1008_v56 = vpop.f32.mrb[2].mxu1 }
  0xf6   :  { %v538_v57 = vpop.f32.mrb[3].mxu1 }
  0xf7   :  { %981 = vmatprep.mubr.msk.bf16.mxu0 %vm252_vm1, %v226_v53 }
  0xf8   :  { %982 = vmatmul.mubr.msk.bf16.gmra.mrb[12].mxu0 %vm252_vm1, %v227_v52 }
  0xfb   :  { %v1011_v58 = vpop.f32.mrb[4].mxu1 }
  0xfc   :  { %v551_v59 = vpop.f32.mrb[5].mxu1 }
  0xfd   :  { %v1012_v60 = vpop.f32.mrb[6].mxu1 }
  0xfe   :  { %v554_v61 = vpop.f32.mrb[7].mxu1 }
 0x1c3   :  { %v979_v62 = vpop.f32.mrb[8].mxu0 }
 0x1c4   :  { %v1013_v0 = vadd.f32 %v1007_v54, %v979_v62  ;;  %v299_v1 = vpop.f32.mrb[9].mxu0 }
 0x1c5   :  { %v1014_v2 = vadd.f32 %v535_v55, %v299_v1  ;;  %v980_v3 = vpop.f32.mrb[10].mxu0 }
 0x1c6   :  { %v1015_v4 = vadd.f32 %v1008_v56, %v980_v3  ;;  %v302_v5 = vpop.f32.mrb[11].mxu0  ;;  %v583_v6 = vadd.f32 %v1013_v0, %v909_v63 }
 0x1c7   :  { %v1016_v8 = vadd.f32 %v538_v57, %v302_v5  ;;  %v581_v9 = vadd.f32 %v1014_v2, %v909_v63 }
 0x1c8   :  { %v596_v10 = vsel %vm589_vm2, %v583_v6, -inf  ;;  %v584_v12 = vadd.f32 %v1015_v4, %v909_v63 }
 0x1c9   :  { %597 = vmax.xlane.f32.xlu1 %v596_v10  ;;  %v590_v14 = vsel %vm589_vm2, %v581_v9, -inf  ;;  %v582_v15 = vadd.f32 %v1016_v8, %v909_v63 }
 0x1ca   :  { %591 = vmax.xlane.f32.xlu0 %v590_v14  ;;  %v599_v24 = vsel %vm589_vm2, %v584_v12, -inf }
 0x1cb   :  { %v983_v16 = vpop.f32.mrb[12].mxu0  ;;  %v593_v27 = vsel %vm589_vm2, %v582_v15, -inf }
 0x1cc   :  { %v1017_v18 = vadd.f32 %v1011_v58, %v983_v16  ;;  %v315_v23 = vpop.f32.mrb[13].mxu0 }
 0x1cd   :  { %v1018_v25 = vadd.f32 %v551_v59, %v315_v23  ;;  %600 = vmax.xlane.f32.xlu1 %v599_v24  ;;  %v984_v26 = vpop.f32.mrb[14].mxu0 }
 0x1ce   :  { %v1019_v29 = vadd.f32 %v1012_v60, %v984_v26  ;;  %594 = vmax.xlane.f32.xlu0 %v593_v27  ;;  %v318_v32 = vpop.f32.mrb[15].mxu0  ;;  %v587_v44 = vadd.f32 %v1017_v18, %v909_v63 }
 0x1cf   :  { %v1020_v38 = vadd.f32 %v554_v61, %v318_v32  ;;  %v585_v39 = vadd.f32 %v1018_v25, %v909_v63 }
 0x1d0   :  { %v588_v52 = vadd.f32 %v1019_v29, %v909_v63  ;;  %v608_v53 = vsel %vm589_vm2, %v587_v44, -inf }
 0x1d1   :  { %v602_v40 = vsel %vm589_vm2, %v585_v39, -inf  ;;  %v586_v42 = vadd.f32 %v1020_v38, %v909_v63 }
 0x1d2   :  { %603 = vmax.xlane.f32.xlu0 %v602_v40  ;;  %v611_v54 = vsel %vm589_vm2, %v588_v52, -inf }
 0x1d3   :  { %v605_v47 = vsel %vm589_vm2, %v586_v42, -inf }
 0x1d4   :  { %606 = vmax.xlane.f32.xlu1 %v605_v47 }
 0x1d6   :  { %609 = vmax.xlane.f32.xlu0 %v608_v53 }
 0x1d8   :  { %612 = vmax.xlane.f32.xlu1 %v611_v54 }
 0x256   :  { %v598_v55 = vpop.xlane.xlu1 %597 }
 0x257   :  { %v616_v56 = vsub.f32 %v583_v6, %v598_v55  ;;  %v592_v57 = vpop.xlane.xlu0 %591  ;;  %v1116_v55 = vmov 0  }
 0x258   :  { %v614_v58 = vsub.f32 %v581_v9, %v592_v57  ;;  %1032 = vset.pattern.permute.xlu1 %v1116_v55  ;;  %1035 = vset.pattern.permute.xlu0 %v1116_v55 }
 0x259   :  { %v626_v59 = vmul.f32 1.442695, %v616_v56 }
 0x25a   :  { %v622_v60 = vmul.f32 1.442695, %v614_v58  ;;  %v601_v61 = vpop.xlane.xlu1 %600 }
 0x25b   :  { %1084 = vpow2.f32 %v626_v59  ;;  %v617_v62 = vsub.f32 %v584_v12, %v601_v61  ;;  %v595_v0 = vpop.xlane.xlu0 %594 }
 0x25c   :  { %v615_v1 = vsub.f32 %v582_v15, %v595_v0  ;;  %1086 = vpow2.f32 %v622_v60 }
 0x25d   :  { %v628_v63 = vmul.f32 1.442695, %v617_v62 }
 0x25e   :  { %v624_v2 = vmul.f32 1.442695, %v615_v1 }
 0x25f   :  { %1088 = vpow2.f32 %v628_v63  ;;  %v604_v3 = vpop.xlane.xlu0 %603 }
 0x260   :  { %v618_v4 = vsub.f32 %v585_v39, %v604_v3  ;;  %1090 = vpow2.f32 %v624_v2  ;;  %v1117_v2 = vmov 1  }
 0x261   :  { %v607_v5 = vpop.xlane.xlu1 %606 }
 0x262   :  { %v630_v8 = vmul.f32 1.442695, %v618_v4  ;;  %v619_v6 = vsub.f32 %v586_v42, %v607_v5  ;;  %v1118_v5 = vmov 2  }
 0x263   :  { %v610_v10 = vpop.xlane.xlu0 %609 }
 0x264   :  { %1092 = vpow2.f32 %v630_v8  ;;  %v620_v9 = vsub.f32 %v587_v44, %v610_v10  ;;  %v632_v24 = vmul.f32 1.442695, %v619_v6 }
 0x265   :  { %v1085_v14 = vpop.eup %1084  ;;  %v613_v16 = vpop.xlane.xlu1 %612 }
 0x266   :  { %v634_v18 = vmul.f32 1.442695, %v620_v9  ;;  %v621_v23 = vsub.f32 %v588_v52, %v613_v16  ;;  %v644_v12 = vsel %vm589_vm2, %v1085_v14, 0.0  ;;  %v1087_v15 = vpop.eup %1086 }
 0x267   :  { %645 = vadd.xlane.f32.xlu0 %v644_v12  ;;  %v638_v27 = vsel %vm589_vm2, %v1087_v15, 0.0 }
 0x268   :  { %1094 = vpow2.f32 %v634_v18  ;;  %v636_v25 = vmul.f32 1.442695, %v621_v23 }
 0x269   :  { %v1089_v26 = vpop.eup %1088 }
 0x26a   :  { %1096 = vpow2.f32 %v636_v25  ;;  %v647_v29 = vsel %vm589_vm2, %v1089_v26, 0.0  ;;  %v1091_v32 = vpop.eup %1090 }
 0x26b   :  { %639 = vadd.xlane.f32.xlu0 %v638_v27  ;;  %648 = vadd.xlane.f32.xlu1 %v647_v29  ;;  %1098 = vpow2.f32 %v632_v24  ;;  %v641_v39 = vsel %vm589_vm2, %v1091_v32, 0.0  ;;  %v196_v27 = vunpack.c.l.bf16 %v1210_v11 }
 0x26e   :  { %v1341_v38 = vpop.eup %1092 }
 0x26f   :  { %642 = vadd.xlane.f32.xlu1 %v641_v39  ;;  %v650_v40 = vsel %vm589_vm2, %v1341_v38, 0.0 }
 0x270   :  { %651 = vadd.xlane.f32.xlu0 %v650_v40 }
 0x272   :  { %v1095_v42 = vpop.eup %1094 }
 0x273   :  { %v656_v44 = vsel %vm589_vm2, %v1095_v42, 0.0 }
 0x274   :  { %v1347_v47 = vpop.eup %1096  ;;  %657 = vadd.xlane.f32.xlu0 %v656_v44 }
 0x275   :  { %v659_v52 = vsel %vm589_vm2, %v1347_v47, 0.0  ;;  %v1099_v53 = vpop.eup %1098 }
 0x276   :  { %660 = vadd.xlane.f32.xlu1 %v659_v52  ;;  %v653_v54 = vsel %vm589_vm2, %v1099_v53, 0.0  ;;  %v194_v52 = vunpack.c.l.bf16 %v1194_v7 }
 0x27a   :  { %654 = vadd.xlane.f32.xlu1 %v653_v54  ;;  %v210_v54 = vunpack.c.l.bf16 %v1246_v19 }
 0x2f4   :  { %v646_v56 = vpop.xlane.xlu0 %645 }
 0x2f5   :  { %1100 = vrcp.f32 %v646_v56 }
 0x2f8   :  { %v640_v57 = vpop.xlane.xlu0 %639  ;;  %v649_v58 = vpop.xlane.xlu1 %648 }
 0x2f9   :  { %1102 = vrcp.f32 %v640_v57 }
 0x2fa   :  { %1104 = vrcp.f32 %v649_v58 }
 0x2fc   :  { %v643_v62 = vpop.xlane.xlu1 %642 }
 0x2fd   :  { %v652_v60 = vpop.xlane.xlu0 %651  ;;  %1106 = vrcp.f32 %v643_v62 }
 0x2ff   :  { %v1101_v59 = vpop.eup %1100 }
 0x300   :  { %v672_v61 = vmul.f32 %v1101_v59, %v1085_v14 }
 0x301   :  { %v658_v63 = vpop.xlane.xlu0 %657 }
 0x302   :  { %690 = vperm.xlu1 %1032, %v672_v61   ;;  %1108 = vrcp.f32 %v658_v63 }
 0x303   :  { %v1103_v0 = vpop.eup %1102  ;;  %v661_v3 = vpop.xlane.xlu1 %660  ;;  %1110 = vrcp.f32 %v652_v60 }
 0x304   :  { %v670_v1 = vmul.f32 %v1103_v0, %v1087_v15  ;;  %v1105_v4 = vpop.eup %1104  ;;  %v197_v0 = vunpack.c.h.bf16 %v1210_v11 }
 0x305   :  { %v673_v8 = vmul.f32 %v1105_v4, %v1089_v26 }
 0x306   :  { %680 = vperm.xlu0 %1035, %v670_v1   ;;  %1033 = vset.pattern.permute.xlu1 %v1117_v2 }
 0x307   :  { %735 = vperm.xlu1 %1033, %v672_v61   ;;  %v1107_v10 = vpop.eup %1106  ;;  %v655_v6 = vpop.xlane.xlu1 %654 }
 0x308   :  { %1112 = vrcp.f32 %v655_v6  ;;  %v671_v9 = vmul.f32 %v1107_v10, %v1091_v32 }
 0x309   :  { %1114 = vrcp.f32 %v661_v3 }
 0x30a   :  { %1037 = vset.pattern.permute.xlu0 %v1118_v5 }
 0x30b   :  { %775 = vperm.xlu0 %1037, %v670_v1   ;;  %1034 = vset.pattern.permute.xlu1 %v1118_v5 }
 0x30c   :  { %783 = vperm.xlu1 %1034, %v672_v61   ;;  %v1109_v14 = vpop.eup %1108 }
 0x30d   :  { %v676_v16 = vmul.f32 %v1109_v14, %v1095_v42  ;;  %v1111_v18 = vpop.eup %1110 }
 0x30e   :  { %v674_v23 = vmul.f32 %v1111_v18, %v1341_v38  ;;  %v212_v38 = vunpack.c.l.bf16 %v1256_v20 }
 0x30f   :  { %787 = vperm.xlu0 %1037, %v673_v8  }
 0x310   :  { %1036 = vset.pattern.permute.xlu1 %v1117_v2 }
 0x311   :  { %727 = vperm.xlu1 %1036, %v670_v1   ;;  %v213_v1 = vunpack.c.h.bf16 %v1256_v20 }
 0x312   :  { %v1113_v12 = vpop.eup %1112 }
 0x313   :  { %1041 = vset.pattern.permute.xlu0 %v1117_v2  ;;  %v675_v15 = vmul.f32 %v1113_v12, %v1099_v53  ;;  %v1115_v24 = vpop.eup %1114 }
 0x314   :  { %731 = vperm.xlu0 %1041, %v671_v9   ;;  %v677_v25 = vmul.f32 %v1115_v24, %v1347_v47  ;;  %v214_v24 = vunpack.c.l.bf16 %v1261_v21 }
 0x315   :  { %1038 = vset.pattern.permute.xlu1 %v1116_v55 }
 0x316   :  { %695 = vperm.xlu1 %1038, %v673_v8  }
 0x318   :  { %751 = vperm.xlu0 %1041, %v676_v16  }
 0x31a   :  { %1039 = vset.pattern.permute.xlu1 %v1117_v2 }
 0x31b   :  { %739 = vperm.xlu1 %1039, %v673_v8  }
 0x31c   :  { %743 = vperm.xlu0 %1041, %v674_v23  }
 0x31f   :  { %1040 = vset.pattern.permute.xlu1 %v1116_v55 }
 0x320   :  { %1049 = vset.pattern.permute.xlu0 %v1118_v5  ;;  %685 = vperm.xlu1 %1040, %v671_v9  }
 0x321   :  { %795 = vperm.xlu0 %1049, %v675_v15  }
 0x324   :  { %1042 = vset.pattern.permute.xlu1 %v1118_v5 }
 0x325   :  { %779 = vperm.xlu1 %1042, %v671_v9   ;;  %803 = vperm.xlu0 %1049, %v677_v25   ;;  %v211_v9 = vunpack.c.h.bf16 %v1246_v19  ;;  %v198_v19 = vunpack.c.l.bf16 %v1218_v13 }
 0x329   :  { %1043 = vset.pattern.permute.xlu1 %v1116_v55 }
 0x32a   :  { %710 = vperm.xlu1 %1043, %v676_v16  }
 0x32e   :  { %700 = vperm.xlu1 %1043, %v674_v23  }
 0x332   :  { %1044 = vset.pattern.permute.xlu1 %v1118_v5 }
 0x333   :  { %791 = vperm.xlu1 %1044, %v674_v23  }
 0x337   :  { %1045 = vset.pattern.permute.xlu1 %v1116_v55 }
 0x338   :  { %715 = vperm.xlu1 %1045, %v677_v25  }
 0x33c   :  { %1046 = vset.pattern.permute.xlu1 %v1117_v2 }
 0x33d   :  { %755 = vperm.xlu1 %1046, %v677_v25  }
 0x341   :  { %1047 = vset.pattern.permute.xlu1 %v1116_v55 }
 0x342   :  { %705 = vperm.xlu1 %1047, %v675_v15  }
 0x346   :  { %1048 = vset.pattern.permute.xlu1 %v1117_v2 }
 0x347   :  { %747 = vperm.xlu1 %1048, %v675_v15  }
 0x34b   :  { %1050 = vset.pattern.permute.xlu1 %v1118_v5  ;;  %v195_v5 = vunpack.c.h.bf16 %v1194_v7 }
 0x34c   :  { %799 = vperm.xlu1 %1050, %v676_v16  }
 0x381   :  { %v691_v26 = vpop.permute.xlu1 %690 }
 0x382   :  { %v720_v39 = vmul.f32 %v691_v26, %v196_v27 }
 0x385   :  { %v681_v40 = vpop.permute.xlu0 %680 }
 0x386   :  { %v736_v29 = vpop.permute.xlu1 %735  ;;  %v718_v58 = vmul.f32 %v681_v40, %v194_v52 }
 0x387   :  { %v760_v32 = vmul.f32 %v736_v29, %v180_v37 }
 0x389   :  { %v768_v44 = vadd.f32 %v760_v32, %v720_v39 }
 0x38a   :  { %v776_v55 = vpop.permute.xlu0 %775 }
 0x38b   :  { %v784_v42 = vpop.permute.xlu1 %783  ;;  %v806_v37 = vmul.f32 %v776_v55, %v210_v54 }
 0x38c   :  { %v808_v47 = vmul.f32 %v784_v42, %v212_v38  ;;  %v201_v42 = vunpack.c.h.bf16 %v1238_v17 }
 0x38e   :  { %v816_v53 = vadd.f32 %v808_v47, %v768_v44  ;;  %v788_v28 = vpop.permute.xlu0 %787  ;;  %v217_v44 = vunpack.c.h.bf16 %v1270_v22 }
 0x38f   :  { %v809_v3 = vmul.f32 %v788_v28, %v213_v1 }
 0x390   :  { %v920_v56 = vpack.c.bf16 %v816_v53, %v816_v53  ;;  %v728_v57 = vpop.permute.xlu1 %727 }
 0x391   :  { %v758_v30 = vmul.f32 %v728_v57, %v178_v35 }
 0x392   :  { %857 = vst.msk [vmem:[%s1434_s9 + $0x8] sm:$0xf] %vm854_vm3, %v920_v56 }
 0x393   :  { %v766_v59 = vadd.f32 %v758_v30, %v718_v58  ;;  %v732_v11 = vpop.permute.xlu0 %731  ;;  %v199_v58 = vunpack.c.h.bf16 %v1218_v13  ;;  %v200_v30 = vunpack.c.l.bf16 %v1238_v17 }
 0x394   :  { %v759_v14 = vmul.f32 %v732_v11, %v179_v36 }
 0x395   :  { %v814_v60 = vadd.f32 %v806_v37, %v766_v59  ;;  %v696_v61 = vpop.permute.xlu1 %695  ;;  %v215_v37 = vunpack.c.h.bf16 %v1261_v21 }
 0x396   :  { %v721_v63 = vmul.f32 %v696_v61, %v197_v0  ;;  %v216_v61 = vunpack.c.l.bf16 %v1270_v22 }
 0x397   :  { %v918_v62 = vpack.c.bf16 %v814_v60, %v814_v60  ;;  %v752_v7 = vpop.permute.xlu0 %751 }
 0x398   :  { %v764_v13 = vmul.f32 %v752_v7, %v184_v45 }
 0x399   :  { %855 = vst.msk [vmem:[%s1434_s9] sm:$0xf] %vm854_vm3, %v918_v62 }
 0x39a   :  { %v740_v35 = vpop.permute.xlu1 %739 }
 0x39b   :  { %v761_v2 = vmul.f32 %v740_v35, %v181_v34  ;;  %v744_v36 = vpop.permute.xlu0 %743 }
 0x39c   :  { %v762_v25 = vmul.f32 %v744_v36, %v182_v48 }
 0x39d   :  { %v769_v4 = vadd.f32 %v761_v2, %v721_v63 }
 0x39f   :  { %v817_v8 = vadd.f32 %v809_v3, %v769_v4  ;;  %v686_v10 = vpop.permute.xlu1 %685 }
 0x3a0   :  { %v719_v20 = vmul.f32 %v686_v10, %v195_v5  ;;  %v796_v38 = vpop.permute.xlu0 %795 }
 0x3a1   :  { %v921_v6 = vpack.c.bf16 %v817_v8, %v817_v8  ;;  %v811_v62 = vmul.f32 %v796_v38, %v215_v37 }
 0x3a2   :  { %v767_v34 = vadd.f32 %v759_v14, %v719_v20 }
 0x3a3   :  { %858 = vst.msk [vmem:[%s1434_s9 + $0xc] sm:$0xf] %vm854_vm3, %v921_v6 }
 0x3a4   :  { %v780_v31 = vpop.permute.xlu1 %779  ;;  %v804_v47 = vpop.permute.xlu0 %803 }
 0x3a5   :  { %v807_v16 = vmul.f32 %v780_v31, %v211_v9  ;;  %v813_v53 = vmul.f32 %v804_v47, %v217_v44 }
 0x3a7   :  { %v815_v18 = vadd.f32 %v807_v16, %v767_v34 }
 0x3a9   :  { %v919_v23 = vpack.c.bf16 %v815_v18, %v815_v18  ;;  %v711_v12 = vpop.permute.xlu1 %710 }
 0x3ab   :  { %856 = vst.msk [vmem:[%s1434_s9 + $0x4] sm:$0xf] %vm854_vm3, %v919_v23 }
 0x3ad   :  { %v701_v33 = vpop.permute.xlu1 %700 }
 0x3ae   :  { %v722_v15 = vmul.f32 %v701_v33, %v198_v19 }
 0x3b0   :  { %v770_v27 = vadd.f32 %v762_v25, %v722_v15 }
 0x3b2   :  { %v792_v26 = vpop.permute.xlu1 %791 }
 0x3b3   :  { %v810_v29 = vmul.f32 %v792_v26, %v214_v24 }
 0x3b5   :  { %v818_v32 = vadd.f32 %v810_v29, %v770_v27 }
 0x3b7   :  { %v922_v39 = vpack.c.bf16 %v818_v32, %v818_v32  ;;  %v716_v40 = vpop.permute.xlu1 %715 }
 0x3b8   :  { %v725_v43 = vmul.f32 %v716_v40, %v201_v42 }
 0x3b9   :  { %859 = vst.msk [vmem:[%s1434_s9 + $0x10] sm:$0xf] %vm854_vm3, %v922_v39 }
 0x3bc   :  { %v756_v52 = vpop.permute.xlu1 %755 }
 0x3bd   :  { %v765_v48 = vmul.f32 %v756_v52, %v185_v50  ;;  %v724_v50 = vmul.f32 %v711_v12, %v200_v30 }
 0x3bf   :  { %v773_v54 = vadd.f32 %v765_v48, %v725_v43  ;;  %v772_v1 = vadd.f32 %v764_v13, %v724_v50 }
 0x3c1   :  { %v821_v55 = vadd.f32 %v813_v53, %v773_v54  ;;  %v706_v56 = vpop.permute.xlu1 %705 }
 0x3c2   :  { %v723_v60 = vmul.f32 %v706_v56, %v199_v58 }
 0x3c3   :  { %v925_v57 = vpack.c.bf16 %v821_v55, %v821_v55 }
 0x3c5   :  { %862 = vst.msk [vmem:[%s1434_s9 + $0x1c] sm:$0xf] %vm854_vm3, %v925_v57 }
 0x3c6   :  { %v748_v59 = vpop.permute.xlu1 %747 }
 0x3c7   :  { %v763_v46 = vmul.f32 %v748_v59, %v183_v51 }
 0x3c9   :  { %v771_v0 = vadd.f32 %v763_v46, %v723_v60 }
 0x3cb   :  { %v819_v17 = vadd.f32 %v811_v62, %v771_v0  ;;  %v800_v21 = vpop.permute.xlu1 %799 }
 0x3cc   :  { %v812_v28 = vmul.f32 %v800_v21, %v216_v61 }
 0x3cd   :  { %v923_v35 = vpack.c.bf16 %v819_v17, %v819_v17 }
 0x3ce   :  { %v820_v63 = vadd.f32 %v812_v28, %v772_v1 }
 0x3cf   :  { %860 = vst.msk [vmem:[%s1434_s9 + $0x14] sm:$0xf] %vm854_vm3, %v923_v35 }
 0x3d0   :  { %v924_v49 = vpack.c.bf16 %v820_v63, %v820_v63 }
 0x3d2   :  { %861 = vst.msk [vmem:[%s1434_s9 + $0x18] sm:$0xf] %vm854_vm3, %v924_v49 }

// kernel: rpvnet_forward.30
= control target key start
LH: loop header
LB: loop body
LE: loop exit
PB: predicated region body
PF: predicated region fallthrough
CT: control target
= control target key end

     0   :  { %vm77_vm0 = vcmask 1043456   ;;  %vm64_vm1 = vcmask 64512   ;;  %vm184_vm2 = vcmask 392192   ;;  %vm317_vm3 = vcmask 257024   ;;  %s531_s2 = inlined_call_operand.vmem [shape: bf16[48,32], index: 2, kind: input, shape index: {}]   ;;  %s532_s3 = inlined_call_operand.vmem [shape: bf16[8,32], index: 3, kind: input, shape index: {}]   ;;  %s533_s1 = inlined_call_operand.vmem [shape: bf16[64,8], index: 1, kind: input, shape index: {}]   ;;  %s534_s0 = inlined_call_operand.vmem [shape: bf16[64,48], index: 0, kind: input, shape index: {}]   ;;  %s535_s4 = inlined_call_operand.vmem [shape: f32[1,32], index: 4, kind: input, shape index: {}]   ;;  %s536_s5 = inlined_call_operand.vmem [shape: bf16[64,32], index: 5, kind: output, shape index: {}]  }
   0x1   :  { %v411_v0 = vld [vmem:[%s531_s2] sm:$0xff]   ;;  %v412_v1 = vld [vmem:[%s531_s2 + $0x8] sm:$0xff]   ;;  %v414_v5 = vld [vmem:[%s531_s2 + $0x10] sm:$0xff]  }
   0x2   :  { %388 = vmatprep.subr.bf16.mxu0 %v411_v0  ;;  %v43_v2 = vld [vmem:[%s532_s3] sm:$0xf]  ;;  %v415_v6 = vld [vmem:[%s533_s1 + $0x8] sm:$0xff]   ;;  %v418_v8 = vld [vmem:[%s533_s1 + $0x10] sm:$0xff]  }
   0x3   :  { %389 = vmatpush3.bf16.msra.mxu0 %v411_v0  ;;  %410 = vmatprep.subr.msk.bf16.mxu1 %vm77_vm0, %v43_v2  ;;  %v79_v3 = vsel %vm77_vm0, %v43_v2, 0  ;;  %v413_v4 = vld [vmem:[%s533_s1] sm:$0xff]   ;;  %v417_v9 = vld [vmem:[%s534_s0 + $0x8] sm:$0xff]   ;;  %v419_v10 = vld [vmem:[%s533_s1 + $0x18] sm:$0xff]  }
   0x4   :  { %390 = vmatprep.subr.bf16.mxu0 %v412_v1  ;;  %379 = vmatpush3.bf16.msra.mxu1 %v79_v3  ;;  %v416_v7 = vld [vmem:[%s534_s0] sm:$0xff]   ;;  %v420_v11 = vld [vmem:[%s534_s0 + $0x10] sm:$0xff]   ;;  %v421_v12 = vld [vmem:[%s534_s0 + $0x18] sm:$0xff]  }
   0x5   :  { %380 = vmatprep.mubr.msk.bf16.mxu1 %vm64_vm1, %v413_v4  ;;  %394 = vmatprep.mubr.msk.bf16.mxu0 %vm184_vm2, %v416_v7  ;;  %v349_v18 = vld [vmem:[%s535_s4] ss:$0 sm:$0xff] }
   0x7   :  { %391 = vmatpush3.bf16.msra.mxu0 %v412_v1  ;;  %381 = vmatmul.mubr.msk.bf16.vlgmr.msra.gmra.mrb[0].mxu1 %vm64_vm1, %v415_v6 }
   0x8   :  { %392 = vmatprep.subr.bf16.mxu0 %v414_v5  ;;  %384 = vmatprep.mubr.msk.bf16.mxu1 %vm64_vm1, %v418_v8 }
   0xb   :  { %393 = vmatpush3.bf16.msra.mxu0 %v414_v5 }
   0xe   :  { %395 = vmatmul.mubr.msk.bf16.vlgmr.msra.gmra.mrb[0].mxu0 %vm184_vm2, %v417_v9 }
   0xf   :  { %385 = vmatmul.mubr.msk.bf16.gmra.mrb[4].mxu1 %vm64_vm1, %v419_v10  ;;  %398 = vmatprep.mubr.msk.bf16.mxu0 %vm184_vm2, %v420_v11 }
  0x16   :  { %399 = vmatmul.mubr.msk.bf16.gmra.mrb[4].mxu0 %vm184_vm2, %v421_v12 }
  0xda   :  { %v382_v13 = vpop.f32.mrb[0].mxu1 }
  0xdb   :  { %v115_v14 = vpop.f32.mrb[1].mxu1 }
  0xdc   :  { %v383_v15 = vpop.f32.mrb[2].mxu1 }
  0xdd   :  { %v118_v16 = vpop.f32.mrb[3].mxu1 }
  0xe1   :  { %v396_v17 = vpop.f32.mrb[0].mxu0 }
  0xe2   :  { %v240_v19 = vadd.f32 %v396_v17, %v382_v13  ;;  %v231_v20 = vpop.f32.mrb[1].mxu0  ;;  %v386_v21 = vpop.f32.mrb[4].mxu1 }
  0xe3   :  { %v232_v22 = vadd.f32 %v231_v20, %v115_v14  ;;  %v397_v23 = vpop.f32.mrb[2].mxu0  ;;  %v131_v24 = vpop.f32.mrb[5].mxu1 }
  0xe4   :  { %v271_v25 = vadd.f32 %v349_v18, %v240_v19  ;;  %v243_v26 = vadd.f32 %v397_v23, %v383_v15  ;;  %v234_v27 = vpop.f32.mrb[3].mxu0  ;;  %v387_v28 = vpop.f32.mrb[6].mxu1 }
  0xe5   :  { %v269_v29 = vadd.f32 %v349_v18, %v232_v22  ;;  %v235_v30 = vadd.f32 %v234_v27, %v118_v16  ;;  %v134_v31 = vpop.f32.mrb[7].mxu1 }
  0xe6   :  { %v279_v32 = vmax.f32 %v271_v25, 0.0  ;;  %v272_v33 = vadd.f32 %v349_v18, %v243_v26 }
  0xe7   :  { %v277_v34 = vmax.f32 %v269_v29, 0.0  ;;  %v270_v35 = vadd.f32 %v349_v18, %v235_v30 }
  0xe8   :  { %v360_v36 = vpack.c.bf16 %v279_v32, %v279_v32  ;;  %v280_v37 = vmax.f32 %v272_v33, 0.0 }
  0xe9   :  { %v358_v38 = vpack.c.bf16 %v277_v34, %v277_v34  ;;  %v278_v39 = vmax.f32 %v270_v35, 0.0  ;;  %v400_v40 = vpop.f32.mrb[4].mxu0 }
  0xea   :  { %320 = vst.msk [vmem:[%s536_s5 + $0x8] sm:$0xf] %vm317_vm3, %v360_v36  ;;  %v361_v41 = vpack.c.bf16 %v280_v37, %v280_v37  ;;  %v256_v42 = vadd.f32 %v400_v40, %v386_v21  ;;  %v247_v43 = vpop.f32.mrb[5].mxu0 }
  0xeb   :  { %318 = vst.msk [vmem:[%s536_s5] sm:$0xf] %vm317_vm3, %v358_v38  ;;  %v359_v44 = vpack.c.bf16 %v278_v39, %v278_v39  ;;  %v248_v45 = vadd.f32 %v247_v43, %v131_v24  ;;  %v401_v46 = vpop.f32.mrb[6].mxu0 }
  0xec   :  { %321 = vst.msk [vmem:[%s536_s5 + $0xc] sm:$0xf] %vm317_vm3, %v361_v41  ;;  %v275_v47 = vadd.f32 %v349_v18, %v256_v42  ;;  %v259_v48 = vadd.f32 %v401_v46, %v387_v28  ;;  %v250_v49 = vpop.f32.mrb[7].mxu0 }
  0xed   :  { %319 = vst.msk [vmem:[%s536_s5 + $0x4] sm:$0xf] %vm317_vm3, %v359_v44  ;;  %v273_v50 = vadd.f32 %v349_v18, %v248_v45  ;;  %v251_v51 = vadd.f32 %v250_v49, %v134_v31 }
  0xee   :  { %v283_v52 = vmax.f32 %v275_v47, 0.0  ;;  %v276_v53 = vadd.f32 %v349_v18, %v259_v48 }
  0xef   :  { %v281_v54 = vmax.f32 %v273_v50, 0.0  ;;  %v274_v55 = vadd.f32 %v349_v18, %v251_v51 }
  0xf0   :  { %v364_v56 = vpack.c.bf16 %v283_v52, %v283_v52  ;;  %v284_v57 = vmax.f32 %v276_v53, 0.0 }
  0xf1   :  { %v362_v58 = vpack.c.bf16 %v281_v54, %v281_v54  ;;  %v282_v59 = vmax.f32 %v274_v55, 0.0 }
  0xf2   :  { %324 = vst.msk [vmem:[%s536_s5 + $0x18] sm:$0xf] %vm317_vm3, %v364_v56  ;;  %v365_v60 = vpack.c.bf16 %v284_v57, %v284_v57 }
  0xf3   :  { %322 = vst.msk [vmem:[%s536_s5 + $0x10] sm:$0xf] %vm317_vm3, %v362_v58  ;;  %v363_v61 = vpack.c.bf16 %v282_v59, %v282_v59 }
  0xf4   :  { %325 = vst.msk [vmem:[%s536_s5 + $0x1c] sm:$0xf] %vm317_vm3, %v365_v60 }
  0xf5   :  { %323 = vst.msk [vmem:[%s536_s5 + $0x14] sm:$0xf] %vm317_vm3, %v363_v61 }

// kernel: rpvnet_forward.31
= control target key start
LH: loop header
LB: loop body
LE: loop exit
PB: predicated region body
PF: predicated region fallthrough
CT: control target
= control target key end

     0   :  { %vm413_vm0 = vcmask 1043456   ;;  %vm316_vm1 = vcmask 64512   ;;  %vm884_vm2 = vcmask 392192   ;;  %vm1661_vm3 = vcmask 257024   ;;  %s2949_s2 = inlined_call_operand.vmem [shape: bf16[48,32], index: 2, kind: input, shape index: {}]   ;;  %s2950_s3 = inlined_call_operand.vmem [shape: bf16[8,32], index: 3, kind: input, shape index: {}]   ;;  %s2951_s1 = inlined_call_operand.vmem [shape: bf16[512,8], index: 1, kind: input, shape index: {}]   ;;  %s2952_s0 = inlined_call_operand.vmem [shape: bf16[512,48], index: 0, kind: input, shape index: {}]   ;;  %s2953_s4 = inlined_call_operand.vmem [shape: f32[1,32], index: 4, kind: input, shape index: {}]   ;;  %s2954_s5 = inlined_call_operand.vmem [shape: bf16[512,32], index: 5, kind: output, shape index: {}]  }
   0x1   :  { %v2259_v0 = vld [vmem:[%s2949_s2] sm:$0xff]   ;;  %v2260_v1 = vld [vmem:[%s2949_s2 + $0x8] sm:$0xff]   ;;  %v2262_v5 = vld [vmem:[%s2949_s2 + $0x10] sm:$0xff]  }
   0x2   :  { %2124 = vmatprep.subr.bf16.mxu0 %v2259_v0  ;;  %v155_v2 = vld [vmem:[%s2950_s3] sm:$0xf]  ;;  %v2263_v6 = vld [vmem:[%s2951_s1 + $0x8] sm:$0xff]   ;;  %v2266_v8 = vld [vmem:[%s2951_s1 + $0x10] sm:$0xff]  }
   0x3   :  { %2125 = vmatpush3.bf16.msra.mxu0 %v2259_v0  ;;  %2258 = vmatprep.subr.msk.bf16.mxu1 %vm413_vm0, %v155_v2  ;;  %v415_v3 = vsel %vm413_vm0, %v155_v2, 0  ;;  %v2261_v4 = vld [vmem:[%s2951_s1] sm:$0xff]   ;;  %v2265_v9 = vld [vmem:[%s2952_s0 + $0x8] sm:$0xff]   ;;  %v2267_v10 = vld [vmem:[%s2951_s1 + $0x18] sm:$0xff]  }
   0x4   :  { %2126 = vmatprep.subr.bf16.mxu0 %v2260_v1  ;;  %2059 = vmatpush3.bf16.msra.mxu1 %v415_v3  ;;  %v2264_v7 = vld [vmem:[%s2952_s0] sm:$0xff]   ;;  %v2268_v11 = vld [vmem:[%s2952_s0 + $0x10] sm:$0xff]   ;;  %v2269_v13 = vld [vmem:[%s2952_s0 + $0x18] sm:$0xff]  }
   0x5   :  { %2060 = vmatprep.mubr.msk.bf16.mxu1 %vm316_vm1, %v2261_v4  ;;  %2130 = vmatprep.mubr.msk.bf16.mxu0 %vm884_vm2, %v2264_v7  ;;  %v2270_v12 = vld [vmem:[%s2951_s1 + $0x20] sm:$0xff]   ;;  %v2271_v14 = vld [vmem:[%s2951_s1 + $0x28] sm:$0xff]   ;;  %v2274_v16 = vld [vmem:[%s2951_s1 + $0x30] sm:$0xff]  }
   0x6   :  { %v2272_v15 = vld [vmem:[%s2952_s0 + $0x20] sm:$0xff]   ;;  %v2273_v17 = vld [vmem:[%s2952_s0 + $0x28] sm:$0xff]   ;;  %v2275_v18 = vld [vmem:[%s2951_s1 + $0x38] sm:$0xff]  }
   0x7   :  { %2127 = vmatpush3.bf16.msra.mxu0 %v2260_v1  ;;  %2061 = vmatmul.mubr.msk.bf16.vlgmr.msra.gmra.mrb[0].mxu1 %vm316_vm1, %v2263_v6  ;;  %v2276_v19 = vld [vmem:[%s2952_s0 + $0x30] sm:$0xff]   ;;  %v2278_v20 = vld [vmem:[%s2951_s1 + $0x40] sm:$0xff]   ;;  %v2277_v21 = vld [vmem:[%s2952_s0 + $0x38] sm:$0xff]  }
   0x8   :  { %2128 = vmatprep.subr.bf16.mxu0 %v2262_v5  ;;  %2064 = vmatprep.mubr.msk.bf16.mxu1 %vm316_vm1, %v2266_v8  ;;  %v2279_v22 = vld [vmem:[%s2951_s1 + $0x48] sm:$0xff]   ;;  %v2280_v23 = vld [vmem:[%s2952_s0 + $0x40] sm:$0xff]   ;;  %v2282_v24 = vld [vmem:[%s2951_s1 + $0x50] sm:$0xff]  }
   0x9   :  { %v2281_v25 = vld [vmem:[%s2952_s0 + $0x48] sm:$0xff]   ;;  %v2283_v26 = vld [vmem:[%s2951_s1 + $0x58] sm:$0xff]   ;;  %v2284_v27 = vld [vmem:[%s2952_s0 + $0x50] sm:$0xff]  }
   0xa   :  { %v2286_v28 = vld [vmem:[%s2951_s1 + $0x60] sm:$0xff]   ;;  %v2285_v29 = vld [vmem:[%s2952_s0 + $0x58] sm:$0xff]   ;;  %v2287_v30 = vld [vmem:[%s2951_s1 + $0x68] sm:$0xff]  }
   0xb   :  { %2129 = vmatpush3.bf16.msra.mxu0 %v2262_v5  ;;  %v2288_v31 = vld [vmem:[%s2952_s0 + $0x60] sm:$0xff]   ;;  %v2290_v32 = vld [vmem:[%s2951_s1 + $0x70] sm:$0xff]   ;;  %v2289_v33 = vld [vmem:[%s2952_s0 + $0x68] sm:$0xff]  }
   0xc   :  { %v2291_v34 = vld [vmem:[%s2951_s1 + $0x78] sm:$0xff]   ;;  %v2292_v35 = vld [vmem:[%s2952_s0 + $0x70] sm:$0xff]   ;;  %v2294_v36 = vld [vmem:[%s2951_s1 + $0x80] sm:$0xff]  }
   0xd   :  { %v2293_v37 = vld [vmem:[%s2952_s0 + $0x78] sm:$0xff]   ;;  %v2295_v38 = vld [vmem:[%s2951_s1 + $0x88] sm:$0xff]   ;;  %v2296_v39 = vld [vmem:[%s2952_s0 + $0x80] sm:$0xff]  }
   0xe   :  { %2131 = vmatmul.mubr.msk.bf16.vlgmr.msra.gmra.mrb[0].mxu0 %vm884_vm2, %v2265_v9  ;;  %v2298_v40 = vld [vmem:[%s2951_s1 + $0x90] sm:$0xff]   ;;  %v2297_v41 = vld [vmem:[%s2952_s0 + $0x88] sm:$0xff]   ;;  %v2299_v42 = vld [vmem:[%s2951_s1 + $0x98] sm:$0xff]  }
   0xf   :  { %2065 = vmatmul.mubr.msk.bf16.gmra.mrb[4].mxu1 %vm316_vm1, %v2267_v10  ;;  %2134 = vmatprep.mubr.msk.bf16.mxu0 %vm884_vm2, %v2268_v11  ;;  %v2300_v43 = vld [vmem:[%s2952_s0 + $0x90] sm:$0xff]   ;;  %v2302_v44 = vld [vmem:[%s2951_s1 + $0xa0] sm:$0xff]   ;;  %v2301_v45 = vld [vmem:[%s2952_s0 + $0x98] sm:$0xff]  }
  0x10   :  { %2068 = vmatprep.mubr.msk.bf16.mxu1 %vm316_vm1, %v2270_v12  ;;  %v2303_v46 = vld [vmem:[%s2951_s1 + $0xa8] sm:$0xff]   ;;  %v2304_v47 = vld [vmem:[%s2952_s0 + $0xa0] sm:$0xff]   ;;  %v2306_v48 = vld [vmem:[%s2951_s1 + $0xb0] sm:$0xff]  }
  0x11   :  { %v2305_v49 = vld [vmem:[%s2952_s0 + $0xa8] sm:$0xff]   ;;  %v2307_v50 = vld [vmem:[%s2951_s1 + $0xb8] sm:$0xff]   ;;  %v2308_v51 = vld [vmem:[%s2952_s0 + $0xb0] sm:$0xff]  }
  0x12   :  { %v2310_v52 = vld [vmem:[%s2951_s1 + $0xc0] sm:$0xff]   ;;  %v2309_v53 = vld [vmem:[%s2952_s0 + $0xb8] sm:$0xff]   ;;  %v2311_v54 = vld [vmem:[%s2951_s1 + $0xc8] sm:$0xff]  }
  0x13   :  { %v2312_v55 = vld [vmem:[%s2952_s0 + $0xc0] sm:$0xff]   ;;  %v2314_v56 = vld [vmem:[%s2951_s1 + $0xd0] sm:$0xff]   ;;  %v2313_v57 = vld [vmem:[%s2952_s0 + $0xc8] sm:$0xff]  }
  0x14   :  { %v2315_v58 = vld [vmem:[%s2951_s1 + $0xd8] sm:$0xff]   ;;  %v2316_v59 = vld [vmem:[%s2952_s0 + $0xd0] sm:$0xff]   ;;  %v2318_v60 = vld [vmem:[%s2951_s1 + $0xe0] sm:$0xff]  }
  0x15   :  { %v2317_v61 = vld [vmem:[%s2952_s0 + $0xd8] sm:$0xff]   ;;  %v2319_v62 = vld [vmem:[%s2951_s1 + $0xe8] sm:$0xff]   ;;  %v2320_v63 = vld [vmem:[%s2952_s0 + $0xe0] sm:$0xff]  }
  0x16   :  { %2135 = vmatmul.mubr.msk.bf16.gmra.mrb[4].mxu0 %vm884_vm2, %v2269_v13  ;;  %v2322_v0 = vld [vmem:[%s2951_s1 + $0xf0] sm:$0xff]   ;;  %v2321_v1 = vld [vmem:[%s2952_s0 + $0xe8] sm:$0xff]   ;;  %v2323_v2 = vld [vmem:[%s2951_s1 + $0xf8] sm:$0xff]  }
  0x17   :  { %2069 = vmatmul.mubr.msk.bf16.gmra.mrb[8].mxu1 %vm316_vm1, %v2271_v14  ;;  %2138 = vmatprep.mubr.msk.bf16.mxu0 %vm884_vm2, %v2272_v15  ;;  %v2324_v3 = vld [vmem:[%s2952_s0 + $0xf0] sm:$0xff]   ;;  %v2325_v4 = vld [vmem:[%s2952_s0 + $0xf8] sm:$0xff]   ;;  %v2627_v10 = vld [vmem:[%s2953_s4] ss:$0 sm:$0xff] }
  0x18   :  { %2072 = vmatprep.mubr.msk.bf16.mxu1 %vm316_vm1, %v2274_v16 }
  0x1e   :  { %2139 = vmatmul.mubr.msk.bf16.gmra.mrb[8].mxu0 %vm884_vm2, %v2273_v17 }
  0x1f   :  { %2073 = vmatmul.mubr.msk.bf16.gmra.mrb[12].mxu1 %vm316_vm1, %v2275_v18  ;;  %2142 = vmatprep.mubr.msk.bf16.mxu0 %vm884_vm2, %v2276_v19 }
  0x20   :  { %2076 = vmatprep.mubr.msk.bf16.mxu1 %vm316_vm1, %v2278_v20 }
  0x26   :  { %2143 = vmatmul.mubr.msk.bf16.gmra.mrb[12].mxu0 %vm884_vm2, %v2277_v21 }
  0x27   :  { %2077 = vmatmul.mubr.msk.bf16.gmra.mrb[16].mxu1 %vm316_vm1, %v2279_v22  ;;  %2146 = vmatprep.mubr.msk.bf16.mxu0 %vm884_vm2, %v2280_v23 }
  0x28   :  { %2080 = vmatprep.mubr.msk.bf16.mxu1 %vm316_vm1, %v2282_v24 }
  0x2e   :  { %2147 = vmatmul.mubr.msk.bf16.gmra.mrb[16].mxu0 %vm884_vm2, %v2281_v25 }
  0x2f   :  { %2081 = vmatmul.mubr.msk.bf16.gmra.mrb[20].mxu1 %vm316_vm1, %v2283_v26  ;;  %2150 = vmatprep.mubr.msk.bf16.mxu0 %vm884_vm2, %v2284_v27 }
  0x30   :  { %2084 = vmatprep.mubr.msk.bf16.mxu1 %vm316_vm1, %v2286_v28 }
  0x36   :  { %2151 = vmatmul.mubr.msk.bf16.gmra.mrb[20].mxu0 %vm884_vm2, %v2285_v29 }
  0x37   :  { %2085 = vmatmul.mubr.msk.bf16.gmra.mrb[24].mxu1 %vm316_vm1, %v2287_v30  ;;  %2154 = vmatprep.mubr.msk.bf16.mxu0 %vm884_vm2, %v2288_v31 }
  0x38   :  { %2088 = vmatprep.mubr.msk.bf16.mxu1 %vm316_vm1, %v2290_v32 }
  0x3e   :  { %2155 = vmatmul.mubr.msk.bf16.gmra.mrb[24].mxu0 %vm884_vm2, %v2289_v33 }
  0x3f   :  { %2089 = vmatmul.mubr.msk.bf16.gmra.mrb[28].mxu1 %vm316_vm1, %v2291_v34  ;;  %2158 = vmatprep.mubr.msk.bf16.mxu0 %vm884_vm2, %v2292_v35 }
  0x40   :  { %2092 = vmatprep.mubr.msk.bf16.mxu1 %vm316_vm1, %v2294_v36 }
  0x46   :  { %2159 = vmatmul.mubr.msk.bf16.gmra.mrb[28].mxu0 %vm884_vm2, %v2293_v37 }
  0x47   :  { %2093 = vmatmul.mubr.msk.bf16.gmra.mrb[32].mxu1 %vm316_vm1, %v2295_v38  ;;  %2162 = vmatprep.mubr.msk.bf16.mxu0 %vm884_vm2, %v2296_v39 }
  0x48   :  { %2096 = vmatprep.mubr.msk.bf16.mxu1 %vm316_vm1, %v2298_v40 }
  0x4e   :  { %2163 = vmatmul.mubr.msk.bf16.gmra.mrb[32].mxu0 %vm884_vm2, %v2297_v41 }
  0x4f   :  { %2097 = vmatmul.mubr.msk.bf16.gmra.mrb[36].mxu1 %vm316_vm1, %v2299_v42  ;;  %2166 = vmatprep.mubr.msk.bf16.mxu0 %vm884_vm2, %v2300_v43 }
  0x50   :  { %2100 = vmatprep.mubr.msk.bf16.mxu1 %vm316_vm1, %v2302_v44 }
  0x56   :  { %2167 = vmatmul.mubr.msk.bf16.gmra.mrb[36].mxu0 %vm884_vm2, %v2301_v45 }
  0x57   :  { %2101 = vmatmul.mubr.msk.bf16.gmra.mrb[40].mxu1 %vm316_vm1, %v2303_v46  ;;  %2170 = vmatprep.mubr.msk.bf16.mxu0 %vm884_vm2, %v2304_v47 }
  0x58   :  { %2104 = vmatprep.mubr.msk.bf16.mxu1 %vm316_vm1, %v2306_v48 }
  0x5e   :  { %2171 = vmatmul.mubr.msk.bf16.gmra.mrb[40].mxu0 %vm884_vm2, %v2305_v49 }
  0x5f   :  { %2105 = vmatmul.mubr.msk.bf16.gmra.mrb[44].mxu1 %vm316_vm1, %v2307_v50  ;;  %2174 = vmatprep.mubr.msk.bf16.mxu0 %vm884_vm2, %v2308_v51 }
  0x60   :  { %2108 = vmatprep.mubr.msk.bf16.mxu1 %vm316_vm1, %v2310_v52 }
  0x66   :  { %2175 = vmatmul.mubr.msk.bf16.gmra.mrb[44].mxu0 %vm884_vm2, %v2309_v53 }
  0x67   :  { %2109 = vmatmul.mubr.msk.bf16.gmra.mrb[48].mxu1 %vm316_vm1, %v2311_v54  ;;  %2178 = vmatprep.mubr.msk.bf16.mxu0 %vm884_vm2, %v2312_v55 }
  0x68   :  { %2112 = vmatprep.mubr.msk.bf16.mxu1 %vm316_vm1, %v2314_v56 }
  0x6e   :  { %2179 = vmatmul.mubr.msk.bf16.gmra.mrb[48].mxu0 %vm884_vm2, %v2313_v57 }
  0x6f   :  { %2113 = vmatmul.mubr.msk.bf16.gmra.mrb[52].mxu1 %vm316_vm1, %v2315_v58  ;;  %2182 = vmatprep.mubr.msk.bf16.mxu0 %vm884_vm2, %v2316_v59 }
  0x70   :  { %2116 = vmatprep.mubr.msk.bf16.mxu1 %vm316_vm1, %v2318_v60 }
  0x76   :  { %2183 = vmatmul.mubr.msk.bf16.gmra.mrb[52].mxu0 %vm884_vm2, %v2317_v61 }
  0x77   :  { %2117 = vmatmul.mubr.msk.bf16.gmra.mrb[56].mxu1 %vm316_vm1, %v2319_v62  ;;  %2186 = vmatprep.mubr.msk.bf16.mxu0 %vm884_vm2, %v2320_v63 }
  0x78   :  { %2120 = vmatprep.mubr.msk.bf16.mxu1 %vm316_vm1, %v2322_v0 }
  0x7e   :  { %2187 = vmatmul.mubr.msk.bf16.gmra.mrb[56].mxu0 %vm884_vm2, %v2321_v1 }
  0x7f   :  { %2121 = vmatmul.mubr.msk.bf16.gmra.mrb[60].mxu1 %vm316_vm1, %v2323_v2  ;;  %2190 = vmatprep.mubr.msk.bf16.mxu0 %vm884_vm2, %v2324_v3 }
  0x86   :  { %2191 = vmatmul.mubr.msk.bf16.gmra.mrb[60].mxu0 %vm884_vm2, %v2325_v4 }
  0xda   :  { %v2062_v5 = vpop.f32.mrb[0].mxu1 }
  0xdb   :  { %v451_v6 = vpop.f32.mrb[1].mxu1 }
  0xdc   :  { %v2063_v7 = vpop.f32.mrb[2].mxu1 }
  0xdd   :  { %v454_v8 = vpop.f32.mrb[3].mxu1 }
  0xe1   :  { %v2132_v9 = vpop.f32.mrb[0].mxu0 }
  0xe2   :  { %v1024_v11 = vadd.f32 %v2132_v9, %v2062_v5  ;;  %v1015_v12 = vpop.f32.mrb[1].mxu0  ;;  %v2066_v13 = vpop.f32.mrb[4].mxu1 }
  0xe3   :  { %v1016_v14 = vadd.f32 %v1015_v12, %v451_v6  ;;  %v2133_v15 = vpop.f32.mrb[2].mxu0  ;;  %v467_v16 = vpop.f32.mrb[5].mxu1 }
  0xe4   :  { %v1279_v17 = vadd.f32 %v2627_v10, %v1024_v11  ;;  %v1027_v18 = vadd.f32 %v2133_v15, %v2063_v7  ;;  %v1018_v19 = vpop.f32.mrb[3].mxu0  ;;  %v2067_v20 = vpop.f32.mrb[6].mxu1 }
  0xe5   :  { %v1277_v21 = vadd.f32 %v2627_v10, %v1016_v14  ;;  %v1019_v22 = vadd.f32 %v1018_v19, %v454_v8  ;;  %v470_v23 = vpop.f32.mrb[7].mxu1 }
  0xe6   :  { %v1343_v24 = vmax.f32 %v1279_v17, 0.0  ;;  %v1280_v25 = vadd.f32 %v2627_v10, %v1027_v18 }
  0xe7   :  { %v1341_v26 = vmax.f32 %v1277_v21, 0.0  ;;  %v1278_v27 = vadd.f32 %v2627_v10, %v1019_v22 }
  0xe8   :  { %v1928_v28 = vpack.c.bf16 %v1343_v24, %v1343_v24  ;;  %v1344_v29 = vmax.f32 %v1280_v25, 0.0 }
  0xe9   :  { %v1926_v30 = vpack.c.bf16 %v1341_v26, %v1341_v26  ;;  %v1342_v31 = vmax.f32 %v1278_v27, 0.0  ;;  %v2136_v32 = vpop.f32.mrb[4].mxu0 }
  0xea   :  { %1664 = vst.msk [vmem:[%s2954_s5 + $0x8] sm:$0xf] %vm1661_vm3, %v1928_v28  ;;  %v1929_v33 = vpack.c.bf16 %v1344_v29, %v1344_v29  ;;  %v1040_v34 = vadd.f32 %v2136_v32, %v2066_v13  ;;  %v1031_v35 = vpop.f32.mrb[5].mxu0  ;;  %v2070_v36 = vpop.f32.mrb[8].mxu1 }
  0xeb   :  { %1662 = vst.msk [vmem:[%s2954_s5] sm:$0xf] %vm1661_vm3, %v1926_v30  ;;  %v1927_v37 = vpack.c.bf16 %v1342_v31, %v1342_v31  ;;  %v1032_v38 = vadd.f32 %v1031_v35, %v467_v16  ;;  %v2137_v39 = vpop.f32.mrb[6].mxu0  ;;  %v483_v40 = vpop.f32.mrb[9].mxu1 }
  0xec   :  { %1665 = vst.msk [vmem:[%s2954_s5 + $0xc] sm:$0xf] %vm1661_vm3, %v1929_v33  ;;  %v1283_v41 = vadd.f32 %v2627_v10, %v1040_v34  ;;  %v1043_v42 = vadd.f32 %v2137_v39, %v2067_v20  ;;  %v1034_v43 = vpop.f32.mrb[7].mxu0  ;;  %v2071_v44 = vpop.f32.mrb[10].mxu1 }
  0xed   :  { %1663 = vst.msk [vmem:[%s2954_s5 + $0x4] sm:$0xf] %vm1661_vm3, %v1927_v37  ;;  %v1281_v45 = vadd.f32 %v2627_v10, %v1032_v38  ;;  %v1035_v46 = vadd.f32 %v1034_v43, %v470_v23  ;;  %v486_v47 = vpop.f32.mrb[11].mxu1 }
  0xee   :  { %v1347_v48 = vmax.f32 %v1283_v41, 0.0  ;;  %v1284_v49 = vadd.f32 %v2627_v10, %v1043_v42 }
  0xef   :  { %v1345_v50 = vmax.f32 %v1281_v45, 0.0  ;;  %v1282_v51 = vadd.f32 %v2627_v10, %v1035_v46 }
  0xf0   :  { %v1932_v52 = vpack.c.bf16 %v1347_v48, %v1347_v48  ;;  %v1348_v53 = vmax.f32 %v1284_v49, 0.0 }
  0xf1   :  { %v1930_v54 = vpack.c.bf16 %v1345_v50, %v1345_v50  ;;  %v1346_v55 = vmax.f32 %v1282_v51, 0.0  ;;  %v2140_v56 = vpop.f32.mrb[8].mxu0 }
  0xf2   :  { %1668 = vst.msk [vmem:[%s2954_s5 + $0x18] sm:$0xf] %vm1661_vm3, %v1932_v52  ;;  %v1933_v57 = vpack.c.bf16 %v1348_v53, %v1348_v53  ;;  %v1056_v58 = vadd.f32 %v2140_v56, %v2070_v36  ;;  %v1047_v59 = vpop.f32.mrb[9].mxu0  ;;  %v2074_v60 = vpop.f32.mrb[12].mxu1 }
  0xf3   :  { %1666 = vst.msk [vmem:[%s2954_s5 + $0x10] sm:$0xf] %vm1661_vm3, %v1930_v54  ;;  %v1931_v61 = vpack.c.bf16 %v1346_v55, %v1346_v55  ;;  %v1048_v62 = vadd.f32 %v1047_v59, %v483_v40  ;;  %v2141_v63 = vpop.f32.mrb[10].mxu0  ;;  %v499_v0 = vpop.f32.mrb[13].mxu1 }
  0xf4   :  { %1669 = vst.msk [vmem:[%s2954_s5 + $0x1c] sm:$0xf] %vm1661_vm3, %v1933_v57  ;;  %v1287_v1 = vadd.f32 %v2627_v10, %v1056_v58  ;;  %v1059_v2 = vadd.f32 %v2141_v63, %v2071_v44  ;;  %v1050_v3 = vpop.f32.mrb[11].mxu0  ;;  %v2075_v4 = vpop.f32.mrb[14].mxu1 }
  0xf5   :  { %1667 = vst.msk [vmem:[%s2954_s5 + $0x14] sm:$0xf] %vm1661_vm3, %v1931_v61  ;;  %v1285_v5 = vadd.f32 %v2627_v10, %v1048_v62  ;;  %v1051_v6 = vadd.f32 %v1050_v3, %v486_v47  ;;  %v502_v7 = vpop.f32.mrb[15].mxu1 }
  0xf6   :  { %v1351_v8 = vmax.f32 %v1287_v1, 0.0  ;;  %v1288_v9 = vadd.f32 %v2627_v10, %v1059_v2 }
  0xf7   :  { %v1349_v11 = vmax.f32 %v1285_v5, 0.0  ;;  %v1286_v12 = vadd.f32 %v2627_v10, %v1051_v6 }
  0xf8   :  { %v1936_v13 = vpack.c.bf16 %v1351_v8, %v1351_v8  ;;  %v1352_v14 = vmax.f32 %v1288_v9, 0.0 }
  0xf9   :  { %v1934_v15 = vpack.c.bf16 %v1349_v11, %v1349_v11  ;;  %v1350_v16 = vmax.f32 %v1286_v12, 0.0  ;;  %v2144_v17 = vpop.f32.mrb[12].mxu0 }
  0xfa   :  { %1672 = vst.msk [vmem:[%s2954_s5 + $0x28] sm:$0xf] %vm1661_vm3, %v1936_v13  ;;  %v1937_v18 = vpack.c.bf16 %v1352_v14, %v1352_v14  ;;  %v1072_v19 = vadd.f32 %v2144_v17, %v2074_v60  ;;  %v1063_v20 = vpop.f32.mrb[13].mxu0  ;;  %v2078_v21 = vpop.f32.mrb[16].mxu1 }
  0xfb   :  { %1670 = vst.msk [vmem:[%s2954_s5 + $0x20] sm:$0xf] %vm1661_vm3, %v1934_v15  ;;  %v1935_v22 = vpack.c.bf16 %v1350_v16, %v1350_v16  ;;  %v1064_v23 = vadd.f32 %v1063_v20, %v499_v0  ;;  %v2145_v24 = vpop.f32.mrb[14].mxu0  ;;  %v515_v25 = vpop.f32.mrb[17].mxu1 }
  0xfc   :  { %1673 = vst.msk [vmem:[%s2954_s5 + $0x2c] sm:$0xf] %vm1661_vm3, %v1937_v18  ;;  %v1291_v26 = vadd.f32 %v2627_v10, %v1072_v19  ;;  %v1075_v27 = vadd.f32 %v2145_v24, %v2075_v4  ;;  %v1066_v28 = vpop.f32.mrb[15].mxu0  ;;  %v2079_v29 = vpop.f32.mrb[18].mxu1 }
  0xfd   :  { %1671 = vst.msk [vmem:[%s2954_s5 + $0x24] sm:$0xf] %vm1661_vm3, %v1935_v22  ;;  %v1289_v30 = vadd.f32 %v2627_v10, %v1064_v23  ;;  %v1067_v31 = vadd.f32 %v1066_v28, %v502_v7  ;;  %v518_v32 = vpop.f32.mrb[19].mxu1 }
  0xfe   :  { %v1355_v33 = vmax.f32 %v1291_v26, 0.0  ;;  %v1292_v34 = vadd.f32 %v2627_v10, %v1075_v27 }
  0xff   :  { %v1353_v35 = vmax.f32 %v1289_v30, 0.0  ;;  %v1290_v36 = vadd.f32 %v2627_v10, %v1067_v31 }
 0x100   :  { %v1940_v37 = vpack.c.bf16 %v1355_v33, %v1355_v33  ;;  %v1356_v38 = vmax.f32 %v1292_v34, 0.0 }
 0x101   :  { %v1938_v39 = vpack.c.bf16 %v1353_v35, %v1353_v35  ;;  %v1354_v40 = vmax.f32 %v1290_v36, 0.0  ;;  %v2148_v41 = vpop.f32.mrb[16].mxu0 }
 0x102   :  { %1676 = vst.msk [vmem:[%s2954_s5 + $0x38] sm:$0xf] %vm1661_vm3, %v1940_v37  ;;  %v1941_v42 = vpack.c.bf16 %v1356_v38, %v1356_v38  ;;  %v1088_v43 = vadd.f32 %v2148_v41, %v2078_v21  ;;  %v1079_v44 = vpop.f32.mrb[17].mxu0  ;;  %v2082_v45 = vpop.f32.mrb[20].mxu1 }
 0x103   :  { %1674 = vst.msk [vmem:[%s2954_s5 + $0x30] sm:$0xf] %vm1661_vm3, %v1938_v39  ;;  %v1939_v46 = vpack.c.bf16 %v1354_v40, %v1354_v40  ;;  %v1080_v47 = vadd.f32 %v1079_v44, %v515_v25  ;;  %v2149_v48 = vpop.f32.mrb[18].mxu0  ;;  %v531_v49 = vpop.f32.mrb[21].mxu1 }
 0x104   :  { %1677 = vst.msk [vmem:[%s2954_s5 + $0x3c] sm:$0xf] %vm1661_vm3, %v1941_v42  ;;  %v1295_v50 = vadd.f32 %v2627_v10, %v1088_v43  ;;  %v1091_v51 = vadd.f32 %v2149_v48, %v2079_v29  ;;  %v1082_v52 = vpop.f32.mrb[19].mxu0  ;;  %v2083_v53 = vpop.f32.mrb[22].mxu1 }
 0x105   :  { %1675 = vst.msk [vmem:[%s2954_s5 + $0x34] sm:$0xf] %vm1661_vm3, %v1939_v46  ;;  %v1293_v54 = vadd.f32 %v2627_v10, %v1080_v47  ;;  %v1083_v55 = vadd.f32 %v1082_v52, %v518_v32  ;;  %v534_v56 = vpop.f32.mrb[23].mxu1 }
 0x106   :  { %v1359_v57 = vmax.f32 %v1295_v50, 0.0  ;;  %v1296_v58 = vadd.f32 %v2627_v10, %v1091_v51 }
 0x107   :  { %v1357_v59 = vmax.f32 %v1293_v54, 0.0  ;;  %v1294_v60 = vadd.f32 %v2627_v10, %v1083_v55 }
 0x108   :  { %v1944_v61 = vpack.c.bf16 %v1359_v57, %v1359_v57  ;;  %v1360_v62 = vmax.f32 %v1296_v58, 0.0 }
 0x109   :  { %v1942_v63 = vpack.c.bf16 %v1357_v59, %v1357_v59  ;;  %v1358_v0 = vmax.f32 %v1294_v60, 0.0  ;;  %v2152_v1 = vpop.f32.mrb[20].mxu0 }
 0x10a   :  { %1680 = vst.msk [vmem:[%s2954_s5 + $0x48] sm:$0xf] %vm1661_vm3, %v1944_v61  ;;  %v1945_v2 = vpack.c.bf16 %v1360_v62, %v1360_v62  ;;  %v1104_v3 = vadd.f32 %v2152_v1, %v2082_v45  ;;  %v1095_v4 = vpop.f32.mrb[21].mxu0  ;;  %v2086_v5 = vpop.f32.mrb[24].mxu1 }
 0x10b   :  { %1678 = vst.msk [vmem:[%s2954_s5 + $0x40] sm:$0xf] %vm1661_vm3, %v1942_v63  ;;  %v1943_v6 = vpack.c.bf16 %v1358_v0, %v1358_v0  ;;  %v1096_v7 = vadd.f32 %v1095_v4, %v531_v49  ;;  %v2153_v8 = vpop.f32.mrb[22].mxu0  ;;  %v547_v9 = vpop.f32.mrb[25].mxu1 }
 0x10c   :  { %1681 = vst.msk [vmem:[%s2954_s5 + $0x4c] sm:$0xf] %vm1661_vm3, %v1945_v2  ;;  %v1299_v11 = vadd.f32 %v2627_v10, %v1104_v3  ;;  %v1107_v12 = vadd.f32 %v2153_v8, %v2083_v53  ;;  %v1098_v13 = vpop.f32.mrb[23].mxu0  ;;  %v2087_v14 = vpop.f32.mrb[26].mxu1 }
 0x10d   :  { %1679 = vst.msk [vmem:[%s2954_s5 + $0x44] sm:$0xf] %vm1661_vm3, %v1943_v6  ;;  %v1297_v15 = vadd.f32 %v2627_v10, %v1096_v7  ;;  %v1099_v16 = vadd.f32 %v1098_v13, %v534_v56  ;;  %v550_v17 = vpop.f32.mrb[27].mxu1 }
 0x10e   :  { %v1363_v18 = vmax.f32 %v1299_v11, 0.0  ;;  %v1300_v19 = vadd.f32 %v2627_v10, %v1107_v12 }
 0x10f   :  { %v1361_v20 = vmax.f32 %v1297_v15, 0.0  ;;  %v1298_v21 = vadd.f32 %v2627_v10, %v1099_v16 }
 0x110   :  { %v1948_v22 = vpack.c.bf16 %v1363_v18, %v1363_v18  ;;  %v1364_v23 = vmax.f32 %v1300_v19, 0.0 }
 0x111   :  { %v1946_v24 = vpack.c.bf16 %v1361_v20, %v1361_v20  ;;  %v1362_v25 = vmax.f32 %v1298_v21, 0.0  ;;  %v2156_v26 = vpop.f32.mrb[24].mxu0 }
 0x112   :  { %1684 = vst.msk [vmem:[%s2954_s5 + $0x58] sm:$0xf] %vm1661_vm3, %v1948_v22  ;;  %v1949_v27 = vpack.c.bf16 %v1364_v23, %v1364_v23  ;;  %v1120_v28 = vadd.f32 %v2156_v26, %v2086_v5  ;;  %v1111_v29 = vpop.f32.mrb[25].mxu0  ;;  %v2090_v30 = vpop.f32.mrb[28].mxu1 }
 0x113   :  { %1682 = vst.msk [vmem:[%s2954_s5 + $0x50] sm:$0xf] %vm1661_vm3, %v1946_v24  ;;  %v1947_v31 = vpack.c.bf16 %v1362_v25, %v1362_v25  ;;  %v1112_v32 = vadd.f32 %v1111_v29, %v547_v9  ;;  %v2157_v33 = vpop.f32.mrb[26].mxu0  ;;  %v563_v34 = vpop.f32.mrb[29].mxu1 }
 0x114   :  { %1685 = vst.msk [vmem:[%s2954_s5 + $0x5c] sm:$0xf] %vm1661_vm3, %v1949_v27  ;;  %v1303_v35 = vadd.f32 %v2627_v10, %v1120_v28  ;;  %v1123_v36 = vadd.f32 %v2157_v33, %v2087_v14  ;;  %v1114_v37 = vpop.f32.mrb[27].mxu0  ;;  %v2091_v38 = vpop.f32.mrb[30].mxu1 }
 0x115   :  { %1683 = vst.msk [vmem:[%s2954_s5 + $0x54] sm:$0xf] %vm1661_vm3, %v1947_v31  ;;  %v1301_v39 = vadd.f32 %v2627_v10, %v1112_v32  ;;  %v1115_v40 = vadd.f32 %v1114_v37, %v550_v17  ;;  %v566_v41 = vpop.f32.mrb[31].mxu1 }
 0x116   :  { %v1367_v42 = vmax.f32 %v1303_v35, 0.0  ;;  %v1304_v43 = vadd.f32 %v2627_v10, %v1123_v36 }
 0x117   :  { %v1365_v44 = vmax.f32 %v1301_v39, 0.0  ;;  %v1302_v45 = vadd.f32 %v2627_v10, %v1115_v40 }
 0x118   :  { %v1952_v46 = vpack.c.bf16 %v1367_v42, %v1367_v42  ;;  %v1368_v47 = vmax.f32 %v1304_v43, 0.0 }
 0x119   :  { %v1950_v48 = vpack.c.bf16 %v1365_v44, %v1365_v44  ;;  %v1366_v49 = vmax.f32 %v1302_v45, 0.0  ;;  %v2160_v50 = vpop.f32.mrb[28].mxu0 }
 0x11a   :  { %1688 = vst.msk [vmem:[%s2954_s5 + $0x68] sm:$0xf] %vm1661_vm3, %v1952_v46  ;;  %v1953_v51 = vpack.c.bf16 %v1368_v47, %v1368_v47  ;;  %v1136_v52 = vadd.f32 %v2160_v50, %v2090_v30  ;;  %v1127_v53 = vpop.f32.mrb[29].mxu0  ;;  %v2094_v54 = vpop.f32.mrb[32].mxu1 }
 0x11b   :  { %1686 = vst.msk [vmem:[%s2954_s5 + $0x60] sm:$0xf] %vm1661_vm3, %v1950_v48  ;;  %v1951_v55 = vpack.c.bf16 %v1366_v49, %v1366_v49  ;;  %v1128_v56 = vadd.f32 %v1127_v53, %v563_v34  ;;  %v2161_v57 = vpop.f32.mrb[30].mxu0  ;;  %v579_v58 = vpop.f32.mrb[33].mxu1 }
 0x11c   :  { %1689 = vst.msk [vmem:[%s2954_s5 + $0x6c] sm:$0xf] %vm1661_vm3, %v1953_v51  ;;  %v1307_v59 = vadd.f32 %v2627_v10, %v1136_v52  ;;  %v1139_v60 = vadd.f32 %v2161_v57, %v2091_v38  ;;  %v1130_v61 = vpop.f32.mrb[31].mxu0  ;;  %v2095_v62 = vpop.f32.mrb[34].mxu1 }
 0x11d   :  { %1687 = vst.msk [vmem:[%s2954_s5 + $0x64] sm:$0xf] %vm1661_vm3, %v1951_v55  ;;  %v1305_v63 = vadd.f32 %v2627_v10, %v1128_v56  ;;  %v1131_v0 = vadd.f32 %v1130_v61, %v566_v41  ;;  %v582_v1 = vpop.f32.mrb[35].mxu1 }
 0x11e   :  { %v1371_v2 = vmax.f32 %v1307_v59, 0.0  ;;  %v1308_v3 = vadd.f32 %v2627_v10, %v1139_v60 }
 0x11f   :  { %v1369_v4 = vmax.f32 %v1305_v63, 0.0  ;;  %v1306_v5 = vadd.f32 %v2627_v10, %v1131_v0 }
 0x120   :  { %v1956_v6 = vpack.c.bf16 %v1371_v2, %v1371_v2  ;;  %v1372_v7 = vmax.f32 %v1308_v3, 0.0 }
 0x121   :  { %v1954_v8 = vpack.c.bf16 %v1369_v4, %v1369_v4  ;;  %v1370_v9 = vmax.f32 %v1306_v5, 0.0  ;;  %v2164_v11 = vpop.f32.mrb[32].mxu0 }
 0x122   :  { %1692 = vst.msk [vmem:[%s2954_s5 + $0x78] sm:$0xf] %vm1661_vm3, %v1956_v6  ;;  %v1957_v12 = vpack.c.bf16 %v1372_v7, %v1372_v7  ;;  %v1152_v13 = vadd.f32 %v2164_v11, %v2094_v54  ;;  %v1143_v14 = vpop.f32.mrb[33].mxu0  ;;  %v2098_v15 = vpop.f32.mrb[36].mxu1 }
 0x123   :  { %1690 = vst.msk [vmem:[%s2954_s5 + $0x70] sm:$0xf] %vm1661_vm3, %v1954_v8  ;;  %v1955_v16 = vpack.c.bf16 %v1370_v9, %v1370_v9  ;;  %v1144_v17 = vadd.f32 %v1143_v14, %v579_v58  ;;  %v2165_v18 = vpop.f32.mrb[34].mxu0  ;;  %v595_v19 = vpop.f32.mrb[37].mxu1 }
 0x124   :  { %1693 = vst.msk [vmem:[%s2954_s5 + $0x7c] sm:$0xf] %vm1661_vm3, %v1957_v12  ;;  %v1311_v20 = vadd.f32 %v2627_v10, %v1152_v13  ;;  %v1155_v21 = vadd.f32 %v2165_v18, %v2095_v62  ;;  %v1146_v22 = vpop.f32.mrb[35].mxu0  ;;  %v2099_v23 = vpop.f32.mrb[38].mxu1 }
 0x125   :  { %1691 = vst.msk [vmem:[%s2954_s5 + $0x74] sm:$0xf] %vm1661_vm3, %v1955_v16  ;;  %v1309_v24 = vadd.f32 %v2627_v10, %v1144_v17  ;;  %v1147_v25 = vadd.f32 %v1146_v22, %v582_v1  ;;  %v598_v26 = vpop.f32.mrb[39].mxu1 }
 0x126   :  { %v1375_v27 = vmax.f32 %v1311_v20, 0.0  ;;  %v1312_v28 = vadd.f32 %v2627_v10, %v1155_v21 }
 0x127   :  { %v1373_v29 = vmax.f32 %v1309_v24, 0.0  ;;  %v1310_v30 = vadd.f32 %v2627_v10, %v1147_v25 }
 0x128   :  { %v1960_v31 = vpack.c.bf16 %v1375_v27, %v1375_v27  ;;  %v1376_v32 = vmax.f32 %v1312_v28, 0.0 }
 0x129   :  { %v1958_v33 = vpack.c.bf16 %v1373_v29, %v1373_v29  ;;  %v1374_v34 = vmax.f32 %v1310_v30, 0.0  ;;  %v2168_v35 = vpop.f32.mrb[36].mxu0 }
 0x12a   :  { %1696 = vst.msk [vmem:[%s2954_s5 + $0x88] sm:$0xf] %vm1661_vm3, %v1960_v31  ;;  %v1961_v36 = vpack.c.bf16 %v1376_v32, %v1376_v32  ;;  %v1168_v37 = vadd.f32 %v2168_v35, %v2098_v15  ;;  %v1159_v38 = vpop.f32.mrb[37].mxu0  ;;  %v2102_v39 = vpop.f32.mrb[40].mxu1 }
 0x12b   :  { %1694 = vst.msk [vmem:[%s2954_s5 + $0x80] sm:$0xf] %vm1661_vm3, %v1958_v33  ;;  %v1959_v40 = vpack.c.bf16 %v1374_v34, %v1374_v34  ;;  %v1160_v41 = vadd.f32 %v1159_v38, %v595_v19  ;;  %v2169_v42 = vpop.f32.mrb[38].mxu0  ;;  %v611_v43 = vpop.f32.mrb[41].mxu1 }
 0x12c   :  { %1697 = vst.msk [vmem:[%s2954_s5 + $0x8c] sm:$0xf] %vm1661_vm3, %v1961_v36  ;;  %v1315_v44 = vadd.f32 %v2627_v10, %v1168_v37  ;;  %v1171_v45 = vadd.f32 %v2169_v42, %v2099_v23  ;;  %v1162_v46 = vpop.f32.mrb[39].mxu0  ;;  %v2103_v47 = vpop.f32.mrb[42].mxu1 }
 0x12d   :  { %1695 = vst.msk [vmem:[%s2954_s5 + $0x84] sm:$0xf] %vm1661_vm3, %v1959_v40  ;;  %v1313_v48 = vadd.f32 %v2627_v10, %v1160_v41  ;;  %v1163_v49 = vadd.f32 %v1162_v46, %v598_v26  ;;  %v614_v50 = vpop.f32.mrb[43].mxu1 }
 0x12e   :  { %v1379_v51 = vmax.f32 %v1315_v44, 0.0  ;;  %v1316_v52 = vadd.f32 %v2627_v10, %v1171_v45 }
 0x12f   :  { %v1377_v53 = vmax.f32 %v1313_v48, 0.0  ;;  %v1314_v54 = vadd.f32 %v2627_v10, %v1163_v49 }
 0x130   :  { %v1964_v55 = vpack.c.bf16 %v1379_v51, %v1379_v51  ;;  %v1380_v56 = vmax.f32 %v1316_v52, 0.0 }
 0x131   :  { %v1962_v57 = vpack.c.bf16 %v1377_v53, %v1377_v53  ;;  %v1378_v58 = vmax.f32 %v1314_v54, 0.0  ;;  %v2172_v59 = vpop.f32.mrb[40].mxu0 }
 0x132   :  { %1700 = vst.msk [vmem:[%s2954_s5 + $0x98] sm:$0xf] %vm1661_vm3, %v1964_v55  ;;  %v1965_v60 = vpack.c.bf16 %v1380_v56, %v1380_v56  ;;  %v1184_v61 = vadd.f32 %v2172_v59, %v2102_v39  ;;  %v1175_v62 = vpop.f32.mrb[41].mxu0  ;;  %v2106_v63 = vpop.f32.mrb[44].mxu1 }
 0x133   :  { %1698 = vst.msk [vmem:[%s2954_s5 + $0x90] sm:$0xf] %vm1661_vm3, %v1962_v57  ;;  %v1963_v0 = vpack.c.bf16 %v1378_v58, %v1378_v58  ;;  %v1176_v1 = vadd.f32 %v1175_v62, %v611_v43  ;;  %v2173_v2 = vpop.f32.mrb[42].mxu0  ;;  %v627_v3 = vpop.f32.mrb[45].mxu1 }
 0x134   :  { %1701 = vst.msk [vmem:[%s2954_s5 + $0x9c] sm:$0xf] %vm1661_vm3, %v1965_v60  ;;  %v1319_v4 = vadd.f32 %v2627_v10, %v1184_v61  ;;  %v1187_v5 = vadd.f32 %v2173_v2, %v2103_v47  ;;  %v1178_v6 = vpop.f32.mrb[43].mxu0  ;;  %v2107_v7 = vpop.f32.mrb[46].mxu1 }
 0x135   :  { %1699 = vst.msk [vmem:[%s2954_s5 + $0x94] sm:$0xf] %vm1661_vm3, %v1963_v0  ;;  %v1317_v8 = vadd.f32 %v2627_v10, %v1176_v1  ;;  %v1179_v9 = vadd.f32 %v1178_v6, %v614_v50  ;;  %v630_v11 = vpop.f32.mrb[47].mxu1 }
 0x136   :  { %v1383_v12 = vmax.f32 %v1319_v4, 0.0  ;;  %v1320_v13 = vadd.f32 %v2627_v10, %v1187_v5 }
 0x137   :  { %v1381_v14 = vmax.f32 %v1317_v8, 0.0  ;;  %v1318_v15 = vadd.f32 %v2627_v10, %v1179_v9 }
 0x138   :  { %v1968_v16 = vpack.c.bf16 %v1383_v12, %v1383_v12  ;;  %v1384_v17 = vmax.f32 %v1320_v13, 0.0 }
 0x139   :  { %v1966_v18 = vpack.c.bf16 %v1381_v14, %v1381_v14  ;;  %v1382_v19 = vmax.f32 %v1318_v15, 0.0  ;;  %v2176_v20 = vpop.f32.mrb[44].mxu0 }
 0x13a   :  { %1704 = vst.msk [vmem:[%s2954_s5 + $0xa8] sm:$0xf] %vm1661_vm3, %v1968_v16  ;;  %v1969_v21 = vpack.c.bf16 %v1384_v17, %v1384_v17  ;;  %v1200_v22 = vadd.f32 %v2176_v20, %v2106_v63  ;;  %v1191_v23 = vpop.f32.mrb[45].mxu0  ;;  %v2110_v24 = vpop.f32.mrb[48].mxu1 }
 0x13b   :  { %1702 = vst.msk [vmem:[%s2954_s5 + $0xa0] sm:$0xf] %vm1661_vm3, %v1966_v18  ;;  %v1967_v25 = vpack.c.bf16 %v1382_v19, %v1382_v19  ;;  %v1192_v26 = vadd.f32 %v1191_v23, %v627_v3  ;;  %v2177_v27 = vpop.f32.mrb[46].mxu0  ;;  %v643_v28 = vpop.f32.mrb[49].mxu1 }
 0x13c   :  { %1705 = vst.msk [vmem:[%s2954_s5 + $0xac] sm:$0xf] %vm1661_vm3, %v1969_v21  ;;  %v1323_v29 = vadd.f32 %v2627_v10, %v1200_v22  ;;  %v1203_v30 = vadd.f32 %v2177_v27, %v2107_v7  ;;  %v1194_v31 = vpop.f32.mrb[47].mxu0  ;;  %v2111_v32 = vpop.f32.mrb[50].mxu1 }
 0x13d   :  { %1703 = vst.msk [vmem:[%s2954_s5 + $0xa4] sm:$0xf] %vm1661_vm3, %v1967_v25  ;;  %v1321_v33 = vadd.f32 %v2627_v10, %v1192_v26  ;;  %v1195_v34 = vadd.f32 %v1194_v31, %v630_v11  ;;  %v646_v35 = vpop.f32.mrb[51].mxu1 }
 0x13e   :  { %v1387_v36 = vmax.f32 %v1323_v29, 0.0  ;;  %v1324_v37 = vadd.f32 %v2627_v10, %v1203_v30 }
 0x13f   :  { %v1385_v38 = vmax.f32 %v1321_v33, 0.0  ;;  %v1322_v39 = vadd.f32 %v2627_v10, %v1195_v34 }
 0x140   :  { %v1972_v40 = vpack.c.bf16 %v1387_v36, %v1387_v36  ;;  %v1388_v41 = vmax.f32 %v1324_v37, 0.0 }
 0x141   :  { %v1970_v42 = vpack.c.bf16 %v1385_v38, %v1385_v38  ;;  %v1386_v43 = vmax.f32 %v1322_v39, 0.0  ;;  %v2180_v44 = vpop.f32.mrb[48].mxu0 }
 0x142   :  { %1708 = vst.msk [vmem:[%s2954_s5 + $0xb8] sm:$0xf] %vm1661_vm3, %v1972_v40  ;;  %v1973_v45 = vpack.c.bf16 %v1388_v41, %v1388_v41  ;;  %v1216_v46 = vadd.f32 %v2180_v44, %v2110_v24  ;;  %v1207_v47 = vpop.f32.mrb[49].mxu0  ;;  %v2114_v48 = vpop.f32.mrb[52].mxu1 }
 0x143   :  { %1706 = vst.msk [vmem:[%s2954_s5 + $0xb0] sm:$0xf] %vm1661_vm3, %v1970_v42  ;;  %v1971_v49 = vpack.c.bf16 %v1386_v43, %v1386_v43  ;;  %v1208_v50 = vadd.f32 %v1207_v47, %v643_v28  ;;  %v2181_v51 = vpop.f32.mrb[50].mxu0  ;;  %v659_v52 = vpop.f32.mrb[53].mxu1 }
 0x144   :  { %1709 = vst.msk [vmem:[%s2954_s5 + $0xbc] sm:$0xf] %vm1661_vm3, %v1973_v45  ;;  %v1327_v53 = vadd.f32 %v2627_v10, %v1216_v46  ;;  %v1219_v54 = vadd.f32 %v2181_v51, %v2111_v32  ;;  %v1210_v55 = vpop.f32.mrb[51].mxu0  ;;  %v2115_v56 = vpop.f32.mrb[54].mxu1 }
 0x145   :  { %1707 = vst.msk [vmem:[%s2954_s5 + $0xb4] sm:$0xf] %vm1661_vm3, %v1971_v49  ;;  %v1325_v57 = vadd.f32 %v2627_v10, %v1208_v50  ;;  %v1211_v58 = vadd.f32 %v1210_v55, %v646_v35  ;;  %v662_v59 = vpop.f32.mrb[55].mxu1 }
 0x146   :  { %v1391_v60 = vmax.f32 %v1327_v53, 0.0  ;;  %v1328_v61 = vadd.f32 %v2627_v10, %v1219_v54 }
 0x147   :  { %v1389_v62 = vmax.f32 %v1325_v57, 0.0  ;;  %v1326_v63 = vadd.f32 %v2627_v10, %v1211_v58 }
 0x148   :  { %v1976_v0 = vpack.c.bf16 %v1391_v60, %v1391_v60  ;;  %v1392_v1 = vmax.f32 %v1328_v61, 0.0 }
 0x149   :  { %v1974_v2 = vpack.c.bf16 %v1389_v62, %v1389_v62  ;;  %v1390_v3 = vmax.f32 %v1326_v63, 0.0  ;;  %v2184_v4 = vpop.f32.mrb[52].mxu0 }
 0x14a   :  { %1712 = vst.msk [vmem:[%s2954_s5 + $0xc8] sm:$0xf] %vm1661_vm3, %v1976_v0  ;;  %v1977_v5 = vpack.c.bf16 %v1392_v1, %v1392_v1  ;;  %v1232_v6 = vadd.f32 %v2184_v4, %v2114_v48  ;;  %v1223_v7 = vpop.f32.mrb[53].mxu0  ;;  %v2118_v8 = vpop.f32.mrb[56].mxu1 }
 0x14b   :  { %1710 = vst.msk [vmem:[%s2954_s5 + $0xc0] sm:$0xf] %vm1661_vm3, %v1974_v2  ;;  %v1975_v9 = vpack.c.bf16 %v1390_v3, %v1390_v3  ;;  %v1224_v11 = vadd.f32 %v1223_v7, %v659_v52  ;;  %v2185_v12 = vpop.f32.mrb[54].mxu0  ;;  %v675_v13 = vpop.f32.mrb[57].mxu1 }
 0x14c   :  { %1713 = vst.msk [vmem:[%s2954_s5 + $0xcc] sm:$0xf] %vm1661_vm3, %v1977_v5  ;;  %v1331_v14 = vadd.f32 %v2627_v10, %v1232_v6  ;;  %v1235_v15 = vadd.f32 %v2185_v12, %v2115_v56  ;;  %v1226_v16 = vpop.f32.mrb[55].mxu0  ;;  %v2119_v17 = vpop.f32.mrb[58].mxu1 }
 0x14d   :  { %1711 = vst.msk [vmem:[%s2954_s5 + $0xc4] sm:$0xf] %vm1661_vm3, %v1975_v9  ;;  %v1329_v18 = vadd.f32 %v2627_v10, %v1224_v11  ;;  %v1227_v19 = vadd.f32 %v1226_v16, %v662_v59  ;;  %v678_v20 = vpop.f32.mrb[59].mxu1 }
 0x14e   :  { %v1395_v21 = vmax.f32 %v1331_v14, 0.0  ;;  %v1332_v22 = vadd.f32 %v2627_v10, %v1235_v15 }
 0x14f   :  { %v1393_v23 = vmax.f32 %v1329_v18, 0.0  ;;  %v1330_v24 = vadd.f32 %v2627_v10, %v1227_v19 }
 0x150   :  { %v1980_v25 = vpack.c.bf16 %v1395_v21, %v1395_v21  ;;  %v1396_v26 = vmax.f32 %v1332_v22, 0.0 }
 0x151   :  { %v1978_v27 = vpack.c.bf16 %v1393_v23, %v1393_v23  ;;  %v1394_v28 = vmax.f32 %v1330_v24, 0.0  ;;  %v2188_v29 = vpop.f32.mrb[56].mxu0 }
 0x152   :  { %1716 = vst.msk [vmem:[%s2954_s5 + $0xd8] sm:$0xf] %vm1661_vm3, %v1980_v25  ;;  %v1981_v30 = vpack.c.bf16 %v1396_v26, %v1396_v26  ;;  %v1248_v31 = vadd.f32 %v2188_v29, %v2118_v8  ;;  %v1239_v32 = vpop.f32.mrb[57].mxu0  ;;  %v2122_v33 = vpop.f32.mrb[60].mxu1 }
 0x153   :  { %1714 = vst.msk [vmem:[%s2954_s5 + $0xd0] sm:$0xf] %vm1661_vm3, %v1978_v27  ;;  %v1979_v34 = vpack.c.bf16 %v1394_v28, %v1394_v28  ;;  %v1240_v35 = vadd.f32 %v1239_v32, %v675_v13  ;;  %v2189_v36 = vpop.f32.mrb[58].mxu0  ;;  %v691_v37 = vpop.f32.mrb[61].mxu1 }
 0x154   :  { %1717 = vst.msk [vmem:[%s2954_s5 + $0xdc] sm:$0xf] %vm1661_vm3, %v1981_v30  ;;  %v1335_v38 = vadd.f32 %v2627_v10, %v1248_v31  ;;  %v1251_v39 = vadd.f32 %v2189_v36, %v2119_v17  ;;  %v1242_v40 = vpop.f32.mrb[59].mxu0  ;;  %v2123_v41 = vpop.f32.mrb[62].mxu1 }
 0x155   :  { %1715 = vst.msk [vmem:[%s2954_s5 + $0xd4] sm:$0xf] %vm1661_vm3, %v1979_v34  ;;  %v1333_v42 = vadd.f32 %v2627_v10, %v1240_v35  ;;  %v1243_v43 = vadd.f32 %v1242_v40, %v678_v20  ;;  %v694_v44 = vpop.f32.mrb[63].mxu1 }
 0x156   :  { %v1399_v45 = vmax.f32 %v1335_v38, 0.0  ;;  %v1336_v46 = vadd.f32 %v2627_v10, %v1251_v39 }
 0x157   :  { %v1397_v47 = vmax.f32 %v1333_v42, 0.0  ;;  %v1334_v48 = vadd.f32 %v2627_v10, %v1243_v43 }
 0x158   :  { %v1984_v49 = vpack.c.bf16 %v1399_v45, %v1399_v45  ;;  %v1400_v50 = vmax.f32 %v1336_v46, 0.0 }
 0x159   :  { %v1982_v51 = vpack.c.bf16 %v1397_v47, %v1397_v47  ;;  %v1398_v52 = vmax.f32 %v1334_v48, 0.0  ;;  %v2192_v53 = vpop.f32.mrb[60].mxu0 }
 0x15a   :  { %1720 = vst.msk [vmem:[%s2954_s5 + $0xe8] sm:$0xf] %vm1661_vm3, %v1984_v49  ;;  %v1985_v54 = vpack.c.bf16 %v1400_v50, %v1400_v50  ;;  %v1264_v55 = vadd.f32 %v2192_v53, %v2122_v33  ;;  %v1255_v56 = vpop.f32.mrb[61].mxu0 }
 0x15b   :  { %1718 = vst.msk [vmem:[%s2954_s5 + $0xe0] sm:$0xf] %vm1661_vm3, %v1982_v51  ;;  %v1983_v57 = vpack.c.bf16 %v1398_v52, %v1398_v52  ;;  %v1256_v58 = vadd.f32 %v1255_v56, %v691_v37  ;;  %v2193_v59 = vpop.f32.mrb[62].mxu0 }
 0x15c   :  { %1721 = vst.msk [vmem:[%s2954_s5 + $0xec] sm:$0xf] %vm1661_vm3, %v1985_v54  ;;  %v1339_v60 = vadd.f32 %v2627_v10, %v1264_v55  ;;  %v1267_v61 = vadd.f32 %v2193_v59, %v2123_v41  ;;  %v1258_v62 = vpop.f32.mrb[63].mxu0 }
 0x15d   :  { %1719 = vst.msk [vmem:[%s2954_s5 + $0xe4] sm:$0xf] %vm1661_vm3, %v1983_v57  ;;  %v1337_v63 = vadd.f32 %v2627_v10, %v1256_v58  ;;  %v1259_v0 = vadd.f32 %v1258_v62, %v694_v44 }
 0x15e   :  { %v1403_v1 = vmax.f32 %v1339_v60, 0.0  ;;  %v1340_v2 = vadd.f32 %v2627_v10, %v1267_v61 }
 0x15f   :  { %v1401_v3 = vmax.f32 %v1337_v63, 0.0  ;;  %v1338_v4 = vadd.f32 %v2627_v10, %v1259_v0 }
 0x160   :  { %v1988_v5 = vpack.c.bf16 %v1403_v1, %v1403_v1  ;;  %v1404_v6 = vmax.f32 %v1340_v2, 0.0 }
 0x161   :  { %v1986_v7 = vpack.c.bf16 %v1401_v3, %v1401_v3  ;;  %v1402_v8 = vmax.f32 %v1338_v4, 0.0 }
 0x162   :  { %1724 = vst.msk [vmem:[%s2954_s5 + $0xf8] sm:$0xf] %vm1661_vm3, %v1988_v5  ;;  %v1989_v9 = vpack.c.bf16 %v1404_v6, %v1404_v6 }
 0x163   :  { %1722 = vst.msk [vmem:[%s2954_s5 + $0xf0] sm:$0xf] %vm1661_vm3, %v1986_v7  ;;  %v1987_v11 = vpack.c.bf16 %v1402_v8, %v1402_v8 }
 0x164   :  { %1725 = vst.msk [vmem:[%s2954_s5 + $0xfc] sm:$0xf] %vm1661_vm3, %v1989_v9 }
 0x165   :  { %1723 = vst.msk [vmem:[%s2954_s5 + $0xf4] sm:$0xf] %vm1661_vm3, %v1987_v11 }

// kernel: rpvnet_forward.33
= control target key start
LH: loop header
LB: loop body
LE: loop exit
PB: predicated region body
PF: predicated region fallthrough
CT: control target
= control target key end

     0   :  { %vm66_vm0 = vcmask 261120   ;;  %s367_s1 = inlined_call_operand.vmem [shape: bf16[32,32], index: 1, kind: input, shape index: {}]   ;;  %s368_s0 = inlined_call_operand.vmem [shape: bf16[64,32], index: 0, kind: input, shape index: {}]   ;;  %s369_s2 = inlined_call_operand.vmem [shape: f32[1,32], index: 2, kind: input, shape index: {}]   ;;  %s370_s3 = inlined_call_operand.vmem [shape: f32[64,32], index: 3, kind: output, shape index: {}]  }
   0x1   :  { %v245_v0 = vld [vmem:[%s367_s1] sm:$0xff]   ;;  %v246_v1 = vld [vmem:[%s367_s1 + $0x8] sm:$0xff]   ;;  %v249_v3 = vld [vmem:[%s368_s0 + $0x10] sm:$0xff]  }
   0x2   :  { %229 = vmatprep.subr.bf16.mxu0 %v245_v0  ;;  %241 = vmatprep.subr.bf16.mxu1 %v245_v0  ;;  %v247_v2 = vld [vmem:[%s368_s0] sm:$0xff]   ;;  %v248_v4 = vld [vmem:[%s368_s0 + $0x8] sm:$0xff]   ;;  %v250_v5 = vld [vmem:[%s368_s0 + $0x18] sm:$0xff]  }
   0x3   :  { %230 = vmatpush3.bf16.msra.mxu0 %v245_v0  ;;  %243 = vmatpush3.bf16.msra.mxu1 %v245_v0  ;;  %v212_v6 = vld [vmem:[%s369_s2] ss:$0 sm:$0xff] }
   0x4   :  { %231 = vmatprep.subr.bf16.mxu0 %v246_v1  ;;  %242 = vmatprep.subr.bf16.mxu1 %v246_v1 }
   0x5   :  { %233 = vmatprep.mubr.msk.bf16.mxu0 %vm66_vm0, %v247_v2  ;;  %237 = vmatprep.mubr.msk.bf16.mxu1 %vm66_vm0, %v249_v3 }
   0x7   :  { %232 = vmatpush3.bf16.msra.mxu0 %v246_v1  ;;  %244 = vmatpush3.bf16.msra.mxu1 %v246_v1 }
   0xa   :  { %234 = vmatmul.mubr.msk.bf16.vlgmr.msra.gmra.mrb[0].mxu0 %vm66_vm0, %v248_v4  ;;  %238 = vmatmul.mubr.msk.bf16.vlgmr.msra.gmra.mrb[0].mxu1 %vm66_vm0, %v250_v5 }
  0xdd   :  { %v235_v7 = vpop.f32.mrb[0].mxu0  ;;  %v239_v8 = vpop.f32.mrb[0].mxu1 }
  0xde   :  { %v122_v9 = vadd.f32 %v235_v7, %v212_v6  ;;  %v113_v10 = vpop.f32.mrb[1].mxu0  ;;  %v129_v11 = vpop.f32.mrb[1].mxu1  ;;  %v138_v31 = vadd.f32 %v239_v8, %v212_v6 }
  0xdf   :  { %v114_v12 = vadd.f32 %v212_v6, %v113_v10  ;;  %v236_v13 = vpop.f32.mrb[2].mxu0  ;;  %v312_v14 = vadd.f32 %v212_v6, %v129_v11  ;;  %v240_v15 = vpop.f32.mrb[2].mxu1 }
  0xe0   :  { %v314_v16 = vadd.f32 %v236_v13, %v212_v6  ;;  %v116_v17 = vpop.f32.mrb[3].mxu0  ;;  %v132_v18 = vpop.f32.mrb[3].mxu1  ;;  %v146_v19 = vmul.f32 %v122_v9, %v122_v9  ;;  %v141_v28 = vadd.f32 %v240_v15, %v212_v6  ;;  %v150_v36 = vmul.f32 %v138_v31, %v138_v31 }
  0xe1   :  { %v144_v20 = vmul.f32 %v114_v12, %v114_v12  ;;  %v148_v21 = vmul.f32 %v312_v14, %v312_v14  ;;  %v318_v22 = vadd.f32 %v212_v6, %v132_v18  ;;  %v117_v25 = vadd.f32 %v212_v6, %v116_v17 }
  0xe2   :  { %v158_v23 = vsel %vm66_vm0, %v146_v19, 0.0  ;;  %v147_v24 = vmul.f32 %v314_v16, %v314_v16  ;;  %v151_v34 = vmul.f32 %v141_v28, %v141_v28  ;;  %v170_v38 = vsel %vm66_vm0, %v150_v36, 0.0 }
  0xe3   :  { %159 = vadd.xlane.f32.xlu1 %v158_v23  ;;  %v152_v26 = vsel %vm66_vm0, %v144_v20, 0.0  ;;  %v164_v27 = vsel %vm66_vm0, %v148_v21, 0.0  ;;  %v149_v30 = vmul.f32 %v318_v22, %v318_v22  ;;  %v145_v32 = vmul.f32 %v117_v25, %v117_v25 }
  0xe4   :  { %153 = vadd.xlane.f32.xlu0 %v152_v26  ;;  %v161_v29 = vsel %vm66_vm0, %v147_v24, 0.0  ;;  %v173_v37 = vsel %vm66_vm0, %v151_v34, 0.0 }
  0xe5   :  { %v167_v33 = vsel %vm66_vm0, %v149_v30, 0.0  ;;  %v155_v35 = vsel %vm66_vm0, %v145_v32, 0.0 }
  0xe7   :  { %162 = vadd.xlane.f32.xlu1 %v161_v29 }
  0xe8   :  { %165 = vadd.xlane.f32.xlu0 %v164_v27 }
  0xeb   :  { %168 = vadd.xlane.f32.xlu1 %v167_v33 }
  0xec   :  { %156 = vadd.xlane.f32.xlu0 %v155_v35 }
  0xef   :  { %174 = vadd.xlane.f32.xlu1 %v173_v37 }
  0xf0   :  { %171 = vadd.xlane.f32.xlu0 %v170_v38 }
 0x170   :  { %v160_v39 = vpop.xlane.xlu1 %159 }
 0x171   :  { %v178_v40 = vadd.f32 1e-12, %v160_v39  ;;  %v154_v41 = vpop.xlane.xlu0 %153 }
 0x172   :  { %v176_v42 = vadd.f32 1e-12, %v154_v41 }
 0x173   :  { %251 = vrsqrt.f32 %v178_v40 }
 0x174   :  { %253 = vrsqrt.f32 %v176_v42  ;;  %v163_v43 = vpop.xlane.xlu1 %162 }
 0x175   :  { %v179_v44 = vadd.f32 1e-12, %v163_v43  ;;  %v166_v45 = vpop.xlane.xlu0 %165 }
 0x176   :  { %v180_v46 = vadd.f32 1e-12, %v166_v45 }
 0x177   :  { %255 = vrsqrt.f32 %v179_v44 }
 0x178   :  { %257 = vrsqrt.f32 %v180_v46  ;;  %v169_v47 = vpop.xlane.xlu1 %168 }
 0x179   :  { %v181_v48 = vadd.f32 1e-12, %v169_v47  ;;  %v157_v49 = vpop.xlane.xlu0 %156 }
 0x17a   :  { %v177_v50 = vadd.f32 1e-12, %v157_v49 }
 0x17b   :  { %259 = vrsqrt.f32 %v181_v48 }
 0x17c   :  { %261 = vrsqrt.f32 %v177_v50  ;;  %v175_v51 = vpop.xlane.xlu1 %174 }
 0x17d   :  { %v252_v52 = vpop.eup %251  ;;  %v183_v53 = vadd.f32 1e-12, %v175_v51  ;;  %v172_v54 = vpop.xlane.xlu0 %171 }
 0x17e   :  { %v254_v55 = vpop.eup %253  ;;  %v194_v56 = vmul.f32 %v252_v52, %v122_v9  ;;  %v182_v57 = vadd.f32 1e-12, %v172_v54 }
 0x17f   :  { %v192_v58 = vmul.f32 %v254_v55, %v114_v12  ;;  %263 = vrsqrt.f32 %v183_v53 }
 0x180   :  { %202 = vst.msk [vmem:[%s370_s3 + $0x10] sm:$0xff] %vm66_vm0, %v194_v56  ;;  %265 = vrsqrt.f32 %v182_v57 }
 0x181   :  { %v256_v59 = vpop.eup %255  ;;  %200 = vst.msk [vmem:[%s370_s3] sm:$0xff] %vm66_vm0, %v192_v58 }
 0x182   :  { %v258_v60 = vpop.eup %257  ;;  %v195_v61 = vmul.f32 %v256_v59, %v314_v16 }
 0x183   :  { %v196_v62 = vmul.f32 %v258_v60, %v312_v14 }
 0x184   :  { %203 = vst.msk [vmem:[%s370_s3 + $0x18] sm:$0xff] %vm66_vm0, %v195_v61 }
 0x185   :  { %v260_v63 = vpop.eup %259  ;;  %204 = vst.msk [vmem:[%s370_s3 + $0x20] sm:$0xff] %vm66_vm0, %v196_v62 }
 0x186   :  { %v262_v0 = vpop.eup %261  ;;  %v197_v1 = vmul.f32 %v260_v63, %v318_v22 }
 0x187   :  { %v193_v2 = vmul.f32 %v262_v0, %v117_v25 }
 0x188   :  { %205 = vst.msk [vmem:[%s370_s3 + $0x28] sm:$0xff] %vm66_vm0, %v197_v1 }
 0x189   :  { %v264_v3 = vpop.eup %263  ;;  %201 = vst.msk [vmem:[%s370_s3 + $0x8] sm:$0xff] %vm66_vm0, %v193_v2 }
 0x18a   :  { %v266_v4 = vpop.eup %265  ;;  %v199_v5 = vmul.f32 %v264_v3, %v141_v28 }
 0x18b   :  { %v198_v6 = vmul.f32 %v266_v4, %v138_v31 }
 0x18c   :  { %207 = vst.msk [vmem:[%s370_s3 + $0x38] sm:$0xff] %vm66_vm0, %v199_v5 }
 0x18d   :  { %206 = vst.msk [vmem:[%s370_s3 + $0x30] sm:$0xff] %vm66_vm0, %v198_v6 }

// kernel: rpvnet_forward.32
= control target key start
LH: loop header
LB: loop body
LE: loop exit
PB: predicated region body
PF: predicated region fallthrough
CT: control target
= control target key end

     0   :  { %vm92_vm0 = vcmask 392192   ;;  %vm234_vm1 = vcmask 261120   ;;  %vm557_vm2 = vcmask 23552   ;;  %vm822_vm3 = vcmask 257024   ;;  %s1361_s3 = inlined_call_operand.vmem [shape: bf16[48,32], index: 3, kind: input, shape index: {}]   ;;  %s1362_s0 = inlined_call_operand.vmem [shape: bf16[64,48], index: 0, kind: input, shape index: {}]   ;;  %s1363_s5 = inlined_call_operand.vmem [shape: bf16[32,3], index: 5, kind: input, shape index: {}]   ;;  %s1364_s1 = inlined_call_operand.vmem [shape: bf16[64,32], index: 1, kind: input, shape index: {}]   ;;  %s1365_s7 = inlined_call_operand.vmem [shape: bf16[32,3], index: 7, kind: input, shape index: {}]   ;;  %s1366_s6 = inlined_call_operand.vmem [shape: bf16[32,3], index: 6, kind: input, shape index: {}]   ;;  %s1367_s2 = inlined_call_operand.vmem [shape: bf16[64,32], index: 2, kind: input, shape index: {}]   ;;  %s1368_s4 = inlined_call_operand.vmem [shape: f32[1,32], index: 4, kind: input, shape index: {}]   ;;  %s1369_s8 = inlined_call_operand.vmem [shape: f32[1,3], index: 8, kind: input, shape index: {}]   ;;  %s1370_s9 = inlined_call_operand.vmem [shape: bf16[64,32], index: 9, kind: output, shape index: {}]  }
   0x1   :  { %v1003_v0 = vld [vmem:[%s1361_s3] sm:$0xff]   ;;  %v1004_v1 = vld [vmem:[%s1361_s3 + $0x8] sm:$0xff]   ;;  %v1005_v3 = vld [vmem:[%s1361_s3 + $0x10] sm:$0xff]  }
   0x2   :  { %915 = vmatprep.subr.bf16.mxu0 %v1003_v0  ;;  %v1006_v2 = vld [vmem:[%s1362_s0] sm:$0xff]   ;;  %v1007_v5 = vld [vmem:[%s1362_s0 + $0x8] sm:$0xff]   ;;  %v1008_v7 = vld [vmem:[%s1362_s0 + $0x10] sm:$0xff]  }
   0x3   :  { %916 = vmatpush3.bf16.msra.mxu0 %v1003_v0  ;;  %921 = vmatprep.mubr.msk.bf16.mxu0 %vm92_vm0, %v1006_v2  ;;  %v1010_v4 = vld [vmem:[%s1363_s5] sm:$0xff]   ;;  %v1011_v6 = vld [vmem:[%s1363_s5 + $0x8] sm:$0xff]   ;;  %v1155_v10 = vld [vmem:[%s1364_s1 + $0x10] sm:$0xff]  }
   0x4   :  { %917 = vmatprep.subr.bf16.mxu0 %v1004_v1  ;;  %941 = vmatprep.subr.bf16.mxu1 %v1010_v4  ;;  %v1145_v8 = vld [vmem:[%s1364_s1] sm:$0xff]   ;;  %v1150_v9 = vld [vmem:[%s1364_s1 + $0x8] sm:$0xff]   ;;  %v1009_v14 = vld [vmem:[%s1362_s0 + $0x18] sm:$0xff]  }
   0x5   :  { %942 = vmatpush3.bf16.msra.mxu1 %v1010_v4  ;;  %v1016_v11 = vld [vmem:[%s1365_s7] sm:$0xff]   ;;  %945 = vmatprep.mubr.msk.bf16.mxu1 %vm234_vm1, %v1145_v8  ;;  %v1017_v13 = vld [vmem:[%s1365_s7 + $0x8] sm:$0xff]   ;;  %v1180_v15 = vld [vmem:[%s1364_s1 + $0x18] sm:$0xff]  }
   0x6   :  { %943 = vmatprep.subr.bf16.mxu1 %v1011_v6  ;;  %v1020_v12 = vld [vmem:[%s1366_s6] sm:$0xff]   ;;  %v1195_v17 = vld [vmem:[%s1367_s2 + $0x8] sm:$0xff]   ;;  %v1200_v18 = vld [vmem:[%s1367_s2 + $0x10] sm:$0xff]  }
   0x7   :  { %918 = vmatpush3.bf16.msra.mxu0 %v1004_v1  ;;  %v1185_v16 = vld [vmem:[%s1367_s2] sm:$0xff]   ;;  %v1209_v19 = vld [vmem:[%s1367_s2 + $0x18] sm:$0xff]   ;;  %v1023_v20 = vld [vmem:[%s1366_s6 + $0x8] sm:$0xff]  }
   0x8   :  { %919 = vmatprep.subr.bf16.mxu0 %v1005_v3  ;;  %v835_v21 = vld [vmem:[%s1368_s4] ss:$0 sm:$0xff] }
   0x9   :  { %944 = vmatpush3.bf16.msra.mxu1 %v1011_v6  ;;  %v873_v59 = vld [vmem:[%s1369_s8] ss:$0 sm:$0xff] }
   0xa   :  { %953 = vmatprep.subr.bf16.mxu1 %v1016_v11 }
   0xb   :  { %920 = vmatpush3.bf16.msra.mxu0 %v1005_v3 }
   0xc   :  { %929 = vmatprep.subr.bf16.mxu0 %v1020_v12  ;;  %946 = vmatmul.mubr.msk.bf16.vlgmr.msra.gmra.mrb[0].mxu1 %vm234_vm1, %v1150_v9 }
   0xd   :  { %949 = vmatprep.mubr.msk.bf16.mxu1 %vm234_vm1, %v1155_v10  ;;  %954 = vmatpush3.bf16.msra.mxu1 %v1016_v11 }
   0xe   :  { %922 = vmatmul.mubr.msk.bf16.vlgmr.msra.gmra.mrb[0].mxu0 %vm92_vm0, %v1007_v5  ;;  %955 = vmatprep.subr.bf16.mxu1 %v1017_v13 }
   0xf   :  { %925 = vmatprep.mubr.msk.bf16.mxu0 %vm92_vm0, %v1008_v7  ;;  %930 = vmatpush3.bf16.msra.mxu0 %v1020_v12 }
  0x10   :  { %931 = vmatprep.subr.bf16.mxu0 %v1023_v20 }
  0x11   :  { %956 = vmatpush3.bf16.msra.mxu1 %v1017_v13 }
  0x13   :  { %932 = vmatpush3.bf16.msra.mxu0 %v1023_v20 }
  0x14   :  { %950 = vmatmul.mubr.msk.bf16.gmra.mrb[4].mxu1 %vm234_vm1, %v1180_v15 }
  0x15   :  { %957 = vmatprep.mubr.msk.bf16.mxu1 %vm234_vm1, %v1185_v16 }
  0x16   :  { %926 = vmatmul.mubr.msk.bf16.gmra.mrb[4].mxu0 %vm92_vm0, %v1009_v14 }
  0x1c   :  { %958 = vmatmul.mubr.msk.bf16.vlgmr.msra.gmra.mrb[0].mxu1 %vm234_vm1, %v1195_v17 }
  0x1d   :  { %961 = vmatprep.mubr.msk.bf16.mxu1 %vm234_vm1, %v1200_v18 }
  0x24   :  { %962 = vmatmul.mubr.msk.bf16.gmra.mrb[4].mxu1 %vm234_vm1, %v1209_v19 }
  0xe1   :  { %v923_v22 = vpop.f32.mrb[0].mxu0 }
  0xe2   :  { %v139_v23 = vpop.f32.mrb[1].mxu0  ;;  %v1221_v26 = vadd.f32 %v923_v22, %v835_v21 }
  0xe3   :  { %v1219_v24 = vadd.f32 %v835_v21, %v139_v23  ;;  %v924_v25 = vpop.f32.mrb[2].mxu0 }
  0xe4   :  { %v1223_v27 = vadd.f32 %v924_v25, %v835_v21  ;;  %v142_v28 = vpop.f32.mrb[3].mxu0  ;;  %v172_v33 = vmax.f32 %v1221_v26, 0.0 }
  0xe5   :  { %v1225_v29 = vadd.f32 %v835_v21, %v142_v28  ;;  %v170_v31 = vmax.f32 %v1219_v24, 0.0 }
  0xe6   :  { %v173_v30 = vmax.f32 %v1223_v27, 0.0 }
  0xe7   :  { %v171_v32 = vmax.f32 %v1225_v29, 0.0 }
  0xe8   :  { %v215_v36 = vpack.c.bf16 %v173_v30, %v172_v33 }
  0xe9   :  { %v214_v34 = vpack.c.bf16 %v171_v32, %v170_v31  ;;  %v927_v35 = vpop.f32.mrb[4].mxu0 }
  0xea   :  { %v1239_v37 = vadd.f32 %v927_v35, %v835_v21  ;;  %v155_v38 = vpop.f32.mrb[5].mxu0 }
  0xeb   :  { %v1241_v39 = vadd.f32 %v835_v21, %v155_v38  ;;  %v928_v40 = vpop.f32.mrb[6].mxu0  ;;  %933 = vmatprep.mubr.msk.bf16.mxu0 %vm234_vm1, %v214_v34 }
  0xec   :  { %v176_v41 = vmax.f32 %v1239_v37, 0.0  ;;  %v1245_v42 = vadd.f32 %v928_v40, %v835_v21  ;;  %v158_v43 = vpop.f32.mrb[7].mxu0  ;;  %934 = vmatmul.mubr.msk.bf16.vlgmr.msra.gmra.mrb[8].mxu0 %vm234_vm1, %v215_v36 }
  0xed   :  { %v174_v44 = vmax.f32 %v1241_v39, 0.0  ;;  %v1249_v45 = vadd.f32 %v835_v21, %v158_v43 }
  0xee   :  { %v177_v46 = vmax.f32 %v1245_v42, 0.0 }
  0xef   :  { %v175_v47 = vmax.f32 %v1249_v45, 0.0  ;;  %v959_v50 = vpop.f32.mrb[0].mxu1 }
  0xf0   :  { %v217_v48 = vpack.c.bf16 %v177_v46, %v176_v41  ;;  %v503_v51 = vpop.f32.mrb[1].mxu1 }
  0xf1   :  { %v216_v49 = vpack.c.bf16 %v175_v47, %v174_v44  ;;  %v960_v52 = vpop.f32.mrb[2].mxu1 }
  0xf2   :  { %v506_v53 = vpop.f32.mrb[3].mxu1 }
  0xf3   :  { %937 = vmatprep.mubr.msk.bf16.mxu0 %vm234_vm1, %v216_v49 }
  0xf4   :  { %938 = vmatmul.mubr.msk.bf16.gmra.mrb[12].mxu0 %vm234_vm1, %v217_v48 }
  0xf7   :  { %v963_v54 = vpop.f32.mrb[4].mxu1 }
  0xf8   :  { %v519_v55 = vpop.f32.mrb[5].mxu1 }
  0xf9   :  { %v964_v56 = vpop.f32.mrb[6].mxu1 }
  0xfa   :  { %v522_v57 = vpop.f32.mrb[7].mxu1 }
 0x1bf   :  { %v935_v58 = vpop.f32.mrb[8].mxu0 }
 0x1c0   :  { %v965_v60 = vadd.f32 %v959_v50, %v935_v58  ;;  %v281_v61 = vpop.f32.mrb[9].mxu0 }
 0x1c1   :  { %v966_v62 = vadd.f32 %v503_v51, %v281_v61  ;;  %v936_v63 = vpop.f32.mrb[10].mxu0 }
 0x1c2   :  { %v967_v0 = vadd.f32 %v960_v52, %v936_v63  ;;  %v284_v1 = vpop.f32.mrb[11].mxu0  ;;  %v551_v2 = vadd.f32 %v965_v60, %v873_v59 }
 0x1c3   :  { %v968_v3 = vadd.f32 %v506_v53, %v284_v1  ;;  %v549_v4 = vadd.f32 %v966_v62, %v873_v59 }
 0x1c4   :  { %v564_v5 = vsel %vm557_vm2, %v551_v2, -inf  ;;  %v552_v6 = vadd.f32 %v967_v0, %v873_v59 }
 0x1c5   :  { %565 = vmax.xlane.f32.xlu1 %v564_v5  ;;  %v558_v7 = vsel %vm557_vm2, %v549_v4, -inf  ;;  %v550_v11 = vadd.f32 %v968_v3, %v873_v59 }
 0x1c6   :  { %559 = vmax.xlane.f32.xlu0 %v558_v7  ;;  %v567_v20 = vsel %vm557_vm2, %v552_v6, -inf }
 0x1c7   :  { %v939_v12 = vpop.f32.mrb[12].mxu0  ;;  %v561_v23 = vsel %vm557_vm2, %v550_v11, -inf }
 0x1c8   :  { %v969_v13 = vadd.f32 %v963_v54, %v939_v12  ;;  %v297_v14 = vpop.f32.mrb[13].mxu0 }
 0x1c9   :  { %v970_v21 = vadd.f32 %v519_v55, %v297_v14  ;;  %568 = vmax.xlane.f32.xlu1 %v567_v20  ;;  %v940_v22 = vpop.f32.mrb[14].mxu0 }
 0x1ca   :  { %v971_v25 = vadd.f32 %v964_v56, %v940_v22  ;;  %562 = vmax.xlane.f32.xlu0 %v561_v23  ;;  %v300_v28 = vpop.f32.mrb[15].mxu0  ;;  %v555_v40 = vadd.f32 %v969_v13, %v873_v59 }
 0x1cb   :  { %v972_v34 = vadd.f32 %v522_v57, %v300_v28  ;;  %v553_v35 = vadd.f32 %v970_v21, %v873_v59 }
 0x1cc   :  { %v556_v48 = vadd.f32 %v971_v25, %v873_v59  ;;  %v576_v49 = vsel %vm557_vm2, %v555_v40, -inf }
 0x1cd   :  { %v570_v36 = vsel %vm557_vm2, %v553_v35, -inf  ;;  %v554_v38 = vadd.f32 %v972_v34, %v873_v59 }
 0x1ce   :  { %571 = vmax.xlane.f32.xlu0 %v570_v36  ;;  %v579_v50 = vsel %vm557_vm2, %v556_v48, -inf }
 0x1cf   :  { %v573_v43 = vsel %vm557_vm2, %v554_v38, -inf }
 0x1d0   :  { %574 = vmax.xlane.f32.xlu1 %v573_v43 }
 0x1d2   :  { %577 = vmax.xlane.f32.xlu0 %v576_v49 }
 0x1d4   :  { %580 = vmax.xlane.f32.xlu1 %v579_v50 }
 0x252   :  { %v566_v51 = vpop.xlane.xlu1 %565 }
 0x253   :  { %v584_v52 = vsub.f32 %v551_v2, %v566_v51  ;;  %v560_v53 = vpop.xlane.xlu0 %559  ;;  %v1064_v51 = vmov 0  }
 0x254   :  { %v582_v54 = vsub.f32 %v549_v4, %v560_v53  ;;  %984 = vset.pattern.permute.xlu1 %v1064_v51  ;;  %987 = vset.pattern.permute.xlu0 %v1064_v51 }
 0x255   :  { %v594_v55 = vmul.f32 1.442695, %v584_v52 }
 0x256   :  { %v590_v56 = vmul.f32 1.442695, %v582_v54  ;;  %v569_v57 = vpop.xlane.xlu1 %568 }
 0x257   :  { %1032 = vpow2.f32 %v594_v55  ;;  %v585_v58 = vsub.f32 %v552_v6, %v569_v57  ;;  %v563_v60 = vpop.xlane.xlu0 %562 }
 0x258   :  { %v583_v61 = vsub.f32 %v550_v11, %v563_v60  ;;  %1034 = vpow2.f32 %v590_v56 }
 0x259   :  { %v596_v59 = vmul.f32 1.442695, %v585_v58 }
 0x25a   :  { %v592_v62 = vmul.f32 1.442695, %v583_v61 }
 0x25b   :  { %1036 = vpow2.f32 %v596_v59  ;;  %v572_v63 = vpop.xlane.xlu0 %571 }
 0x25c   :  { %v586_v0 = vsub.f32 %v553_v35, %v572_v63  ;;  %1038 = vpow2.f32 %v592_v62  ;;  %v1065_v62 = vmov 1  }
 0x25d   :  { %v575_v1 = vpop.xlane.xlu1 %574 }
 0x25e   :  { %v598_v3 = vmul.f32 1.442695, %v586_v0  ;;  %v587_v2 = vsub.f32 %v554_v38, %v575_v1  ;;  %v1066_v1 = vmov 2  }
 0x25f   :  { %v578_v5 = vpop.xlane.xlu0 %577 }
 0x260   :  { %1040 = vpow2.f32 %v598_v3  ;;  %v588_v4 = vsub.f32 %v555_v40, %v578_v5  ;;  %v600_v20 = vmul.f32 1.442695, %v587_v2 }
 0x261   :  { %v1033_v7 = vpop.eup %1032  ;;  %v581_v12 = vpop.xlane.xlu1 %580 }
 0x262   :  { %v602_v13 = vmul.f32 1.442695, %v588_v4  ;;  %v589_v14 = vsub.f32 %v556_v48, %v581_v12  ;;  %v612_v6 = vsel %vm557_vm2, %v1033_v7, 0.0  ;;  %v1035_v11 = vpop.eup %1034 }
 0x263   :  { %613 = vadd.xlane.f32.xlu0 %v612_v6  ;;  %v606_v23 = vsel %vm557_vm2, %v1035_v11, 0.0 }
 0x264   :  { %1042 = vpow2.f32 %v602_v13  ;;  %v604_v21 = vmul.f32 1.442695, %v589_v14 }
 0x265   :  { %v1037_v22 = vpop.eup %1036 }
 0x266   :  { %1044 = vpow2.f32 %v604_v21  ;;  %v615_v25 = vsel %vm557_vm2, %v1037_v22, 0.0  ;;  %v1039_v28 = vpop.eup %1038 }
 0x267   :  { %607 = vadd.xlane.f32.xlu0 %v606_v23  ;;  %616 = vadd.xlane.f32.xlu1 %v615_v25  ;;  %1046 = vpow2.f32 %v600_v20  ;;  %v609_v35 = vsel %vm557_vm2, %v1039_v28, 0.0  ;;  %v188_v23 = vunpack.c.l.bf16 %v1150_v9 }
 0x26a   :  { %v1277_v34 = vpop.eup %1040 }
 0x26b   :  { %610 = vadd.xlane.f32.xlu1 %v609_v35  ;;  %v618_v36 = vsel %vm557_vm2, %v1277_v34, 0.0 }
 0x26c   :  { %619 = vadd.xlane.f32.xlu0 %v618_v36 }
 0x26e   :  { %v1043_v38 = vpop.eup %1042 }
 0x26f   :  { %v624_v40 = vsel %vm557_vm2, %v1043_v38, 0.0 }
 0x270   :  { %v1283_v43 = vpop.eup %1044  ;;  %625 = vadd.xlane.f32.xlu0 %v624_v40 }
 0x271   :  { %v627_v48 = vsel %vm557_vm2, %v1283_v43, 0.0  ;;  %v1047_v49 = vpop.eup %1046 }
 0x272   :  { %628 = vadd.xlane.f32.xlu1 %v627_v48  ;;  %v621_v50 = vsel %vm557_vm2, %v1047_v49, 0.0  ;;  %v186_v48 = vunpack.c.l.bf16 %v1145_v8 }
 0x276   :  { %622 = vadd.xlane.f32.xlu1 %v621_v50  ;;  %v202_v50 = vunpack.c.l.bf16 %v1185_v16 }
 0x2f0   :  { %v614_v52 = vpop.xlane.xlu0 %613 }
 0x2f1   :  { %1048 = vrcp.f32 %v614_v52 }
 0x2f4   :  { %v608_v53 = vpop.xlane.xlu0 %607  ;;  %v617_v54 = vpop.xlane.xlu1 %616 }
 0x2f5   :  { %1050 = vrcp.f32 %v608_v53 }
 0x2f6   :  { %1052 = vrcp.f32 %v617_v54 }
 0x2f8   :  { %v611_v58 = vpop.xlane.xlu1 %610 }
 0x2f9   :  { %v620_v56 = vpop.xlane.xlu0 %619  ;;  %1054 = vrcp.f32 %v611_v58 }
 0x2fb   :  { %v1049_v55 = vpop.eup %1048 }
 0x2fc   :  { %v640_v57 = vmul.f32 %v1049_v55, %v1033_v7 }
 0x2fd   :  { %v626_v59 = vpop.xlane.xlu0 %625 }
 0x2fe   :  { %658 = vperm.xlu1 %984, %v640_v57   ;;  %1056 = vrcp.f32 %v626_v59 }
 0x2ff   :  { %v1051_v60 = vpop.eup %1050  ;;  %v629_v63 = vpop.xlane.xlu1 %628  ;;  %1058 = vrcp.f32 %v620_v56 }
 0x300   :  { %v638_v61 = vmul.f32 %v1051_v60, %v1035_v11  ;;  %v1053_v0 = vpop.eup %1052  ;;  %v189_v60 = vunpack.c.h.bf16 %v1150_v9 }
 0x301   :  { %v641_v3 = vmul.f32 %v1053_v0, %v1037_v22 }
 0x302   :  { %648 = vperm.xlu0 %987, %v638_v61   ;;  %985 = vset.pattern.permute.xlu1 %v1065_v62 }
 0x303   :  { %703 = vperm.xlu1 %985, %v640_v57   ;;  %v1055_v5 = vpop.eup %1054  ;;  %v623_v2 = vpop.xlane.xlu1 %622 }
 0x304   :  { %1060 = vrcp.f32 %v623_v2  ;;  %v639_v4 = vmul.f32 %v1055_v5, %v1039_v28 }
 0x305   :  { %1062 = vrcp.f32 %v629_v63 }
 0x306   :  { %989 = vset.pattern.permute.xlu0 %v1066_v1 }
 0x307   :  { %743 = vperm.xlu0 %989, %v638_v61   ;;  %986 = vset.pattern.permute.xlu1 %v1066_v1 }
 0x308   :  { %751 = vperm.xlu1 %986, %v640_v57   ;;  %v1057_v7 = vpop.eup %1056 }
 0x309   :  { %v644_v12 = vmul.f32 %v1057_v7, %v1043_v38  ;;  %v1059_v13 = vpop.eup %1058 }
 0x30a   :  { %v642_v14 = vmul.f32 %v1059_v13, %v1277_v34  ;;  %v204_v34 = vunpack.c.l.bf16 %v1195_v17 }
 0x30b   :  { %755 = vperm.xlu0 %989, %v641_v3  }
 0x30c   :  { %988 = vset.pattern.permute.xlu1 %v1065_v62 }
 0x30d   :  { %695 = vperm.xlu1 %988, %v638_v61   ;;  %v205_v61 = vunpack.c.h.bf16 %v1195_v17 }
 0x30e   :  { %v1061_v6 = vpop.eup %1060 }
 0x30f   :  { %993 = vset.pattern.permute.xlu0 %v1065_v62  ;;  %v643_v11 = vmul.f32 %v1061_v6, %v1047_v49  ;;  %v1063_v20 = vpop.eup %1062 }
 0x310   :  { %699 = vperm.xlu0 %993, %v639_v4   ;;  %v645_v21 = vmul.f32 %v1063_v20, %v1283_v43  ;;  %v206_v20 = vunpack.c.l.bf16 %v1200_v18 }
 0x311   :  { %990 = vset.pattern.permute.xlu1 %v1064_v51 }
 0x312   :  { %663 = vperm.xlu1 %990, %v641_v3  }
 0x314   :  { %719 = vperm.xlu0 %993, %v644_v12  }
 0x316   :  { %991 = vset.pattern.permute.xlu1 %v1065_v62 }
 0x317   :  { %707 = vperm.xlu1 %991, %v641_v3  }
 0x318   :  { %711 = vperm.xlu0 %993, %v642_v14  }
 0x31b   :  { %992 = vset.pattern.permute.xlu1 %v1064_v51 }
 0x31c   :  { %1001 = vset.pattern.permute.xlu0 %v1066_v1  ;;  %653 = vperm.xlu1 %992, %v639_v4  }
 0x31d   :  { %763 = vperm.xlu0 %1001, %v643_v11  }
 0x320   :  { %994 = vset.pattern.permute.xlu1 %v1066_v1 }
 0x321   :  { %747 = vperm.xlu1 %994, %v639_v4   ;;  %771 = vperm.xlu0 %1001, %v645_v21   ;;  %v203_v4 = vunpack.c.h.bf16 %v1185_v16  ;;  %v190_v16 = vunpack.c.l.bf16 %v1155_v10 }
 0x325   :  { %995 = vset.pattern.permute.xlu1 %v1064_v51 }
 0x326   :  { %678 = vperm.xlu1 %995, %v644_v12  }
 0x32a   :  { %668 = vperm.xlu1 %995, %v642_v14  }
 0x32e   :  { %996 = vset.pattern.permute.xlu1 %v1066_v1 }
 0x32f   :  { %759 = vperm.xlu1 %996, %v642_v14  }
 0x333   :  { %997 = vset.pattern.permute.xlu1 %v1064_v51 }
 0x334   :  { %683 = vperm.xlu1 %997, %v645_v21  }
 0x338   :  { %998 = vset.pattern.permute.xlu1 %v1065_v62 }
 0x339   :  { %723 = vperm.xlu1 %998, %v645_v21  }
 0x33d   :  { %999 = vset.pattern.permute.xlu1 %v1064_v51 }
 0x33e   :  { %673 = vperm.xlu1 %999, %v643_v11  }
 0x342   :  { %1000 = vset.pattern.permute.xlu1 %v1065_v62 }
 0x343   :  { %715 = vperm.xlu1 %1000, %v643_v11  }
 0x347   :  { %1002 = vset.pattern.permute.xlu1 %v1066_v1  ;;  %v187_v1 = vunpack.c.h.bf16 %v1145_v8 }
 0x348   :  { %767 = vperm.xlu1 %1002, %v644_v12  }
 0x37d   :  { %v659_v22 = vpop.permute.xlu1 %658 }
 0x37e   :  { %v688_v35 = vmul.f32 %v659_v22, %v188_v23 }
 0x381   :  { %v649_v36 = vpop.permute.xlu0 %648 }
 0x382   :  { %v704_v25 = vpop.permute.xlu1 %703  ;;  %v686_v54 = vmul.f32 %v649_v36, %v186_v48 }
 0x383   :  { %v728_v28 = vmul.f32 %v704_v25, %v172_v33 }
 0x385   :  { %v736_v40 = vadd.f32 %v728_v28, %v688_v35 }
 0x386   :  { %v744_v51 = vpop.permute.xlu0 %743 }
 0x387   :  { %v752_v38 = vpop.permute.xlu1 %751  ;;  %v774_v33 = vmul.f32 %v744_v51, %v202_v50 }
 0x388   :  { %v776_v43 = vmul.f32 %v752_v38, %v204_v34  ;;  %v193_v38 = vunpack.c.h.bf16 %v1180_v15 }
 0x38a   :  { %v784_v49 = vadd.f32 %v776_v43, %v736_v40  ;;  %v756_v24 = vpop.permute.xlu0 %755  ;;  %v209_v40 = vunpack.c.h.bf16 %v1209_v19 }
 0x38b   :  { %v777_v63 = vmul.f32 %v756_v24, %v205_v61 }
 0x38c   :  { %v884_v52 = vpack.c.bf16 %v784_v49, %v784_v49  ;;  %v696_v53 = vpop.permute.xlu1 %695 }
 0x38d   :  { %v726_v26 = vmul.f32 %v696_v53, %v170_v31 }
 0x38e   :  { %825 = vst.msk [vmem:[%s1370_s9 + $0x8] sm:$0xf] %vm822_vm3, %v884_v52 }
 0x38f   :  { %v734_v55 = vadd.f32 %v726_v26, %v686_v54  ;;  %v700_v9 = vpop.permute.xlu0 %699  ;;  %v191_v54 = vunpack.c.h.bf16 %v1155_v10  ;;  %v192_v26 = vunpack.c.l.bf16 %v1180_v15 }
 0x390   :  { %v727_v7 = vmul.f32 %v700_v9, %v171_v32 }
 0x391   :  { %v782_v56 = vadd.f32 %v774_v33, %v734_v55  ;;  %v664_v57 = vpop.permute.xlu1 %663  ;;  %v207_v33 = vunpack.c.h.bf16 %v1200_v18 }
 0x392   :  { %v689_v59 = vmul.f32 %v664_v57, %v189_v60  ;;  %v208_v57 = vunpack.c.l.bf16 %v1209_v19 }
 0x393   :  { %v882_v58 = vpack.c.bf16 %v782_v56, %v782_v56  ;;  %v720_v8 = vpop.permute.xlu0 %719 }
 0x394   :  { %v732_v10 = vmul.f32 %v720_v8, %v176_v41 }
 0x395   :  { %823 = vst.msk [vmem:[%s1370_s9] sm:$0xf] %vm822_vm3, %v882_v58 }
 0x396   :  { %v708_v31 = vpop.permute.xlu1 %707 }
 0x397   :  { %v729_v62 = vmul.f32 %v708_v31, %v173_v30  ;;  %v712_v32 = vpop.permute.xlu0 %711 }
 0x398   :  { %v730_v21 = vmul.f32 %v712_v32, %v174_v44 }
 0x399   :  { %v737_v0 = vadd.f32 %v729_v62, %v689_v59 }
 0x39b   :  { %v785_v3 = vadd.f32 %v777_v63, %v737_v0  ;;  %v654_v5 = vpop.permute.xlu1 %653 }
 0x39c   :  { %v687_v17 = vmul.f32 %v654_v5, %v187_v1  ;;  %v764_v34 = vpop.permute.xlu0 %763 }
 0x39d   :  { %v885_v2 = vpack.c.bf16 %v785_v3, %v785_v3  ;;  %v779_v58 = vmul.f32 %v764_v34, %v207_v33 }
 0x39e   :  { %v735_v30 = vadd.f32 %v727_v7, %v687_v17 }
 0x39f   :  { %826 = vst.msk [vmem:[%s1370_s9 + $0xc] sm:$0xf] %vm822_vm3, %v885_v2 }
 0x3a0   :  { %v748_v27 = vpop.permute.xlu1 %747  ;;  %v772_v43 = vpop.permute.xlu0 %771 }
 0x3a1   :  { %v775_v12 = vmul.f32 %v748_v27, %v203_v4  ;;  %v781_v49 = vmul.f32 %v772_v43, %v209_v40 }
 0x3a3   :  { %v783_v13 = vadd.f32 %v775_v12, %v735_v30 }
 0x3a5   :  { %v883_v14 = vpack.c.bf16 %v783_v13, %v783_v13  ;;  %v679_v6 = vpop.permute.xlu1 %678 }
 0x3a7   :  { %824 = vst.msk [vmem:[%s1370_s9 + $0x4] sm:$0xf] %vm822_vm3, %v883_v14 }
 0x3a9   :  { %v669_v29 = vpop.permute.xlu1 %668 }
 0x3aa   :  { %v690_v11 = vmul.f32 %v669_v29, %v190_v16 }
 0x3ac   :  { %v738_v23 = vadd.f32 %v730_v21, %v690_v11 }
 0x3ae   :  { %v760_v22 = vpop.permute.xlu1 %759 }
 0x3af   :  { %v778_v25 = vmul.f32 %v760_v22, %v206_v20 }
 0x3b1   :  { %v786_v28 = vadd.f32 %v778_v25, %v738_v23 }
 0x3b3   :  { %v886_v35 = vpack.c.bf16 %v786_v28, %v786_v28  ;;  %v684_v36 = vpop.permute.xlu1 %683 }
 0x3b4   :  { %v693_v39 = vmul.f32 %v684_v36, %v193_v38 }
 0x3b5   :  { %827 = vst.msk [vmem:[%s1370_s9 + $0x10] sm:$0xf] %vm822_vm3, %v886_v35 }
 0x3b8   :  { %v724_v48 = vpop.permute.xlu1 %723 }
 0x3b9   :  { %v733_v44 = vmul.f32 %v724_v48, %v177_v46  ;;  %v692_v46 = vmul.f32 %v679_v6, %v192_v26 }
 0x3bb   :  { %v741_v50 = vadd.f32 %v733_v44, %v693_v39  ;;  %v740_v61 = vadd.f32 %v732_v10, %v692_v46 }
 0x3bd   :  { %v789_v51 = vadd.f32 %v781_v49, %v741_v50  ;;  %v674_v52 = vpop.permute.xlu1 %673 }
 0x3be   :  { %v691_v56 = vmul.f32 %v674_v52, %v191_v54 }
 0x3bf   :  { %v889_v53 = vpack.c.bf16 %v789_v51, %v789_v51 }
 0x3c1   :  { %830 = vst.msk [vmem:[%s1370_s9 + $0x1c] sm:$0xf] %vm822_vm3, %v889_v53 }
 0x3c2   :  { %v716_v55 = vpop.permute.xlu1 %715 }
 0x3c3   :  { %v731_v42 = vmul.f32 %v716_v55, %v175_v47 }
 0x3c5   :  { %v739_v60 = vadd.f32 %v731_v42, %v691_v56 }
 0x3c7   :  { %v787_v15 = vadd.f32 %v779_v58, %v739_v60  ;;  %v768_v18 = vpop.permute.xlu1 %767 }
 0x3c8   :  { %v780_v24 = vmul.f32 %v768_v18, %v208_v57 }
 0x3c9   :  { %v887_v31 = vpack.c.bf16 %v787_v15, %v787_v15 }
 0x3ca   :  { %v788_v59 = vadd.f32 %v780_v24, %v740_v61 }
 0x3cb   :  { %828 = vst.msk [vmem:[%s1370_s9 + $0x14] sm:$0xf] %vm822_vm3, %v887_v31 }
 0x3cc   :  { %v888_v45 = vpack.c.bf16 %v788_v59, %v788_v59 }
 0x3ce   :  { %829 = vst.msk [vmem:[%s1370_s9 + $0x18] sm:$0xf] %vm822_vm3, %v888_v45 }

</bundles_post_ra>
